<compile_context>
chip_gen: v7x
topology: tpu7x:2x2x1
jax: 0.10.0
libtpu: 0.0.40
codegen_flags: <defaults>
</compile_context>

<pallas_src>
import math
import numpy as np
import jax
import jax.numpy as jnp
from jax import lax
from jax.experimental import pallas as pl
from jax.experimental.pallas import tpu as pltpu

EPS = 1e-6
NEG_BIG = 1.0e9   # torch uses masked_fill(mask == 0, -1e9)

PARAM_ORDER = ["a1", "g1", "wqkv1", "bqkv1", "wo1", "bo1",
               "a2", "g2", "wq2", "bq2", "wkv2", "bkv2", "wo2", "bo2",
               "a3", "g3", "w1", "b1", "w2", "b2"]


# --------------------------------------------------------------------------------------
# Fused decoder kernel (all layers + final Norm)
# --------------------------------------------------------------------------------------
def make_decoder_kernel(S_t, S_e, D, H, D_FF):
    d_k = D // H

    def norm(v, alpha, bias):
        # torch Norm: alpha * (x - mean) / (std + eps) + bias, unbiased std (ddof=1).
        # Exact divide here (one value per row) so LayerNorm error does not compound.
        mean = jnp.mean(v, axis=-1, keepdims=True)
        c = v - mean
        var = jnp.sum(c * c, axis=-1, keepdims=True) * (1.0 / (D - 1))
        return alpha * (c / (jnp.sqrt(var) + EPS)) + bias

    def rope2d(t, cos_f, sin_a, sin_b):
        # t: (S, d_k) f32, interleaved-pair RoPE:
        #   out[2j]   = t[2j]*cos_j - t[2j+1]*sin_j
        #   out[2j+1] = t[2j+1]*cos_j + t[2j]*sin_j
        # implemented as t*cos + roll(t,-1)*sin_a + roll(t,+1)*sin_b with sign/parity
        # folded into the (S, d_k) tables.  Rolls run on the XLU.
        t_next = pltpu.roll(t, d_k - 1, 1)   # t[..., i+1]  (roll by -1 mod d_k)
        t_prev = pltpu.roll(t, 1, 1)         # t[..., i-1]
        return t * cos_f + t_next * sin_a + t_prev * sin_b

    def attend_head(q, k, v, mask_add):
        # q: (Sq, d_k) f32 (already 1/sqrt(d_k)-scaled via the packed Q weights),
        # k/v: (Sk, d_k) f32; mask_add: (1, Sk) additive (0 / -1e9).
        # TODO(synk): for large Sq/Sk, flash-tile the KV dimension (256-wide) with
        #             online softmax so both matmuls run full MXU contraction width.
        qb = q.astype(jnp.bfloat16)
        kb = k.astype(jnp.bfloat16)
        vb = v.astype(jnp.bfloat16)
        s = lax.dot_general(qb, kb, (((1,), (1,)), ((), ())),
                            preferred_element_type=jnp.float32)     # (Sq, Sk)
        s = s + mask_add
        s = s - jnp.max(s, axis=-1, keepdims=True)
        p = jnp.exp(s)
        p = p * pl.reciprocal(jnp.sum(p, axis=-1, keepdims=True), approx=True)
        return jnp.dot(p.astype(jnp.bfloat16), vb,
                       preferred_element_type=jnp.float32)           # (Sq, d_k)

    def kernel(x_ref, e_ref, mt_ref, ms_ref,
               cos_t_ref, sa_t_ref, sb_t_ref, cos_e_ref, sa_e_ref, sb_e_ref,
               af_ref, gf_ref,
               a1_ref, g1_ref, wqkv1_ref, bqkv1_ref, wo1_ref, bo1_ref,
               a2_ref, g2_ref, wq2_ref, bq2_ref, wkv2_ref, bkv2_ref, wo2_ref, bo2_ref,
               a3_ref, g3_ref, w1_ref, b1_ref, w2_ref, b2_ref,
               o_ref, x_scr):
        l = pl.program_id(1)
        n_layers = pl.num_programs(1)

        # ---- layer-0: load the embedded target block into the VMEM carry ----
        @pl.when(l == 0)
        def _():
            x_scr[...] = x_ref[0]

        x = x_scr[...]                       # (S_t, D) f32 carried across layers
        mask_t = mt_ref[0]                   # (1, S_t) additive mask
        mask_s = ms_ref[0]                   # (1, S_e) additive mask
        cos_t, sa_t, sb_t = cos_t_ref[...], sa_t_ref[...], sb_t_ref[...]
        cos_e, sa_e, sb_e = cos_e_ref[...], sa_e_ref[...], sb_e_ref[...]

        # ---- sublayer 1: masked self-attention (attn_1, trg_mask) ----
        x2 = norm(x, a1_ref[0], g1_ref[0]).astype(jnp.bfloat16)
        qkv = jnp.dot(x2, wqkv1_ref[0],
                      preferred_element_type=jnp.float32) + bqkv1_ref[0]   # (S_t, 3*D)
        heads = []
        for h in range(H):                                   # H=2, unrolled at trace time
            q = rope2d(qkv[:, h * d_k:(h + 1) * d_k], cos_t, sa_t, sb_t)
            k = rope2d(qkv[:, D + h * d_k:D + (h + 1) * d_k], cos_t, sa_t, sb_t)
            v = qkv[:, 2 * D + h * d_k:2 * D + (h + 1) * d_k]
            heads.append(attend_head(q, k, v, mask_t))
        concat = jnp.concatenate(heads, axis=-1).astype(jnp.bfloat16)      # (S_t, D)
        x = x + jnp.dot(concat, wo1_ref[0],
                        preferred_element_type=jnp.float32) + bo1_ref[0]

        # ---- sublayer 2: cross-attention over encoder outputs (attn_2, src_mask) ----
        x2 = norm(x, a2_ref[0], g2_ref[0]).astype(jnp.bfloat16)
        qh = jnp.dot(x2, wq2_ref[0],
                     preferred_element_type=jnp.float32) + bq2_ref[0]      # (S_t, D)
        eb = e_ref[0].astype(jnp.bfloat16)
        kv = jnp.dot(eb, wkv2_ref[0],
                     preferred_element_type=jnp.float32) + bkv2_ref[0]     # (S_e, 2*D)
        heads = []
        for h in range(H):
            q = rope2d(qh[:, h * d_k:(h + 1) * d_k], cos_t, sa_t, sb_t)
            k = rope2d(kv[:, h * d_k:(h + 1) * d_k], cos_e, sa_e, sb_e)
            v = kv[:, D + h * d_k:D + (h + 1) * d_k]
            heads.append(attend_head(q, k, v, mask_s))
        concat = jnp.concatenate(heads, axis=-1).astype(jnp.bfloat16)
        x = x + jnp.dot(concat, wo2_ref[0],
                        preferred_element_type=jnp.float32) + bo2_ref[0]

        # ---- sublayer 3: feed-forward ----
        x2 = norm(x, a3_ref[0], g3_ref[0]).astype(jnp.bfloat16)
        h1 = jnp.dot(x2, w1_ref[0], preferred_element_type=jnp.float32) + b1_ref[0]
        h1 = jnp.maximum(h1, 0.0)
        x = x + jnp.dot(h1.astype(jnp.bfloat16), w2_ref[0],
                        preferred_element_type=jnp.float32) + b2_ref[0]

        x_scr[...] = x

        # ---- last layer: apply final Norm and emit the output block ----
        @pl.when(l == n_layers - 1)
        def _():
            o_ref[0] = norm(x, af_ref[...], gf_ref[...])

    return kernel


def make_decoder_fn(B, L, S_t, S_e, D, H, D_FF):
    kernel = make_decoder_kernel(S_t, S_e, D, H, D_FF)

    def const_spec(arr):
        nd = arr.ndim
        return pl.BlockSpec(arr.shape, lambda b, l, _nd=nd: (0,) * _nd)

    def layer_spec(arr):
        nd = arr.ndim
        return pl.BlockSpec((1,) + arr.shape[1:],
                            lambda b, l, _nd=nd: (l,) + (0,) * (_nd - 1))

    def cost_estimate(param_bytes):
        d_k = D // H
        per_layer = (2 * S_t * D * (3 * D)          # fused QKV projection
                     + 3 * (2 * S_t * D * D)        # out-proj x2, q-proj
                     + 2 * S_e * D * (2 * D)        # fused KV projection
                     + 2 * S_t * D * D_FF * 2       # FFN
                     + 2 * H * (2 * S_t * S_t * d_k + 2 * S_t * S_e * d_k))  # attention
        flops = B * L * per_layer
        transc = B * L * H * (S_t * S_t + S_t * S_e)
        act_bytes = B * 4 * (2 * S_t * D + S_e * D + S_t + S_e)
        return pl.CostEstimate(flops=int(flops), transcendentals=int(transc),
                               bytes_accessed=int(B * param_bytes + act_bytes))

    def fn(x_emb, e, mask_t_add, mask_s_add, rope_tables, alpha_f, bias_f, stacked):
        consts = [rope_tables["cos_t"], rope_tables["sa_t"], rope_tables["sb_t"],
                  rope_tables["cos_e"], rope_tables["sa_e"], rope_tables["sb_e"],
                  alpha_f, bias_f]
        plist = [stacked[name] for name in PARAM_ORDER]
        param_bytes = sum(int(np.prod(p.shape)) * p.dtype.itemsize for p in plist)

        in_specs = ([pl.BlockSpec((1, S_t, D), lambda b, l: (b, 0, 0)),   # embedded trg
                     pl.BlockSpec((1, S_e, D), lambda b, l: (b, 0, 0)),   # e_outputs
                     pl.BlockSpec((1, 1, S_t), lambda b, l: (b, 0, 0)),   # additive trg mask
                     pl.BlockSpec((1, 1, S_e), lambda b, l: (b, 0, 0))]   # additive src mask
                    + [const_spec(c) for c in consts]
                    + [layer_spec(p) for p in plist])

        grid_spec = pltpu.PrefetchScalarGridSpec(
            num_scalar_prefetch=0,
            grid=(B, L),
            in_specs=in_specs,
            out_specs=pl.BlockSpec((1, S_t, D), lambda b, l: (b, 0, 0)),
            scratch_shapes=[pltpu.VMEM((S_t, D), jnp.float32)],   # x carried across layers
        )
        return pl.pallas_call(
            kernel,
            out_shape=jax.ShapeDtypeStruct((B, S_t, D), jnp.float32),
            grid_spec=grid_spec,
            compiler_params=pltpu.CompilerParams(
                dimension_semantics=("parallel", "arbitrary"),
                vmem_limit_bytes=32 * 1024 * 1024),
            cost_estimate=cost_estimate(param_bytes),
        )(x_emb, e, mask_t_add, mask_s_add, *consts, *plist)

    return fn


# --------------------------------------------------------------------------------------
# Parameter construction / packing
# --------------------------------------------------------------------------------------
def _linear_init(key, fan_in, fan_out):
    kw, kb = jax.random.split(key)
    bound = 1.0 / math.sqrt(fan_in)
    w = jax.random.uniform(kw, (fan_in, fan_out), jnp.float32, -bound, bound)
    b = jax.random.uniform(kb, (1, fan_out), jnp.float32, -bound, bound)
    return w, b


def build_layer_params(key, d_model, d_ff):
    names = ["q1", "k1", "v1", "o1", "q2", "k2", "v2", "o2"]
    ks = jax.random.split(key, len(names) + 2)
    raw = {}
    for k, nm in zip(ks[:len(names)], names):
        w, b = _linear_init(k, d_model, d_model)
        raw["w" + nm], raw["b" + nm] = w, b
    raw["w1"], raw["b1"] = _linear_init(ks[-2], d_model, d_ff)
    raw["w2"], raw["b2"] = _linear_init(ks[-1], d_ff, d_model)
    ones = jnp.ones((1, d_model), jnp.float32)
    zeros = jnp.zeros((1, d_model), jnp.float32)
    raw.update(a1=ones, g1=zeros, a2=ones, g2=zeros, a3=ones, g3=zeros)
    return raw


def pack_layer_params(raw, heads, d_model):
    # 2-D weight layouts (single full-K matmuls in-kernel); head columns are already
    # contiguous 128-wide groups, so in-kernel per-head slices are lane-aligned.
    # The 1/sqrt(d_k) attention scale is folded into the Q weights/biases (RoPE is linear).
    d_k = d_model // heads
    scale = 1.0 / math.sqrt(d_k)
    bf = lambda a: a.astype(jnp.bfloat16)
    return dict(
        a1=raw["a1"], g1=raw["g1"], a2=raw["a2"], g2=raw["g2"],
        a3=raw["a3"], g3=raw["g3"],
        wqkv1=bf(jnp.concatenate([raw["wq1"] * scale, raw["wk1"], raw["wv1"]], axis=1)),
        bqkv1=jnp.concatenate([raw["bq1"] * scale, raw["bk1"], raw["bv1"]], axis=1),
        wo1=bf(raw["wo1"]), bo1=raw["bo1"],
        wq2=bf(raw["wq2"] * scale), bq2=raw["bq2"] * scale,
        wkv2=bf(jnp.concatenate([raw["wk2"], raw["wv2"]], axis=1)),
        bkv2=jnp.concatenate([raw["bk2"], raw["bv2"]], axis=1),
        wo2=bf(raw["wo2"]), bo2=raw["bo2"],
        w1=bf(raw["w1"]), b1=raw["b1"], w2=bf(raw["w2"]), b2=raw["b2"],
    )


def stack_layer_params(packed_list):
    return {name: jnp.stack([p[name] for p in packed_list], axis=0)
            for name in PARAM_ORDER}


def build_rope_tables(S, d_k, base=10000.0):
    half = d_k // 2
    theta = 1.0 / (base ** (np.arange(0, d_k, 2, dtype=np.float32)[:half] / d_k))
    idx = np.arange(S, dtype=np.float32)[:, None] * theta[None, :]      # (S, half)
    cos_h = np.cos(idx).astype(np.float32)
    sin_h = np.sin(idx).astype(np.float32)
    cos_full = np.repeat(cos_h, 2, axis=1)                              # (S, d_k)
    sin_a = np.zeros((S, d_k), np.float32)   # multiplies t[i+1]; -sin at even lanes
    sin_b = np.zeros((S, d_k), np.float32)   # multiplies t[i-1]; +sin at odd lanes
    sin_a[:, 0::2] = -sin_h
    sin_b[:, 1::2] = sin_h
    return (jnp.asarray(cos_full), jnp.asarray(sin_a), jnp.asarray(sin_b),
            jnp.asarray(cos_h), jnp.asarray(sin_h))


# --------------------------------------------------------------------------------------
# Pure-JAX reference mirroring the torch module (f32)
# --------------------------------------------------------------------------------------
def ref_norm(v, alpha, bias):
    mean = jnp.mean(v, axis=-1, keepdims=True)
    std = jnp.std(v, axis=-1, ddof=1, keepdims=True)
    return alpha * (v - mean) / (std + EPS) + bias


def ref_rope(t, cos_h, sin_h):
    B, S, H, dk = t.shape
    ts = t.reshape(B, S, H, dk // 2, 2)
    c = cos_h[None, :, None, :]
    s = sin_h[None, :, None, :]
    o0 = ts[..., 0] * c - ts[..., 1] * s
    o1 = ts[..., 1] * c + ts[..., 0] * s
    return jnp.stack([o0, o1], axis=-1).reshape(B, S, H, dk)


def ref_mha(xq, xkv, mask, wq, bq, wk, bk, wv, bv, wo, bo, heads, rope_q, rope_k):
    B, Sq, D = xq.shape
    Sk = xkv.shape[1]
    dk = D // heads
    q = (xq @ wq + bq).reshape(B, Sq, heads, dk)
    k = (xkv @ wk + bk).reshape(B, Sk, heads, dk)
    v = (xkv @ wv + bv).reshape(B, Sk, heads, dk)
    q = ref_rope(q, *rope_q)
    k = ref_rope(k, *rope_k)
    q, k, v = (t.transpose(0, 2, 1, 3) for t in (q, k, v))
    scores = jnp.einsum("bhqd,bhkd->bhqk", q, k) / math.sqrt(dk)
    scores = jnp.where(mask[:, None, :, :] == 0, -NEG_BIG, scores)
    p = jax.nn.softmax(scores, axis=-1)
    att = jnp.einsum("bhqk,bhkd->bhqd", p, v)
    concat = att.transpose(0, 2, 1, 3).reshape(B, Sq, D)
    return concat @ wo + bo


def ref_decoder(trg, e_out, src_mask, trg_mask, embed, raw_layers, an, gn,
                heads, rope_t, rope_e):
    x = embed[trg]
    for rp in raw_layers:
        x2 = ref_norm(x, rp["a1"], rp["g1"])
        x = x + ref_mha(x2, x2, trg_mask, rp["wq1"], rp["bq1"], rp["wk1"], rp["bk1"],
                        rp["wv1"], rp["bv1"], rp["wo1"], rp["bo1"], heads, rope_t, rope_t)
        x2 = ref_norm(x, rp["a2"], rp["g2"])
        x = x + ref_mha(x2, e_out, src_mask, rp["wq2"], rp["bq2"], rp["wk2"], rp["bk2"],
                        rp["wv2"], rp["bv2"], rp["wo2"], rp["bo2"], heads, rope_t, rope_e)
        x2 = ref_norm(x, rp["a3"], rp["g3"])
        h = jnp.maximum(x2 @ rp["w1"] + rp["b1"], 0.0)
        x = x + h @ rp["w2"] + rp["b2"]
    return ref_norm(x, an, gn)


# --------------------------------------------------------------------------------------
if __name__ == "__main__":
    B, S_T, S_E, D_MODEL, HEADS, D_FF, N_LAYERS, VOCAB = 2, 16, 24, 256, 2, 2048, 2, 101
    D_K = D_MODEL // HEADS

    key = jax.random.PRNGKey(0)
    k_trg, k_enc, k_emb, k_layers = jax.random.split(key, 4)
    trg = jax.random.randint(k_trg, (B, S_T), 0, VOCAB, dtype=jnp.int32)
    e_outputs = jax.random.normal(k_enc, (B, S_E, D_MODEL), jnp.float32)
    embed_table = jax.random.normal(k_emb, (VOCAB, D_MODEL), jnp.float32)

    trg_mask = np.ones((B, 1, S_T), np.float32); trg_mask[1, 0, -3:] = 0.0
    src_mask = np.ones((B, 1, S_E), np.float32); src_mask[0, 0, -4:] = 0.0
    trg_mask = jnp.asarray(trg_mask)
    src_mask = jnp.asarray(src_mask)

    layer_keys = jax.random.split(k_layers, N_LAYERS)
    raw_layers = [build_layer_params(k, D_MODEL, D_FF) for k in layer_keys]
    packed_layers = [pack_layer_params(r, HEADS, D_MODEL) for r in raw_layers]
    stacked = stack_layer_params(packed_layers)          # leading L axis on every param
    alpha_f = jnp.ones((1, D_MODEL), jnp.float32)
    bias_f = jnp.zeros((1, D_MODEL), jnp.float32)

    cos_t, sa_t, sb_t, cos_ht, sin_ht = build_rope_tables(S_T, D_K)
    cos_e, sa_e, sb_e, cos_he, sin_he = build_rope_tables(S_E, D_K)
    rope_tables = dict(cos_t=cos_t, sa_t=sa_t, sb_t=sb_t,
                       cos_e=cos_e, sa_e=sa_e, sb_e=sb_e)

    decoder_fn = make_decoder_fn(B, N_LAYERS, S_T, S_E, D_MODEL, HEADS, D_FF)

    x_emb = embed_table[trg]                                # embedding gather stays in XLA
    mask_t_add = (trg_mask - 1.0) * NEG_BIG                 # 0 where keep, -1e9 where masked
    mask_s_add = (src_mask - 1.0) * NEG_BIG

    out = decoder_fn(x_emb, e_outputs, mask_t_add, mask_s_add,
                     rope_tables, alpha_f, bias_f, stacked)
    out = jax.block_until_ready(out)

    ref = jax.block_until_ready(
        ref_decoder(trg, e_outputs, src_mask, trg_mask, embed_table, raw_layers,
                    alpha_f, bias_f, HEADS, (cos_ht, sin_ht), (cos_he, sin_he)))

    # bf16 matmuls + approx softmax reciprocal => slightly looser tolerance than pure f32
    np.testing.assert_allclose(np.asarray(out), np.asarray(ref), rtol=3e-2, atol=3e-2)

    print("KERNEL_OK")
</pallas_src>

<mosaic_0001>
module attributes {stable_mosaic.version = 11 : i64} {
  func.func @kernel(%arg0: i32, %arg1: i32, %arg2: memref<1x16x256xf32, #tpu.memory_space<vmem>>, %arg3: memref<1x24x256xf32, #tpu.memory_space<vmem>>, %arg4: memref<1x1x16xf32, #tpu.memory_space<vmem>>, %arg5: memref<1x1x24xf32, #tpu.memory_space<vmem>>, %arg6: memref<16x128xf32, #tpu.memory_space<vmem>>, %arg7: memref<16x128xf32, #tpu.memory_space<vmem>>, %arg8: memref<16x128xf32, #tpu.memory_space<vmem>>, %arg9: memref<24x128xf32, #tpu.memory_space<vmem>>, %arg10: memref<24x128xf32, #tpu.memory_space<vmem>>, %arg11: memref<24x128xf32, #tpu.memory_space<vmem>>, %arg12: memref<1x256xf32, #tpu.memory_space<vmem>>, %arg13: memref<1x256xf32, #tpu.memory_space<vmem>>, %arg14: memref<1x1x256xf32, #tpu.memory_space<vmem>>, %arg15: memref<1x1x256xf32, #tpu.memory_space<vmem>>, %arg16: memref<1x256x768xbf16, #tpu.memory_space<vmem>>, %arg17: memref<1x1x768xf32, #tpu.memory_space<vmem>>, %arg18: memref<1x256x256xbf16, #tpu.memory_space<vmem>>, %arg19: memref<1x1x256xf32, #tpu.memory_space<vmem>>, %arg20: memref<1x1x256xf32, #tpu.memory_space<vmem>>, %arg21: memref<1x1x256xf32, #tpu.memory_space<vmem>>, %arg22: memref<1x256x256xbf16, #tpu.memory_space<vmem>>, %arg23: memref<1x1x256xf32, #tpu.memory_space<vmem>>, %arg24: memref<1x256x512xbf16, #tpu.memory_space<vmem>>, %arg25: memref<1x1x512xf32, #tpu.memory_space<vmem>>, %arg26: memref<1x256x256xbf16, #tpu.memory_space<vmem>>, %arg27: memref<1x1x256xf32, #tpu.memory_space<vmem>>, %arg28: memref<1x1x256xf32, #tpu.memory_space<vmem>>, %arg29: memref<1x1x256xf32, #tpu.memory_space<vmem>>, %arg30: memref<1x256x2048xbf16, #tpu.memory_space<vmem>>, %arg31: memref<1x1x2048xf32, #tpu.memory_space<vmem>>, %arg32: memref<1x2048x256xbf16, #tpu.memory_space<vmem>>, %arg33: memref<1x1x256xf32, #tpu.memory_space<vmem>>, %arg34: memref<1x16x256xf32, #tpu.memory_space<vmem>>, %arg35: memref<16x256xf32, #tpu.memory_space<vmem>>) attributes {dimension_semantics = [#tpu.dimension_semantics<parallel>, #tpu.dimension_semantics<arbitrary>], iteration_bounds = array<i64: 2, 2>, scalar_prefetch = 0 : i64, scratch_operands = 1 : i64, tpu.core_type = #tpu.core_type<tc>, window_params = [{transform_indices = @transform_0, window_bounds = array<i64: 1, 16, 256>}, {transform_indices = @transform_1, window_bounds = array<i64: 1, 24, 256>}, {transform_indices = @transform_2, window_bounds = array<i64: 1, 1, 16>}, {transform_indices = @transform_3, window_bounds = array<i64: 1, 1, 24>}, {pipeline_mode = #tpu.pipeline_mode<synchronous>, transform_indices = @transform_4, window_bounds = array<i64: 16, 128>}, {pipeline_mode = #tpu.pipeline_mode<synchronous>, transform_indices = @transform_5, window_bounds = array<i64: 16, 128>}, {pipeline_mode = #tpu.pipeline_mode<synchronous>, transform_indices = @transform_6, window_bounds = array<i64: 16, 128>}, {pipeline_mode = #tpu.pipeline_mode<synchronous>, transform_indices = @transform_7, window_bounds = array<i64: 24, 128>}, {pipeline_mode = #tpu.pipeline_mode<synchronous>, transform_indices = @transform_8, window_bounds = array<i64: 24, 128>}, {pipeline_mode = #tpu.pipeline_mode<synchronous>, transform_indices = @transform_9, window_bounds = array<i64: 24, 128>}, {pipeline_mode = #tpu.pipeline_mode<synchronous>, transform_indices = @transform_10, window_bounds = array<i64: 1, 256>}, {pipeline_mode = #tpu.pipeline_mode<synchronous>, transform_indices = @transform_11, window_bounds = array<i64: 1, 256>}, {transform_indices = @transform_12, window_bounds = array<i64: 1, 1, 256>}, {transform_indices = @transform_13, window_bounds = array<i64: 1, 1, 256>}, {transform_indices = @transform_14, window_bounds = array<i64: 1, 256, 768>}, {transform_indices = @transform_15, window_bounds = array<i64: 1, 1, 768>}, {transform_indices = @transform_16, window_bounds = array<i64: 1, 256, 256>}, {transform_indices = @transform_17, window_bounds = array<i64: 1, 1, 256>}, {transform_indices = @transform_18, window_bounds = array<i64: 1, 1, 256>}, {transform_indices = @transform_19, window_bounds = array<i64: 1, 1, 256>}, {transform_indices = @transform_20, window_bounds = array<i64: 1, 256, 256>}, {transform_indices = @transform_21, window_bounds = array<i64: 1, 1, 256>}, {transform_indices = @transform_22, window_bounds = array<i64: 1, 256, 512>}, {transform_indices = @transform_23, window_bounds = array<i64: 1, 1, 512>}, {transform_indices = @transform_24, window_bounds = array<i64: 1, 256, 256>}, {transform_indices = @transform_25, window_bounds = array<i64: 1, 1, 256>}, {transform_indices = @transform_26, window_bounds = array<i64: 1, 1, 256>}, {transform_indices = @transform_27, window_bounds = array<i64: 1, 1, 256>}, {transform_indices = @transform_28, window_bounds = array<i64: 1, 256, 2048>}, {transform_indices = @transform_29, window_bounds = array<i64: 1, 1, 2048>}, {transform_indices = @transform_30, window_bounds = array<i64: 1, 2048, 256>}, {transform_indices = @transform_31, window_bounds = array<i64: 1, 1, 256>}, {transform_indices = @transform_32, window_bounds = array<i64: 1, 16, 256>}]} {
    %c0_i32 = arith.constant 0 : i32
    %0 = arith.cmpi eq, %arg1, %c0_i32 : i32
    %1 = arith.extui %0 : i1 to i32
    %c0_i32_0 = arith.constant 0 : i32
    %2 = arith.cmpi ne, %1, %c0_i32_0 : i32
    scf.if %2 {
      %c0_139 = arith.constant 0 : index
      %c0_140 = arith.constant 0 : index
      %c0_141 = arith.constant 0 : index
      %295 = vector.load %arg2[%c0_139, %c0_140, %c0_141] : memref<1x16x256xf32, #tpu.memory_space<vmem>>, vector<1x16x256xf32>
      %296 = vector.shape_cast %295 : vector<1x16x256xf32> to vector<16x256xf32>
      %c0_142 = arith.constant 0 : index
      %c0_143 = arith.constant 0 : index
      %297 = vector.load %arg35[%c0_142, %c0_143] : memref<16x256xf32, #tpu.memory_space<vmem>>, vector<16x256xf32>
      tpu.vector_store %arg35[%c0_142, %c0_143], %296 {strides = array<i32>} : memref<16x256xf32, #tpu.memory_space<vmem>>, vector<16x256xf32>,
    } else {
    }
    %c0 = arith.constant 0 : index
    %c0_1 = arith.constant 0 : index
    %3 = vector.load %arg35[%c0, %c0_1] : memref<16x256xf32, #tpu.memory_space<vmem>>, vector<16x256xf32>
    %c0_2 = arith.constant 0 : index
    %c0_3 = arith.constant 0 : index
    %c0_4 = arith.constant 0 : index
    %4 = vector.load %arg4[%c0_2, %c0_3, %c0_4] : memref<1x1x16xf32, #tpu.memory_space<vmem>>, vector<1x1x16xf32>
    %5 = vector.shape_cast %4 : vector<1x1x16xf32> to vector<1x16xf32>
    %c0_5 = arith.constant 0 : index
    %c0_6 = arith.constant 0 : index
    %c0_7 = arith.constant 0 : index
    %6 = vector.load %arg5[%c0_5, %c0_6, %c0_7] : memref<1x1x24xf32, #tpu.memory_space<vmem>>, vector<1x1x24xf32>
    %7 = vector.shape_cast %6 : vector<1x1x24xf32> to vector<1x24xf32>
    %c0_8 = arith.constant 0 : index
    %c0_9 = arith.constant 0 : index
    %8 = vector.load %arg6[%c0_8, %c0_9] : memref<16x128xf32, #tpu.memory_space<vmem>>, vector<16x128xf32>
    %c0_10 = arith.constant 0 : index
    %c0_11 = arith.constant 0 : index
    %9 = vector.load %arg7[%c0_10, %c0_11] : memref<16x128xf32, #tpu.memory_space<vmem>>, vector<16x128xf32>
    %c0_12 = arith.constant 0 : index
    %c0_13 = arith.constant 0 : index
    %10 = vector.load %arg8[%c0_12, %c0_13] : memref<16x128xf32, #tpu.memory_space<vmem>>, vector<16x128xf32>
    %c0_14 = arith.constant 0 : index
    %c0_15 = arith.constant 0 : index
    %11 = vector.load %arg9[%c0_14, %c0_15] : memref<24x128xf32, #tpu.memory_space<vmem>>, vector<24x128xf32>
    %c0_16 = arith.constant 0 : index
    %c0_17 = arith.constant 0 : index
    %12 = vector.load %arg10[%c0_16, %c0_17] : memref<24x128xf32, #tpu.memory_space<vmem>>, vector<24x128xf32>
    %c0_18 = arith.constant 0 : index
    %c0_19 = arith.constant 0 : index
    %13 = vector.load %arg11[%c0_18, %c0_19] : memref<24x128xf32, #tpu.memory_space<vmem>>, vector<24x128xf32>
    %c0_20 = arith.constant 0 : index
    %c0_21 = arith.constant 0 : index
    %c0_22 = arith.constant 0 : index
    %14 = vector.load %arg14[%c0_20, %c0_21, %c0_22] : memref<1x1x256xf32, #tpu.memory_space<vmem>>, vector<1x1x256xf32>
    %15 = vector.shape_cast %14 : vector<1x1x256xf32> to vector<1x256xf32>
    %c0_23 = arith.constant 0 : index
    %c0_24 = arith.constant 0 : index
    %c0_25 = arith.constant 0 : index
    %16 = vector.load %arg15[%c0_23, %c0_24, %c0_25] : memref<1x1x256xf32, #tpu.memory_space<vmem>>, vector<1x1x256xf32>
    %17 = vector.shape_cast %16 : vector<1x1x256xf32> to vector<1x256xf32>
    %cst = arith.constant dense<0.000000e+00> : vector<16xf32>
    %18 = vector.multi_reduction <add>, %3, %cst [1] : vector<16x256xf32> to vector<16xf32>
    %19 = vector.shape_cast %18 : vector<16xf32> to vector<16x1xf32>
    %cst_26 = arith.constant 2.560000e+02 : f32
    %20 = vector.broadcast %cst_26 : f32 to vector<16x1xf32>
    %21 = arith.divf %19, %20 : vector<16x1xf32>
    %22 = vector.broadcast %21 : vector<16x1xf32> to vector<16x256xf32>
    %23 = arith.subf %3, %22 : vector<16x256xf32>
    %24 = arith.mulf %23, %23 : vector<16x256xf32>
    %cst_27 = arith.constant dense<0.000000e+00> : vector<16xf32>
    %25 = vector.multi_reduction <add>, %24, %cst_27 [1] : vector<16x256xf32> to vector<16xf32>
    %26 = vector.shape_cast %25 : vector<16xf32> to vector<16x1xf32>
    %cst_28 = arith.constant 0.00392156886 : f32
    %27 = vector.broadcast %cst_28 : f32 to vector<16x1xf32>
    %28 = arith.mulf %26, %27 : vector<16x1xf32>
    %29 = math.sqrt %28 : vector<16x1xf32>
    %cst_29 = arith.constant 9.99999997E-7 : f32
    %30 = vector.broadcast %cst_29 : f32 to vector<16x1xf32>
    %31 = arith.addf %29, %30 : vector<16x1xf32>
    %32 = vector.broadcast %31 : vector<16x1xf32> to vector<16x256xf32>
    %33 = arith.divf %23, %32 : vector<16x256xf32>
    %34 = vector.broadcast %15 : vector<1x256xf32> to vector<16x256xf32>
    %35 = arith.mulf %34, %33 : vector<16x256xf32>
    %36 = vector.broadcast %17 : vector<1x256xf32> to vector<16x256xf32>
    %37 = arith.addf %35, %36 : vector<16x256xf32>
    %38 = arith.truncf %37 : vector<16x256xf32> to vector<16x256xbf16>
    %c0_30 = arith.constant 0 : index
    %c0_31 = arith.constant 0 : index
    %c0_32 = arith.constant 0 : index
    %39 = vector.load %arg16[%c0_30, %c0_31, %c0_32] : memref<1x256x768xbf16, #tpu.memory_space<vmem>>, vector<1x256x768xbf16>
    %40 = vector.shape_cast %39 : vector<1x256x768xbf16> to vector<256x768xbf16>
    %cst_33 = arith.constant dense<0.000000e+00> : vector<16x768xf32>
    %41 = tpu.matmul %38, %40, %cst_33 {dimension_numbers = #tpu.dot_dimension_numbers<[1], [0], [0], [1], [0, 0, 1, 1], [], []>} : vector<16x256xbf16>, vector<256x768xbf16>, vector<16x768xf32> -> vector<16x768xf32>
    %c0_34 = arith.constant 0 : index
    %c0_35 = arith.constant 0 : index
    %c0_36 = arith.constant 0 : index
    %42 = vector.load %arg17[%c0_34, %c0_35, %c0_36] : memref<1x1x768xf32, #tpu.memory_space<vmem>>, vector<1x1x768xf32>
    %43 = vector.shape_cast %42 : vector<1x1x768xf32> to vector<1x768xf32>
    %44 = vector.broadcast %43 : vector<1x768xf32> to vector<16x768xf32>
    %45 = arith.addf %41, %44 : vector<16x768xf32>
    %46 = vector.extract_strided_slice %45 {offsets = [0, 0], sizes = [16, 128], strides = [1, 1]} : vector<16x768xf32> to vector<16x128xf32>
    %c127_i32 = arith.constant 127 : i32
    %47 = tpu.dynamic_rotate %46 by %c127_i32 dim 1 : vector<16x128xf32>, i32 -> vector<16x128xf32>
    %c1_i32 = arith.constant 1 : i32
    %48 = tpu.dynamic_rotate %46 by %c1_i32 dim 1 : vector<16x128xf32>, i32 -> vector<16x128xf32>
    %49 = arith.mulf %46, %8 : vector<16x128xf32>
    %50 = arith.mulf %47, %9 : vector<16x128xf32>
    %51 = arith.addf %49, %50 : vector<16x128xf32>
    %52 = arith.mulf %48, %10 : vector<16x128xf32>
    %53 = arith.addf %51, %52 : vector<16x128xf32>
    %54 = vector.extract_strided_slice %45 {offsets = [0, 256], sizes = [16, 128], strides = [1, 1]} : vector<16x768xf32> to vector<16x128xf32>
    %c127_i32_37 = arith.constant 127 : i32
    %55 = tpu.dynamic_rotate %54 by %c127_i32_37 dim 1 : vector<16x128xf32>, i32 -> vector<16x128xf32>
    %c1_i32_38 = arith.constant 1 : i32
    %56 = tpu.dynamic_rotate %54 by %c1_i32_38 dim 1 : vector<16x128xf32>, i32 -> vector<16x128xf32>
    %57 = arith.mulf %54, %8 : vector<16x128xf32>
    %58 = arith.mulf %55, %9 : vector<16x128xf32>
    %59 = arith.addf %57, %58 : vector<16x128xf32>
    %60 = arith.mulf %56, %10 : vector<16x128xf32>
    %61 = arith.addf %59, %60 : vector<16x128xf32>
    %62 = vector.extract_strided_slice %45 {offsets = [0, 512], sizes = [16, 128], strides = [1, 1]} : vector<16x768xf32> to vector<16x128xf32>
    %63 = arith.truncf %53 : vector<16x128xf32> to vector<16x128xbf16>
    %64 = arith.truncf %61 : vector<16x128xf32> to vector<16x128xbf16>
    %65 = arith.truncf %62 : vector<16x128xf32> to vector<16x128xbf16>
    %cst_39 = arith.constant dense<0.000000e+00> : vector<16x16xf32>
    %66 = tpu.matmul %63, %64, %cst_39 {dimension_numbers = #tpu.dot_dimension_numbers<[1], [1], [0], [0], [0, 0, 1, 0], [], []>} : vector<16x128xbf16>, vector<16x128xbf16>, vector<16x16xf32> -> vector<16x16xf32>
    %67 = vector.broadcast %5 : vector<1x16xf32> to vector<16x16xf32>
    %68 = arith.addf %66, %67 : vector<16x16xf32>
    %cst_40 = arith.constant dense<0xFF800000> : vector<16xf32>
    %69 = vector.multi_reduction <maximumf>, %68, %cst_40 [1] : vector<16x16xf32> to vector<16xf32>
    %70 = vector.shape_cast %69 : vector<16xf32> to vector<16x1xf32>
    %71 = vector.broadcast %70 : vector<16x1xf32> to vector<16x16xf32>
    %72 = arith.subf %68, %71 : vector<16x16xf32>
    %73 = math.exp %72 : vector<16x16xf32>
    %cst_41 = arith.constant dense<0.000000e+00> : vector<16xf32>
    %74 = vector.multi_reduction <add>, %73, %cst_41 [1] : vector<16x16xf32> to vector<16xf32>
    %75 = vector.shape_cast %74 : vector<16xf32> to vector<16x1xf32>
    %76 = tpu.reciprocal %75 {approx = true} : vector<16x1xf32> -> vector<16x1xf32>
    %77 = vector.broadcast %76 : vector<16x1xf32> to vector<16x16xf32>
    %78 = arith.mulf %73, %77 : vector<16x16xf32>
    %79 = arith.truncf %78 : vector<16x16xf32> to vector<16x16xbf16>
    %cst_42 = arith.constant dense<0.000000e+00> : vector<16x128xf32>
    %80 = tpu.matmul %79, %65, %cst_42 {dimension_numbers = #tpu.dot_dimension_numbers<[1], [0], [0], [1], [0, 0, 1, 1], [], []>} : vector<16x16xbf16>, vector<16x128xbf16>, vector<16x128xf32> -> vector<16x128xf32>
    %81 = vector.extract_strided_slice %45 {offsets = [0, 128], sizes = [16, 128], strides = [1, 1]} : vector<16x768xf32> to vector<16x128xf32>
    %c127_i32_43 = arith.constant 127 : i32
    %82 = tpu.dynamic_rotate %81 by %c127_i32_43 dim 1 : vector<16x128xf32>, i32 -> vector<16x128xf32>
    %c1_i32_44 = arith.constant 1 : i32
    %83 = tpu.dynamic_rotate %81 by %c1_i32_44 dim 1 : vector<16x128xf32>, i32 -> vector<16x128xf32>
    %84 = arith.mulf %81, %8 : vector<16x128xf32>
    %85 = arith.mulf %82, %9 : vector<16x128xf32>
    %86 = arith.addf %84, %85 : vector<16x128xf32>
    %87 = arith.mulf %83, %10 : vector<16x128xf32>
    %88 = arith.addf %86, %87 : vector<16x128xf32>
    %89 = vector.extract_strided_slice %45 {offsets = [0, 384], sizes = [16, 128], strides = [1, 1]} : vector<16x768xf32> to vector<16x128xf32>
    %c127_i32_45 = arith.constant 127 : i32
    %90 = tpu.dynamic_rotate %89 by %c127_i32_45 dim 1 : vector<16x128xf32>, i32 -> vector<16x128xf32>
    %c1_i32_46 = arith.constant 1 : i32
    %91 = tpu.dynamic_rotate %89 by %c1_i32_46 dim 1 : vector<16x128xf32>, i32 -> vector<16x128xf32>
    %92 = arith.mulf %89, %8 : vector<16x128xf32>
    %93 = arith.mulf %90, %9 : vector<16x128xf32>
    %94 = arith.addf %92, %93 : vector<16x128xf32>
    %95 = arith.mulf %91, %10 : vector<16x128xf32>
    %96 = arith.addf %94, %95 : vector<16x128xf32>
    %97 = vector.extract_strided_slice %45 {offsets = [0, 640], sizes = [16, 128], strides = [1, 1]} : vector<16x768xf32> to vector<16x128xf32>
    %98 = arith.truncf %88 : vector<16x128xf32> to vector<16x128xbf16>
    %99 = arith.truncf %96 : vector<16x128xf32> to vector<16x128xbf16>
    %100 = arith.truncf %97 : vector<16x128xf32> to vector<16x128xbf16>
    %cst_47 = arith.constant dense<0.000000e+00> : vector<16x16xf32>
    %101 = tpu.matmul %98, %99, %cst_47 {dimension_numbers = #tpu.dot_dimension_numbers<[1], [1], [0], [0], [0, 0, 1, 0], [], []>} : vector<16x128xbf16>, vector<16x128xbf16>, vector<16x16xf32> -> vector<16x16xf32>
    %102 = vector.broadcast %5 : vector<1x16xf32> to vector<16x16xf32>
    %103 = arith.addf %101, %102 : vector<16x16xf32>
    %cst_48 = arith.constant dense<0xFF800000> : vector<16xf32>
    %104 = vector.multi_reduction <maximumf>, %103, %cst_48 [1] : vector<16x16xf32> to vector<16xf32>
    %105 = vector.shape_cast %104 : vector<16xf32> to vector<16x1xf32>
    %106 = vector.broadcast %105 : vector<16x1xf32> to vector<16x16xf32>
    %107 = arith.subf %103, %106 : vector<16x16xf32>
    %108 = math.exp %107 : vector<16x16xf32>
    %cst_49 = arith.constant dense<0.000000e+00> : vector<16xf32>
    %109 = vector.multi_reduction <add>, %108, %cst_49 [1] : vector<16x16xf32> to vector<16xf32>
    %110 = vector.shape_cast %109 : vector<16xf32> to vector<16x1xf32>
    %111 = tpu.reciprocal %110 {approx = true} : vector<16x1xf32> -> vector<16x1xf32>
    %112 = vector.broadcast %111 : vector<16x1xf32> to vector<16x16xf32>
    %113 = arith.mulf %108, %112 : vector<16x16xf32>
    %114 = arith.truncf %113 : vector<16x16xf32> to vector<16x16xbf16>
    %cst_50 = arith.constant dense<0.000000e+00> : vector<16x128xf32>
    %115 = tpu.matmul %114, %100, %cst_50 {dimension_numbers = #tpu.dot_dimension_numbers<[1], [0], [0], [1], [0, 0, 1, 1], [], []>} : vector<16x16xbf16>, vector<16x128xbf16>, vector<16x128xf32> -> vector<16x128xf32>
    %116 = tpu.concatenate %80, %115 in 1 : vector<16x128xf32>, vector<16x128xf32> -> vector<16x256xf32>
    %117 = arith.truncf %116 : vector<16x256xf32> to vector<16x256xbf16>
    %c0_51 = arith.constant 0 : index
    %c0_52 = arith.constant 0 : index
    %c0_53 = arith.constant 0 : index
    %118 = vector.load %arg18[%c0_51, %c0_52, %c0_53] : memref<1x256x256xbf16, #tpu.memory_space<vmem>>, vector<1x256x256xbf16>
    %119 = vector.shape_cast %118 : vector<1x256x256xbf16> to vector<256x256xbf16>
    %cst_54 = arith.constant dense<0.000000e+00> : vector<16x256xf32>
    %120 = tpu.matmul %117, %119, %cst_54 {dimension_numbers = #tpu.dot_dimension_numbers<[1], [0], [0], [1], [0, 0, 1, 1], [], []>} : vector<16x256xbf16>, vector<256x256xbf16>, vector<16x256xf32> -> vector<16x256xf32>
    %121 = arith.addf %3, %120 : vector<16x256xf32>
    %c0_55 = arith.constant 0 : index
    %c0_56 = arith.constant 0 : index
    %c0_57 = arith.constant 0 : index
    %122 = vector.load %arg19[%c0_55, %c0_56, %c0_57] : memref<1x1x256xf32, #tpu.memory_space<vmem>>, vector<1x1x256xf32>
    %123 = vector.shape_cast %122 : vector<1x1x256xf32> to vector<1x256xf32>
    %124 = vector.broadcast %123 : vector<1x256xf32> to vector<16x256xf32>
    %125 = arith.addf %121, %124 : vector<16x256xf32>
    %c0_58 = arith.constant 0 : index
    %c0_59 = arith.constant 0 : index
    %c0_60 = arith.constant 0 : index
    %126 = vector.load %arg20[%c0_58, %c0_59, %c0_60] : memref<1x1x256xf32, #tpu.memory_space<vmem>>, vector<1x1x256xf32>
    %127 = vector.shape_cast %126 : vector<1x1x256xf32> to vector<1x256xf32>
    %c0_61 = arith.constant 0 : index
    %c0_62 = arith.constant 0 : index
    %c0_63 = arith.constant 0 : index
    %128 = vector.load %arg21[%c0_61, %c0_62, %c0_63] : memref<1x1x256xf32, #tpu.memory_space<vmem>>, vector<1x1x256xf32>
    %129 = vector.shape_cast %128 : vector<1x1x256xf32> to vector<1x256xf32>
    %cst_64 = arith.constant dense<0.000000e+00> : vector<16xf32>
    %130 = vector.multi_reduction <add>, %125, %cst_64 [1] : vector<16x256xf32> to vector<16xf32>
    %131 = vector.shape_cast %130 : vector<16xf32> to vector<16x1xf32>
    %cst_65 = arith.constant 2.560000e+02 : f32
    %132 = vector.broadcast %cst_65 : f32 to vector<16x1xf32>
    %133 = arith.divf %131, %132 : vector<16x1xf32>
    %134 = vector.broadcast %133 : vector<16x1xf32> to vector<16x256xf32>
    %135 = arith.subf %125, %134 : vector<16x256xf32>
    %136 = arith.mulf %135, %135 : vector<16x256xf32>
    %cst_66 = arith.constant dense<0.000000e+00> : vector<16xf32>
    %137 = vector.multi_reduction <add>, %136, %cst_66 [1] : vector<16x256xf32> to vector<16xf32>
    %138 = vector.shape_cast %137 : vector<16xf32> to vector<16x1xf32>
    %cst_67 = arith.constant 0.00392156886 : f32
    %139 = vector.broadcast %cst_67 : f32 to vector<16x1xf32>
    %140 = arith.mulf %138, %139 : vector<16x1xf32>
    %141 = math.sqrt %140 : vector<16x1xf32>
    %cst_68 = arith.constant 9.99999997E-7 : f32
    %142 = vector.broadcast %cst_68 : f32 to vector<16x1xf32>
    %143 = arith.addf %141, %142 : vector<16x1xf32>
    %144 = vector.broadcast %143 : vector<16x1xf32> to vector<16x256xf32>
    %145 = arith.divf %135, %144 : vector<16x256xf32>
    %146 = vector.broadcast %127 : vector<1x256xf32> to vector<16x256xf32>
    %147 = arith.mulf %146, %145 : vector<16x256xf32>
    %148 = vector.broadcast %129 : vector<1x256xf32> to vector<16x256xf32>
    %149 = arith.addf %147, %148 : vector<16x256xf32>
    %150 = arith.truncf %149 : vector<16x256xf32> to vector<16x256xbf16>
    %c0_69 = arith.constant 0 : index
    %c0_70 = arith.constant 0 : index
    %c0_71 = arith.constant 0 : index
    %151 = vector.load %arg22[%c0_69, %c0_70, %c0_71] : memref<1x256x256xbf16, #tpu.memory_space<vmem>>, vector<1x256x256xbf16>
    %152 = vector.shape_cast %151 : vector<1x256x256xbf16> to vector<256x256xbf16>
    %cst_72 = arith.constant dense<0.000000e+00> : vector<16x256xf32>
    %153 = tpu.matmul %150, %152, %cst_72 {dimension_numbers = #tpu.dot_dimension_numbers<[1], [0], [0], [1], [0, 0, 1, 1], [], []>} : vector<16x256xbf16>, vector<256x256xbf16>, vector<16x256xf32> -> vector<16x256xf32>
    %c0_73 = arith.constant 0 : index
    %c0_74 = arith.constant 0 : index
    %c0_75 = arith.constant 0 : index
    %154 = vector.load %arg23[%c0_73, %c0_74, %c0_75] : memref<1x1x256xf32, #tpu.memory_space<vmem>>, vector<1x1x256xf32>
    %155 = vector.shape_cast %154 : vector<1x1x256xf32> to vector<1x256xf32>
    %156 = vector.broadcast %155 : vector<1x256xf32> to vector<16x256xf32>
    %157 = arith.addf %153, %156 : vector<16x256xf32>
    %c0_76 = arith.constant 0 : index
    %c0_77 = arith.constant 0 : index
    %c0_78 = arith.constant 0 : index
    %158 = vector.load %arg3[%c0_76, %c0_77, %c0_78] : memref<1x24x256xf32, #tpu.memory_space<vmem>>, vector<1x24x256xf32>
    %159 = vector.shape_cast %158 : vector<1x24x256xf32> to vector<24x256xf32>
    %160 = arith.truncf %159 : vector<24x256xf32> to vector<24x256xbf16>
    %c0_79 = arith.constant 0 : index
    %c0_80 = arith.constant 0 : index
    %c0_81 = arith.constant 0 : index
    %161 = vector.load %arg24[%c0_79, %c0_80, %c0_81] : memref<1x256x512xbf16, #tpu.memory_space<vmem>>, vector<1x256x512xbf16>
    %162 = vector.shape_cast %161 : vector<1x256x512xbf16> to vector<256x512xbf16>
    %cst_82 = arith.constant dense<0.000000e+00> : vector<24x512xf32>
    %163 = tpu.matmul %160, %162, %cst_82 {dimension_numbers = #tpu.dot_dimension_numbers<[1], [0], [0], [1], [0, 0, 1, 1], [], []>} : vector<24x256xbf16>, vector<256x512xbf16>, vector<24x512xf32> -> vector<24x512xf32>
    %c0_83 = arith.constant 0 : index
    %c0_84 = arith.constant 0 : index
    %c0_85 = arith.constant 0 : index
    %164 = vector.load %arg25[%c0_83, %c0_84, %c0_85] : memref<1x1x512xf32, #tpu.memory_space<vmem>>, vector<1x1x512xf32>
    %165 = vector.shape_cast %164 : vector<1x1x512xf32> to vector<1x512xf32>
    %166 = vector.broadcast %165 : vector<1x512xf32> to vector<24x512xf32>
    %167 = arith.addf %163, %166 : vector<24x512xf32>
    %168 = vector.extract_strided_slice %157 {offsets = [0, 0], sizes = [16, 128], strides = [1, 1]} : vector<16x256xf32> to vector<16x128xf32>
    %c127_i32_86 = arith.constant 127 : i32
    %169 = tpu.dynamic_rotate %168 by %c127_i32_86 dim 1 : vector<16x128xf32>, i32 -> vector<16x128xf32>
    %c1_i32_87 = arith.constant 1 : i32
    %170 = tpu.dynamic_rotate %168 by %c1_i32_87 dim 1 : vector<16x128xf32>, i32 -> vector<16x128xf32>
    %171 = arith.mulf %168, %8 : vector<16x128xf32>
    %172 = arith.mulf %169, %9 : vector<16x128xf32>
    %173 = arith.addf %171, %172 : vector<16x128xf32>
    %174 = arith.mulf %170, %10 : vector<16x128xf32>
    %175 = arith.addf %173, %174 : vector<16x128xf32>
    %176 = vector.extract_strided_slice %167 {offsets = [0, 0], sizes = [24, 128], strides = [1, 1]} : vector<24x512xf32> to vector<24x128xf32>
    %c127_i32_88 = arith.constant 127 : i32
    %177 = tpu.dynamic_rotate %176 by %c127_i32_88 dim 1 : vector<24x128xf32>, i32 -> vector<24x128xf32>
    %c1_i32_89 = arith.constant 1 : i32
    %178 = tpu.dynamic_rotate %176 by %c1_i32_89 dim 1 : vector<24x128xf32>, i32 -> vector<24x128xf32>
    %179 = arith.mulf %176, %11 : vector<24x128xf32>
    %180 = arith.mulf %177, %12 : vector<24x128xf32>
    %181 = arith.addf %179, %180 : vector<24x128xf32>
    %182 = arith.mulf %178, %13 : vector<24x128xf32>
    %183 = arith.addf %181, %182 : vector<24x128xf32>
    %184 = vector.extract_strided_slice %167 {offsets = [0, 256], sizes = [24, 128], strides = [1, 1]} : vector<24x512xf32> to vector<24x128xf32>
    %185 = arith.truncf %175 : vector<16x128xf32> to vector<16x128xbf16>
    %186 = arith.truncf %183 : vector<24x128xf32> to vector<24x128xbf16>
    %187 = arith.truncf %184 : vector<24x128xf32> to vector<24x128xbf16>
    %cst_90 = arith.constant dense<0.000000e+00> : vector<16x24xf32>
    %188 = tpu.matmul %185, %186, %cst_90 {dimension_numbers = #tpu.dot_dimension_numbers<[1], [1], [0], [0], [0, 0, 1, 0], [], []>} : vector<16x128xbf16>, vector<24x128xbf16>, vector<16x24xf32> -> vector<16x24xf32>
    %189 = vector.broadcast %7 : vector<1x24xf32> to vector<16x24xf32>
    %190 = arith.addf %188, %189 : vector<16x24xf32>
    %cst_91 = arith.constant dense<0xFF800000> : vector<16xf32>
    %191 = vector.multi_reduction <maximumf>, %190, %cst_91 [1] : vector<16x24xf32> to vector<16xf32>
    %192 = vector.shape_cast %191 : vector<16xf32> to vector<16x1xf32>
    %193 = vector.broadcast %192 : vector<16x1xf32> to vector<16x24xf32>
    %194 = arith.subf %190, %193 : vector<16x24xf32>
    %195 = math.exp %194 : vector<16x24xf32>
    %cst_92 = arith.constant dense<0.000000e+00> : vector<16xf32>
    %196 = vector.multi_reduction <add>, %195, %cst_92 [1] : vector<16x24xf32> to vector<16xf32>
    %197 = vector.shape_cast %196 : vector<16xf32> to vector<16x1xf32>
    %198 = tpu.reciprocal %197 {approx = true} : vector<16x1xf32> -> vector<16x1xf32>
    %199 = vector.broadcast %198 : vector<16x1xf32> to vector<16x24xf32>
    %200 = arith.mulf %195, %199 : vector<16x24xf32>
    %201 = arith.truncf %200 : vector<16x24xf32> to vector<16x24xbf16>
    %cst_93 = arith.constant dense<0.000000e+00> : vector<16x128xf32>
    %202 = tpu.matmul %201, %187, %cst_93 {dimension_numbers = #tpu.dot_dimension_numbers<[1], [0], [0], [1], [0, 0, 1, 1], [], []>} : vector<16x24xbf16>, vector<24x128xbf16>, vector<16x128xf32> -> vector<16x128xf32>
    %203 = vector.extract_strided_slice %157 {offsets = [0, 128], sizes = [16, 128], strides = [1, 1]} : vector<16x256xf32> to vector<16x128xf32>
    %c127_i32_94 = arith.constant 127 : i32
    %204 = tpu.dynamic_rotate %203 by %c127_i32_94 dim 1 : vector<16x128xf32>, i32 -> vector<16x128xf32>
    %c1_i32_95 = arith.constant 1 : i32
    %205 = tpu.dynamic_rotate %203 by %c1_i32_95 dim 1 : vector<16x128xf32>, i32 -> vector<16x128xf32>
    %206 = arith.mulf %203, %8 : vector<16x128xf32>
    %207 = arith.mulf %204, %9 : vector<16x128xf32>
    %208 = arith.addf %206, %207 : vector<16x128xf32>
    %209 = arith.mulf %205, %10 : vector<16x128xf32>
    %210 = arith.addf %208, %209 : vector<16x128xf32>
    %211 = vector.extract_strided_slice %167 {offsets = [0, 128], sizes = [24, 128], strides = [1, 1]} : vector<24x512xf32> to vector<24x128xf32>
    %c127_i32_96 = arith.constant 127 : i32
    %212 = tpu.dynamic_rotate %211 by %c127_i32_96 dim 1 : vector<24x128xf32>, i32 -> vector<24x128xf32>
    %c1_i32_97 = arith.constant 1 : i32
    %213 = tpu.dynamic_rotate %211 by %c1_i32_97 dim 1 : vector<24x128xf32>, i32 -> vector<24x128xf32>
    %214 = arith.mulf %211, %11 : vector<24x128xf32>
    %215 = arith.mulf %212, %12 : vector<24x128xf32>
    %216 = arith.addf %214, %215 : vector<24x128xf32>
    %217 = arith.mulf %213, %13 : vector<24x128xf32>
    %218 = arith.addf %216, %217 : vector<24x128xf32>
    %219 = vector.extract_strided_slice %167 {offsets = [0, 384], sizes = [24, 128], strides = [1, 1]} : vector<24x512xf32> to vector<24x128xf32>
    %220 = arith.truncf %210 : vector<16x128xf32> to vector<16x128xbf16>
    %221 = arith.truncf %218 : vector<24x128xf32> to vector<24x128xbf16>
    %222 = arith.truncf %219 : vector<24x128xf32> to vector<24x128xbf16>
    %cst_98 = arith.constant dense<0.000000e+00> : vector<16x24xf32>
    %223 = tpu.matmul %220, %221, %cst_98 {dimension_numbers = #tpu.dot_dimension_numbers<[1], [1], [0], [0], [0, 0, 1, 0], [], []>} : vector<16x128xbf16>, vector<24x128xbf16>, vector<16x24xf32> -> vector<16x24xf32>
    %224 = vector.broadcast %7 : vector<1x24xf32> to vector<16x24xf32>
    %225 = arith.addf %223, %224 : vector<16x24xf32>
    %cst_99 = arith.constant dense<0xFF800000> : vector<16xf32>
    %226 = vector.multi_reduction <maximumf>, %225, %cst_99 [1] : vector<16x24xf32> to vector<16xf32>
    %227 = vector.shape_cast %226 : vector<16xf32> to vector<16x1xf32>
    %228 = vector.broadcast %227 : vector<16x1xf32> to vector<16x24xf32>
    %229 = arith.subf %225, %228 : vector<16x24xf32>
    %230 = math.exp %229 : vector<16x24xf32>
    %cst_100 = arith.constant dense<0.000000e+00> : vector<16xf32>
    %231 = vector.multi_reduction <add>, %230, %cst_100 [1] : vector<16x24xf32> to vector<16xf32>
    %232 = vector.shape_cast %231 : vector<16xf32> to vector<16x1xf32>
    %233 = tpu.reciprocal %232 {approx = true} : vector<16x1xf32> -> vector<16x1xf32>
    %234 = vector.broadcast %233 : vector<16x1xf32> to vector<16x24xf32>
    %235 = arith.mulf %230, %234 : vector<16x24xf32>
    %236 = arith.truncf %235 : vector<16x24xf32> to vector<16x24xbf16>
    %cst_101 = arith.constant dense<0.000000e+00> : vector<16x128xf32>
    %237 = tpu.matmul %236, %222, %cst_101 {dimension_numbers = #tpu.dot_dimension_numbers<[1], [0], [0], [1], [0, 0, 1, 1], [], []>} : vector<16x24xbf16>, vector<24x128xbf16>, vector<16x128xf32> -> vector<16x128xf32>
    %238 = tpu.concatenate %202, %237 in 1 : vector<16x128xf32>, vector<16x128xf32> -> vector<16x256xf32>
    %239 = arith.truncf %238 : vector<16x256xf32> to vector<16x256xbf16>
    %c0_102 = arith.constant 0 : index
    %c0_103 = arith.constant 0 : index
    %c0_104 = arith.constant 0 : index
    %240 = vector.load %arg26[%c0_102, %c0_103, %c0_104] : memref<1x256x256xbf16, #tpu.memory_space<vmem>>, vector<1x256x256xbf16>
    %241 = vector.shape_cast %240 : vector<1x256x256xbf16> to vector<256x256xbf16>
    %cst_105 = arith.constant dense<0.000000e+00> : vector<16x256xf32>
    %242 = tpu.matmul %239, %241, %cst_105 {dimension_numbers = #tpu.dot_dimension_numbers<[1], [0], [0], [1], [0, 0, 1, 1], [], []>} : vector<16x256xbf16>, vector<256x256xbf16>, vector<16x256xf32> -> vector<16x256xf32>
    %243 = arith.addf %125, %242 : vector<16x256xf32>
    %c0_106 = arith.constant 0 : index
    %c0_107 = arith.constant 0 : index
    %c0_108 = arith.constant 0 : index
    %244 = vector.load %arg27[%c0_106, %c0_107, %c0_108] : memref<1x1x256xf32, #tpu.memory_space<vmem>>, vector<1x1x256xf32>
    %245 = vector.shape_cast %244 : vector<1x1x256xf32> to vector<1x256xf32>
    %246 = vector.broadcast %245 : vector<1x256xf32> to vector<16x256xf32>
    %247 = arith.addf %243, %246 : vector<16x256xf32>
    %c0_109 = arith.constant 0 : index
    %c0_110 = arith.constant 0 : index
    %c0_111 = arith.constant 0 : index
    %248 = vector.load %arg28[%c0_109, %c0_110, %c0_111] : memref<1x1x256xf32, #tpu.memory_space<vmem>>, vector<1x1x256xf32>
    %249 = vector.shape_cast %248 : vector<1x1x256xf32> to vector<1x256xf32>
    %c0_112 = arith.constant 0 : index
    %c0_113 = arith.constant 0 : index
    %c0_114 = arith.constant 0 : index
    %250 = vector.load %arg29[%c0_112, %c0_113, %c0_114] : memref<1x1x256xf32, #tpu.memory_space<vmem>>, vector<1x1x256xf32>
    %251 = vector.shape_cast %250 : vector<1x1x256xf32> to vector<1x256xf32>
    %cst_115 = arith.constant dense<0.000000e+00> : vector<16xf32>
    %252 = vector.multi_reduction <add>, %247, %cst_115 [1] : vector<16x256xf32> to vector<16xf32>
    %253 = vector.shape_cast %252 : vector<16xf32> to vector<16x1xf32>
    %cst_116 = arith.constant 2.560000e+02 : f32
    %254 = vector.broadcast %cst_116 : f32 to vector<16x1xf32>
    %255 = arith.divf %253, %254 : vector<16x1xf32>
    %256 = vector.broadcast %255 : vector<16x1xf32> to vector<16x256xf32>
    %257 = arith.subf %247, %256 : vector<16x256xf32>
    %258 = arith.mulf %257, %257 : vector<16x256xf32>
    %cst_117 = arith.constant dense<0.000000e+00> : vector<16xf32>
    %259 = vector.multi_reduction <add>, %258, %cst_117 [1] : vector<16x256xf32> to vector<16xf32>
    %260 = vector.shape_cast %259 : vector<16xf32> to vector<16x1xf32>
    %cst_118 = arith.constant 0.00392156886 : f32
    %261 = vector.broadcast %cst_118 : f32 to vector<16x1xf32>
    %262 = arith.mulf %260, %261 : vector<16x1xf32>
    %263 = math.sqrt %262 : vector<16x1xf32>
    %cst_119 = arith.constant 9.99999997E-7 : f32
    %264 = vector.broadcast %cst_119 : f32 to vector<16x1xf32>
    %265 = arith.addf %263, %264 : vector<16x1xf32>
    %266 = vector.broadcast %265 : vector<16x1xf32> to vector<16x256xf32>
    %267 = arith.divf %257, %266 : vector<16x256xf32>
    %268 = vector.broadcast %249 : vector<1x256xf32> to vector<16x256xf32>
    %269 = arith.mulf %268, %267 : vector<16x256xf32>
    %270 = vector.broadcast %251 : vector<1x256xf32> to vector<16x256xf32>
    %271 = arith.addf %269, %270 : vector<16x256xf32>
    %272 = arith.truncf %271 : vector<16x256xf32> to vector<16x256xbf16>
    %c0_120 = arith.constant 0 : index
    %c0_121 = arith.constant 0 : index
    %c0_122 = arith.constant 0 : index
    %273 = vector.load %arg30[%c0_120, %c0_121, %c0_122] : memref<1x256x2048xbf16, #tpu.memory_space<vmem>>, vector<1x256x2048xbf16>
    %274 = vector.shape_cast %273 : vector<1x256x2048xbf16> to vector<256x2048xbf16>
    %cst_123 = arith.constant dense<0.000000e+00> : vector<16x2048xf32>
    %275 = tpu.matmul %272, %274, %cst_123 {dimension_numbers = #tpu.dot_dimension_numbers<[1], [0], [0], [1], [0, 0, 1, 1], [], []>} : vector<16x256xbf16>, vector<256x2048xbf16>, vector<16x2048xf32> -> vector<16x2048xf32>
    %c0_124 = arith.constant 0 : index
    %c0_125 = arith.constant 0 : index
    %c0_126 = arith.constant 0 : index
    %276 = vector.load %arg31[%c0_124, %c0_125, %c0_126] : memref<1x1x2048xf32, #tpu.memory_space<vmem>>, vector<1x1x2048xf32>
    %277 = vector.shape_cast %276 : vector<1x1x2048xf32> to vector<1x2048xf32>
    %278 = vector.broadcast %277 : vector<1x2048xf32> to vector<16x2048xf32>
    %279 = arith.addf %275, %278 : vector<16x2048xf32>
    %cst_127 = arith.constant 0.000000e+00 : f32
    %280 = vector.broadcast %cst_127 : f32 to vector<16x2048xf32>
    %281 = arith.maximumf %279, %280 : vector<16x2048xf32>
    %282 = arith.truncf %281 : vector<16x2048xf32> to vector<16x2048xbf16>
    %c0_128 = arith.constant 0 : index
    %c0_129 = arith.constant 0 : index
    %c0_130 = arith.constant 0 : index
    %283 = vector.load %arg32[%c0_128, %c0_129, %c0_130] : memref<1x2048x256xbf16, #tpu.memory_space<vmem>>, vector<1x2048x256xbf16>
    %284 = vector.shape_cast %283 : vector<1x2048x256xbf16> to vector<2048x256xbf16>
    %cst_131 = arith.constant dense<0.000000e+00> : vector<16x256xf32>
    %285 = tpu.matmul %282, %284, %cst_131 {dimension_numbers = #tpu.dot_dimension_numbers<[1], [0], [0], [1], [0, 0, 1, 1], [], []>} : vector<16x2048xbf16>, vector<2048x256xbf16>, vector<16x256xf32> -> vector<16x256xf32>
    %286 = arith.addf %247, %285 : vector<16x256xf32>
    %c0_132 = arith.constant 0 : index
    %c0_133 = arith.constant 0 : index
    %c0_134 = arith.constant 0 : index
    %287 = vector.load %arg33[%c0_132, %c0_133, %c0_134] : memref<1x1x256xf32, #tpu.memory_space<vmem>>, vector<1x1x256xf32>
    %288 = vector.shape_cast %287 : vector<1x1x256xf32> to vector<1x256xf32>
    %289 = vector.broadcast %288 : vector<1x256xf32> to vector<16x256xf32>
    %290 = arith.addf %286, %289 : vector<16x256xf32>
    %c0_135 = arith.constant 0 : index
    %c0_136 = arith.constant 0 : index
    %291 = vector.load %arg35[%c0_135, %c0_136] : memref<16x256xf32, #tpu.memory_space<vmem>>, vector<16x256xf32>
    tpu.vector_store %arg35[%c0_135, %c0_136], %290 {strides = array<i32>} : memref<16x256xf32, #tpu.memory_space<vmem>>, vector<16x256xf32>,
    %c1_i32_137 = arith.constant 1 : i32
    %292 = arith.cmpi eq, %arg1, %c1_i32_137 : i32
    %293 = arith.extui %292 : i1 to i32
    %c0_i32_138 = arith.constant 0 : i32
    %294 = arith.cmpi ne, %293, %c0_i32_138 : i32
    scf.if %294 {
      %c0_139 = arith.constant 0 : index
      %c0_140 = arith.constant 0 : index
      %295 = vector.load %arg12[%c0_139, %c0_140] : memref<1x256xf32, #tpu.memory_space<vmem>>, vector<1x256xf32>
      %c0_141 = arith.constant 0 : index
      %c0_142 = arith.constant 0 : index
      %296 = vector.load %arg13[%c0_141, %c0_142] : memref<1x256xf32, #tpu.memory_space<vmem>>, vector<1x256xf32>
      %cst_143 = arith.constant dense<0.000000e+00> : vector<16xf32>
      %297 = vector.multi_reduction <add>, %290, %cst_143 [1] : vector<16x256xf32> to vector<16xf32>
      %298 = vector.shape_cast %297 : vector<16xf32> to vector<16x1xf32>
      %cst_144 = arith.constant 2.560000e+02 : f32
      %299 = vector.broadcast %cst_144 : f32 to vector<16x1xf32>
      %300 = arith.divf %298, %299 : vector<16x1xf32>
      %301 = vector.broadcast %300 : vector<16x1xf32> to vector<16x256xf32>
      %302 = arith.subf %290, %301 : vector<16x256xf32>
      %303 = arith.mulf %302, %302 : vector<16x256xf32>
      %cst_145 = arith.constant dense<0.000000e+00> : vector<16xf32>
      %304 = vector.multi_reduction <add>, %303, %cst_145 [1] : vector<16x256xf32> to vector<16xf32>
      %305 = vector.shape_cast %304 : vector<16xf32> to vector<16x1xf32>
      %cst_146 = arith.constant 0.00392156886 : f32
      %306 = vector.broadcast %cst_146 : f32 to vector<16x1xf32>
      %307 = arith.mulf %305, %306 : vector<16x1xf32>
      %308 = math.sqrt %307 : vector<16x1xf32>
      %cst_147 = arith.constant 9.99999997E-7 : f32
      %309 = vector.broadcast %cst_147 : f32 to vector<16x1xf32>
      %310 = arith.addf %308, %309 : vector<16x1xf32>
      %311 = vector.broadcast %310 : vector<16x1xf32> to vector<16x256xf32>
      %312 = arith.divf %302, %311 : vector<16x256xf32>
      %313 = vector.broadcast %295 : vector<1x256xf32> to vector<16x256xf32>
      %314 = arith.mulf %313, %312 : vector<16x256xf32>
      %315 = vector.broadcast %296 : vector<1x256xf32> to vector<16x256xf32>
      %316 = arith.addf %314, %315 : vector<16x256xf32>
      %c0_148 = arith.constant 0 : index
      %c0_149 = arith.constant 0 : index
      %c0_150 = arith.constant 0 : index
      %317 = vector.load %arg34[%c0_148, %c0_149, %c0_150] : memref<1x16x256xf32, #tpu.memory_space<vmem>>, vector<1x16x256xf32>
      %318 = vector.shape_cast %317 : vector<1x16x256xf32> to vector<16x256xf32>
      %319 = vector.shape_cast %316 : vector<16x256xf32> to vector<1x16x256xf32>
      tpu.vector_store %arg34[%c0_148, %c0_149, %c0_150], %319 {strides = array<i32>} : memref<1x16x256xf32, #tpu.memory_space<vmem>>, vector<1x16x256xf32>,
    } else {
    }
    return
  }
  func.func @transform_0(%arg0: i32, %arg1: i32) -> (i32, i32, i32) {
    %c0_i32 = arith.constant 0 : i32
    %c0_i32_0 = arith.constant 0 : i32
    %c0_i32_1 = arith.constant 0 : i32
    return %arg0, %c0_i32, %c0_i32_0 : i32, i32, i32
  }
  func.func @transform_1(%arg0: i32, %arg1: i32) -> (i32, i32, i32) {
    %c0_i32 = arith.constant 0 : i32
    %c0_i32_0 = arith.constant 0 : i32
    %c0_i32_1 = arith.constant 0 : i32
    return %arg0, %c0_i32, %c0_i32_0 : i32, i32, i32
  }
  func.func @transform_2(%arg0: i32, %arg1: i32) -> (i32, i32, i32) {
    %c0_i32 = arith.constant 0 : i32
    %c0_i32_0 = arith.constant 0 : i32
    %c0_i32_1 = arith.constant 0 : i32
    return %arg0, %c0_i32, %c0_i32_0 : i32, i32, i32
  }
  func.func @transform_3(%arg0: i32, %arg1: i32) -> (i32, i32, i32) {
    %c0_i32 = arith.constant 0 : i32
    %c0_i32_0 = arith.constant 0 : i32
    %c0_i32_1 = arith.constant 0 : i32
    return %arg0, %c0_i32, %c0_i32_0 : i32, i32, i32
  }
  func.func @transform_4(%arg0: i32, %arg1: i32) -> (i32, i32) {
    %c0_i32 = arith.constant 0 : i32
    %c0_i32_0 = arith.constant 0 : i32
    %c0_i32_1 = arith.constant 0 : i32
    return %c0_i32, %c0_i32_0 : i32, i32
  }
  func.func @transform_5(%arg0: i32, %arg1: i32) -> (i32, i32) {
    %c0_i32 = arith.constant 0 : i32
    %c0_i32_0 = arith.constant 0 : i32
    %c0_i32_1 = arith.constant 0 : i32
    return %c0_i32, %c0_i32_0 : i32, i32
  }
  func.func @transform_6(%arg0: i32, %arg1: i32) -> (i32, i32) {
    %c0_i32 = arith.constant 0 : i32
    %c0_i32_0 = arith.constant 0 : i32
    %c0_i32_1 = arith.constant 0 : i32
    return %c0_i32, %c0_i32_0 : i32, i32
  }
  func.func @transform_7(%arg0: i32, %arg1: i32) -> (i32, i32) {
    %c0_i32 = arith.constant 0 : i32
    %c0_i32_0 = arith.constant 0 : i32
    %c0_i32_1 = arith.constant 0 : i32
    return %c0_i32, %c0_i32_0 : i32, i32
  }
  func.func @transform_8(%arg0: i32, %arg1: i32) -> (i32, i32) {
    %c0_i32 = arith.constant 0 : i32
    %c0_i32_0 = arith.constant 0 : i32
    %c0_i32_1 = arith.constant 0 : i32
    return %c0_i32, %c0_i32_0 : i32, i32
  }
  func.func @transform_9(%arg0: i32, %arg1: i32) -> (i32, i32) {
    %c0_i32 = arith.constant 0 : i32
    %c0_i32_0 = arith.constant 0 : i32
    %c0_i32_1 = arith.constant 0 : i32
    return %c0_i32, %c0_i32_0 : i32, i32
  }
  func.func @transform_10(%arg0: i32, %arg1: i32) -> (i32, i32) {
    %c0_i32 = arith.constant 0 : i32
    %c0_i32_0 = arith.constant 0 : i32
    %c0_i32_1 = arith.constant 0 : i32
    return %c0_i32, %c0_i32_0 : i32, i32
  }
  func.func @transform_11(%arg0: i32, %arg1: i32) -> (i32, i32) {
    %c0_i32 = arith.constant 0 : i32
    %c0_i32_0 = arith.constant 0 : i32
    %c0_i32_1 = arith.constant 0 : i32
    return %c0_i32, %c0_i32_0 : i32, i32
  }
  func.func @transform_12(%arg0: i32, %arg1: i32) -> (i32, i32, i32) {
    %c0_i32 = arith.constant 0 : i32
    %c0_i32_0 = arith.constant 0 : i32
    %c0_i32_1 = arith.constant 0 : i32
    return %arg1, %c0_i32, %c0_i32_0 : i32, i32, i32
  }
  func.func @transform_13(%arg0: i32, %arg1: i32) -> (i32, i32, i32) {
    %c0_i32 = arith.constant 0 : i32
    %c0_i32_0 = arith.constant 0 : i32
    %c0_i32_1 = arith.constant 0 : i32
    return %arg1, %c0_i32, %c0_i32_0 : i32, i32, i32
  }
  func.func @transform_14(%arg0: i32, %arg1: i32) -> (i32, i32, i32) {
    %c0_i32 = arith.constant 0 : i32
    %c0_i32_0 = arith.constant 0 : i32
    %c0_i32_1 = arith.constant 0 : i32
    return %arg1, %c0_i32, %c0_i32_0 : i32, i32, i32
  }
  func.func @transform_15(%arg0: i32, %arg1: i32) -> (i32, i32, i32) {
    %c0_i32 = arith.constant 0 : i32
    %c0_i32_0 = arith.constant 0 : i32
    %c0_i32_1 = arith.constant 0 : i32
    return %arg1, %c0_i32, %c0_i32_0 : i32, i32, i32
  }
  func.func @transform_16(%arg0: i32, %arg1: i32) -> (i32, i32, i32) {
    %c0_i32 = arith.constant 0 : i32
    %c0_i32_0 = arith.constant 0 : i32
    %c0_i32_1 = arith.constant 0 : i32
    return %arg1, %c0_i32, %c0_i32_0 : i32, i32, i32
  }
  func.func @transform_17(%arg0: i32, %arg1: i32) -> (i32, i32, i32) {
    %c0_i32 = arith.constant 0 : i32
    %c0_i32_0 = arith.constant 0 : i32
    %c0_i32_1 = arith.constant 0 : i32
    return %arg1, %c0_i32, %c0_i32_0 : i32, i32, i32
  }
  func.func @transform_18(%arg0: i32, %arg1: i32) -> (i32, i32, i32) {
    %c0_i32 = arith.constant 0 : i32
    %c0_i32_0 = arith.constant 0 : i32
    %c0_i32_1 = arith.constant 0 : i32
    return %arg1, %c0_i32, %c0_i32_0 : i32, i32, i32
  }
  func.func @transform_19(%arg0: i32, %arg1: i32) -> (i32, i32, i32) {
    %c0_i32 = arith.constant 0 : i32
    %c0_i32_0 = arith.constant 0 : i32
    %c0_i32_1 = arith.constant 0 : i32
    return %arg1, %c0_i32, %c0_i32_0 : i32, i32, i32
  }
  func.func @transform_20(%arg0: i32, %arg1: i32) -> (i32, i32, i32) {
    %c0_i32 = arith.constant 0 : i32
    %c0_i32_0 = arith.constant 0 : i32
    %c0_i32_1 = arith.constant 0 : i32
    return %arg1, %c0_i32, %c0_i32_0 : i32, i32, i32
  }
  func.func @transform_21(%arg0: i32, %arg1: i32) -> (i32, i32, i32) {
    %c0_i32 = arith.constant 0 : i32
    %c0_i32_0 = arith.constant 0 : i32
    %c0_i32_1 = arith.constant 0 : i32
    return %arg1, %c0_i32, %c0_i32_0 : i32, i32, i32
  }
  func.func @transform_22(%arg0: i32, %arg1: i32) -> (i32, i32, i32) {
    %c0_i32 = arith.constant 0 : i32
    %c0_i32_0 = arith.constant 0 : i32
    %c0_i32_1 = arith.constant 0 : i32
    return %arg1, %c0_i32, %c0_i32_0 : i32, i32, i32
  }
  func.func @transform_23(%arg0: i32, %arg1: i32) -> (i32, i32, i32) {
    %c0_i32 = arith.constant 0 : i32
    %c0_i32_0 = arith.constant 0 : i32
    %c0_i32_1 = arith.constant 0 : i32
    return %arg1, %c0_i32, %c0_i32_0 : i32, i32, i32
  }
  func.func @transform_24(%arg0: i32, %arg1: i32) -> (i32, i32, i32) {
    %c0_i32 = arith.constant 0 : i32
    %c0_i32_0 = arith.constant 0 : i32
    %c0_i32_1 = arith.constant 0 : i32
    return %arg1, %c0_i32, %c0_i32_0 : i32, i32, i32
  }
  func.func @transform_25(%arg0: i32, %arg1: i32) -> (i32, i32, i32) {
    %c0_i32 = arith.constant 0 : i32
    %c0_i32_0 = arith.constant 0 : i32
    %c0_i32_1 = arith.constant 0 : i32
    return %arg1, %c0_i32, %c0_i32_0 : i32, i32, i32
  }
  func.func @transform_26(%arg0: i32, %arg1: i32) -> (i32, i32, i32) {
    %c0_i32 = arith.constant 0 : i32
    %c0_i32_0 = arith.constant 0 : i32
    %c0_i32_1 = arith.constant 0 : i32
    return %arg1, %c0_i32, %c0_i32_0 : i32, i32, i32
  }
  func.func @transform_27(%arg0: i32, %arg1: i32) -> (i32, i32, i32) {
    %c0_i32 = arith.constant 0 : i32
    %c0_i32_0 = arith.constant 0 : i32
    %c0_i32_1 = arith.constant 0 : i32
    return %arg1, %c0_i32, %c0_i32_0 : i32, i32, i32
  }
  func.func @transform_28(%arg0: i32, %arg1: i32) -> (i32, i32, i32) {
    %c0_i32 = arith.constant 0 : i32
    %c0_i32_0 = arith.constant 0 : i32
    %c0_i32_1 = arith.constant 0 : i32
    return %arg1, %c0_i32, %c0_i32_0 : i32, i32, i32
  }
  func.func @transform_29(%arg0: i32, %arg1: i32) -> (i32, i32, i32) {
    %c0_i32 = arith.constant 0 : i32
    %c0_i32_0 = arith.constant 0 : i32
    %c0_i32_1 = arith.constant 0 : i32
    return %arg1, %c0_i32, %c0_i32_0 : i32, i32, i32
  }
  func.func @transform_30(%arg0: i32, %arg1: i32) -> (i32, i32, i32) {
    %c0_i32 = arith.constant 0 : i32
    %c0_i32_0 = arith.constant 0 : i32
    %c0_i32_1 = arith.constant 0 : i32
    return %arg1, %c0_i32, %c0_i32_0 : i32, i32, i32
  }
  func.func @transform_31(%arg0: i32, %arg1: i32) -> (i32, i32, i32) {
    %c0_i32 = arith.constant 0 : i32
    %c0_i32_0 = arith.constant 0 : i32
    %c0_i32_1 = arith.constant 0 : i32
    return %arg1, %c0_i32, %c0_i32_0 : i32, i32, i32
  }
  func.func @transform_32(%arg0: i32, %arg1: i32) -> (i32, i32, i32) {
    %c0_i32 = arith.constant 0 : i32
    %c0_i32_0 = arith.constant 0 : i32
    %c0_i32_1 = arith.constant 0 : i32
    return %arg0, %c0_i32, %c0_i32_0 : i32, i32, i32
  }
}

</mosaic_0001>

<bundles_post_ra>
// kernel: tpu_custom_call.1
= control target key start
LH: loop header
LB: loop body
LE: loop exit
PB: predicated region body
PF: predicated region fallthrough
CT: control target
= control target key end

     0   :  { %s12797_s6 = smov 1   ;;  %s12798_s10 = smov 2   ;;  %s15603_s0 = inlined_call_operand.smem [shape: u32[33], index: -1, kind: input, shape index: {}] }
   0x1   :  { %s12886_s5 = sld [smem:[%s15603_s0]]   ;;  %s12799_s14 = smov 3  }
   0x2   :  { %s12891_s9 = sld [smem:[%s15603_s0 + %s12797_s6]]   ;;  %s12800_s18 = smov 4  }
   0x3   :  { %s12896_s13 = sld [smem:[%s15603_s0 + %s12798_s10]]   ;;  %s12801_s22 = smov 5  }
   0x4   :  { %s12901_s17 = sld [smem:[%s15603_s0 + %s12799_s14]]   ;;  %s12802_s26 = smov 6  }
   0x5   :  { %s12906_s21 = sld [smem:[%s15603_s0 + %s12800_s18]]   ;;  %s12803_s30 = smov 7  }
   0x6   :  { %s12911_s25 = sld [smem:[%s15603_s0 + %s12801_s22]]   ;;  %s12804_s4 = smov 8  }
   0x7   :  { %15683 = sst [smem:[#allocation73_spill]] %s12886_s5  ;;  %s12805_s10 = smov 9  }
   0x8   :  { %15684 = sst [smem:[#allocation74_spill]] %s12891_s9  ;;  %s12806_s15 = smov 10  }
   0x9   :  { %15685 = sst [smem:[#allocation75_spill]] %s12896_s13  ;;  %s12807_s20 = smov 11  }
   0xa   :  { %15686 = sst [smem:[#allocation76_spill]] %s12901_s17  ;;  %s12809_s1 = smov 13  }
   0xb   :  { %15687 = sst [smem:[#allocation77_spill]] %s12906_s21  ;;  %s12810_s7 = smov 14  }
   0xc   :  { %15688 = sst [smem:[#allocation78_spill]] %s12911_s25  ;;  %s12812_s22 = smov 16  }
   0xd   :  { %s12916_s29 = sld [smem:[%s15603_s0 + %s12802_s26]]   ;;  %s12808_s26 = smov 12  }
   0xe   :  { %s12921_s3 = sld [smem:[%s15603_s0 + %s12803_s30]]   ;;  %s12813_s28 = smov 17  }
   0xf   :  { %s12926_s8 = sld [smem:[%s15603_s0 + %s12804_s4]]  }
  0x10   :  { %s12931_s14 = sld [smem:[%s15603_s0 + %s12805_s10]]  }
  0x11   :  { %s12936_s19 = sld [smem:[%s15603_s0 + %s12806_s15]]   ;;  %s12811_s15 = smov 15  }
  0x12   :  { %s12941_s24 = sld [smem:[%s15603_s0 + %s12807_s20]]  }
  0x13   :  { %15689 = sst [smem:[#allocation79_spill]] %s12916_s29 }
  0x14   :  { %15690 = sst [smem:[#allocation80_spill]] %s12921_s3 }
  0x15   :  { %15691 = sst [smem:[#allocation81_spill]] %s12926_s8 }
  0x16   :  { %15692 = sst [smem:[#allocation82_spill]] %s12931_s14 }
  0x17   :  { %15693 = sst [smem:[#allocation83_spill]] %s12936_s19 }
  0x18   :  { %15694 = sst [smem:[#allocation84_spill]] %s12941_s24 }
  0x19   :  { %s12946_s30 = sld [smem:[%s15603_s0 + %s12808_s26]]  }
  0x1a   :  { %s12951_s6 = sld [smem:[%s15603_s0 + %s12809_s1]]  }
  0x1b   :  { %s12956_s12 = sld [smem:[%s15603_s0 + %s12810_s7]]   ;;  %s12814_s7 = smov 18  }
  0x1c   :  { %s12961_s20 = sld [smem:[%s15603_s0 + %s12811_s15]]   ;;  %s12815_s15 = smov 19  }
  0x1d   :  { %s12966_s27 = sld [smem:[%s15603_s0 + %s12812_s22]]   ;;  %s12816_s22 = smov 20  }
  0x1e   :  { %s12971_s4 = sld [smem:[%s15603_s0 + %s12813_s28]]   ;;  %s12817_s28 = smov 21  }
  0x1f   :  { %15695 = sst [smem:[#allocation85_spill]] %s12946_s30 }
  0x20   :  { %15696 = sst [smem:[#allocation86_spill]] %s12951_s6 }
  0x21   :  { %15697 = sst [smem:[#allocation87_spill]] %s12956_s12 }
  0x22   :  { %15698 = sst [smem:[#allocation88_spill]] %s12961_s20 }
  0x23   :  { %15699 = sst [smem:[#allocation89_spill]] %s12966_s27 }
  0x24   :  { %15700 = sst [smem:[#allocation90_spill]] %s12971_s4 }
  0x25   :  { %s12976_s12 = sld [smem:[%s15603_s0 + %s12814_s7]]   ;;  %s12818_s7 = smov 22  }
  0x26   :  { %s12981_s20 = sld [smem:[%s15603_s0 + %s12815_s15]]   ;;  %s12819_s15 = smov 23  }
  0x27   :  { %s12986_s27 = sld [smem:[%s15603_s0 + %s12816_s22]]   ;;  %s12820_s22 = smov 24  }
  0x28   :  { %s12991_s4 = sld [smem:[%s15603_s0 + %s12817_s28]]   ;;  %s12821_s28 = smov 25  }
  0x2b   :  { %15701 = sst [smem:[#allocation91_spill]] %s12976_s12 }
  0x2c   :  { %15702 = sst [smem:[#allocation92_spill]] %s12981_s20 }
  0x2d   :  { %15703 = sst [smem:[#allocation93_spill]] %s12986_s27 }
  0x2e   :  { %15704 = sst [smem:[#allocation94_spill]] %s12991_s4 }
  0x2f   :  { %s12996_s12 = sld [smem:[%s15603_s0 + %s12818_s7]]   ;;  %s12822_s7 = smov 26  }
  0x30   :  { %s13001_s20 = sld [smem:[%s15603_s0 + %s12819_s15]]   ;;  %s12823_s15 = smov 27  }
  0x31   :  { %s13006_s27 = sld [smem:[%s15603_s0 + %s12820_s22]]   ;;  %s12824_s22 = smov 28  }
  0x32   :  { %s13011_s4 = sld [smem:[%s15603_s0 + %s12821_s28]]   ;;  %s12825_s28 = smov 29  }
  0x35   :  { %15705 = sst [smem:[#allocation95_spill]] %s12996_s12 }
  0x36   :  { %15706 = sst [smem:[#allocation96_spill]] %s13001_s20 }
  0x37   :  { %15707 = sst [smem:[#allocation97_spill]] %s13006_s27 }
  0x38   :  { %15708 = sst [smem:[#allocation98_spill]] %s13011_s4 }
  0x39   :  { %s13016_s12 = sld [smem:[%s15603_s0 + %s12822_s7]]   ;;  %s12826_s7 = smov 30  }
  0x3a   :  { %s13021_s20 = sld [smem:[%s15603_s0 + %s12823_s15]]   ;;  %s12827_s15 = smov 31  }
  0x3b   :  { %s13026_s27 = sld [smem:[%s15603_s0 + %s12824_s22]]   ;;  %s12828_s22 = smov 32  }
  0x3c   :  { %s13031_s4 = sld [smem:[%s15603_s0 + %s12825_s28]]  }
  0x3f   :  { %15709 = sst [smem:[#allocation99_spill]] %s13016_s12 }
  0x40   :  { %15710 = sst [smem:[#allocation100_spill]] %s13021_s20 }
  0x41   :  { %15711 = sst [smem:[#allocation101_spill]] %s13026_s27 }
  0x42   :  { %15712 = sst [smem:[#allocation102_spill]] %s13031_s4 }
  0x43   :  { %s13036_s12 = sld [smem:[%s15603_s0 + %s12826_s7]]  }
  0x44   :  { %s13041_s20 = sld [smem:[%s15603_s0 + %s12827_s15]]  }
  0x45   :  { %s13046_s27 = sld [smem:[%s15603_s0 + %s12828_s22]]  }
  0x49   :  { %15713 = sst [smem:[#allocation103_spill]] %s13036_s12 }
  0x4a   :  { %15714 = sst [smem:[#allocation104_spill]] %s13041_s20 }
  0x4b   :  { %15715 = sst [smem:[#allocation105_spill]] %s13046_s27 }
  0x4c   :  { %70 = vsyncpa [#allocation4], 0 }
  0x4d   :  { %72 = vsyncpa [#allocation4 + $0x1], 0 }
  0x4e   :  { %73 = vsyncpa [#allocation7], 0 }
  0x4f   :  { %75 = vsyncpa [#allocation7 + $0x1], 0 }
  0x50   :  { %76 = vsyncpa [#allocation10], 0 }
  0x51   :  { %78 = vsyncpa [#allocation10 + $0x1], 0 }
  0x52   :  { %79 = vsyncpa [#allocation13], 0 }
  0x53   :  { %80 = vsyncpa [#allocation16], 0 }
  0x54   :  { %81 = vsyncpa [#allocation19], 0 }
  0x55   :  { %82 = vsyncpa [#allocation22], 0 }
  0x56   :  { %83 = vsyncpa [#allocation5], 0 }
  0x57   :  { %85 = vsyncpa [#allocation5 + $0x1], 0  ;;  %s13048_s28 = smov 0   ;;  %s13050_s1 = smov 0  }
  0x58   :  { %s13052_s2 = smov 0   ;;  %s13054_s0 = smov 0  }
  0x59   :  { %s13056_s7 = smov 0   ;;  %s13058_s10 = smov 0  }
  0x5a   :  { %s13060_s11 = smov 0   ;;  %s13062_s15 = smov 0  }
  0x5b   :  { %s13064_s16 = smov 0   ;;  %s13066_s18 = smov 0  }
  0x5c   :  { %s13068_s22 = smov 0  }
  0x5d LB: > { %s15716_s29 = sld [smem:[#allocation79_spill]]  ;;  %s15717_s24 = sld [smem:[#allocation84_spill]]  ;;  %s12791_s18 = sphi %s13066_s18, %s15830_s18   ;;  %s12787_s16 = sphi %s13064_s16, %s15829_s16   ;;  %s12783_s15 = sphi %s13062_s15, %s15828_s15   ;;  %s12779_s11 = sphi %s13060_s11, %s15827_s11   ;;  %s12775_s10 = sphi %s13058_s10, %s15826_s10   ;;  %s12771_s7 = sphi %s13056_s7, %s15834_s7   ;;  %s12767_s0 = sphi %s13054_s0, %s15833_s0   ;;  %s12763_s2 = sphi %s13052_s2, %s15824_s2   ;;  %s12759_s1 = sphi %s13050_s1, %s15832_s1   ;;  %s12755_s28 = sphi %s13048_s28, %s15831_s28   ;;  %s12795_s22 = sphi %s13068_s22, %s91_s22  }
  0x5e   : > { %s15718_s21 = sld [smem:[#allocation77_spill]]  ;;  %s15719_s19 = sld [smem:[#allocation83_spill]] }
  0x5f   : > { %s15720_s5 = sld [smem:[#allocation73_spill]]  ;;  %s15721_s14 = sld [smem:[#allocation82_spill]] }
  0x60   : > { %s15722_s9 = sld [smem:[#allocation74_spill]]  ;;  %s15723_s8 = sld [smem:[#allocation81_spill]] }
  0x61   : > { %s15724_s3 = sld [smem:[#allocation80_spill]]  ;;  %s15725_s25 = sld [smem:[#allocation78_spill]] }
  0x62   : > { %15726 = sst [smem:[#allocation106_spill]] %s12763_s2  ;;  %s13104_s23 = sadd.s32 4294967295, %s12795_s22  }
  0x63   : > { %15727 = sst [smem:[#allocation107_spill]] %s12767_s0  ;;  %s9539_s26 = sadd.s32 4294967294, %s12795_s22  }
  0x64   : > { %15728 = sst [smem:[#allocation108_spill]] %s12775_s10  ;;  %s100_s27 = sadd.s32 1, %s12787_s16 }
  0x65   : > { %15729 = sst [smem:[#allocation109_spill]] %s12779_s11  ;;  %p101_p0 = scmp.ge.s32.totalorder %s100_s27, 2 }
  0x66   : > { %15730 = sst [smem:[#allocation110_spill]] %s12783_s15  ;;  %s103_s15 = sadd.s32 1, %s12791_s18 }
  0x67   : > { %15731 = sst [smem:[#allocation111_spill]] %s12787_s16  ;;  %s110_s11 = sadd.s32 1, %s12775_s10 }
  0x68   : > { %15732 = sst [smem:[#allocation112_spill]] %s12791_s18  ;;  %p15631_p1 = scmp.ne.s32.totalorder %s12775_s10, %s12771_s7 }
  0x69   : > { %p118_p2 = scmp.eq.s32.totalorder %s12795_s22, 0  ;;  %s15836_s27 = smov (%p101_p0, %s100_s27), 0 }
  0x6a   : > { %15733 = sst [smem:[#allocation113_spill]] %s15836_s27  ;;  %s15838_s15 = smov (!%p101_p0, %s103_s15), %s12791_s18 }
  0x6b   : > { %p13121_p3 = por %p118_p2, %p15631_p1  ;;  %p15630_p4 = scmp.ne.s32.totalorder %s12771_s7, %s12767_s0 }
  0x6c   : > { %p105_p5 = scmp.ge.s32.totalorder %s15838_s15, 2  ;;  %p15635_p6 = scmp.eq.s32.totalorder %s13104_s23, 0 }
  0x6d   : > { %s15734_s20 = scalar_select %p13121_p3, 1, 0 }
  0x6e   : > { %s379_s12 = ssub.s32 %s12787_s16, %s15836_s27  ;;  %s382_s4 = sadd.s32 1, %s12763_s2 }
  0x6f   : > { %s15840_s15 = smov (%p105_p5, %s15838_s15), 0  ;;  %p13138_p7 = por %p15635_p6, %p15630_p4 }
  0x70   : > { %15735 = sst [smem:[#allocation114_spill]] %s15840_s15  ;;  %p380_p8 = scmp.eq.s32.totalorder %s379_s12, 0 }
  0x71   : > { %s15736_s6 = scalar_select %p13138_p7, 1, 0 }
  0x72   : > { %s107_s30 = ssub.s32 %s12791_s18, %s15840_s15  ;;  %p389_p9 = scmp.ne.s32.totalorder %s12763_s2, %s12759_s1 }
  0x73   : > { %p108_p10 = scmp.eq.s32.totalorder %s107_s30, 0  ;;  %p395_p11 = scmp.ne.s32.totalorder %s12759_s1, %s12755_s28 }
  0x74   : > { %s13149_s27 = scalar_select %p380_p8, %s12763_s2, %s382_s4  }
  0x75   : > { %s13152_s16 = scalar_select %p108_p10, %s12775_s10, %s110_s11  }
  0x76   : > { %15737 = sst [smem:[#allocation115_spill]] %s13149_s27  ;;  %p13156_p12 = por %p389_p9, %p118_p2 }
  0x77   : > { %15738 = sst [smem:[#allocation116_spill]] %s13152_s16  ;;  %p13162_p13 = por %p395_p11, %p15635_p6 }
  0x78   : > { %s15739_s17 = scalar_select %p13156_p12, 1, 0 }
  0x79   : > { %s15740_s13 = scalar_select %p13162_p13, 1, 0 }
  0x7a   : > { %p913_p0 = scmp.eq.s32.totalorder %s13104_s23, 3  ;;  %p919_p5 = scmp.eq.s32.totalorder %s9539_s26, 3 }
  0x7b   : > { %p9540_p4 = scmp.ge.s32.totalorder %s12795_s22, 1  ;;  %p926_p1 = scmp.lt.s32.totalorder %s12795_s22, 5 }
  0x7c   : > { %p15741_p8 = scmp.ne.s32.totalorder %s12775_s10, %s12771_s7  ;;  %p15744_p2 = scmp.ne.s32.totalorder %s12771_s7, %s12767_s0 }
  0x7d   : > { %p13183_p10 = pnand %p9540_p4, %p926_p1  ;;  %s12829_s28 = smov [#allocation12]  }
  0x7e   : > { %p13172_p7 = por %p913_p0, %p15741_p8  ;;  %p13179_p9 = por %p919_p5, %p15744_p2 }
  0x7f   : > { %s15747_s4 = scalar_select %p13183_p10, 1, 0 }
  0x80   : > { %s15742_s30 = scalar_select %p13172_p7, 1, 0 }
  0x81   : > { %s15745_s12 = scalar_select %p13179_p9, 1, 0 }
  0x82   : > { %15743 = sst [smem:[#allocation117_spill]] %s15742_s30  ;;  %p10637_p11 = pneg %p13183_p10 }
  0x83   : > { %15746 = sst [smem:[#allocation118_spill]] %s15745_s12  ;;  %s951_s11 = sshll.u32 %s12829_s28, 4  ;;  %s952_s11 = int_to_ptr.vmem [resolvable:$true] %s951_s11 }
  0x84   : > { %p13191_p0 = pnand %p10637_p11, %p15635_p6  ;;  %s12830_s15 = smov [#allocation15]  }
  0x85   : > { %s977_s16 = sshll.u32 %s12830_s15, 4  ;;  %s11669_s27 = scalar_lea.hbm %s15725_s25, 256  ;;  %s13195_s16 = int_to_ptr.vmem [resolvable:$true] %s977_s16 }
  0x86   : > { %p11670_p1 = scmp.ne.s32.totalorder %s15725_s25, %s11669_s27  ;;  %p13201_p4 = pneg %p13191_p0 }
  0x87   : > { %p11676_p2 = scmp.lt.u32.totalorder %s11669_s27, %s15725_s25 }
  0x88   : > { %p11672_p5 = pnand %p13201_p4, %p11670_p1 }
  0x8a   : > { %p11673_p8 = pneg %p11672_p5 }
  0x8c   : > { %p11678_p11 = pnand %p11676_p2, %p11673_p8 }
  0x8e   : > { %11681 = shalt.err (!%p11678_p11)
}
  0x8f   : > { %s11682_s28 = scalar_lea.vmem %s952_s11, 256  ;;  %p11690_p13 = scmp.lt.s32.totalorder %s952_s11, %s952_s11 }
  0x90   : > { %p11683_p6 = scmp.ne.s32.totalorder %s952_s11, %s11682_s28  ;;  %p11691_p10 = scmp.lt.s32.totalorder %s11682_s28, %s11682_s28 }
  0x92   : > { %p11685_p9 = pnand %p11683_p6, %p13201_p4  ;;  %p11692_p12 = por %p11691_p10, %p11690_p13 }
  0x94   : > { %p11686_p7 = pneg %p11685_p9 }
  0x96   : > { %p11693_p3 = pnand %p11692_p12, %p11686_p7 }
  0x98   : > { %11696 = shalt.err (!%p11693_p3)
}
  0x99   : > { %s12831_s15 = smov 128   ;;  %s12832_s27 = smov 8  }
  0x9a   : > { %10643 = dma.hbm_to_vmem [thread:$0]  (!%p13191_p0), %s15725_s25, 256, %s952_s11, [#allocation13], %s12831_s15, %s12831_s15, %s12832_s27  }
  0x9b   : > { %s11697_s0 = scalar_lea.hbm %s15724_s3, 384 }
  0x9c   : > { %p11698_p6 = scmp.ne.s32.totalorder %s15724_s3, %s11697_s0  ;;  %p11704_p7 = scmp.lt.u32.totalorder %s11697_s0, %s15724_s3 }
  0x9e   : > { %p11700_p9 = pnand %p11698_p6, %p13201_p4 }
  0xa0   : > { %p11701_p13 = pneg %p11700_p9 }
  0xa2   : > { %p11706_p3 = pnand %p11704_p7, %p11701_p13 }
  0xa4   : > { %11709 = shalt.err (!%p11706_p3)
}
  0xa5   : > { %s11710_s28 = scalar_lea.vmem %s13195_s16, 384  ;;  %p11718_p5 = scmp.lt.s32.totalorder %s13195_s16, %s13195_s16 }
  0xa6   : > { %p11711_p12 = scmp.ne.s32.totalorder %s13195_s16, %s11710_s28  ;;  %p11719_p8 = scmp.lt.s32.totalorder %s11710_s28, %s11710_s28 }
  0xa8   : > { %p11713_p10 = pnand %p11711_p12, %p13201_p4  ;;  %p11720_p2 = por %p11719_p8, %p11718_p5 }
  0xaa   : > { %p11714_p1 = pneg %p11713_p10 }
  0xac   : > { %p11721_p11 = pnand %p11720_p2, %p11714_p1 }
  0xae   : > { %11724 = shalt.err (!%p11721_p11)
}
  0xaf   : > { %10649 = dma.hbm_to_vmem [thread:$0]  (!%p13191_p0), %s15724_s3, 384, %s13195_s16, [#allocation16], %s12831_s15, %s12831_s15, %s12832_s27  }
  0xb0   : > { %s12833_s0 = smov [#allocation18]   ;;  %s11725_s25 = scalar_lea.hbm %s15721_s14, 384 }
  0xb1   : > { %s1003_s11 = sshll.u32 %s12833_s0, 4  ;;  %p11726_p6 = scmp.ne.s32.totalorder %s15721_s14, %s11725_s25  ;;  %s1004_s11 = int_to_ptr.vmem [resolvable:$true] %s1003_s11 }
  0xb2   : > { %p11732_p7 = scmp.lt.u32.totalorder %s11725_s25, %s15721_s14 }
  0xb3   : > { %p11728_p9 = pnand %p11726_p6, %p13201_p4 }
  0xb5   : > { %p11729_p13 = pneg %p11728_p9 }
  0xb7   : > { %p11734_p3 = pnand %p11732_p7, %p11729_p13 }
  0xb9   : > { %11737 = shalt.err (!%p11734_p3)
}
  0xba   : > { %s11738_s28 = scalar_lea.vmem %s1004_s11, 384  ;;  %p11746_p5 = scmp.lt.s32.totalorder %s1004_s11, %s1004_s11 }
  0xbb   : > { %p11739_p12 = scmp.ne.s32.totalorder %s1004_s11, %s11738_s28  ;;  %p11747_p8 = scmp.lt.s32.totalorder %s11738_s28, %s11738_s28 }
  0xbd   : > { %p11741_p10 = pnand %p11739_p12, %p13201_p4  ;;  %p11748_p2 = por %p11747_p8, %p11746_p5 }
  0xbf   : > { %p11742_p1 = pneg %p11741_p10 }
  0xc1   : > { %p11749_p11 = pnand %p11748_p2, %p11742_p1 }
  0xc3   : > { %11752 = shalt.err (!%p11749_p11)
}
  0xc4   : > { %10655 = dma.hbm_to_vmem [thread:$0]  (!%p13191_p0), %s15721_s14, 384, %s1004_s11, [#allocation19], %s12831_s15, %s12831_s15, %s12832_s27  }
  0xc5   : > { %s12834_s25 = smov [#allocation11]   ;;  %s12835_s0 = smov [#allocation14]  }
  0xc6   : > { %s938_s16 = sshll.u32 %s12834_s25, 4  ;;  %s964_s3 = sshll.u32 %s12835_s0, 4  ;;  %s939_s16 = int_to_ptr.vmem [resolvable:$true] %s938_s16  ;;  %s13247_s3 = int_to_ptr.vmem [resolvable:$true] %s964_s3 }
  0xc7   : > { %s11753_s28 = scalar_lea.hbm %s15718_s21, 256 }
  0xc8   : > { %p11754_p6 = scmp.ne.s32.totalorder %s15718_s21, %s11753_s28  ;;  %p11760_p7 = scmp.lt.u32.totalorder %s11753_s28, %s15718_s21 }
  0xca   : > { %p11756_p9 = pnand %p11754_p6, %p13201_p4 }
  0xcc   : > { %p11757_p13 = pneg %p11756_p9 }
  0xce   : > { %p11762_p3 = pnand %p11760_p7, %p11757_p13 }
  0xd0   : > { %11765 = shalt.err (!%p11762_p3)
}
  0xd1   : > { %s11766_s30 = scalar_lea.vmem %s939_s16, 256  ;;  %p11774_p5 = scmp.lt.s32.totalorder %s939_s16, %s939_s16 }
  0xd2   : > { %p11767_p12 = scmp.ne.s32.totalorder %s939_s16, %s11766_s30  ;;  %p11775_p8 = scmp.lt.s32.totalorder %s11766_s30, %s11766_s30 }
  0xd4   : > { %p11769_p10 = pnand %p11767_p12, %p13201_p4  ;;  %p11776_p2 = por %p11775_p8, %p11774_p5 }
  0xd6   : > { %p11770_p1 = pneg %p11769_p10 }
  0xd8   : > { %p11777_p11 = pnand %p11776_p2, %p11770_p1 }
  0xda   : > { %11780 = shalt.err (!%p11777_p11)
}
  0xdb   : > { %10640 = dma.hbm_to_vmem [thread:$0]  (!%p13191_p0), %s15718_s21, 256, %s939_s16, [#allocation10], %s12831_s15, %s12831_s15, %s12832_s27  }
  0xdc   : > { %s11781_s11 = scalar_lea.hbm %s15716_s29, 256 }
  0xdd   : > { %p11782_p6 = scmp.ne.s32.totalorder %s15716_s29, %s11781_s11  ;;  %p11788_p7 = scmp.lt.u32.totalorder %s11781_s11, %s15716_s29 }
  0xdf   : > { %p11784_p9 = pnand %p11782_p6, %p13201_p4 }
  0xe1   : > { %p11785_p13 = pneg %p11784_p9 }
  0xe3   : > { %p11790_p3 = pnand %p11788_p7, %p11785_p13 }
  0xe5   : > { %11793 = shalt.err (!%p11790_p3)
}
  0xe6   : > { %s11794_s30 = scalar_lea.vmem %s13247_s3, 256  ;;  %p11802_p5 = scmp.lt.s32.totalorder %s13247_s3, %s13247_s3 }
  0xe7   : > { %p11795_p12 = scmp.ne.s32.totalorder %s13247_s3, %s11794_s30  ;;  %p11803_p8 = scmp.lt.s32.totalorder %s11794_s30, %s11794_s30 }
  0xe9   : > { %p11797_p10 = pnand %p11795_p12, %p13201_p4  ;;  %p11804_p2 = por %p11803_p8, %p11802_p5 }
  0xeb   : > { %p11798_p1 = pneg %p11797_p10 }
  0xed   : > { %p11805_p11 = pnand %p11804_p2, %p11798_p1 }
  0xef   : > { %11808 = shalt.err (!%p11805_p11)
}
  0xf0   : > { %10646 = dma.hbm_to_vmem [thread:$0]  (!%p13191_p0), %s15716_s29, 256, %s13247_s3, [#allocation13], %s12831_s15, %s12831_s15, %s12832_s27  }
  0xf1   : > { %s12836_s25 = smov [#allocation17]   ;;  %s12837_s0 = smov [#allocation20]  }
  0xf2   : > { %s990_s16 = sshll.u32 %s12836_s25, 4  ;;  %s1017_s28 = sshll.u32 %s12837_s0, 4  ;;  %s991_s16 = int_to_ptr.vmem [resolvable:$true] %s990_s16  ;;  %s13280_s28 = int_to_ptr.vmem [resolvable:$true] %s1017_s28 }
  0xf3   : > { %s11809_s11 = scalar_lea.hbm %s15723_s8, 384 }
  0xf4   : > { %p11810_p6 = scmp.ne.s32.totalorder %s15723_s8, %s11809_s11  ;;  %p11816_p7 = scmp.lt.u32.totalorder %s11809_s11, %s15723_s8 }
  0xf6   : > { %p11812_p9 = pnand %p11810_p6, %p13201_p4 }
  0xf8   : > { %p11813_p13 = pneg %p11812_p9 }
  0xfa   : > { %p11818_p3 = pnand %p11816_p7, %p11813_p13 }
  0xfc   : > { %11821 = shalt.err (!%p11818_p3)
}
  0xfd   : > { %s11822_s30 = scalar_lea.vmem %s991_s16, 384  ;;  %p11830_p5 = scmp.lt.s32.totalorder %s991_s16, %s991_s16 }
  0xfe   : > { %p11823_p12 = scmp.ne.s32.totalorder %s991_s16, %s11822_s30  ;;  %p11831_p8 = scmp.lt.s32.totalorder %s11822_s30, %s11822_s30 }
 0x100   : > { %p11825_p10 = pnand %p11823_p12, %p13201_p4  ;;  %p11832_p2 = por %p11831_p8, %p11830_p5 }
 0x102   : > { %p11826_p1 = pneg %p11825_p10 }
 0x104   : > { %p11833_p11 = pnand %p11832_p2, %p11826_p1 }
 0x106   : > { %11836 = shalt.err (!%p11833_p11)
}
 0x107   : > { %10652 = dma.hbm_to_vmem [thread:$0]  (!%p13191_p0), %s15723_s8, 384, %s991_s16, [#allocation16], %s12831_s15, %s12831_s15, %s12832_s27  }
 0x108   : > { %s11837_s3 = scalar_lea.hbm %s15719_s19, 32 }
 0x109   : > { %p11838_p6 = scmp.ne.s32.totalorder %s15719_s19, %s11837_s3  ;;  %p11844_p7 = scmp.lt.u32.totalorder %s11837_s3, %s15719_s19 }
 0x10b   : > { %p11840_p9 = pnand %p11838_p6, %p13201_p4 }
 0x10d   : > { %p11841_p13 = pneg %p11840_p9 }
 0x10f   : > { %p11846_p3 = pnand %p11844_p7, %p11841_p13 }
 0x111   : > { %11849 = shalt.err (!%p11846_p3)
}
 0x112   : > { %s11850_s25 = scalar_lea.vmem %s13280_s28, 32  ;;  %p11858_p5 = scmp.lt.s32.totalorder %s13280_s28, %s13280_s28 }
 0x113   : > { %p11851_p12 = scmp.ne.s32.totalorder %s13280_s28, %s11850_s25  ;;  %p11859_p8 = scmp.lt.s32.totalorder %s11850_s25, %s11850_s25 }
 0x115   : > { %p11853_p10 = pnand %p11851_p12, %p13201_p4  ;;  %p11860_p2 = por %p11859_p8, %p11858_p5 }
 0x117   : > { %p11854_p1 = pneg %p11853_p10 }
 0x119   : > { %p11861_p11 = pnand %p11860_p2, %p11854_p1 }
 0x11b   : > { %11864 = shalt.err (!%p11861_p11)
}
 0x11c   : > { %10658 = dma.hbm_to_vmem [thread:$0]  (!%p13191_p0), %s15719_s19, 32, %s13280_s28, [#allocation19]  }
 0x11d   : > { %s12838_s15 = smov [#allocation21]   ;;  %s11865_s16 = scalar_lea.hbm %s15717_s24, 32 }
 0x11e   : > { %s1028_s27 = sshll.u32 %s12838_s15, 4  ;;  %p11866_p6 = scmp.ne.s32.totalorder %s15717_s24, %s11865_s16  ;;  %s1029_s27 = int_to_ptr.vmem [resolvable:$true] %s1028_s27 }
 0x11f   : > { %p11872_p7 = scmp.lt.u32.totalorder %s11865_s16, %s15717_s24 }
 0x120   : > { %p11868_p9 = pnand %p11866_p6, %p13201_p4 }
 0x122   : > { %p11869_p13 = pneg %p11868_p9 }
 0x124   : > { %p11874_p3 = pnand %p11872_p7, %p11869_p13 }
 0x126   : > { %11877 = shalt.err (!%p11874_p3)
}
 0x127   : > { %s11878_s0 = scalar_lea.vmem %s1029_s27, 32  ;;  %p11886_p5 = scmp.lt.s32.totalorder %s1029_s27, %s1029_s27 }
 0x128   : > { %p11879_p12 = scmp.ne.s32.totalorder %s1029_s27, %s11878_s0  ;;  %p11887_p8 = scmp.lt.s32.totalorder %s11878_s0, %s11878_s0 }
 0x12a   : > { %p11881_p10 = pnand %p11879_p12, %p13201_p4  ;;  %p11888_p2 = por %p11887_p8, %p11886_p5 }
 0x12c   : > { %p11882_p1 = pneg %p11881_p10 }
 0x12e   : > { %p11889_p11 = pnand %p11888_p2, %p11882_p1 }
 0x130   : > { %11892 = shalt.err (!%p11889_p11)
}
 0x131   : > { %10661 = dma.hbm_to_vmem [thread:$0]  (!%p13191_p0), %s15717_s24, 32, %s1029_s27, [#allocation22]  }
 0x132   : > { %p9549_p6 = scmp.ge.s32.totalorder %s12795_s22, 4 }
 0x133   : > { %s13322_s12 = sand.u32 (!%p9549_p6), 1, %s12795_s22   ;;  %s13325_s28 = sand.u32 (!%p9549_p6), 1, %s12775_s10  }
 0x134   : > { %1035 = sbr.rel (%p9549_p6) target bundleno = 963 (0x3c3), region = 48  ;;  %s13336_s27 = scalar_lea.sflag (!%p9549_p6), [#allocation7], %s13322_s12 }
 0x135   : > { %s10546_s26 = smul.u32 (!%p9549_p6), 48, %s13325_s28  ;;  %p15750_p4 = scmp.ne.s32.totalorder (!%p9549_p6), %s15734_s20, 0 }
 0x136   : > { %s10547_s11 = smul.u32 (!%p9549_p6), 768, %s12791_s18  ;;  %s11897_s0 = scalar_lea.hbm (!%p9549_p6), %s15722_s9, 1536 }
 0x137   : > { %s1064_s25 = scalar_lea.vmem (!%p9549_p6), [#allocation6], %s10546_s26 }
 0x138   : > { %s13331_s3 = scalar_lea.hbm (!%p9549_p6), %s15722_s9, %s10547_s11  ;;  %s1071_s15 = sshll.u32 (!%p9549_p6), %s1064_s25, 4  ;;  %s13333_s15 = int_to_ptr.vmem [resolvable:$true] %s1071_s15 }
 0x139   : > { %s11893_s16 = scalar_lea.hbm (!%p9549_p6), %s13331_s3, 768  ;;  %p11898_p7 = scmp.lt.u32.totalorder (!%p9549_p6), %s13331_s3, %s15722_s9 }
 0x13a   : > { %p11894_p0 = scmp.ne.s32.totalorder (!%p9549_p6), %s13331_s3, %s11893_s16  ;;  %p11899_p3 = scmp.lt.u32.totalorder (!%p9549_p6), %s11897_s0, %s11893_s16 }
 0x13b   : > { %p11901_p10 = scmp.lt.u32.totalorder %s11893_s16, %s13331_s3 }
 0x13c   : > { %p11895_p9 = pnand %p11894_p0, %p15750_p4  ;;  %p11900_p12 = por %p11899_p3, %p11898_p7 }
 0x13e   : > { %p11896_p13 = pneg %p11895_p9  ;;  %p11902_p1 = por %p11901_p10, %p11900_p12 }
 0x140   : > { %p11903_p5 = pnand %p11902_p1, %p11896_p13 }
 0x142   : > { %11906 = shalt.err (!%p11903_p5)
}
 0x143   : > { %s11907_s26 = scalar_lea.vmem %s13333_s15, 768  ;;  %s12839_s11 = smov [#allocation6]  }
 0x144   : > { %p11908_p8 = scmp.ne.s32.totalorder %s13333_s15, %s11907_s26  ;;  %s11911_s25 = sshll.u32 %s12839_s11, 4  ;;  %s11912_s25 = int_to_ptr.vmem [resolvable:$false] %s11911_s25 }
 0x145   : > { %s11913_s30 = scalar_lea.vmem %s11912_s25, 1536  ;;  %p11914_p6 = scmp.lt.s32.totalorder %s13333_s15, %s11912_s25 }
 0x146   : > { %p11909_p2 = pnand %p11908_p8, %p15750_p4  ;;  %p11915_p0 = scmp.lt.s32.totalorder %s11913_s30, %s11907_s26 }
 0x148   : > { %p11910_p11 = pneg %p11909_p2  ;;  %p11916_p9 = por %p11915_p0, %p11914_p6 }
 0x14a   : > { %p11917_p7 = pnand %p11916_p9, %p11910_p11 }
 0x14c   : > { %11920 = shalt.err (!%p11917_p7)
}
 0x14d   : > { %s15650_s16 = smov 256   ;;  %s15651_s0 = smov 16  }
 0x14e   : > { %10572 = dma.hbm_to_vmem [thread:$0]  (%p15750_p4), %s13331_s3, 768, %s13333_s15, %s13336_s27, %s15650_s16, %s15650_s16, %s15651_s0  }
 0x14f   : > { %s10422_s30 = sshll.u32 %s12791_s18, 9  ;;  %s15751_s26 = sshll.u32 %s13325_s28, 5 }
 0x150   : > { %s1043_s11 = scalar_lea.vmem [#allocation3], %s15751_s26  ;;  %s13363_s8 = scalar_lea.hbm %s15720_s5, %s10422_s30 }
 0x151   : > { %s1050_s25 = sshll.u32 %s1043_s11, 4  ;;  %s13368_s9 = scalar_lea.sflag [#allocation4], %s13322_s12  ;;  %s13365_s25 = int_to_ptr.vmem [resolvable:$true] %s1050_s25 }
 0x152   : > { %s11921_s14 = scalar_lea.hbm %s13363_s8, 512  ;;  %s11925_s3 = scalar_lea.hbm %s15720_s5, 1024 }
 0x153   : > { %p11922_p13 = scmp.ne.s32.totalorder %s13363_s8, %s11921_s14  ;;  %p11926_p10 = scmp.lt.u32.totalorder %s13363_s8, %s15720_s5 }
 0x154   : > { %p11927_p1 = scmp.lt.u32.totalorder %s11925_s3, %s11921_s14  ;;  %p11929_p8 = scmp.lt.u32.totalorder %s11921_s14, %s13363_s8 }
 0x155   : > { %p11923_p3 = pnand %p11922_p13, %p15750_p4 }
 0x156   : > { %p11928_p5 = por %p11927_p1, %p11926_p10 }
 0x157   : > { %p11924_p12 = pneg %p11923_p3 }
 0x158   : > { %p11930_p2 = por %p11929_p8, %p11928_p5 }
 0x15a   : > { %p11931_p11 = pnand %p11930_p2, %p11924_p12 }
 0x15c   : > { %11934 = shalt.err (!%p11931_p11)
}
 0x15d   : > { %s11935_s15 = scalar_lea.vmem %s13365_s25, 512  ;;  %s12842_s30 = smov [#allocation3]  }
 0x15e   : > { %p11936_p6 = scmp.ne.s32.totalorder %s13365_s25, %s11935_s15  ;;  %s11939_s26 = sshll.u32 %s12842_s30, 4  ;;  %s11940_s26 = int_to_ptr.vmem [resolvable:$false] %s11939_s26 }
 0x15f   : > { %s11941_s11 = scalar_lea.vmem %s11940_s26, 1024  ;;  %p11942_p7 = scmp.lt.s32.totalorder %s13365_s25, %s11940_s26 }
 0x160   : > { %p11937_p0 = pnand %p11936_p6, %p15750_p4  ;;  %p11943_p13 = scmp.lt.s32.totalorder %s11941_s11, %s11935_s15 }
 0x162   : > { %p11938_p9 = pneg %p11937_p0  ;;  %p11944_p3 = por %p11943_p13, %p11942_p7 }
 0x164   : > { %p11945_p10 = pnand %p11944_p3, %p11938_p9 }
 0x166   : > { %11948 = shalt.err (!%p11945_p10)
}
 0x167   : > { %s15752_s14 = sld [smem:[#allocation75_spill]]  ;;  %s9554_s3 = sshll.u32 %s12791_s18, 4 }
 0x168   : > { %10571 = dma.hbm_to_vmem [thread:$0]  (%p15750_p4), %s13363_s8, 512, %s13365_s25, %s13368_s9, %s15650_s16, %s15650_s16, %s15651_s0  }
 0x169   : > { %s1084_s30 = scalar_lea.vmem [#allocation8], %s13325_s28 }
 0x16a   : > { %s1091_s26 = sshll.u32 %s1084_s30, 4  ;;  %s1092_s26 = int_to_ptr.vmem [resolvable:$true] %s1091_s26 }
 0x16d   : > { %s13395_s15 = scalar_lea.hbm %s15752_s14, %s9554_s3  ;;  %s11953_s5 = scalar_lea.hbm %s15752_s14, 32 }
 0x16e   : > { %s11949_s11 = scalar_lea.hbm %s13395_s15, 16  ;;  %p11954_p8 = scmp.lt.u32.totalorder %s13395_s15, %s15752_s14 }
 0x16f   : > { %p11950_p12 = scmp.ne.s32.totalorder %s13395_s15, %s11949_s11  ;;  %p11955_p2 = scmp.lt.u32.totalorder %s11953_s5, %s11949_s11 }
 0x170   : > { %p11957_p6 = scmp.lt.u32.totalorder %s11949_s11, %s13395_s15 }
 0x171   : > { %p11951_p1 = pnand %p11950_p12, %p15750_p4  ;;  %p11956_p11 = por %p11955_p2, %p11954_p8 }
 0x173   : > { %p11952_p5 = pneg %p11951_p1  ;;  %p11958_p0 = por %p11957_p6, %p11956_p11 }
 0x175   : > { %p11959_p9 = pnand %p11958_p0, %p11952_p5 }
 0x177   : > { %11962 = shalt.err (!%p11959_p9)
}
 0x178   : > { %s11963_s8 = scalar_lea.vmem %s1092_s26, 16  ;;  %s12843_s25 = smov [#allocation8]  }
 0x179   : > { %p11964_p7 = scmp.ne.s32.totalorder %s1092_s26, %s11963_s8  ;;  %s11967_s30 = sshll.u32 %s12843_s25, 4  ;;  %s11968_s30 = int_to_ptr.vmem [resolvable:$false] %s11967_s30 }
 0x17a   : > { %s11969_s16 = scalar_lea.vmem %s11968_s30, 32  ;;  %p11970_p10 = scmp.lt.s32.totalorder %s1092_s26, %s11968_s30 }
 0x17b   : > { %p11965_p13 = pnand %p11964_p7, %p15750_p4  ;;  %p11971_p12 = scmp.lt.s32.totalorder %s11969_s16, %s11963_s8 }
 0x17d   : > { %p11966_p3 = pneg %p11965_p13  ;;  %p11972_p1 = por %p11971_p12, %p11970_p10 }
 0x17f   : > { %p11973_p2 = pnand %p11972_p1, %p11966_p3 }
 0x181   : > { %11976 = shalt.err (!%p11973_p2)
}
 0x182   : > { %s15753_s5 = sld [smem:[#allocation76_spill]]  ;;  %s1101_s16 = scalar_lea.vmem [#allocation9], %s13325_s28 }
 0x183   : > { %10573 = dma.hbm_to_vmem [thread:$0]  (%p15750_p4), %s13395_s15, 16, %s1092_s26, %s13336_s27  }
 0x184   : > { %s1108_s8 = sshll.u32 %s1101_s16, 4  ;;  %s13419_s25 = sand.u32 1, %s12763_s2   ;;  %s13421_s8 = int_to_ptr.vmem [resolvable:$true] %s1108_s8 }
 0x185   : > { %s13424_s30 = sshll.u32 %s13419_s25, 1  ;;  %s13427_s0 = scalar_lea.sflag [#allocation10], %s13322_s12 }
 0x188   : > { %s13415_s11 = scalar_lea.hbm %s15753_s5, %s9554_s3  ;;  %s11981_s3 = scalar_lea.hbm %s15753_s5, 32 }
 0x189   : > { %s11977_s14 = scalar_lea.hbm %s13415_s11, 16  ;;  %p11982_p6 = scmp.lt.u32.totalorder %s13415_s11, %s15753_s5 }
 0x18a   : > { %p11978_p5 = scmp.ne.s32.totalorder %s13415_s11, %s11977_s14  ;;  %p11983_p0 = scmp.lt.u32.totalorder %s11981_s3, %s11977_s14 }
 0x18b   : > { %p11985_p7 = scmp.lt.u32.totalorder %s11977_s14, %s13415_s11 }
 0x18c   : > { %p11979_p8 = pnand %p11978_p5, %p15750_p4  ;;  %p11984_p9 = por %p11983_p0, %p11982_p6 }
 0x18e   : > { %p11980_p11 = pneg %p11979_p8  ;;  %p11986_p13 = por %p11985_p7, %p11984_p9 }
 0x190   : > { %p11987_p3 = pnand %p11986_p13, %p11980_p11 }
 0x192   : > { %11990 = shalt.err (!%p11987_p3)
}
 0x193   : > { %s11991_s28 = scalar_lea.vmem %s13421_s8, 16  ;;  %s12844_s12 = smov [#allocation9]  }
 0x194   : > { %p11992_p10 = scmp.ne.s32.totalorder %s13421_s8, %s11991_s28  ;;  %s11995_s15 = sshll.u32 %s12844_s12, 4  ;;  %s11996_s15 = int_to_ptr.vmem [resolvable:$false] %s11995_s15 }
 0x195   : > { %s11997_s26 = scalar_lea.vmem %s11996_s15, 32  ;;  %p11998_p2 = scmp.lt.s32.totalorder %s13421_s8, %s11996_s15 }
 0x196   : > { %p11993_p12 = pnand %p11992_p10, %p15750_p4  ;;  %p11999_p5 = scmp.lt.s32.totalorder %s11997_s26, %s11991_s28 }
 0x198   : > { %p11994_p1 = pneg %p11993_p12  ;;  %p12000_p8 = por %p11999_p5, %p11998_p2 }
 0x19a   : > { %p12001_p6 = pnand %p12000_p8, %p11994_p1 }
 0x19c   : > { %12004 = shalt.err (!%p12001_p6)
}
 0x19d   : > { %s15754_s14 = sld [smem:[#allocation111_spill]]  ;;  %s15755_s16 = sld [smem:[#allocation85_spill]] }
 0x19e   : > { %10574 = dma.hbm_to_vmem [thread:$0]  (%p15750_p4), %s13415_s11, 16, %s13421_s8, %s13427_s0  }
 0x19f   : > { %s1119_s20 = scalar_lea.vmem [#allocation23], %s13424_s30  ;;  %p15757_p0 = scmp.ne.s32.totalorder %s15739_s17, 0 }
 0x1a0   : > { %s1127_s28 = sshll.u32 %s1119_s20, 4  ;;  %s1128_s28 = int_to_ptr.vmem [resolvable:$true] %s1127_s28 }
 0x1a3   : > { %s15756_s3 = smov %s15755_s16  ;;  %s13448_s12 = sshll.u32 %s15754_s14, 5 }
 0x1a4   : > { %s13452_s15 = scalar_lea.hbm %s15755_s16, %s13448_s12  ;;  %s12009_s5 = scalar_lea.hbm %s15756_s3, 64 }
 0x1a5   : > { %s12005_s26 = scalar_lea.hbm %s13452_s15, 32  ;;  %p12010_p13 = scmp.lt.u32.totalorder %s13452_s15, %s15756_s3 }
 0x1a6   : > { %p12006_p11 = scmp.ne.s32.totalorder %s13452_s15, %s12005_s26  ;;  %p12011_p4 = scmp.lt.u32.totalorder %s12009_s5, %s12005_s26 }
 0x1a7   : > { %p12013_p10 = scmp.lt.u32.totalorder %s12005_s26, %s13452_s15 }
 0x1a8   : > { %p12007_p9 = pnand %p12006_p11, %p15757_p0  ;;  %p12012_p3 = por %p12011_p4, %p12010_p13 }
 0x1aa   : > { %p12008_p7 = pneg %p12007_p9  ;;  %p12014_p12 = por %p12013_p10, %p12012_p3 }
 0x1ac   : > { %p12015_p1 = pnand %p12014_p12, %p12008_p7 }
 0x1ae   : > { %12018 = shalt.err (!%p12015_p1)
}
 0x1af   : > { %s12019_s11 = scalar_lea.vmem %s1128_s28, 32  ;;  %s12845_s8 = smov [#allocation23]  }
 0x1b0   : > { %p12020_p2 = scmp.ne.s32.totalorder %s1128_s28, %s12019_s11  ;;  %s12023_s16 = sshll.u32 %s12845_s8, 4  ;;  %s12024_s16 = int_to_ptr.vmem [resolvable:$false] %s12023_s16 }
 0x1b1   : > { %s12025_s20 = scalar_lea.vmem %s12024_s16, 64  ;;  %p12026_p6 = scmp.lt.s32.totalorder %s1128_s28, %s12024_s16 }
 0x1b2   : > { %p12021_p5 = pnand %p12020_p2, %p15757_p0  ;;  %p12027_p11 = scmp.lt.s32.totalorder %s12025_s20, %s12019_s11 }
 0x1b4   : > { %p12022_p8 = pneg %p12021_p5  ;;  %p12028_p9 = por %p12027_p11, %p12026_p6 }
 0x1b6   : > { %p12029_p4 = pnand %p12028_p9, %p12022_p8 }
 0x1b8   : > { %12032 = shalt.err (!%p12029_p4)
}
 0x1b9   : > { %s15758_s5 = sld [smem:[#allocation86_spill]]  ;;  %s1138_s11 = scalar_lea.vmem [#allocation24], %s13424_s30 }
 0x1ba   : > { %10575 = dma.hbm_to_vmem [thread:$0]  (%p15757_p0), %s13452_s15, 32, %s1128_s28, %s13368_s9  }
 0x1bb   : > { %s1146_s8 = sshll.u32 %s1138_s11, 4  ;;  %s10548_s16 = smul.u32 768, %s13419_s25  ;;  %s1147_s8 = int_to_ptr.vmem [resolvable:$true] %s1146_s8 }
 0x1bf   : > { %s13471_s26 = scalar_lea.hbm %s15758_s5, %s13448_s12  ;;  %s12037_s3 = scalar_lea.hbm %s15758_s5, 64 }
 0x1c0   : > { %s12033_s20 = scalar_lea.hbm %s13471_s26, 32  ;;  %p12038_p10 = scmp.lt.u32.totalorder %s13471_s26, %s15758_s5 }
 0x1c1   : > { %p12034_p7 = scmp.ne.s32.totalorder %s13471_s26, %s12033_s20  ;;  %p12039_p12 = scmp.lt.u32.totalorder %s12037_s3, %s12033_s20 }
 0x1c2   : > { %p12041_p2 = scmp.lt.u32.totalorder %s12033_s20, %s13471_s26 }
 0x1c3   : > { %p12035_p13 = pnand %p12034_p7, %p15757_p0  ;;  %p12040_p1 = por %p12039_p12, %p12038_p10 }
 0x1c5   : > { %p12036_p3 = pneg %p12035_p13  ;;  %p12042_p5 = por %p12041_p2, %p12040_p1 }
 0x1c7   : > { %p12043_p8 = pnand %p12042_p5, %p12036_p3 }
 0x1c9   : > { %12046 = shalt.err (!%p12043_p8)
}
 0x1ca   : > { %s12047_s15 = scalar_lea.vmem %s1147_s8, 32  ;;  %s12846_s28 = smov [#allocation24]  }
 0x1cb   : > { %p12048_p6 = scmp.ne.s32.totalorder %s1147_s8, %s12047_s15  ;;  %s12051_s11 = sshll.u32 %s12846_s28, 4  ;;  %s12052_s11 = int_to_ptr.vmem [resolvable:$false] %s12051_s11 }
 0x1cc   : > { %s12053_s19 = scalar_lea.vmem %s12052_s11, 64  ;;  %p12054_p4 = scmp.lt.s32.totalorder %s1147_s8, %s12052_s11 }
 0x1cd   : > { %p12049_p11 = pnand %p12048_p6, %p15757_p0  ;;  %p12055_p7 = scmp.lt.s32.totalorder %s12053_s19, %s12047_s15 }
 0x1cf   : > { %p12050_p9 = pneg %p12049_p11  ;;  %p12056_p13 = por %p12055_p7, %p12054_p4 }
 0x1d1   : > { %p12057_p10 = pnand %p12056_p13, %p12050_p9 }
 0x1d3   : > { %12060 = shalt.err (!%p12057_p10)
}
 0x1d4   : > { %s15759_s3 = sld [smem:[#allocation87_spill]]  ;;  %s10549_s20 = smul.u32 12288, %s15754_s14 }
 0x1d5   : > { %10576 = dma.hbm_to_vmem [thread:$0]  (%p15757_p0), %s13471_s26, 32, %s1147_s8, %s13336_s27  }
 0x1d6   : > { %s1157_s28 = scalar_lea.vmem [#allocation25], %s10548_s16 }
 0x1d7   : > { %s1164_s5 = sshll.u32 %s1157_s28, 4  ;;  %s13493_s5 = int_to_ptr.vmem [resolvable:$true] %s1164_s5 }
 0x1da   : > { %s13491_s21 = scalar_lea.hbm %s15759_s3, %s10549_s20  ;;  %s12065_s11 = scalar_lea.hbm %s15759_s3, 24576 }
 0x1db   : > { %s12061_s15 = scalar_lea.hbm %s13491_s21, 12288  ;;  %p12066_p2 = scmp.lt.u32.totalorder %s13491_s21, %s15759_s3 }
 0x1dc   : > { %p12062_p3 = scmp.ne.s32.totalorder %s13491_s21, %s12061_s15  ;;  %p12067_p5 = scmp.lt.u32.totalorder %s12065_s11, %s12061_s15 }
 0x1dd   : > { %p12069_p6 = scmp.lt.u32.totalorder %s12061_s15, %s13491_s21 }
 0x1de   : > { %p12063_p12 = pnand %p12062_p3, %p15757_p0  ;;  %p12068_p8 = por %p12067_p5, %p12066_p2 }
 0x1e0   : > { %p12064_p1 = pneg %p12063_p12  ;;  %p12070_p11 = por %p12069_p6, %p12068_p8 }
 0x1e2   : > { %p12071_p9 = pnand %p12070_p11, %p12064_p1 }
 0x1e4   : > { %12074 = shalt.err (!%p12071_p9)
}
 0x1e5   : > { %s12075_s26 = scalar_lea.vmem %s13493_s5, 12288  ;;  %s12847_s8 = smov [#allocation25]  }
 0x1e6   : > { %p12076_p4 = scmp.ne.s32.totalorder %s13493_s5, %s12075_s26  ;;  %s12079_s16 = sshll.u32 %s12847_s8, 4  ;;  %s12080_s16 = int_to_ptr.vmem [resolvable:$false] %s12079_s16 }
 0x1e7   : > { %s12081_s20 = scalar_lea.vmem %s12080_s16, 24576  ;;  %p12082_p10 = scmp.lt.s32.totalorder %s13493_s5, %s12080_s16 }
 0x1e8   : > { %p12077_p7 = pnand %p12076_p4, %p15757_p0  ;;  %p12083_p3 = scmp.lt.s32.totalorder %s12081_s20, %s12075_s26 }
 0x1ea   : > { %p12078_p13 = pneg %p12077_p7  ;;  %p12084_p12 = por %p12083_p3, %p12082_p10 }
 0x1ec   : > { %p12085_p2 = pnand %p12084_p12, %p12078_p13 }
 0x1ee   : > { %12088 = shalt.err (!%p12085_p2)
}
 0x1ef   : > { %s12848_s28 = smov 384   ;;  %s15760_s15 = sld [smem:[#allocation88_spill]] }
 0x1f0   : > { %s12849_s11 = smov 24   ;;  %s10551_s8 = smul.u32 96, %s15754_s14 }
 0x1f1   : > { %10577 = dma.hbm_to_vmem [thread:$0]  (%p15757_p0), %s13491_s21, 12288, %s13493_s5, %s13427_s0, %s12848_s28, %s12848_s28, %s12849_s11  }
 0x1f2   : > { %s15762_s26 = smul.u32 6, %s13419_s25  ;;  %s13518_s3 = sshll.u32 %s13419_s25, 8 }
 0x1f4   : > { %s1178_s16 = scalar_lea.vmem [#allocation26], %s15762_s26 }
 0x1f5   : > { %s15761_s19 = smov %s15760_s15  ;;  %s1186_s20 = sshll.u32 %s1178_s16, 4  ;;  %s1187_s20 = int_to_ptr.vmem [resolvable:$true] %s1186_s20 }
 0x1f6   : > { %s1184_s24 = scalar_lea.hbm %s15760_s15, %s10551_s8  ;;  %s12093_s18 = scalar_lea.hbm %s15761_s19, 192 }
 0x1f7   : > { %s12089_s29 = scalar_lea.hbm %s1184_s24, 96  ;;  %p12094_p6 = scmp.lt.u32.totalorder %s1184_s24, %s15761_s19 }
 0x1f8   : > { %p12090_p1 = scmp.ne.s32.totalorder %s1184_s24, %s12089_s29  ;;  %p12095_p11 = scmp.lt.u32.totalorder %s12093_s18, %s12089_s29 }
 0x1f9   : > { %p12097_p4 = scmp.lt.u32.totalorder %s12089_s29, %s1184_s24 }
 0x1fa   : > { %p12091_p5 = pnand %p12090_p1, %p15757_p0  ;;  %p12096_p9 = por %p12095_p11, %p12094_p6 }
 0x1fc   : > { %p12092_p8 = pneg %p12091_p5  ;;  %p12098_p7 = por %p12097_p4, %p12096_p9 }
 0x1fe   : > { %p12099_p13 = pnand %p12098_p7, %p12092_p8 }
 0x200   : > { %12102 = shalt.err (!%p12099_p13)
}
 0x201   : > { %s12103_s21 = scalar_lea.vmem %s1187_s20, 96  ;;  %s12850_s5 = smov [#allocation26]  }
 0x202   : > { %p12104_p10 = scmp.ne.s32.totalorder %s1187_s20, %s12103_s21  ;;  %s12107_s28 = sshll.u32 %s12850_s5, 4  ;;  %s12108_s28 = int_to_ptr.vmem [resolvable:$false] %s12107_s28 }
 0x203   : > { %s12109_s15 = scalar_lea.vmem %s12108_s28, 192  ;;  %p12110_p2 = scmp.lt.s32.totalorder %s1187_s20, %s12108_s28 }
 0x204   : > { %p12105_p3 = pnand %p12104_p10, %p15757_p0  ;;  %p12111_p1 = scmp.lt.s32.totalorder %s12109_s15, %s12103_s21 }
 0x206   : > { %p12106_p12 = pneg %p12105_p3  ;;  %p12112_p5 = por %p12111_p1, %p12110_p2 }
 0x208   : > { %p12113_p6 = pnand %p12112_p5, %p12106_p12 }
 0x20a   : > { %12116 = shalt.err (!%p12113_p6)
}
 0x20b   : > { %s15763_s29 = sld [smem:[#allocation89_spill]]  ;;  %s13531_s18 = sshll.u32 %s15754_s14, 12 }
 0x20c   : > { %10578 = dma.hbm_to_vmem [thread:$0]  (%p15757_p0), %s1184_s24, 96, %s1187_s20, %s13368_s9  }
 0x20d   : > { %s1197_s8 = scalar_lea.vmem [#allocation27], %s13518_s3 }
 0x20e   : > { %s1204_s26 = sshll.u32 %s1197_s8, 4  ;;  %s13538_s26 = int_to_ptr.vmem [resolvable:$true] %s1204_s26 }
 0x211   : > { %s13535_s11 = scalar_lea.hbm %s15763_s29, %s13531_s18  ;;  %s12121_s21 = scalar_lea.hbm %s15763_s29, 8192 }
 0x212   : > { %s12117_s16 = scalar_lea.hbm %s13535_s11, 4096  ;;  %p12122_p4 = scmp.lt.u32.totalorder %s13535_s11, %s15763_s29 }
 0x213   : > { %p12118_p8 = scmp.ne.s32.totalorder %s13535_s11, %s12117_s16  ;;  %p12123_p7 = scmp.lt.u32.totalorder %s12121_s21, %s12117_s16 }
 0x214   : > { %p12125_p10 = scmp.lt.u32.totalorder %s12117_s16, %s13535_s11 }
 0x215   : > { %p12119_p11 = pnand %p12118_p8, %p15757_p0  ;;  %p12124_p13 = por %p12123_p7, %p12122_p4 }
 0x217   : > { %p12120_p9 = pneg %p12119_p11  ;;  %p12126_p3 = por %p12125_p10, %p12124_p13 }
 0x219   : > { %p12127_p12 = pnand %p12126_p3, %p12120_p9 }
 0x21b   : > { %12130 = shalt.err (!%p12127_p12)
}
 0x21c   : > { %s12131_s24 = scalar_lea.vmem %s13538_s26, 4096  ;;  %s12851_s20 = smov [#allocation27]  }
 0x21d   : > { %p12132_p2 = scmp.ne.s32.totalorder %s13538_s26, %s12131_s24  ;;  %s12135_s5 = sshll.u32 %s12851_s20, 4  ;;  %s12136_s5 = int_to_ptr.vmem [resolvable:$false] %s12135_s5 }
 0x21e   : > { %s12137_s28 = scalar_lea.vmem %s12136_s5, 8192  ;;  %p12138_p6 = scmp.lt.s32.totalorder %s13538_s26, %s12136_s5 }
 0x21f   : > { %p12133_p1 = pnand %p12132_p2, %p15757_p0  ;;  %p12139_p8 = scmp.lt.s32.totalorder %s12137_s28, %s12131_s24 }
 0x221   : > { %p12134_p5 = pneg %p12133_p1  ;;  %p12140_p11 = por %p12139_p8, %p12138_p6 }
 0x223   : > { %p12141_p4 = pnand %p12140_p11, %p12134_p5 }
 0x225   : > { %12144 = shalt.err (!%p12141_p4)
}
 0x226   : > { %s15662_s15 = smov 128   ;;  %s15764_s8 = sld [smem:[#allocation90_spill]] }
 0x227   : > { %s15664_s16 = smov 8   ;;  %s1218_s24 = scalar_lea.vmem [#allocation28], %s13424_s30 }
 0x228   : > { %10579 = dma.hbm_to_vmem [thread:$0]  (%p15757_p0), %s13535_s11, 4096, %s13538_s26, %s13336_s27, %s15662_s15, %s15662_s15, %s15664_s16  }
 0x229   : > { %s1226_s20 = sshll.u32 %s1218_s24, 4  ;;  %s1227_s20 = int_to_ptr.vmem [resolvable:$true] %s1226_s20 }
 0x22c   : > { %s13563_s21 = scalar_lea.hbm %s15764_s8, %s13448_s12  ;;  %s12149_s28 = scalar_lea.hbm %s15764_s8, 64 }
 0x22d   : > { %s12145_s5 = scalar_lea.hbm %s13563_s21, 32  ;;  %p12150_p10 = scmp.lt.u32.totalorder %s13563_s21, %s15764_s8 }
 0x22e   : > { %p12146_p9 = scmp.ne.s32.totalorder %s13563_s21, %s12145_s5  ;;  %p12151_p3 = scmp.lt.u32.totalorder %s12149_s28, %s12145_s5 }
 0x22f   : > { %p12153_p2 = scmp.lt.u32.totalorder %s12145_s5, %s13563_s21 }
 0x230   : > { %p12147_p7 = pnand %p12146_p9, %p15757_p0  ;;  %p12152_p12 = por %p12151_p3, %p12150_p10 }
 0x232   : > { %p12148_p13 = pneg %p12147_p7  ;;  %p12154_p1 = por %p12153_p2, %p12152_p12 }
 0x234   : > { %p12155_p5 = pnand %p12154_p1, %p12148_p13 }
 0x236   : > { %12158 = shalt.err (!%p12155_p5)
}
 0x237   : > { %s12159_s11 = scalar_lea.vmem %s1227_s20, 32  ;;  %s12854_s26 = smov [#allocation28]  }
 0x238   : > { %p12160_p6 = scmp.ne.s32.totalorder %s1227_s20, %s12159_s11  ;;  %s12163_s24 = sshll.u32 %s12854_s26, 4  ;;  %s12164_s24 = int_to_ptr.vmem [resolvable:$false] %s12163_s24 }
 0x239   : > { %s12165_s15 = scalar_lea.vmem %s12164_s24, 64  ;;  %p12166_p4 = scmp.lt.s32.totalorder %s1227_s20, %s12164_s24 }
 0x23a   : > { %p12161_p8 = pnand %p12160_p6, %p15757_p0  ;;  %p12167_p9 = scmp.lt.s32.totalorder %s12165_s15, %s12159_s11 }
 0x23c   : > { %p12162_p11 = pneg %p12161_p8  ;;  %p12168_p7 = por %p12167_p9, %p12166_p4 }
 0x23e   : > { %p12169_p3 = pnand %p12168_p7, %p12162_p11 }
 0x240   : > { %12172 = shalt.err (!%p12169_p3)
}
 0x241   : > { %s15765_s5 = sld [smem:[#allocation91_spill]]  ;;  %s1237_s15 = scalar_lea.vmem [#allocation29], %s13424_s30 }
 0x242   : > { %10580 = dma.hbm_to_vmem [thread:$0]  (%p15757_p0), %s13563_s21, 32, %s1227_s20, %s13427_s0  }
 0x243   : > { %s1245_s11 = sshll.u32 %s1237_s15, 4  ;;  %s1246_s11 = int_to_ptr.vmem [resolvable:$true] %s1245_s11 }
 0x247   : > { %s13582_s28 = scalar_lea.hbm %s15765_s5, %s13448_s12  ;;  %s12177_s24 = scalar_lea.hbm %s15765_s5, 64 }
 0x248   : > { %s12173_s26 = scalar_lea.hbm %s13582_s28, 32  ;;  %p12178_p2 = scmp.lt.u32.totalorder %s13582_s28, %s15765_s5 }
 0x249   : > { %p12174_p13 = scmp.ne.s32.totalorder %s13582_s28, %s12173_s26  ;;  %p12179_p1 = scmp.lt.u32.totalorder %s12177_s24, %s12173_s26 }
 0x24a   : > { %p12181_p6 = scmp.lt.u32.totalorder %s12173_s26, %s13582_s28 }
 0x24b   : > { %p12175_p10 = pnand %p12174_p13, %p15757_p0  ;;  %p12180_p5 = por %p12179_p1, %p12178_p2 }
 0x24d   : > { %p12176_p12 = pneg %p12175_p10  ;;  %p12182_p8 = por %p12181_p6, %p12180_p5 }
 0x24f   : > { %p12183_p11 = pnand %p12182_p8, %p12176_p12 }
 0x251   : > { %12186 = shalt.err (!%p12183_p11)
}
 0x252   : > { %s12187_s21 = scalar_lea.vmem %s1246_s11, 32  ;;  %s12855_s20 = smov [#allocation29]  }
 0x253   : > { %p12188_p4 = scmp.ne.s32.totalorder %s1246_s11, %s12187_s21  ;;  %s12191_s15 = sshll.u32 %s12855_s20, 4  ;;  %s12192_s15 = int_to_ptr.vmem [resolvable:$false] %s12191_s15 }
 0x254   : > { %s12193_s16 = scalar_lea.vmem %s12192_s15, 64  ;;  %p12194_p3 = scmp.lt.s32.totalorder %s1246_s11, %s12192_s15 }
 0x255   : > { %p12189_p9 = pnand %p12188_p4, %p15757_p0  ;;  %p12195_p13 = scmp.lt.s32.totalorder %s12193_s16, %s12187_s21 }
 0x257   : > { %p12190_p7 = pneg %p12189_p9  ;;  %p12196_p10 = por %p12195_p13, %p12194_p3 }
 0x259   : > { %p12197_p1 = pnand %p12196_p10, %p12190_p7 }
 0x25b   : > { %12200 = shalt.err (!%p12197_p1)
}
 0x25c   : > { %s15766_s26 = sld [smem:[#allocation92_spill]]  ;;  %s1256_s16 = scalar_lea.vmem [#allocation30], %s13424_s30 }
 0x25d   : > { %10581 = dma.hbm_to_vmem [thread:$0]  (%p15757_p0), %s13582_s28, 32, %s1246_s11, %s13368_s9  }
 0x25e   : > { %s1264_s21 = sshll.u32 %s1256_s16, 4  ;;  %s1265_s21 = int_to_ptr.vmem [resolvable:$true] %s1264_s21 }
 0x262   : > { %s13601_s24 = scalar_lea.hbm %s15766_s26, %s13448_s12  ;;  %s12205_s15 = scalar_lea.hbm %s15766_s26, 64 }
 0x263   : > { %s12201_s20 = scalar_lea.hbm %s13601_s24, 32  ;;  %p12206_p6 = scmp.lt.u32.totalorder %s13601_s24, %s15766_s26 }
 0x264   : > { %p12202_p12 = scmp.ne.s32.totalorder %s13601_s24, %s12201_s20  ;;  %p12207_p8 = scmp.lt.u32.totalorder %s12205_s15, %s12201_s20 }
 0x265   : > { %p12209_p4 = scmp.lt.u32.totalorder %s12201_s20, %s13601_s24 }
 0x266   : > { %p12203_p2 = pnand %p12202_p12, %p15757_p0  ;;  %p12208_p11 = por %p12207_p8, %p12206_p6 }
 0x268   : > { %p12204_p5 = pneg %p12203_p2  ;;  %p12210_p9 = por %p12209_p4, %p12208_p11 }
 0x26a   : > { %p12211_p7 = pnand %p12210_p9, %p12204_p5 }
 0x26c   : > { %12214 = shalt.err (!%p12211_p7)
}
 0x26d   : > { %s12215_s28 = scalar_lea.vmem %s1265_s21, 32  ;;  %s12856_s11 = smov [#allocation30]  }
 0x26e   : > { %p12216_p3 = scmp.ne.s32.totalorder %s1265_s21, %s12215_s28  ;;  %s12219_s16 = sshll.u32 %s12856_s11, 4  ;;  %s12220_s16 = int_to_ptr.vmem [resolvable:$false] %s12219_s16 }
 0x26f   : > { %s12221_s5 = scalar_lea.vmem %s12220_s16, 64  ;;  %p12222_p1 = scmp.lt.s32.totalorder %s1265_s21, %s12220_s16 }
 0x270   : > { %p12217_p13 = pnand %p12216_p3, %p15757_p0  ;;  %p12223_p12 = scmp.lt.s32.totalorder %s12221_s5, %s12215_s28 }
 0x272   : > { %p12218_p10 = pneg %p12217_p13  ;;  %p12224_p2 = por %p12223_p12, %p12222_p1 }
 0x274   : > { %p12225_p6 = pnand %p12224_p2, %p12218_p10 }
 0x276   : > { %12228 = shalt.err (!%p12225_p6)
}
 0x277   : > { %s15767_s20 = sld [smem:[#allocation93_spill]]  ;;  %s1275_s5 = scalar_lea.vmem [#allocation31], %s13518_s3 }
 0x278   : > { %10582 = dma.hbm_to_vmem [thread:$0]  (%p15757_p0), %s13601_s24, 32, %s1265_s21, %s13336_s27  }
 0x279   : > { %s1282_s28 = sshll.u32 %s1275_s5, 4  ;;  %s13623_s28 = int_to_ptr.vmem [resolvable:$true] %s1282_s28 }
 0x27d   : > { %s13620_s15 = scalar_lea.hbm %s15767_s20, %s13531_s18  ;;  %s12233_s16 = scalar_lea.hbm %s15767_s20, 8192 }
 0x27e   : > { %s12229_s11 = scalar_lea.hbm %s13620_s15, 4096  ;;  %p12234_p4 = scmp.lt.u32.totalorder %s13620_s15, %s15767_s20 }
 0x27f   : > { %p12230_p5 = scmp.ne.s32.totalorder %s13620_s15, %s12229_s11  ;;  %p12235_p9 = scmp.lt.u32.totalorder %s12233_s16, %s12229_s11 }
 0x280   : > { %p12237_p3 = scmp.lt.u32.totalorder %s12229_s11, %s13620_s15 }
 0x281   : > { %p12231_p8 = pnand %p12230_p5, %p15757_p0  ;;  %p12236_p7 = por %p12235_p9, %p12234_p4 }
 0x283   : > { %p12232_p11 = pneg %p12231_p8  ;;  %p12238_p13 = por %p12237_p3, %p12236_p7 }
 0x285   : > { %p12239_p10 = pnand %p12238_p13, %p12232_p11 }
 0x287   : > { %12242 = shalt.err (!%p12239_p10)
}
 0x288   : > { %s12243_s24 = scalar_lea.vmem %s13623_s28, 4096  ;;  %s12857_s21 = smov [#allocation31]  }
 0x289   : > { %p12244_p1 = scmp.ne.s32.totalorder %s13623_s28, %s12243_s24  ;;  %s12247_s5 = sshll.u32 %s12857_s21, 4  ;;  %s12248_s5 = int_to_ptr.vmem [resolvable:$false] %s12247_s5 }
 0x28a   : > { %s12249_s8 = scalar_lea.vmem %s12248_s5, 8192  ;;  %p12250_p6 = scmp.lt.s32.totalorder %s13623_s28, %s12248_s5 }
 0x28b   : > { %p12245_p12 = pnand %p12244_p1, %p15757_p0  ;;  %p12251_p5 = scmp.lt.s32.totalorder %s12249_s8, %s12243_s24 }
 0x28d   : > { %p12246_p2 = pneg %p12245_p12  ;;  %p12252_p8 = por %p12251_p5, %p12250_p6 }
 0x28f   : > { %p12253_p4 = pnand %p12252_p8, %p12246_p2 }
 0x291   : > { %12256 = shalt.err (!%p12253_p4)
}
 0x292   : > { %s15768_s11 = smov 8   ;;  %s15769_s16 = smov 128  }
 0x293   : > { %s15770_s19 = sld [smem:[#allocation94_spill]]  ;;  %s1296_s24 = scalar_lea.vmem [#allocation32], %s13424_s30 }
 0x294   : > { %10583 = dma.hbm_to_vmem [thread:$0]  (%p15757_p0), %s13620_s15, 4096, %s13623_s28, %s13427_s0, %s15769_s16, %s15769_s16, %s15768_s11  }
 0x295   : > { %s1304_s21 = sshll.u32 %s1296_s24, 4  ;;  %s1305_s21 = int_to_ptr.vmem [resolvable:$true] %s1304_s21 }
 0x299   : > { %s13648_s8 = scalar_lea.hbm %s15770_s19, %s13448_s12  ;;  %s12261_s26 = scalar_lea.hbm %s15770_s19, 64 }
 0x29a   : > { %s12257_s20 = scalar_lea.hbm %s13648_s8, 32  ;;  %p12262_p3 = scmp.lt.u32.totalorder %s13648_s8, %s15770_s19 }
 0x29b   : > { %p12258_p11 = scmp.ne.s32.totalorder %s13648_s8, %s12257_s20  ;;  %p12263_p13 = scmp.lt.u32.totalorder %s12261_s26, %s12257_s20 }
 0x29c   : > { %p12265_p1 = scmp.lt.u32.totalorder %s12257_s20, %s13648_s8 }
 0x29d   : > { %p12259_p9 = pnand %p12258_p11, %p15757_p0  ;;  %p12264_p10 = por %p12263_p13, %p12262_p3 }
 0x29f   : > { %p12260_p7 = pneg %p12259_p9  ;;  %p12266_p12 = por %p12265_p1, %p12264_p10 }
 0x2a1   : > { %p12267_p2 = pnand %p12266_p12, %p12260_p7 }
 0x2a3   : > { %12270 = shalt.err (!%p12267_p2)
}
 0x2a4   : > { %s12271_s15 = scalar_lea.vmem %s1305_s21, 32  ;;  %s12858_s28 = smov [#allocation32]  }
 0x2a5   : > { %p12272_p6 = scmp.ne.s32.totalorder %s1305_s21, %s12271_s15  ;;  %s12275_s24 = sshll.u32 %s12858_s28, 4  ;;  %s12276_s24 = int_to_ptr.vmem [resolvable:$false] %s12275_s24 }
 0x2a6   : > { %s12277_s5 = scalar_lea.vmem %s12276_s24, 64  ;;  %p12278_p4 = scmp.lt.s32.totalorder %s1305_s21, %s12276_s24 }
 0x2a7   : > { %p12273_p5 = pnand %p12272_p6, %p15757_p0  ;;  %p12279_p11 = scmp.lt.s32.totalorder %s12277_s5, %s12271_s15 }
 0x2a9   : > { %p12274_p8 = pneg %p12273_p5  ;;  %p12280_p9 = por %p12279_p11, %p12278_p4 }
 0x2ab   : > { %p12281_p3 = pnand %p12280_p9, %p12274_p8 }
 0x2ad   : > { %12284 = shalt.err (!%p12281_p3)
}
 0x2ae   : > { %s15771_s26 = sld [smem:[#allocation95_spill]]  ;;  %s10431_s20 = sshll.u32 %s15754_s14, 13 }
 0x2af   : > { %10584 = dma.hbm_to_vmem [thread:$0]  (%p15757_p0), %s13648_s8, 32, %s1305_s21, %s13368_s9  }
 0x2b0   : > { %s15772_s24 = sshll.u32 %s13419_s25, 9  ;;  %s9585_s19 = sshll.u32 %s13419_s25, 2 }
 0x2b1   : > { %s1315_s5 = scalar_lea.vmem [#allocation33], %s15772_s24 }
 0x2b2   : > { %s1322_s15 = sshll.u32 %s1315_s5, 4  ;;  %s13672_s15 = int_to_ptr.vmem [resolvable:$true] %s1322_s15 }
 0x2b4   : > { %s13668_s28 = scalar_lea.hbm %s15771_s26, %s10431_s20  ;;  %s12289_s10 = scalar_lea.hbm %s15771_s26, 16384 }
 0x2b5   : > { %s12285_s29 = scalar_lea.hbm %s13668_s28, 8192  ;;  %p12290_p1 = scmp.lt.u32.totalorder %s13668_s28, %s15771_s26 }
 0x2b6   : > { %p12286_p7 = scmp.ne.s32.totalorder %s13668_s28, %s12285_s29  ;;  %p12291_p12 = scmp.lt.u32.totalorder %s12289_s10, %s12285_s29 }
 0x2b7   : > { %p12293_p6 = scmp.lt.u32.totalorder %s12285_s29, %s13668_s28 }
 0x2b8   : > { %p12287_p13 = pnand %p12286_p7, %p15757_p0  ;;  %p12292_p2 = por %p12291_p12, %p12290_p1 }
 0x2ba   : > { %p12288_p10 = pneg %p12287_p13  ;;  %p12294_p5 = por %p12293_p6, %p12292_p2 }
 0x2bc   : > { %p12295_p8 = pnand %p12294_p5, %p12288_p10 }
 0x2be   : > { %12298 = shalt.err (!%p12295_p8)
}
 0x2bf   : > { %s12299_s8 = scalar_lea.vmem %s13672_s15, 8192  ;;  %s12859_s21 = smov [#allocation33]  }
 0x2c0   : > { %p12300_p4 = scmp.ne.s32.totalorder %s13672_s15, %s12299_s8  ;;  %s12303_s20 = sshll.u32 %s12859_s21, 4  ;;  %s12304_s20 = int_to_ptr.vmem [resolvable:$false] %s12303_s20 }
 0x2c1   : > { %s12305_s24 = scalar_lea.vmem %s12304_s20, 16384  ;;  %p12306_p3 = scmp.lt.s32.totalorder %s13672_s15, %s12304_s20 }
 0x2c2   : > { %p12301_p11 = pnand %p12300_p4, %p15757_p0  ;;  %p12307_p7 = scmp.lt.s32.totalorder %s12305_s24, %s12299_s8 }
 0x2c4   : > { %p12302_p9 = pneg %p12301_p11  ;;  %p12308_p13 = por %p12307_p7, %p12306_p3 }
 0x2c6   : > { %p12309_p1 = pnand %p12308_p13, %p12302_p9 }
 0x2c8   : > { %12312 = shalt.err (!%p12309_p1)
}
 0x2c9   : > { %s15773_s10 = smov 16   ;;  %s15774_s29 = smov 256  }
 0x2ca   : > { %s15775_s5 = sld [smem:[#allocation96_spill]]  ;;  %s10432_s21 = sshll.u32 %s15754_s14, 6 }
 0x2cb   : > { %10585 = dma.hbm_to_vmem [thread:$0]  (%p15757_p0), %s13668_s28, 8192, %s13672_s15, %s13336_s27, %s15774_s29, %s15774_s29, %s15773_s10  }
 0x2cc   : > { %s1336_s20 = scalar_lea.vmem [#allocation34], %s9585_s19 }
 0x2cd   : > { %s1344_s24 = sshll.u32 %s1336_s20, 4  ;;  %s1345_s24 = int_to_ptr.vmem [resolvable:$true] %s1344_s24 }
 0x2d0   : > { %s13698_s8 = scalar_lea.hbm %s15775_s5, %s10432_s21  ;;  %s12317_s2 = scalar_lea.hbm %s15775_s5, 128 }
 0x2d1   : > { %s12313_s26 = scalar_lea.hbm %s13698_s8, 64  ;;  %p12318_p6 = scmp.lt.u32.totalorder %s13698_s8, %s15775_s5 }
 0x2d2   : > { %p12314_p10 = scmp.ne.s32.totalorder %s13698_s8, %s12313_s26  ;;  %p12319_p5 = scmp.lt.u32.totalorder %s12317_s2, %s12313_s26 }
 0x2d3   : > { %p12321_p4 = scmp.lt.u32.totalorder %s12313_s26, %s13698_s8 }
 0x2d4   : > { %p12315_p12 = pnand %p12314_p10, %p15757_p0  ;;  %p12320_p8 = por %p12319_p5, %p12318_p6 }
 0x2d6   : > { %p12316_p2 = pneg %p12315_p12  ;;  %p12322_p11 = por %p12321_p4, %p12320_p8 }
 0x2d8   : > { %p12323_p9 = pnand %p12322_p11, %p12316_p2 }
 0x2da   : > { %12326 = shalt.err (!%p12323_p9)
}
 0x2db   : > { %s12327_s28 = scalar_lea.vmem %s1345_s24, 64  ;;  %s12860_s19 = smov [#allocation34]  }
 0x2dc   : > { %p12328_p3 = scmp.ne.s32.totalorder %s1345_s24, %s12327_s28  ;;  %s12331_s15 = sshll.u32 %s12860_s19, 4  ;;  %s12332_s15 = int_to_ptr.vmem [resolvable:$false] %s12331_s15 }
 0x2dd   : > { %s12333_s10 = scalar_lea.vmem %s12332_s15, 128  ;;  %p12334_p1 = scmp.lt.s32.totalorder %s1345_s24, %s12332_s15 }
 0x2de   : > { %p12329_p7 = pnand %p12328_p3, %p15757_p0  ;;  %p12335_p10 = scmp.lt.s32.totalorder %s12333_s10, %s12327_s28 }
 0x2e0   : > { %p12330_p13 = pneg %p12329_p7  ;;  %p12336_p12 = por %p12335_p10, %p12334_p1 }
 0x2e2   : > { %p12337_p5 = pnand %p12336_p12, %p12330_p13 }
 0x2e4   : > { %12340 = shalt.err (!%p12337_p5)
}
 0x2e5   : > { %s15776_s2 = sld [smem:[#allocation97_spill]]  ;;  %s1355_s21 = scalar_lea.vmem [#allocation35], %s13518_s3 }
 0x2e6   : > { %10586 = dma.hbm_to_vmem [thread:$0]  (%p15757_p0), %s13698_s8, 64, %s1345_s24, %s13427_s0  }
 0x2e7   : > { %s1362_s20 = sshll.u32 %s1355_s21, 4  ;;  %s13721_s20 = int_to_ptr.vmem [resolvable:$true] %s1362_s20 }
 0x2eb   : > { %s15777_s26 = smov %s15776_s2  ;;  %s13718_s29 = scalar_lea.hbm %s15776_s2, %s13531_s18 }
 0x2ec   : > { %s12341_s28 = scalar_lea.hbm %s13718_s29, 4096  ;;  %s12345_s19 = scalar_lea.hbm %s15777_s26, 8192 }
 0x2ed   : > { %p12342_p2 = scmp.ne.s32.totalorder %s13718_s29, %s12341_s28  ;;  %p12346_p4 = scmp.lt.u32.totalorder %s13718_s29, %s15777_s26 }
 0x2ee   : > { %p12347_p11 = scmp.lt.u32.totalorder %s12345_s19, %s12341_s28  ;;  %p12349_p3 = scmp.lt.u32.totalorder %s12341_s28, %s13718_s29 }
 0x2ef   : > { %p12343_p6 = pnand %p12342_p2, %p15757_p0 }
 0x2f0   : > { %p12348_p9 = por %p12347_p11, %p12346_p4 }
 0x2f1   : > { %p12344_p8 = pneg %p12343_p6 }
 0x2f2   : > { %p12350_p7 = por %p12349_p3, %p12348_p9 }
 0x2f4   : > { %p12351_p13 = pnand %p12350_p7, %p12344_p8 }
 0x2f6   : > { %12354 = shalt.err (!%p12351_p13)
}
 0x2f7   : > { %s12355_s3 = scalar_lea.vmem %s13721_s20, 4096  ;;  %s12861_s18 = smov [#allocation35]  }
 0x2f8   : > { %p12356_p1 = scmp.ne.s32.totalorder %s13721_s20, %s12355_s3  ;;  %s12359_s8 = sshll.u32 %s12861_s18, 4  ;;  %s12360_s8 = int_to_ptr.vmem [resolvable:$false] %s12359_s8 }
 0x2f9   : > { %s12361_s24 = scalar_lea.vmem %s12360_s8, 8192  ;;  %p12362_p5 = scmp.lt.s32.totalorder %s13721_s20, %s12360_s8 }
 0x2fa   : > { %p12357_p10 = pnand %p12356_p1, %p15757_p0  ;;  %p12363_p2 = scmp.lt.s32.totalorder %s12361_s24, %s12355_s3 }
 0x2fc   : > { %p12358_p12 = pneg %p12357_p10  ;;  %p12364_p6 = por %p12363_p2, %p12362_p5 }
 0x2fe   : > { %p12365_p4 = pnand %p12364_p6, %p12358_p12 }
 0x300   : > { %12368 = shalt.err (!%p12365_p4)
}
 0x301   : > { %s15778_s15 = sld [smem:[#allocation98_spill]]  ;;  %s1376_s2 = scalar_lea.vmem [#allocation36], %s13424_s30 }
 0x302   : > { %10587 = dma.hbm_to_vmem [thread:$0]  (%p15757_p0), %s13718_s29, 4096, %s13721_s20, %s13368_s9, %s15769_s16, %s15769_s16, %s15768_s11  }
 0x303   : > { %s1384_s28 = sshll.u32 %s1376_s2, 4  ;;  %s1385_s28 = int_to_ptr.vmem [resolvable:$true] %s1384_s28 }
 0x307   : > { %s15779_s21 = smov %s15778_s15  ;;  %s13746_s10 = scalar_lea.hbm %s15778_s15, %s13448_s12 }
 0x308   : > { %s12369_s19 = scalar_lea.hbm %s13746_s10, 32  ;;  %s12373_s3 = scalar_lea.hbm %s15779_s21, 64 }
 0x309   : > { %p12370_p8 = scmp.ne.s32.totalorder %s13746_s10, %s12369_s19  ;;  %p12374_p3 = scmp.lt.u32.totalorder %s13746_s10, %s15779_s21 }
 0x30a   : > { %p12375_p7 = scmp.lt.u32.totalorder %s12373_s3, %s12369_s19  ;;  %p12377_p1 = scmp.lt.u32.totalorder %s12369_s19, %s13746_s10 }
 0x30b   : > { %p12371_p11 = pnand %p12370_p8, %p15757_p0 }
 0x30c   : > { %p12376_p13 = por %p12375_p7, %p12374_p3 }
 0x30d   : > { %p12372_p9 = pneg %p12371_p11 }
 0x30e   : > { %p12378_p10 = por %p12377_p1, %p12376_p13 }
 0x310   : > { %p12379_p12 = pnand %p12378_p10, %p12372_p9 }
 0x312   : > { %12382 = shalt.err (!%p12379_p12)
}
 0x313   : > { %s12383_s29 = scalar_lea.vmem %s1385_s28, 32  ;;  %s12862_s20 = smov [#allocation36]  }
 0x314   : > { %p12384_p5 = scmp.ne.s32.totalorder %s1385_s28, %s12383_s29  ;;  %s12387_s18 = sshll.u32 %s12862_s20, 4  ;;  %s12388_s18 = int_to_ptr.vmem [resolvable:$false] %s12387_s18 }
 0x315   : > { %s12389_s8 = scalar_lea.vmem %s12388_s18, 64  ;;  %p12390_p4 = scmp.lt.s32.totalorder %s1385_s28, %s12388_s18 }
 0x316   : > { %p12385_p2 = pnand %p12384_p5, %p15757_p0  ;;  %p12391_p8 = scmp.lt.s32.totalorder %s12389_s8, %s12383_s29 }
 0x318   : > { %p12386_p6 = pneg %p12385_p2  ;;  %p12392_p11 = por %p12391_p8, %p12390_p4 }
 0x31a   : > { %p12393_p3 = pnand %p12392_p11, %p12386_p6 }
 0x31c   : > { %12396 = shalt.err (!%p12393_p3)
}
 0x31d   : > { %s15780_s24 = sld [smem:[#allocation99_spill]]  ;;  %s1395_s2 = scalar_lea.vmem [#allocation37], %s13424_s30 }
 0x31e   : > { %10588 = dma.hbm_to_vmem [thread:$0]  (%p15757_p0), %s13746_s10, 32, %s1385_s28, %s13336_s27  }
 0x31f   : > { %s1403_s19 = sshll.u32 %s1395_s2, 4  ;;  %s1404_s19 = int_to_ptr.vmem [resolvable:$true] %s1403_s19 }
 0x323   : > { %s13765_s15 = scalar_lea.hbm %s15780_s24, %s13448_s12  ;;  %s12401_s29 = scalar_lea.hbm %s15780_s24, 64 }
 0x324   : > { %s12397_s3 = scalar_lea.hbm %s13765_s15, 32  ;;  %p12402_p1 = scmp.lt.u32.totalorder %s13765_s15, %s15780_s24 }
 0x325   : > { %p12398_p9 = scmp.ne.s32.totalorder %s13765_s15, %s12397_s3  ;;  %p12403_p10 = scmp.lt.u32.totalorder %s12401_s29, %s12397_s3 }
 0x326   : > { %p12405_p5 = scmp.lt.u32.totalorder %s12397_s3, %s13765_s15 }
 0x327   : > { %p12399_p7 = pnand %p12398_p9, %p15757_p0  ;;  %p12404_p12 = por %p12403_p10, %p12402_p1 }
 0x329   : > { %p12400_p13 = pneg %p12399_p7  ;;  %p12406_p2 = por %p12405_p5, %p12404_p12 }
 0x32b   : > { %p12407_p6 = pnand %p12406_p2, %p12400_p13 }
 0x32d   : > { %12410 = shalt.err (!%p12407_p6)
}
 0x32e   : > { %s12411_s10 = scalar_lea.vmem %s1404_s19, 32  ;;  %s12863_s28 = smov [#allocation37]  }
 0x32f   : > { %p12412_p4 = scmp.ne.s32.totalorder %s1404_s19, %s12411_s10  ;;  %s12415_s20 = sshll.u32 %s12863_s28, 4  ;;  %s12416_s20 = int_to_ptr.vmem [resolvable:$false] %s12415_s20 }
 0x330   : > { %s12417_s18 = scalar_lea.vmem %s12416_s20, 64  ;;  %p12418_p3 = scmp.lt.s32.totalorder %s1404_s19, %s12416_s20 }
 0x331   : > { %p12413_p8 = pnand %p12412_p4, %p15757_p0  ;;  %p12419_p9 = scmp.lt.s32.totalorder %s12417_s18, %s12411_s10 }
 0x333   : > { %p12414_p11 = pneg %p12413_p8  ;;  %p12420_p7 = por %p12419_p9, %p12418_p3 }
 0x335   : > { %p12421_p1 = pnand %p12420_p7, %p12414_p11 }
 0x337   : > { %12424 = shalt.err (!%p12421_p1)
}
 0x338   : > { %s15781_s8 = sld [smem:[#allocation100_spill]]  ;;  %s1414_s3 = scalar_lea.vmem [#allocation38], %s13424_s30 }
 0x339   : > { %10589 = dma.hbm_to_vmem [thread:$0]  (%p15757_p0), %s13765_s15, 32, %s1404_s19, %s13427_s0  }
 0x33a   : > { %s1422_s29 = sshll.u32 %s1414_s3, 4  ;;  %s15678_s10 = sshll.u32 %s13419_s25, 11  ;;  %s1423_s29 = int_to_ptr.vmem [resolvable:$true] %s1422_s29 }
 0x33e   : > { %s13784_s2 = scalar_lea.hbm %s15781_s8, %s13448_s12  ;;  %s12429_s20 = scalar_lea.hbm %s15781_s8, 64 }
 0x33f   : > { %s12425_s28 = scalar_lea.hbm %s13784_s2, 32  ;;  %p12430_p5 = scmp.lt.u32.totalorder %s13784_s2, %s15781_s8 }
 0x340   : > { %p12426_p13 = scmp.ne.s32.totalorder %s13784_s2, %s12425_s28  ;;  %p12431_p2 = scmp.lt.u32.totalorder %s12429_s20, %s12425_s28 }
 0x341   : > { %p12433_p4 = scmp.lt.u32.totalorder %s12425_s28, %s13784_s2 }
 0x342   : > { %p12427_p10 = pnand %p12426_p13, %p15757_p0  ;;  %p12432_p6 = por %p12431_p2, %p12430_p5 }
 0x344   : > { %p12428_p12 = pneg %p12427_p10  ;;  %p12434_p8 = por %p12433_p4, %p12432_p6 }
 0x346   : > { %p12435_p11 = pnand %p12434_p8, %p12428_p12 }
 0x348   : > { %12438 = shalt.err (!%p12435_p11)
}
 0x349   : > { %s12439_s15 = scalar_lea.vmem %s1423_s29, 32  ;;  %s12864_s19 = smov [#allocation38]  }
 0x34a   : > { %p12440_p3 = scmp.ne.s32.totalorder %s1423_s29, %s12439_s15  ;;  %s12443_s18 = sshll.u32 %s12864_s19, 4  ;;  %s12444_s18 = int_to_ptr.vmem [resolvable:$false] %s12443_s18 }
 0x34b   : > { %s12445_s3 = scalar_lea.vmem %s12444_s18, 64  ;;  %p12446_p1 = scmp.lt.s32.totalorder %s1423_s29, %s12444_s18 }
 0x34c   : > { %p12441_p9 = pnand %p12440_p3, %p15757_p0  ;;  %p12447_p13 = scmp.lt.s32.totalorder %s12445_s3, %s12439_s15 }
 0x34e   : > { %p12442_p7 = pneg %p12441_p9  ;;  %p12448_p10 = por %p12447_p13, %p12446_p1 }
 0x350   : > { %p12449_p2 = pnand %p12448_p10, %p12442_p7 }
 0x352   : > { %12452 = shalt.err (!%p12449_p2)
}
 0x353   : > { %s15782_s28 = sld [smem:[#allocation101_spill]]  ;;  %s15679_s19 = sshll.u32 %s15754_s14, 15 }
 0x354   : > { %10590 = dma.hbm_to_vmem [thread:$0]  (%p15757_p0), %s13784_s2, 32, %s1423_s29, %s13368_s9  }
 0x355   : > { %s1433_s15 = scalar_lea.vmem [#allocation39], %s15678_s10 }
 0x356   : > { %s1440_s3 = sshll.u32 %s1433_s15, 4  ;;  %s13810_s3 = int_to_ptr.vmem [resolvable:$true] %s1440_s3 }
 0x359   : > { %s15783_s20 = smov %s15782_s28  ;;  %s13806_s18 = scalar_lea.hbm %s15782_s28, %s15679_s19 }
 0x35a   : > { %s12453_s8 = scalar_lea.hbm %s13806_s18, 32768  ;;  %s12457_s2 = scalar_lea.hbm %s15783_s20, 65536 }
 0x35b   : > { %p12454_p12 = scmp.ne.s32.totalorder %s13806_s18, %s12453_s8  ;;  %p12458_p4 = scmp.lt.u32.totalorder %s13806_s18, %s15783_s20 }
 0x35c   : > { %p12459_p8 = scmp.lt.u32.totalorder %s12457_s2, %s12453_s8  ;;  %p12461_p3 = scmp.lt.u32.totalorder %s12453_s8, %s13806_s18 }
 0x35d   : > { %p12455_p5 = pnand %p12454_p12, %p15757_p0 }
 0x35e   : > { %p12460_p11 = por %p12459_p8, %p12458_p4 }
 0x35f   : > { %p12456_p6 = pneg %p12455_p5 }
 0x360   : > { %p12462_p9 = por %p12461_p3, %p12460_p11 }
 0x362   : > { %p12463_p7 = pnand %p12462_p9, %p12456_p6 }
 0x364   : > { %12466 = shalt.err (!%p12463_p7)
}
 0x365   : > { %s12467_s29 = scalar_lea.vmem %s13810_s3, 32768  ;;  %s12865_s28 = smov [#allocation39]  }
 0x366   : > { %p12468_p1 = scmp.ne.s32.totalorder %s13810_s3, %s12467_s29  ;;  %s12471_s15 = sshll.u32 %s12865_s28, 4  ;;  %s12472_s15 = int_to_ptr.vmem [resolvable:$false] %s12471_s15 }
 0x367   : > { %s12473_s10 = scalar_lea.vmem %s12472_s15, 65536  ;;  %p12474_p2 = scmp.lt.s32.totalorder %s13810_s3, %s12472_s15 }
 0x368   : > { %p12469_p13 = pnand %p12468_p1, %p15757_p0  ;;  %p12475_p12 = scmp.lt.s32.totalorder %s12473_s10, %s12467_s29 }
 0x36a   : > { %p12470_p10 = pneg %p12469_p13  ;;  %p12476_p5 = por %p12475_p12, %p12474_p2 }
 0x36c   : > { %p12477_p4 = pnand %p12476_p5, %p12470_p10 }
 0x36e   : > { %12480 = shalt.err (!%p12477_p4)
}
 0x36f   : > { %s12866_s8 = smov 1024   ;;  %s15784_s2 = sld [smem:[#allocation102_spill]] }
 0x370   : > { %s12867_s5 = smov 64   ;;  %s10438_s28 = sshll.u32 %s15754_s14, 8 }
 0x371   : > { %10591 = dma.hbm_to_vmem [thread:$0]  (%p15757_p0), %s13806_s18, 32768, %s13810_s3, %s13336_s27, %s12866_s8, %s12866_s8, %s12867_s5  }
 0x372   : > { %s15786_s10 = sshll.u32 %s13419_s25, 4 }
 0x373   : > { %s1454_s29 = scalar_lea.vmem [#allocation40], %s15786_s10 }
 0x374   : > { %s1462_s20 = sshll.u32 %s1454_s29, 4  ;;  %s1463_s20 = int_to_ptr.vmem [resolvable:$true] %s1462_s20 }
 0x375   : > { %s15785_s19 = smov %s15784_s2  ;;  %s13833_s15 = scalar_lea.hbm %s15784_s2, %s10438_s28 }
 0x376   : > { %s12481_s21 = scalar_lea.hbm %s13833_s15, 256  ;;  %s12485_s24 = scalar_lea.hbm %s15785_s19, 512 }
 0x377   : > { %p12482_p6 = scmp.ne.s32.totalorder %s13833_s15, %s12481_s21  ;;  %p12486_p3 = scmp.lt.u32.totalorder %s13833_s15, %s15785_s19 }
 0x378   : > { %p12487_p9 = scmp.lt.u32.totalorder %s12485_s24, %s12481_s21  ;;  %p12489_p1 = scmp.lt.u32.totalorder %s12481_s21, %s13833_s15 }
 0x379   : > { %p12483_p8 = pnand %p12482_p6, %p15757_p0 }
 0x37a   : > { %p12488_p7 = por %p12487_p9, %p12486_p3 }
 0x37b   : > { %p12484_p11 = pneg %p12483_p8 }
 0x37c   : > { %p12490_p13 = por %p12489_p1, %p12488_p7 }
 0x37e   : > { %p12491_p10 = pnand %p12490_p13, %p12484_p11 }
 0x380   : > { %12494 = shalt.err (!%p12491_p10)
}
 0x381   : > { %s12495_s5 = scalar_lea.vmem %s1463_s20, 256  ;;  %s12868_s18 = smov [#allocation40]  }
 0x382   : > { %p12496_p2 = scmp.ne.s32.totalorder %s1463_s20, %s12495_s5  ;;  %s12499_s3 = sshll.u32 %s12868_s18, 4  ;;  %s12500_s3 = int_to_ptr.vmem [resolvable:$false] %s12499_s3 }
 0x383   : > { %s12501_s8 = scalar_lea.vmem %s12500_s3, 512  ;;  %p12502_p4 = scmp.lt.s32.totalorder %s1463_s20, %s12500_s3 }
 0x384   : > { %p12497_p12 = pnand %p12496_p2, %p15757_p0  ;;  %p12503_p6 = scmp.lt.s32.totalorder %s12501_s8, %s12495_s5 }
 0x386   : > { %p12498_p5 = pneg %p12497_p12  ;;  %p12504_p8 = por %p12503_p6, %p12502_p4 }
 0x388   : > { %p12505_p3 = pnand %p12504_p8, %p12498_p5 }
 0x38a   : > { %12508 = shalt.err (!%p12505_p3)
}
 0x38b   : > { %s15787_s21 = sld [smem:[#allocation103_spill]]  ;;  %s15788_s24 = sshll.u32 %s15754_s14, 15 }
 0x38c   : > { %10592 = dma.hbm_to_vmem [thread:$0]  (%p15757_p0), %s13833_s15, 256, %s1463_s20, %s13427_s0  }
 0x38d   : > { %s15789_s28 = sshll.u32 %s13419_s25, 11 }
 0x38e   : > { %s1473_s10 = scalar_lea.vmem [#allocation41], %s15789_s28 }
 0x38f   : > { %s1480_s29 = sshll.u32 %s1473_s10, 4  ;;  %s13858_s29 = int_to_ptr.vmem [resolvable:$true] %s1480_s29 }
 0x391   : > { %s13854_s2 = scalar_lea.hbm %s15787_s21, %s15788_s24  ;;  %s12513_s18 = scalar_lea.hbm %s15787_s21, 65536 }
 0x392   : > { %s12509_s5 = scalar_lea.hbm %s13854_s2, 32768  ;;  %p12514_p1 = scmp.lt.u32.totalorder %s13854_s2, %s15787_s21 }
 0x393   : > { %p12510_p11 = scmp.ne.s32.totalorder %s13854_s2, %s12509_s5  ;;  %p12515_p13 = scmp.lt.u32.totalorder %s12513_s18, %s12509_s5 }
 0x394   : > { %p12517_p2 = scmp.lt.u32.totalorder %s12509_s5, %s13854_s2 }
 0x395   : > { %p12511_p9 = pnand %p12510_p11, %p15757_p0  ;;  %p12516_p10 = por %p12515_p13, %p12514_p1 }
 0x397   : > { %p12512_p7 = pneg %p12511_p9  ;;  %p12518_p12 = por %p12517_p2, %p12516_p10 }
 0x399   : > { %p12519_p5 = pnand %p12518_p12, %p12512_p7 }
 0x39b   : > { %12522 = shalt.err (!%p12519_p5)
}
 0x39c   : > { %s12523_s0 = scalar_lea.vmem %s13858_s29, 32768  ;;  %s12869_s25 = smov [#allocation41]  }
 0x39d   : > { %p12524_p4 = scmp.ne.s32.totalorder %s13858_s29, %s12523_s0  ;;  %s12527_s14 = sshll.u32 %s12869_s25, 4  ;;  %s12528_s14 = int_to_ptr.vmem [resolvable:$false] %s12527_s14 }
 0x39e   : > { %s12529_s20 = scalar_lea.vmem %s12528_s14, 65536  ;;  %p12530_p3 = scmp.lt.s32.totalorder %s13858_s29, %s12528_s14 }
 0x39f   : > { %p12525_p6 = pnand %p12524_p4, %p15757_p0  ;;  %p12531_p11 = scmp.lt.s32.totalorder %s12529_s20, %s12523_s0 }
 0x3a1   : > { %p12526_p8 = pneg %p12525_p6  ;;  %p12532_p9 = por %p12531_p11, %p12530_p3 }
 0x3a3   : > { %p12533_p1 = pnand %p12532_p9, %p12526_p8 }
 0x3a5   : > { %12536 = shalt.err (!%p12533_p1)
}
 0x3a6   : > { %s15790_s15 = sld [smem:[#allocation104_spill]]  ;;  %s1494_s24 = scalar_lea.vmem [#allocation42], %s13424_s30 }
 0x3a7   : > { %10593 = dma.hbm_to_vmem [thread:$0]  (%p15757_p0), %s13854_s2, 32768, %s13858_s29, %s13368_s9, %s15769_s16, %s15769_s16, %s15768_s11  }
 0x3a8   : > { %s1502_s28 = sshll.u32 %s1494_s24, 4  ;;  %s1503_s28 = int_to_ptr.vmem [resolvable:$true] %s1502_s28 }
 0x3ac   : > { %s15791_s3 = smov %s15790_s15  ;;  %s13883_s8 = scalar_lea.hbm %s15790_s15, %s13448_s12 }
 0x3ad   : > { %s12537_s10 = scalar_lea.hbm %s13883_s8, 32  ;;  %s12541_s5 = scalar_lea.hbm %s15791_s3, 64 }
 0x3ae   : > { %p12538_p7 = scmp.ne.s32.totalorder %s13883_s8, %s12537_s10  ;;  %p12542_p2 = scmp.lt.u32.totalorder %s13883_s8, %s15791_s3 }
 0x3af   : > { %p12543_p12 = scmp.lt.u32.totalorder %s12541_s5, %s12537_s10  ;;  %p12545_p4 = scmp.lt.u32.totalorder %s12537_s10, %s13883_s8 }
 0x3b0   : > { %p12539_p13 = pnand %p12538_p7, %p15757_p0 }
 0x3b1   : > { %p12544_p5 = por %p12543_p12, %p12542_p2 }
 0x3b2   : > { %p12540_p10 = pneg %p12539_p13 }
 0x3b3   : > { %p12546_p6 = por %p12545_p4, %p12544_p5 }
 0x3b5   : > { %p12547_p8 = pnand %p12546_p6, %p12540_p10 }
 0x3b7   : > { %12550 = shalt.err (!%p12547_p8)
}
 0x3b8   : > { %s12551_s9 = scalar_lea.vmem %s1503_s28, 32  ;;  %s12870_s30 = smov [#allocation42]  }
 0x3b9   : > { %p12552_p3 = scmp.ne.s32.totalorder %s1503_s28, %s12551_s9  ;;  %s12555_s12 = sshll.u32 %s12870_s30, 4  ;;  %s12556_s12 = int_to_ptr.vmem [resolvable:$false] %s12555_s12 }
 0x3ba   : > { %s12557_s11 = scalar_lea.vmem %s12556_s12, 64  ;;  %p12558_p1 = scmp.lt.s32.totalorder %s1503_s28, %s12556_s12 }
 0x3bb   : > { %p12553_p11 = pnand %p12552_p3, %p15757_p0  ;;  %p12559_p7 = scmp.lt.s32.totalorder %s12557_s11, %s12551_s9 }
 0x3bd   : > { %p12554_p9 = pneg %p12553_p11  ;;  %p12560_p13 = por %p12559_p7, %p12558_p1 }
 0x3bf   : > { %p12561_p2 = pnand %p12560_p13, %p12554_p9 }
 0x3c1   : > { %12564 = shalt.err (!%p12561_p2)
}
 0x3c2   : > { %10594 = dma.hbm_to_vmem [thread:$0]  (%p15757_p0), %s13883_s8, 32, %s1503_s28, %s13336_s27  }
 0x3c3 PF: > { %p15792_p10 = scmp.ne.s32.totalorder %s15747_s4, 0 }
 0x3c4   : > { %s1513_s16 = sand.u32 (!%p15792_p10), 1, %s13104_s23   ;;  %s13904_s2 = sand.u32 (!%p15792_p10), 1, %s12771_s7  }
 0x3c5   : > { %1511 = sbr.rel (%p15792_p10) target bundleno = 7139 (0x1be3), region = 148  ;;  %s9613_s29 = sshll.u32 (!%p15792_p10), %s13904_s2, 5 }
 0x3c6   : > { %s13907_s18 = scalar_lea.sflag (!%p15792_p10), [#allocation4], %s1513_s16  ;;  %s13911_s17 = scalar_lea.vmem (!%p15792_p10), [#allocation3], %s9613_s29 }
 0x3c7   : > { %p15793_p0 = scmp.ne.s32.totalorder (!%p15792_p10), %s15736_s6, 0 }
 0x3cc   : > { %12638 = dma.done.wait (%p15793_p0), %s13907_s18, 512  }
 0x3cd   : > { %12640 = vsyncadd (%p15793_p0), %s13907_s18, 4294966784  ;;  %s10552_s4 = smul.u32 48, %s13904_s2  ;;  %s13920_s27 = scalar_lea.sflag [#allocation7], %s1513_s16 }
 0x3cf   : > { %s13922_s0 = scalar_lea.vmem [#allocation6], %s10552_s4 }
 0x3d0   : > { %12642 = dma.done.wait (%p15793_p0), %s13920_s27, 784  }
 0x3d1   : > { %12644 = vsyncadd (%p15793_p0), %s13920_s27, 4294966512  ;;  %s13931_s14 = scalar_lea.sflag [#allocation10], %s1513_s16 }
 0x3d2   : > { %12646 = dma.done.wait (%p15793_p0), %s13931_s14, 16  }
 0x3d3   : > { %12648 = vsyncadd (%p15793_p0), %s13931_s14, 4294967280  ;;  %p15794_p12 = scmp.eq.s32.totalorder %s13104_s23, 0 }
 0x3d5   : > { %12650 = dma.done.wait (%p15794_p12), [#allocation10], 256   ;;  %p15795_p5 = pmov %p15794_p12 }
 0x3d7   : > { %12652 = vsyncadd (%p15795_p5), [#allocation10], 4294967040  ;;  %p15796_p4 = pmov %p15795_p5 }
 0x3d9   : > { %12654 = dma.done.wait (%p15796_p4), [#allocation13], 512   ;;  %p15797_p6 = pmov %p15796_p4 }
 0x3da   : > { %p15798_p8 = pmov %p15796_p4 }
 0x3db   : > { %12656 = vsyncadd (%p15797_p6), [#allocation13], 4294966784 }
 0x3dc   : > { %12658 = dma.done.wait (%p15798_p8), [#allocation16], 768   ;;  %p15799_p3 = pmov %p15796_p4 }
 0x3de   : > { %12660 = vsyncadd (%p15799_p3), [#allocation16], 4294966528  ;;  %p15800_p11 = pmov %p15799_p3 }
 0x3df   : > { %p15801_p9 = pmov %p15799_p3 }
 0x3e0   : > { %12662 = dma.done.wait (%p15800_p11), [#allocation19], 416  }
 0x3e1   : > { %12664 = vsyncadd (%p15801_p9), [#allocation19], 4294966880  ;;  %p15802_p1 = pmov %p15799_p3 }
 0x3e3   : > { %12666 = dma.done.wait (%p15802_p1), [#allocation22], 32   ;;  %p15803_p7 = pmov %p15802_p1 }
 0x3e4   : > { %s13961_s6 = sand.u32 1, %s12759_s1   ;;  %p15804_p13 = scmp.ne.s32.totalorder %s15740_s13, 0 }
 0x3e5   : > { %12668 = vsyncadd (%p15803_p7), [#allocation22], 4294967264  ;;  %s13964_s15 = sshll.u32 %s13961_s6, 1 }
 0x3e6   : > { %s1583_s8 = scalar_lea.vmem [#allocation23], %s13964_s15 }
 0x3e7   : > { %12670 = dma.done.wait (%p15804_p13), %s13907_s18, 32  }
 0x3e8   : > { %12672 = vsyncadd (%p15804_p13), %s13907_s18, 4294967264  ;;  %s1592_s23 = scalar_lea.vmem [#allocation24], %s13964_s15 }
 0x3e9   : > { %12674 = dma.done.wait (%p15804_p13), %s13920_s27, 32  }
 0x3ea   : > { %12676 = vsyncadd (%p15804_p13), %s13920_s27, 4294967264  ;;  %s10553_s24 = smul.u32 768, %s13961_s6 }
 0x3ec   : > { %s13981_s28 = scalar_lea.vmem [#allocation25], %s10553_s24 }
 0x3ed   : > { %12678 = dma.done.wait (%p15804_p13), %s13931_s14, 12288  }
 0x3ee   : > { %12680 = vsyncadd (%p15804_p13), %s13931_s14, 4294955008  ;;  %s10554_s10 = smul.u32 6, %s13961_s6 }
 0x3f0   : > { %s13990_s5 = scalar_lea.vmem [#allocation26], %s10554_s10 }
 0x3f1   : > { %12682 = dma.done.wait (%p15804_p13), %s13907_s18, 96  }
 0x3f2   : > { %12684 = vsyncadd (%p15804_p13), %s13907_s18, 4294967200  ;;  %s9624_s9 = sshll.u32 %s13961_s6, 8 }
 0x3f3   : > { %s13999_s30 = scalar_lea.vmem [#allocation27], %s9624_s9 }
 0x3f4   : > { %12686 = dma.done.wait (%p15804_p13), %s13920_s27, 4096  }
 0x3f5   : > { %12688 = vsyncadd (%p15804_p13), %s13920_s27, 4294963200 }
 0x3f6   : > { %12690 = dma.done.wait (%p15804_p13), %s13931_s14, 32  }
 0x3f7   : > { %12692 = vsyncadd (%p15804_p13), %s13931_s14, 4294967264 }
 0x3f8   : > { %12694 = dma.done.wait (%p15804_p13), %s13907_s18, 32  }
 0x3f9   : > { %12696 = vsyncadd (%p15804_p13), %s13907_s18, 4294967264 }
 0x3fa   : > { %12698 = dma.done.wait (%p15804_p13), %s13920_s27, 32  }
 0x3fb   : > { %12700 = vsyncadd (%p15804_p13), %s13920_s27, 4294967264  ;;  %s14028_s4 = scalar_lea.vmem [#allocation31], %s9624_s9 }
 0x3fc   : > { %12702 = dma.done.wait (%p15804_p13), %s13931_s14, 4096  }
 0x3fd   : > { %12704 = vsyncadd (%p15804_p13), %s13931_s14, 4294963200 }
 0x3fe   : > { %12706 = dma.done.wait (%p15804_p13), %s13907_s18, 32  }
 0x3ff   : > { %12708 = vsyncadd (%p15804_p13), %s13907_s18, 4294967264  ;;  %s9630_s10 = sshll.u32 %s13961_s6, 9 }
 0x400   : > { %s14044_s20 = scalar_lea.vmem [#allocation33], %s9630_s10 }
 0x401   : > { %12710 = dma.done.wait (%p15804_p13), %s13920_s27, 8192  }
 0x402   : > { %12712 = vsyncadd (%p15804_p13), %s13920_s27, 4294959104  ;;  %s9631_s24 = sshll.u32 %s13961_s6, 2 }
 0x403   : > { %s14053_s16 = scalar_lea.vmem [#allocation34], %s9631_s24 }
 0x404   : > { %12714 = dma.done.wait (%p15804_p13), %s13931_s14, 64  }
 0x405   : > { %12716 = vsyncadd (%p15804_p13), %s13931_s14, 4294967232  ;;  %s14061_s10 = scalar_lea.vmem [#allocation35], %s9624_s9 }
 0x406   : > { %12718 = dma.done.wait (%p15804_p13), %s13907_s18, 4096  }
 0x407   : > { %12720 = vsyncadd (%p15804_p13), %s13907_s18, 4294963200 }
 0x408   : > { %12722 = dma.done.wait (%p15804_p13), %s13920_s27, 32  }
 0x409   : > { %12724 = vsyncadd (%p15804_p13), %s13920_s27, 4294967264 }
 0x40a   : > { %12726 = dma.done.wait (%p15804_p13), %s13931_s14, 32  }
 0x40b   : > { %12728 = vsyncadd (%p15804_p13), %s13931_s14, 4294967264 }
 0x40c   : > { %12730 = dma.done.wait (%p15804_p13), %s13907_s18, 32  }
 0x40d   : > { %12732 = vsyncadd (%p15804_p13), %s13907_s18, 4294967264  ;;  %s9636_s9 = sshll.u32 %s13961_s6, 11 }
 0x40e   : > { %s14091_s11 = scalar_lea.vmem [#allocation39], %s9636_s9 }
 0x40f   : > { %12734 = dma.done.wait (%p15804_p13), %s13920_s27, 32768  }
 0x410   : > { %12736 = vsyncadd (%p15804_p13), %s13920_s27, 4294934528  ;;  %s9637_s24 = sshll.u32 %s13961_s6, 4 }
 0x411   : > { %s14100_s12 = scalar_lea.vmem [#allocation40], %s9637_s24 }
 0x412   : > { %12738 = dma.done.wait (%p15804_p13), %s13931_s14, 256  }
 0x413   : > { %12740 = vsyncadd (%p15804_p13), %s13931_s14, 4294967040  ;;  %s14108_s25 = scalar_lea.vmem [#allocation41], %s9636_s9 }
 0x414   : > { %12742 = dma.done.wait (%p15804_p13), %s13907_s18, 32768  }
 0x415   : > { %12744 = vsyncadd (%p15804_p13), %s13907_s18, 4294934528  ;;  %s1754_s6 = scalar_lea.vmem [#allocation42], %s13964_s15 }
 0x416   : > { %12746 = dma.done.wait (%p15804_p13), %s13920_s27, 32  }
 0x417   : > { %12748 = vsyncadd (%p15804_p13), %s13920_s27, 4294967264  ;;  %s14125_s14 = scalar_lea.vmem [#allocation43], %s9613_s29  ;;  %s15805_s24 = sld [smem:[#allocation109_spill]] }
 0x41d   : > { %p9641_p2 = scmp.ne.s32.totalorder %s15805_s24, 0 }
 0x41e   : > { %v1953_v0 = vld [vmem:[%s13911_s17] sm:$0xff] (!%p9641_p2)  ;;  %v1954_v1 = vld [vmem:[%s13911_s17 + $0x8] sm:$0xff] (!%p9641_p2)  ;;  %v1955_v2 = vld [vmem:[%s13911_s17 + $0x10] sm:$0xff] (!%p9641_p2) }
 0x41f   : > { %1952 = sbr.rel (%p9641_p2) target bundleno = 1062 (0x426), region = 280  ;;  %1957 = vst [vmem:[#allocation2] sm:$0xff] (!%p9641_p2), %v1953_v0  ;;  %1958 = vst [vmem:[#allocation2 + $0x8] sm:$0xff] (!%p9641_p2), %v1954_v1  ;;  %v1956_v3 = vld [vmem:[%s13911_s17 + $0x18] sm:$0xff] (!%p9641_p2) }
 0x420   : > { %1959 = vst [vmem:[#allocation2 + $0x10] sm:$0xff] (!%p9641_p2), %v1955_v2  ;;  %1960 = vst [vmem:[#allocation2 + $0x18] sm:$0xff] (!%p9641_p2), %v1956_v3 }
 0x426 PF: > { %v1961_v4 = vld [vmem:[#allocation2] sm:$0xff]  ;;  %v1962_v5 = vld [vmem:[#allocation2 + $0x8] sm:$0xff]  ;;  %v10830_v12 = vld [vmem:[%s13981_s28 + $0x34] ss:$24 sps:$4 sm:$0xff]   ;;  %s12871_s13 = smov 1   ;;  %s12872_s29 = smov 127  }
 0x427   : > { %v1963_v6 = vld [vmem:[#allocation2 + $0x10] sm:$0xff]  ;;  %v1984_v7 = vadd.f32 %v1962_v5, %v1961_v4  ;;  %v1964_v8 = vld [vmem:[#allocation2 + $0x18] sm:$0xff]  ;;  %v10827_v10 = vld [vmem:[%s13981_s28 + $0x4] ss:$24 sps:$4 sm:$0xff]   ;;  %vm12874_vm4 = vmmov 0   ;;  %s15806_s18 = scalar_lea.vmem [#allocation8], %s13904_s2 }
 0x428   : > { %v1987_v9 = vadd.f32 %v1964_v8, %v1963_v6  ;;  %v10829_v11 = vld [vmem:[%s13981_s28] ss:$24 sps:$4 sm:$0xff]   ;;  %2671 = vmatprep.subr.bf16.mxu1 %v10827_v10  ;;  %v10832_v13 = vld [vmem:[%s13981_s28 + $0x30] ss:$24 sps:$4 sm:$0xff]   ;;  %v10833_v14 = vld [vmem:[%s13981_s28 + $0x64] ss:$24 sps:$4 sm:$0xff]  }
 0x429   : > { %1985 = vadd.xlane.f32.xlu0 %v1984_v7  ;;  %2672 = vmatpush1.bf16.msra.mxu1 %v10829_v11  ;;  %v10835_v15 = vld [vmem:[%s13981_s28 + $0x60] ss:$24 sps:$4 sm:$0xff]   ;;  %v10836_v16 = vld [vmem:[%s13981_s28 + $0x94] ss:$24 sps:$4 sm:$0xff]   ;;  %v10838_v17 = vld [vmem:[%s13981_s28 + $0x90] ss:$24 sps:$4 sm:$0xff]  }
 0x42a   : > { %2673 = vmatprep.subr.bf16.mxu1 %v10830_v12  ;;  %v10839_v18 = vld [vmem:[%s13981_s28 + $0xc4] ss:$24 sps:$4 sm:$0xff]   ;;  %v10841_v19 = vld [vmem:[%s13981_s28 + $0xc0] ss:$24 sps:$4 sm:$0xff]   ;;  %v10842_v20 = vld [vmem:[%s13981_s28 + $0xf4] ss:$24 sps:$4 sm:$0xff]  }
 0x42b   : > { %v10844_v21 = vld [vmem:[%s13981_s28 + $0xf0] ss:$24 sps:$4 sm:$0xff]   ;;  %v10845_v36 = vld [vmem:[%s13981_s28 + $0x124] ss:$24 sps:$4 sm:$0xff]   ;;  %v10847_v37 = vld [vmem:[%s13981_s28 + $0x120] ss:$24 sps:$4 sm:$0xff]  }
 0x42c   : > { %v10848_v38 = vld [vmem:[%s13981_s28 + $0x154] ss:$24 sps:$4 sm:$0xff]   ;;  %v10850_v39 = vld [vmem:[%s13981_s28 + $0x150] ss:$24 sps:$4 sm:$0xff]   ;;  %v10851_v40 = vld [vmem:[%s13981_s28 + $0x184] ss:$24 sps:$4 sm:$0xff]  }
 0x42d   : > { %1988 = vadd.xlane.f32.xlu0 %v1987_v9  ;;  %2674 = vmatpush1.bf16.msra.mxu1 %v10832_v13  ;;  %v10853_v41 = vld [vmem:[%s13981_s28 + $0x180] ss:$24 sps:$4 sm:$0xff]   ;;  %v10854_v42 = vld [vmem:[%s13981_s28 + $0x1b4] ss:$24 sps:$4 sm:$0xff]   ;;  %v10856_v43 = vld [vmem:[%s13981_s28 + $0x1b0] ss:$24 sps:$4 sm:$0xff]  }
 0x42e   : > { %2675 = vmatprep.subr.bf16.mxu1 %v10833_v14  ;;  %v10857_v44 = vld [vmem:[%s13981_s28 + $0x1e4] ss:$24 sps:$4 sm:$0xff]   ;;  %v10859_v45 = vld [vmem:[%s13981_s28 + $0x1e0] ss:$24 sps:$4 sm:$0xff]   ;;  %v10860_v46 = vld [vmem:[%s13981_s28 + $0x214] ss:$24 sps:$4 sm:$0xff]  }
 0x42f   : > { %v10862_v47 = vld [vmem:[%s13981_s28 + $0x210] ss:$24 sps:$4 sm:$0xff]   ;;  %v10863_v48 = vld [vmem:[%s13981_s28 + $0x244] ss:$24 sps:$4 sm:$0xff]   ;;  %v10865_v49 = vld [vmem:[%s13981_s28 + $0x240] ss:$24 sps:$4 sm:$0xff]  }
 0x430   : > { %v10866_v50 = vld [vmem:[%s13981_s28 + $0x274] ss:$24 sps:$4 sm:$0xff]   ;;  %v10868_v51 = vld [vmem:[%s13981_s28 + $0x270] ss:$24 sps:$4 sm:$0xff]   ;;  %v10869_v52 = vld [vmem:[%s13981_s28 + $0x2a4] ss:$24 sps:$4 sm:$0xff]  }
 0x431   : > { %2676 = vmatpush1.bf16.msra.mxu1 %v10835_v15  ;;  %v10871_v53 = vld [vmem:[%s13981_s28 + $0x2a0] ss:$24 sps:$4 sm:$0xff]   ;;  %v10872_v54 = vld [vmem:[%s13981_s28 + $0x2d4] ss:$24 sps:$4 sm:$0xff]   ;;  %v10874_v55 = vld [vmem:[%s13981_s28 + $0x2d0] ss:$24 sps:$4 sm:$0xff]  }
 0x432   : > { %2677 = vmatprep.subr.bf16.mxu1 %v10836_v16  ;;  %v10877_v56 = vld [vmem:[%s13981_s28 + $0xc] ss:$24 sps:$4 sm:$0xff]   ;;  %v1982_v13 = vld [vmem:[%s1583_s8] sm:$0x3]  ;;  %v1983_v15 = vld [vmem:[%s1592_s23] sm:$0x3] }
 0x433   : > { %vm2886_vm5 = vcmask 130048   ;;  %s15807_s17 = scalar_lea.vmem [#allocation28], %s13964_s15  ;;  %s15808_s27 = scalar_lea.vmem [#allocation29], %s13964_s15  ;;  %vm4327_vm10 = vcmask 1043456   ;;  %vm4300_vm11 = vcmask 195584  }
 0x434   : > { %s15811_s8 = scalar_lea.vmem [#allocation9], %s13904_s2  ;;  %s15812_s23 = scalar_lea.vmem [#allocation36], %s13964_s15 }
 0x435   : > { %2678 = vmatpush1.bf16.msra.mxu1 %v10838_v17 }
 0x436   : > { %2679 = vmatprep.subr.bf16.mxu1 %v10839_v18 }
 0x439   : > { %2680 = vmatpush1.bf16.msra.mxu1 %v10841_v19 }
 0x43a   : > { %2681 = vmatprep.subr.bf16.mxu1 %v10842_v20 }
 0x43d   : > { %2682 = vmatpush1.bf16.msra.mxu1 %v10844_v21 }
 0x43e   : > { %2683 = vmatprep.subr.bf16.mxu1 %v10845_v36  ;;  %v10875_v36 = vld [vmem:[%s13981_s28 + $0x8] ss:$24 sps:$4 sm:$0xff]  }
 0x441   : > { %2684 = vmatpush1.bf16.msra.mxu1 %v10847_v37 }
 0x442   : > { %2685 = vmatprep.subr.bf16.mxu1 %v10848_v38  ;;  %v10883_v38 = vld [vmem:[%s13981_s28 + $0x6c] ss:$24 sps:$4 sm:$0xff]  }
 0x445   : > { %2686 = vmatpush1.bf16.msra.mxu1 %v10850_v39  ;;  %v10881_v39 = vld [vmem:[%s13981_s28 + $0x68] ss:$24 sps:$4 sm:$0xff]  }
 0x446   : > { %2687 = vmatprep.subr.bf16.mxu1 %v10851_v40  ;;  %v10886_v40 = vld [vmem:[%s13981_s28 + $0x9c] ss:$24 sps:$4 sm:$0xff]  }
 0x449   : > { %2688 = vmatpush1.bf16.msra.mxu1 %v10853_v41  ;;  %v10884_v41 = vld [vmem:[%s13981_s28 + $0x98] ss:$24 sps:$4 sm:$0xff]  }
 0x44a   : > { %2689 = vmatprep.subr.bf16.mxu1 %v10854_v42  ;;  %v10889_v42 = vld [vmem:[%s13981_s28 + $0xcc] ss:$24 sps:$4 sm:$0xff]  }
 0x44d   : > { %2690 = vmatpush1.bf16.msra.mxu1 %v10856_v43  ;;  %v10887_v43 = vld [vmem:[%s13981_s28 + $0xc8] ss:$24 sps:$4 sm:$0xff]  }
 0x44e   : > { %2691 = vmatprep.subr.bf16.mxu1 %v10857_v44  ;;  %v10892_v44 = vld [vmem:[%s13981_s28 + $0xfc] ss:$24 sps:$4 sm:$0xff]  }
 0x451   : > { %2692 = vmatpush1.bf16.msra.mxu1 %v10859_v45  ;;  %v10890_v45 = vld [vmem:[%s13981_s28 + $0xf8] ss:$24 sps:$4 sm:$0xff]  }
 0x452   : > { %2693 = vmatprep.subr.bf16.mxu1 %v10860_v46  ;;  %v10895_v46 = vld [vmem:[%s13981_s28 + $0x12c] ss:$24 sps:$4 sm:$0xff]  }
 0x455   : > { %2694 = vmatpush1.bf16.msra.mxu1 %v10862_v47  ;;  %v10893_v47 = vld [vmem:[%s13981_s28 + $0x128] ss:$24 sps:$4 sm:$0xff]  }
 0x456   : > { %2695 = vmatprep.subr.bf16.mxu1 %v10863_v48  ;;  %v10898_v48 = vld [vmem:[%s13981_s28 + $0x15c] ss:$24 sps:$4 sm:$0xff]  }
 0x459   : > { %2696 = vmatpush1.bf16.msra.mxu1 %v10865_v49  ;;  %v10896_v49 = vld [vmem:[%s13981_s28 + $0x158] ss:$24 sps:$4 sm:$0xff]  }
 0x45a   : > { %2697 = vmatprep.subr.bf16.mxu1 %v10866_v50  ;;  %v10901_v50 = vld [vmem:[%s13981_s28 + $0x18c] ss:$24 sps:$4 sm:$0xff]  }
 0x45d   : > { %2698 = vmatpush1.bf16.msra.mxu1 %v10868_v51  ;;  %v10899_v51 = vld [vmem:[%s13981_s28 + $0x188] ss:$24 sps:$4 sm:$0xff]  }
 0x45e   : > { %2699 = vmatprep.subr.bf16.mxu1 %v10869_v52  ;;  %v10904_v52 = vld [vmem:[%s13981_s28 + $0x1bc] ss:$24 sps:$4 sm:$0xff]  }
 0x461   : > { %2700 = vmatpush1.bf16.msra.mxu1 %v10871_v53  ;;  %v10902_v53 = vld [vmem:[%s13981_s28 + $0x1b8] ss:$24 sps:$4 sm:$0xff]  }
 0x462   : > { %2701 = vmatprep.subr.bf16.mxu1 %v10872_v54  ;;  %v10907_v54 = vld [vmem:[%s13981_s28 + $0x1ec] ss:$24 sps:$4 sm:$0xff]  }
 0x465   : > { %2702 = vmatpush1.bf16.msra.mxu1 %v10874_v55  ;;  %v10905_v55 = vld [vmem:[%s13981_s28 + $0x1e8] ss:$24 sps:$4 sm:$0xff]  }
 0x466   : > { %2714 = vmatprep.subr.bf16.mxu1 %v10877_v56  ;;  %v10910_v56 = vld [vmem:[%s13981_s28 + $0x21c] ss:$24 sps:$4 sm:$0xff]  }
 0x4b6   : > { %v1986_v22 = vpop.xlane.xlu0 %1985 }
 0x4b7   : > { %v1991_v23 = vmul.f32 0.00390625, %v1986_v22 }
 0x4b9   : > { %v14144_v24 = vsub.f32 %v1961_v4, %v1991_v23  ;;  %v14146_v25 = vsub.f32 %v1962_v5, %v1991_v23 }
 0x4ba   : > { %v1989_v26 = vpop.xlane.xlu0 %1988 }
 0x4bb   : > { %v1992_v27 = vmul.f32 0.00390625, %v1989_v26  ;;  %v1997_v28 = vmul.f32 %v14144_v24, %v14144_v24  ;;  %v1998_v29 = vmul.f32 %v14146_v25, %v14146_v25 }
 0x4bd   : > { %v14152_v30 = vsub.f32 %v1963_v6, %v1992_v27  ;;  %v14154_v31 = vsub.f32 %v1964_v8, %v1992_v27  ;;  %v2001_v32 = vadd.f32 %v1998_v29, %v1997_v28  ;;  %v2032_v6 = vlaneseq }
 0x4bf   : > { %2002 = vadd.xlane.f32.xlu1 %v2001_v32  ;;  %v1999_v33 = vmul.f32 %v14152_v30, %v14152_v30  ;;  %v2000_v34 = vmul.f32 %v14154_v31, %v14154_v31  ;;  %v14181_v10 = vshrl.u32 %v2032_v6, 7  ;;  %v10931_v6 = vld [vmem:[%s13981_s28 + $0x74] ss:$24 sps:$4 sm:$0xff]  }
 0x4c1   : > { %v2004_v35 = vadd.f32 %v2000_v34, %v1999_v33  ;;  %v14184_v11 = vsub.s32 1, %v14181_v10  ;;  %v14187_v12 = vsub.s32 0, %v14181_v10 }
 0x4c3   : > { %2005 = vadd.xlane.f32.xlu1 %v2004_v35  ;;  %v2039_v17 = vrot.slane %v1982_v13, %v14184_v11  ;;  %v2035_v19 = vrot.slane %v1982_v13, %v14187_v12  ;;  %v2054_v21 = vrot.slane %v1983_v15, %v14184_v11  ;;  %v2050_v22 = vrot.slane %v1983_v15, %v14187_v12  ;;  %v10937_v13 = vld [vmem:[%s13981_s28 + $0xd4] ss:$24 sps:$4 sm:$0xff]   ;;  %v10940_v15 = vld [vmem:[%s13981_s28 + $0x104] ss:$24 sps:$4 sm:$0xff]  }
 0x54c   : > { %v2003_v57 = vpop.xlane.xlu1 %2002 }
 0x54d   : > { %v2007_v58 = vmul.f32 0.003921569, %v2003_v57  ;;  %v10908_v57 = vld [vmem:[%s13981_s28 + $0x218] ss:$24 sps:$4 sm:$0xff]  }
 0x54f   : > { %11595 = vrsqrt.f32 %v2007_v58  ;;  %vm2011_vm0 = vcmp.eq.f32.partialorder %v2007_v58, inf  ;;  %v2014_v63 = vand.u32 2147483648, %v2007_v58  ;;  %vm2013_vm1 = vcmp.eq.f32.partialorder %v2007_v58, 0.0 }
 0x550   : > { %v2006_v59 = vpop.xlane.xlu1 %2005 }
 0x551   : > { %v2008_v60 = vmul.f32 0.003921569, %v2006_v59  ;;  %v10911_v59 = vld [vmem:[%s13981_s28 + $0x248] ss:$24 sps:$4 sm:$0xff]  }
 0x553   : > { %11597 = vrsqrt.f32 %v2008_v60  ;;  %vm2018_vm2 = vcmp.eq.f32.partialorder %v2008_v60, inf  ;;  %v2021_v5 = vand.u32 2147483648, %v2008_v60  ;;  %vm2020_vm3 = vcmp.eq.f32.partialorder %v2008_v60, 0.0 }
 0x559   : > { %v11596_v61 = vpop.eup %11595 }
 0x55a   : > { %v2010_v62 = vmul.f32 %v11596_v61, %v2007_v58  ;;  %v10914_v61 = vld [vmem:[%s13981_s28 + $0x278] ss:$24 sps:$4 sm:$0xff]  }
 0x55c   : > { %v2012_v0 = vsel %vm2011_vm0, %v2007_v58, %v2010_v62  ;;  %v10913_v58 = vld [vmem:[%s13981_s28 + $0x24c] ss:$24 sps:$4 sm:$0xff]  }
 0x55d   : > { %v11598_v1 = vpop.eup %11597  ;;  %v2015_v2 = vsel %vm2013_vm1, %v2014_v63, %v2012_v0  ;;  %v10919_v62 = vld [vmem:[%s13981_s28 + $0x2ac] ss:$24 sps:$4 sm:$0xff]   ;;  %v10917_v63 = vld [vmem:[%s13981_s28 + $0x2a8] ss:$24 sps:$4 sm:$0xff]   ;;  %v10922_v0 = vld [vmem:[%s13981_s28 + $0x2dc] ss:$24 sps:$4 sm:$0xff]  }
 0x55e   : > { %v2023_v3 = vadd.f32 1e-06, %v2015_v2  ;;  %v2017_v4 = vmul.f32 %v11598_v1, %v2008_v60  ;;  %v10920_v1 = vld [vmem:[%s13981_s28 + $0x2d8] ss:$24 sps:$4 sm:$0xff]   ;;  %v10925_v2 = vld [vmem:[%s13981_s28 + $0x14] ss:$24 sps:$4 sm:$0xff]  }
 0x560   : > { %v2019_v7 = vsel %vm2018_vm2, %v2008_v60, %v2017_v4  ;;  %11599 = vrcp.f32 %v2023_v3  ;;  %v10916_v60 = vld [vmem:[%s13981_s28 + $0x27c] ss:$24 sps:$4 sm:$0xff]   ;;  %v10923_v3 = vld [vmem:[%s13981_s28 + $0x10] ss:$24 sps:$4 sm:$0xff]  }
 0x561   : > { %v2022_v8 = vsel %vm2020_vm3, %v2021_v5, %v2019_v7  ;;  %v10928_v4 = vld [vmem:[%s13981_s28 + $0x44] ss:$24 sps:$4 sm:$0xff]   ;;  %v10926_v5 = vld [vmem:[%s13981_s28 + $0x40] ss:$24 sps:$4 sm:$0xff]   ;;  %v10929_v7 = vld [vmem:[%s13981_s28 + $0x70] ss:$24 sps:$4 sm:$0xff]  }
 0x562   : > { %v2024_v9 = vadd.f32 1e-06, %v2022_v8  ;;  %v10934_v8 = vld [vmem:[%s13981_s28 + $0xa4] ss:$24 sps:$4 sm:$0xff]  }
 0x564   : > { %11601 = vrcp.f32 %v2024_v9  ;;  %v10932_v9 = vld [vmem:[%s13981_s28 + $0xa0] ss:$24 sps:$4 sm:$0xff]  }
 0x56a   : > { %v11600_v14 = vpop.eup %11599 }
 0x56b   : > { %v2027_v16 = vmul.f32 %v11600_v14, %v14146_v25  ;;  %v2026_v18 = vmul.f32 %v11600_v14, %v14144_v24  ;;  %v10935_v14 = vld [vmem:[%s13981_s28 + $0xd0] ss:$24 sps:$4 sm:$0xff]  }
 0x56d   : > { %v2043_v26 = vmul.f32 %v2039_v17, %v2027_v16  ;;  %v2042_v25 = vmul.f32 %v2035_v19, %v2026_v18  ;;  %v10938_v16 = vld [vmem:[%s13981_s28 + $0x100] ss:$24 sps:$4 sm:$0xff]   ;;  %v10941_v18 = vld [vmem:[%s13981_s28 + $0x130] ss:$24 sps:$4 sm:$0xff]  }
 0x56e   : > { %v11602_v20 = vpop.eup %11601 }
 0x56f   : > { %v2030_v23 = vmul.f32 %v11602_v20, %v14154_v31  ;;  %v2029_v27 = vmul.f32 %v11602_v20, %v14152_v30  ;;  %v2058_v24 = vadd.f32 %v2054_v21, %v2043_v26  ;;  %v2057_v33 = vadd.f32 %v2050_v22, %v2042_v25  ;;  %v10880_v31 = vld [vmem:[%s13981_s28 + $0x3c] ss:$24 sps:$4 sm:$0xff]   ;;  %v10878_v30 = vld [vmem:[%s13981_s28 + $0x38] ss:$24 sps:$4 sm:$0xff]  }
 0x570   : > { %v10944_v20 = vld [vmem:[%s13981_s28 + $0x160] ss:$24 sps:$4 sm:$0xff]   ;;  %v10953_v25 = vld [vmem:[%s13981_s28 + $0x1f0] ss:$24 sps:$4 sm:$0xff]  }
 0x571   : > { %v2045_v28 = vmul.f32 %v2039_v17, %v2030_v23  ;;  %v2044_v29 = vmul.f32 %v2035_v19, %v2029_v27  ;;  %v10943_v17 = vld [vmem:[%s13981_s28 + $0x134] ss:$24 sps:$4 sm:$0xff]   ;;  %v10946_v19 = vld [vmem:[%s13981_s28 + $0x164] ss:$24 sps:$4 sm:$0xff]   ;;  %v10950_v26 = vld [vmem:[%s13981_s28 + $0x1c0] ss:$24 sps:$4 sm:$0xff]  }
 0x572   : > { %v10952_v23 = vld [vmem:[%s13981_s28 + $0x1c4] ss:$24 sps:$4 sm:$0xff]   ;;  %v10955_v27 = vld [vmem:[%s13981_s28 + $0x1f4] ss:$24 sps:$4 sm:$0xff]  }
 0x573   : > { %v2060_v32 = vadd.f32 %v2054_v21, %v2045_v28  ;;  %v2059_v34 = vadd.f32 %v2050_v22, %v2044_v29  ;;  %v10949_v21 = vld [vmem:[%s13981_s28 + $0x194] ss:$24 sps:$4 sm:$0xff]   ;;  %v10947_v22 = vld [vmem:[%s13981_s28 + $0x190] ss:$24 sps:$4 sm:$0xff]   ;;  %v10958_v28 = vld [vmem:[%s13981_s28 + $0x224] ss:$24 sps:$4 sm:$0xff]  }
 0x574   : > { %v10956_v29 = vld [vmem:[%s13981_s28 + $0x220] ss:$24 sps:$4 sm:$0xff]  }
 0x575   : > { %v14201_v35 = vpack.c.bf16 %v2060_v32, %v2058_v24  ;;  %v14204_v37 = vpack.c.bf16 %v2059_v34, %v2057_v33  ;;  %v10961_v24 = vld [vmem:[%s13981_s28 + $0x254] ss:$24 sps:$4 sm:$0xff]   ;;  %v10959_v32 = vld [vmem:[%s13981_s28 + $0x250] ss:$24 sps:$4 sm:$0xff]   ;;  %v10964_v33 = vld [vmem:[%s13981_s28 + $0x284] ss:$24 sps:$4 sm:$0xff]  }
 0x576   : > { %v10962_v34 = vld [vmem:[%s13981_s28 + $0x280] ss:$24 sps:$4 sm:$0xff]  }
 0x577   : > { %2703 = vmatprep.mubr.bf16.mxu1 %v14201_v35 }
 0x578   : > { %2704 = vmatmul.mubr.bf16.vlgmr.msra.gmra.mrb[0].mxu1 %v14204_v37 }
 0x579   : > { %2715 = vmatpush1.bf16.msra.mxu1 %v10875_v36  ;;  %2746 = vmatprep.mubr.bf16.mxu1 %v14201_v35  ;;  %v10965_v36 = vld [vmem:[%s13981_s28 + $0x2b0] ss:$24 sps:$4 sm:$0xff]  }
 0x57a   : > { %2716 = vmatprep.subr.bf16.mxu1 %v10880_v31  ;;  %v10970_v31 = vld [vmem:[%s13981_s28 + $0x2e4] ss:$24 sps:$4 sm:$0xff]  }
 0x57d   : > { %2717 = vmatpush1.bf16.msra.mxu1 %v10878_v30  ;;  %v10968_v30 = vld [vmem:[%s13981_s28 + $0x2e0] ss:$24 sps:$4 sm:$0xff]  }
 0x57e   : > { %2718 = vmatprep.subr.bf16.mxu1 %v10883_v38 }
 0x581   : > { %2719 = vmatpush1.bf16.msra.mxu1 %v10881_v39 }
 0x582   : > { %2720 = vmatprep.subr.bf16.mxu1 %v10886_v40 }
 0x585   : > { %2721 = vmatpush1.bf16.msra.mxu1 %v10884_v41 }
 0x586   : > { %2722 = vmatprep.subr.bf16.mxu1 %v10889_v42  ;;  %v14279_v42 = vsub.s32 2, %v14181_v10 }
 0x589   : > { %2723 = vmatpush1.bf16.msra.mxu1 %v10887_v43  ;;  %v14282_v43 = vld [vmem:[%s13990_s5] sm:$0x3f]  ;;  %s15814_s5 = scalar_lea.vmem [#allocation38], %s13964_s15 }
 0x58a   : > { %2724 = vmatprep.subr.bf16.mxu1 %v10892_v44  ;;  %v2172_v44 = vrot.slane %v14282_v43, %v14279_v42 }
 0x58d   : > { %2725 = vmatpush1.bf16.msra.mxu1 %v10890_v45 }
 0x58e   : > { %2726 = vmatprep.subr.bf16.mxu1 %v10895_v46  ;;  %v2164_v46 = vrot.slane %v14282_v43, %v14187_v12 }
 0x591   : > { %2727 = vmatpush1.bf16.msra.mxu1 %v10893_v47 }
 0x592   : > { %2728 = vmatprep.subr.bf16.mxu1 %v10898_v48 }
 0x595   : > { %2729 = vmatpush1.bf16.msra.mxu1 %v10896_v49 }
 0x596   : > { %2730 = vmatprep.subr.bf16.mxu1 %v10901_v50  ;;  %v12873_v50 = vmov 0.0  }
 0x599   : > { %2731 = vmatpush1.bf16.msra.mxu1 %v10899_v51 }
 0x59a   : > { %2732 = vmatprep.subr.bf16.mxu1 %v10904_v52 }
 0x59d   : > { %2733 = vmatpush1.bf16.msra.mxu1 %v10902_v53 }
 0x59e   : > { %2734 = vmatprep.subr.bf16.mxu1 %v10907_v54  ;;  %v14304_v54 = vsub.s32 4, %v14181_v10 }
 0x5a1   : > { %2735 = vmatpush1.bf16.msra.mxu1 %v10905_v55  ;;  %v14307_v55 = vsub.s32 5, %v14181_v10 }
 0x5a2   : > { %2736 = vmatprep.subr.bf16.mxu1 %v10910_v56  ;;  %v2180_v56 = vrot.slane %v14282_v43, %v14304_v54 }
 0x5a5   : > { %2737 = vmatpush1.bf16.msra.mxu1 %v10908_v57 }
 0x5a6   : > { %2738 = vmatprep.subr.bf16.mxu1 %v10913_v58  ;;  %v2184_v58 = vrot.slane %v14282_v43, %v14307_v55 }
 0x5a9   : > { %2739 = vmatpush1.bf16.msra.mxu1 %v10911_v59 }
 0x5aa   : > { %2740 = vmatprep.subr.bf16.mxu1 %v10916_v60 }
 0x5ad   : > { %2741 = vmatpush1.bf16.msra.mxu1 %v10914_v61 }
 0x5ae   : > { %2742 = vmatprep.subr.bf16.mxu1 %v10919_v62 }
 0x5b1   : > { %2743 = vmatpush1.bf16.msra.mxu1 %v10917_v63 }
 0x5b2   : > { %2744 = vmatprep.subr.bf16.mxu1 %v10922_v0 }
 0x5b5   : > { %2745 = vmatpush1.bf16.msra.mxu1 %v10920_v1 }
 0x5b6   : > { %2757 = vmatprep.subr.bf16.mxu1 %v10925_v2 }
 0x5b8   : > { %2747 = vmatmul.mubr.bf16.vlgmr.msra.gmra.mrb[4].mxu1 %v14204_v37 }
 0x5b9   : > { %2758 = vmatpush1.bf16.msra.mxu1 %v10923_v3  ;;  %2789 = vmatprep.mubr.bf16.mxu1 %v14201_v35  ;;  %v10967_v35 = vld [vmem:[%s13981_s28 + $0x2b4] ss:$24 sps:$4 sm:$0xff]   ;;  %s15813_s28 = scalar_lea.vmem [#allocation37], %s13964_s15 }
 0x5ba   : > { %2759 = vmatprep.subr.bf16.mxu1 %v10928_v4 }
 0x5bd   : > { %2760 = vmatpush1.bf16.msra.mxu1 %v10926_v5  ;;  %v14319_v5 = vld [vmem:[#allocation12] sm:$0xff] }
 0x5be   : > { %2761 = vmatprep.subr.bf16.mxu1 %v10931_v6 }
 0x5c1   : > { %2762 = vmatpush1.bf16.msra.mxu1 %v10929_v7  ;;  %v14321_v7 = vld [vmem:[#allocation12 + $0x8] sm:$0xff] }
 0x5c2   : > { %2763 = vmatprep.subr.bf16.mxu1 %v10934_v8 }
 0x5c5   : > { %2764 = vmatpush1.bf16.msra.mxu1 %v10932_v9  ;;  %v14324_v9 = vld [vmem:[#allocation11] sm:$0xff] }
 0x5c6   : > { %2765 = vmatprep.subr.bf16.mxu1 %v10937_v13 }
 0x5c9   : > { %2766 = vmatpush1.bf16.msra.mxu1 %v10935_v14 }
 0x5ca   : > { %2767 = vmatprep.subr.bf16.mxu1 %v10940_v15 }
 0x5cd   : > { %2768 = vmatpush1.bf16.msra.mxu1 %v10938_v16  ;;  %v14328_v16 = vld [vmem:[#allocation14] sm:$0xff] }
 0x5ce   : > { %2769 = vmatprep.subr.bf16.mxu1 %v10943_v17  ;;  %v14330_v17 = vld [vmem:[#allocation11 + $0x8] sm:$0xff] }
 0x5d1   : > { %2770 = vmatpush1.bf16.msra.mxu1 %v10941_v18 }
 0x5d2   : > { %2771 = vmatprep.subr.bf16.mxu1 %v10946_v19  ;;  %v14332_v19 = vld [vmem:[#allocation14 + $0x8] sm:$0xff] }
 0x5d5   : > { %2772 = vmatpush1.bf16.msra.mxu1 %v10944_v20 }
 0x5d6   : > { %2773 = vmatprep.subr.bf16.mxu1 %v10949_v21 }
 0x5d9   : > { %2774 = vmatpush1.bf16.msra.mxu1 %v10947_v22 }
 0x5da   : > { %2775 = vmatprep.subr.bf16.mxu1 %v10952_v23 }
 0x5dd   : > { %2776 = vmatpush1.bf16.msra.mxu1 %v10950_v26 }
 0x5de   : > { %2777 = vmatprep.subr.bf16.mxu1 %v10955_v27 }
 0x5e1   : > { %2778 = vmatpush1.bf16.msra.mxu1 %v10953_v25 }
 0x5e2   : > { %2779 = vmatprep.subr.bf16.mxu1 %v10958_v28 }
 0x5e5   : > { %2780 = vmatpush1.bf16.msra.mxu1 %v10956_v29 }
 0x5e6   : > { %2781 = vmatprep.subr.bf16.mxu1 %v10961_v24 }
 0x5e9   : > { %2782 = vmatpush1.bf16.msra.mxu1 %v10959_v32 }
 0x5ea   : > { %2783 = vmatprep.subr.bf16.mxu1 %v10964_v33 }
 0x5ed   : > { %2784 = vmatpush1.bf16.msra.mxu1 %v10962_v34 }
 0x5ee   : > { %2785 = vmatprep.subr.bf16.mxu1 %v10967_v35 }
 0x5f1   : > { %2786 = vmatpush1.bf16.msra.mxu1 %v10965_v36 }
 0x5f2   : > { %2787 = vmatprep.subr.bf16.mxu1 %v10970_v31 }
 0x5f5   : > { %2788 = vmatpush1.bf16.msra.mxu1 %v10968_v30 }
 0x5f6   : > { %10462 = vmatprep.subr.bf16.mxu1 %v12873_v50 }
 0x5f8   : > { %2790 = vmatmul.mubr.bf16.vlgmr.msra.gmra.mrb[8].mxu1 %v14204_v37 }
 0x5f9   : > { %10464 = vmatprep.mubr.msk.bf16.mxu1 %vm12874_vm4, %v12873_v50 }
 0x64b   : > { %v2705_v38 = vpop.f32.mrb[0].mxu1 }
 0x64c   : > { %v14274_v39 = vpop.f32.mrb[1].mxu1  ;;  %v2706_v51 = vadd.f32 %v2705_v38, %v2164_v46 }
 0x64d   : > { %v2709_v40 = vpop.f32.mrb[2].mxu1 }
 0x64e   : > { %v14276_v41 = vpop.f32.mrb[3].mxu1  ;;  %v2710_v53 = vadd.f32 %v2709_v40, %v2164_v46  ;;  %v2808_v35 = vmul.f32 %v2706_v51, %v14324_v9 }
 0x650   : > { %v2809_v31 = vmul.f32 %v2710_v53, %v14330_v17 }
 0x68b   : > { %v2748_v45 = vpop.f32.mrb[4].mxu1 }
 0x68c   : > { %v2749_v47 = vadd.f32 %v2748_v45, %v2172_v44  ;;  %v14288_v37 = vpop.f32.mrb[5].mxu1 }
 0x68d   : > { %v2752_v48 = vpop.f32.mrb[6].mxu1 }
 0x68e   : > { %v14290_v49 = vpop.f32.mrb[7].mxu1  ;;  %2822 = vrot.lane.b32.xlu1 %v2749_v47, %s12871_s13  ;;  %2818 = vrot.lane.b32.xlu0 %v2749_v47, %s12872_s29  ;;  %v2753_v52 = vadd.f32 %v2752_v48, %v2172_v44  ;;  %v2826_v14 = vmul.f32 %v2749_v47, %v14324_v9  ;;  %v14349_v48 = vld [vmem:[%s15806_s18] ss:$0 sm:$0xff] }
 0x690   : > { %v2827_v21 = vmul.f32 %v2753_v52, %v14330_v17 }
 0x692   : > { %2820 = vrot.lane.b32.xlu1 %v2753_v52, %s12872_s29  ;;  %2800 = vrot.lane.b32.xlu0 %v2706_v51, %s12872_s29 }
 0x696   : > { %2824 = vrot.lane.b32.xlu1 %v2753_v52, %s12871_s13  ;;  %2804 = vrot.lane.b32.xlu0 %v2706_v51, %s12871_s13 }
 0x69a   : > { %2802 = vrot.lane.b32.xlu1 %v2710_v53, %s12872_s29 }
 0x69e   : > { %2806 = vrot.lane.b32.xlu1 %v2710_v53, %s12871_s13 }
 0x6cb   : > { %v2791_v57 = vpop.f32.mrb[8].mxu1 }
 0x6cc   : > { %v2793_v59 = vpop.f32.mrb[9].mxu1  ;;  %v2792_v61 = vadd.f32 %v2791_v57, %v2180_v56 }
 0x6cd   : > { %v2795_v60 = vpop.f32.mrb[10].mxu1  ;;  %v14313_v0 = vadd.f32 %v2793_v59, %v2184_v58 }
 0x6ce   : > { %v2796_v62 = vadd.f32 %v2795_v60, %v2180_v56  ;;  %v2797_v63 = vpop.f32.mrb[11].mxu1 }
 0x6cf   : > { %v14315_v1 = vadd.f32 %v2797_v63, %v2184_v58 }
 0x6d0   : > { %v2838_v2 = vpack.c.bf16 %v2796_v62, %v2792_v61  ;;  %v14356_v61 = vsub.s32 3, %v14181_v10 }
 0x6d1   : > { %v2992_v3 = vpack.c.bf16 %v14315_v1, %v14313_v0 }
 0x6d2   : > { %v2176_v62 = vrot.slane %v14282_v43, %v14356_v61 }
 0x6d4   : > { %v2755_v63 = vadd.f32 %v14290_v49, %v2176_v62 }
 0x700   : > { %v2823_v4 = vpop.permute.xlu1 %2822  ;;  %v2819_v6 = vpop.permute.xlu0 %2818 }
 0x701   : > { %v2828_v8 = vmul.f32 %v2819_v6, %v14319_v5  ;;  %v2832_v23 = vmul.f32 %v2823_v4, %v14328_v16  ;;  %v2751_v4 = vadd.f32 %v14288_v37, %v2176_v62 }
 0x703   : > { %v2830_v20 = vadd.f32 %v2828_v8, %v2826_v14 }
 0x704   : > { %v2821_v13 = vpop.permute.xlu1 %2820  ;;  %v2801_v18 = vpop.permute.xlu0 %2800 }
 0x705   : > { %v2829_v15 = vmul.f32 %v2821_v13, %v14321_v7  ;;  %v2834_v25 = vadd.f32 %v2832_v23, %v2830_v20  ;;  %v2810_v32 = vmul.f32 %v2801_v18, %v14319_v5 }
 0x707   : > { %v2831_v26 = vadd.f32 %v2829_v15, %v2827_v21  ;;  %v2812_v38 = vadd.f32 %v2810_v32, %v2808_v35  ;;  %v2981_v32 = vmul.f32 %v2755_v63, %v14330_v17 }
 0x708   : > { %v2825_v22 = vpop.permute.xlu1 %2824  ;;  %v2805_v29 = vpop.permute.xlu0 %2804 }
 0x709   : > { %v2833_v27 = vmul.f32 %v2825_v22, %v14332_v19  ;;  %v2814_v36 = vmul.f32 %v2805_v29, %v14328_v16 }
 0x70b   : > { %v2835_v28 = vadd.f32 %v2833_v27, %v2831_v26  ;;  %v2816_v45 = vadd.f32 %v2814_v36, %v2812_v38  ;;  %v2980_v36 = vmul.f32 %v2751_v4, %v14324_v9 }
 0x70c   : > { %v2803_v24 = vpop.permute.xlu1 %2802 }
 0x70d   : > { %v2837_v33 = vpack.c.bf16 %v2835_v28, %v2834_v25  ;;  %v2811_v34 = vmul.f32 %v2803_v24, %v14321_v7 }
 0x70f   : > { %10463 = vmatpush3.bf16.xpose.msra.mxu1 %v2837_v33  ;;  %v2813_v40 = vadd.f32 %v2811_v34, %v2809_v31 }
 0x710   : > { %v2807_v30 = vpop.permute.xlu1 %2806  ;;  %10468 = vmatprep.subr.bf16.mxu1 %v12873_v50 }
 0x711   : > { %v2815_v44 = vmul.f32 %v2807_v30, %v14332_v19 }
 0x713   : > { %v2817_v46 = vadd.f32 %v2815_v44, %v2813_v40 }
 0x715   : > { %v2836_v47 = vpack.c.bf16 %v2817_v46, %v2816_v45 }
 0x717   : > { %10465 = vmatmul.mubr.bf16.vlgmr.msra.gmra.mrb[12].mxu1 %v2836_v47 }
 0x718   : > { %10469 = vmatpush3.bf16.msra.mxu1 %v2838_v2  ;;  %10470 = vmatprep.mubr.msk.bf16.mxu1 %vm12874_vm4, %v12873_v50  ;;  %v2168_v2 = vrot.slane %v14282_v43, %v14184_v11 }
 0x719   : > { %10474 = vmatprep.subr.bf16.mxu1 %v12873_v50 }
 0x71a   : > { %v2708_v6 = vadd.f32 %v14274_v39, %v2168_v2  ;;  %v2712_v8 = vadd.f32 %v14276_v41, %v2168_v2 }
 0x7ea   : > { %v2879_v51 = vpop.f32.mrb[12].mxu1 }
 0x7eb   : > { %v2880_v52 = vadd.f32 %v14349_v48, %v2879_v51  ;;  %v10466_v53 = vpop.f32.mrb[13].mxu1 }
 0x7ec   : > { %v2882_v56 = vpop.f32.mrb[14].mxu1 }
 0x7ed   : > { %v2883_v57 = vadd.f32 %v14349_v48, %v2882_v56  ;;  %v10467_v58 = vpop.f32.mrb[15].mxu1  ;;  %v2887_v59 = vsel %vm2886_vm5, %v2880_v52, -inf  ;;  %v2962_v56 = vmul.f32 %v2708_v6, %v14324_v9 }
 0x7ee   : > { %2888 = vmax.xlane.f32.xlu0 %v2887_v59 }
 0x7ef   : > { %v2890_v60 = vsel %vm2886_vm5, %v2883_v57, -inf }
 0x7f0   : > { %2891 = vmax.xlane.f32.xlu1 %v2890_v60 }
 0x801   : > { %2974 = vrot.lane.b32.xlu1 %v2755_v63, %s12872_s29 }
 0x804   : > { %2972 = vrot.lane.b32.xlu0 %v2751_v4, %s12872_s29 }
 0x805   : > { %2976 = vrot.lane.b32.xlu1 %v2751_v4, %s12871_s13 }
 0x808   : > { %2954 = vrot.lane.b32.xlu0 %v2708_v6, %s12872_s29 }
 0x809   : > { %2978 = vrot.lane.b32.xlu1 %v2755_v63, %s12871_s13  ;;  %v2963_v63 = vmul.f32 %v2712_v8, %v14330_v17 }
 0x80d   : > { %2956 = vrot.lane.b32.xlu1 %v2712_v8, %s12872_s29 }
 0x811   : > { %2960 = vrot.lane.b32.xlu1 %v2712_v8, %s12871_s13 }
 0x87b   : > { %v2889_v49 = vpop.xlane.xlu0 %2888 }
 0x87c   : > { %v2893_v43 = vsub.f32 %v2880_v52, %v2889_v49 }
 0x87d   : > { %v2892_v13 = vpop.xlane.xlu1 %2891 }
 0x87e   : > { %v2895_v37 = vmul.f32 1.442695, %v2893_v43  ;;  %v2894_v14 = vsub.f32 %v2883_v57, %v2892_v13 }
 0x87f   : > { %v2973_v41 = vpop.permute.xlu0 %2972 }
 0x880   : > { %11603 = vpow2.f32 %v2895_v37  ;;  %v2897_v15 = vmul.f32 1.442695, %v2894_v14  ;;  %v2982_v24 = vmul.f32 %v2973_v41, %v14319_v5 }
 0x881   : > { %v2975_v22 = vpop.permute.xlu1 %2974 }
 0x882   : > { %11605 = vpow2.f32 %v2897_v15  ;;  %v2983_v29 = vmul.f32 %v2975_v22, %v14321_v7  ;;  %v2984_v40 = vadd.f32 %v2982_v24, %v2980_v36  ;;  %v10976_v36 = vld [vmem:[%s13999_s30 + $0x14] ss:$8 sps:$4 sm:$0xff]  }
 0x883   : > { %v2955_v23 = vpop.permute.xlu0 %2954 }
 0x884   : > { %v2985_v31 = vadd.f32 %v2983_v29, %v2981_v32  ;;  %v2964_v46 = vmul.f32 %v2955_v23, %v14319_v5 }
 0x885   : > { %v2977_v26 = vpop.permute.xlu1 %2976 }
 0x886   : > { %v2986_v30 = vmul.f32 %v2977_v26, %v14328_v16  ;;  %v2966_v62 = vadd.f32 %v2964_v46, %v2962_v56  ;;  %v10983_v46 = vld [vmem:[%s13999_s30 + $0x40] ss:$8 sps:$4 sm:$0xff]   ;;  %v10994_v56 = vld [vmem:[%s13999_s30 + $0x74] ss:$8 sps:$4 sm:$0xff]  }
 0x888   : > { %v2988_v52 = vadd.f32 %v2986_v30, %v2984_v40  ;;  %v10979_v30 = vld [vmem:[%s13999_s30 + $0x24] ss:$8 sps:$4 sm:$0xff]   ;;  %v10982_v40 = vld [vmem:[%s13999_s30 + $0x34] ss:$8 sps:$4 sm:$0xff]  }
 0x889   : > { %v2979_v28 = vpop.permute.xlu1 %2978 }
 0x88a   : > { %v11604_v18 = vpop.eup %11603  ;;  %v2987_v33 = vmul.f32 %v2979_v28, %v14332_v19 }
 0x88b   : > { %v2899_v39 = vsel %vm2886_vm5, %v11604_v18, 0.0 }
 0x88c   : > { %v11606_v20 = vpop.eup %11605  ;;  %2900 = vadd.xlane.f32.xlu0 %v2899_v39  ;;  %v2989_v44 = vadd.f32 %v2987_v33, %v2985_v31  ;;  %v10974_v31 = vld [vmem:[%s13999_s30 + $0x10] ss:$8 sps:$4 sm:$0xff]  }
 0x88d   : > { %v2902_v21 = vsel %vm2886_vm5, %v11606_v20, 0.0  ;;  %v2957_v34 = vpop.permute.xlu1 %2956 }
 0x88e   : > { %v2965_v57 = vmul.f32 %v2957_v34, %v14321_v7  ;;  %v2991_v60 = vpack.c.bf16 %v2989_v44, %v2988_v52  ;;  %v10971_v34 = vld [vmem:[%s13999_s30] ss:$8 sps:$4 sm:$0xff]   ;;  %v10980_v44 = vld [vmem:[%s13999_s30 + $0x30] ss:$8 sps:$4 sm:$0xff]   ;;  %v10991_v52 = vld [vmem:[%s13999_s30 + $0x64] ss:$8 sps:$4 sm:$0xff]  }
 0x890   : > { %2903 = vadd.xlane.f32.xlu0 %v2902_v21  ;;  %v2967_v5 = vadd.f32 %v2965_v57, %v2963_v63  ;;  %v10992_v57 = vld [vmem:[%s13999_s30 + $0x70] ss:$8 sps:$4 sm:$0xff]   ;;  %v11003_v63 = vld [vmem:[%s13999_s30 + $0xa4] ss:$8 sps:$4 sm:$0xff]  }
 0x891   : > { %v2961_v53 = vpop.permute.xlu1 %2960 }
 0x892   : > { %v2969_v2 = vmul.f32 %v2961_v53, %v14332_v19  ;;  %v10989_v53 = vld [vmem:[%s13999_s30 + $0x60] ss:$8 sps:$4 sm:$0xff]  }
 0x894   : > { %v2971_v7 = vadd.f32 %v2969_v2, %v2967_v5  ;;  %v11001_v2 = vld [vmem:[%s13999_s30 + $0xa0] ss:$8 sps:$4 sm:$0xff]   ;;  %v11006_v5 = vld [vmem:[%s13999_s30 + $0xb4] ss:$8 sps:$4 sm:$0xff]  }
 0x8a6   : > { %2958 = vrot.lane.b32.xlu0 %v2708_v6, %s12871_s13 }
 0x919   : > { %v2901_v27 = vpop.xlane.xlu0 %2900 }
 0x91a   : > { %11607 = vrcp.f32 %v2901_v27  ;;  %v10973_v27 = vld [vmem:[%s13999_s30 + $0x4] ss:$8 sps:$4 sm:$0xff]  }
 0x91d   : > { %v2904_v25 = vpop.xlane.xlu0 %2903 }
 0x91e   : > { %11609 = vrcp.f32 %v2904_v25 }
 0x921   : > { %v2959_v45 = vpop.permute.xlu0 %2958 }
 0x922   : > { %v2968_v58 = vmul.f32 %v2959_v45, %v14328_v16  ;;  %v10985_v45 = vld [vmem:[%s13999_s30 + $0x44] ss:$8 sps:$4 sm:$0xff]  }
 0x924   : > { %v11608_v35 = vpop.eup %11607  ;;  %v2970_v4 = vadd.f32 %v2968_v58, %v2966_v62  ;;  %v10997_v58 = vld [vmem:[%s13999_s30 + $0x84] ss:$8 sps:$4 sm:$0xff]   ;;  %v10998_v62 = vld [vmem:[%s13999_s30 + $0x90] ss:$8 sps:$4 sm:$0xff]  }
 0x925   : > { %v2907_v47 = vmul.f32 %v11608_v35, %v11604_v18 }
 0x926   : > { %v2990_v9 = vpack.c.bf16 %v2971_v7, %v2970_v4  ;;  %v11004_v4 = vld [vmem:[%s13999_s30 + $0xb0] ss:$8 sps:$4 sm:$0xff]   ;;  %v11009_v7 = vld [vmem:[%s13999_s30 + $0xc4] ss:$8 sps:$4 sm:$0xff]  }
 0x928   : > { %v11610_v38 = vpop.eup %11609 }
 0x929   : > { %v2908_v51 = vmul.f32 %v11610_v38, %v11606_v20  ;;  %v10977_v38 = vld [vmem:[%s13999_s30 + $0x20] ss:$8 sps:$4 sm:$0xff]  }
 0x92b   : > { %v2909_v59 = vpack.c.bf16 %v2908_v51, %v2907_v47  ;;  %v10988_v47 = vld [vmem:[%s13999_s30 + $0x54] ss:$8 sps:$4 sm:$0xff]   ;;  %v10986_v51 = vld [vmem:[%s13999_s30 + $0x50] ss:$8 sps:$4 sm:$0xff]  }
 0x92d   : > { %10471 = vmatmul.mubr.msk.bf16.vlgmr.msra.gmra.mrb[16].mxu1 %vm2886_vm5, %v2909_v59  ;;  %v10995_v59 = vld [vmem:[%s13999_s30 + $0x80] ss:$8 sps:$4 sm:$0xff]  }
 0x92e   : > { %10475 = vmatpush3.bf16.xpose.msra.mxu1 %v2991_v60  ;;  %10476 = vmatprep.mubr.msk.bf16.mxu1 %vm12874_vm4, %v12873_v50  ;;  %v11000_v60 = vld [vmem:[%s13999_s30 + $0x94] ss:$8 sps:$4 sm:$0xff]  }
 0x92f   : > { %10480 = vmatprep.subr.bf16.mxu1 %v12873_v50 }
 0x935   : > { %10477 = vmatmul.mubr.bf16.vlgmr.msra.gmra.mrb[20].mxu1 %v2990_v9  ;;  %v11007_v9 = vld [vmem:[%s13999_s30 + $0xc0] ss:$8 sps:$4 sm:$0xff]  }
 0x936   : > { %10481 = vmatpush3.bf16.msra.mxu1 %v2992_v3  ;;  %10482 = vmatprep.mubr.msk.bf16.mxu1 %vm12874_vm4, %v12873_v50 }
 0x937   : > { %3295 = vmatprep.subr.bf16.mxu1 %v10973_v27  ;;  %v11651_v27 = vld [vmem:[#allocation2] sm:$0xff] }
 0xa00   : > { %v14397_v16 = vpop.f32.mrb[16].mxu1 }
 0xa01   : > { %v10472_v17 = vpop.f32.mrb[17].mxu1 }
 0xa02   : > { %v14399_v19 = vpop.f32.mrb[18].mxu1  ;;  %v11012_v17 = vld [vmem:[%s13999_s30 + $0xd4] ss:$8 sps:$4 sm:$0xff]  }
 0xa03   : > { %v3101_v6 = vpack.c.bf16 %v14399_v19, %v14397_v16  ;;  %v10473_v8 = vpop.f32.mrb[19].mxu1  ;;  %v3342_v16 = vld [vmem:[%s15807_s17] sm:$0x3] }
 0xa04   : > { %v11010_v8 = vld [vmem:[%s13999_s30 + $0xd0] ss:$8 sps:$4 sm:$0xff]   ;;  %v3347_v19 = vrot.slane %v3342_v16, %v14187_v12 }
 0xa08   : > { %v3027_v49 = vpop.f32.mrb[20].mxu1 }
 0xa09   : > { %v3028_v43 = vadd.f32 %v14349_v48, %v3027_v49  ;;  %v10478_v13 = vpop.f32.mrb[21].mxu1  ;;  %v11015_v49 = vld [vmem:[%s13999_s30 + $0xe4] ss:$8 sps:$4 sm:$0xff]  }
 0xa0a   : > { %v3030_v37 = vpop.f32.mrb[22].mxu1  ;;  %v11018_v13 = vld [vmem:[%s13999_s30 + $0xf4] ss:$8 sps:$4 sm:$0xff]  }
 0xa0b   : > { %v3031_v0 = vadd.f32 %v14349_v48, %v3030_v37  ;;  %v10479_v1 = vpop.f32.mrb[23].mxu1  ;;  %v3034_v3 = vsel %vm2886_vm5, %v3028_v43, -inf  ;;  %v11016_v37 = vld [vmem:[%s13999_s30 + $0xf0] ss:$8 sps:$4 sm:$0xff]  }
 0xa0c   : > { %3035 = vmax.xlane.f32.xlu0 %v3034_v3 }
 0xa0d   : > { %v3037_v14 = vsel %vm2886_vm5, %v3031_v0, -inf }
 0xa0e   : > { %3038 = vmax.xlane.f32.xlu1 %v3037_v14 }
 0xa99   : > { %v3036_v15 = vpop.xlane.xlu0 %3035 }
 0xa9a   : > { %v3040_v18 = vsub.f32 %v3028_v43, %v3036_v15  ;;  %v11013_v43 = vld [vmem:[%s13999_s30 + $0xe0] ss:$8 sps:$4 sm:$0xff]  }
 0xa9b   : > { %v3039_v39 = vpop.xlane.xlu1 %3038 }
 0xa9c   : > { %v3042_v20 = vmul.f32 1.442695, %v3040_v18  ;;  %v3041_v21 = vsub.f32 %v3031_v0, %v3039_v39  ;;  %v11019_v18 = vld [vmem:[%s14044_s20] ss:$16 sps:$4 sm:$0xff]   ;;  %v11021_v39 = vld [vmem:[%s14044_s20 + $0x4] ss:$16 sps:$4 sm:$0xff]  }
 0xa9e   : > { %11611 = vpow2.f32 %v3042_v20  ;;  %v3044_v41 = vmul.f32 1.442695, %v3041_v21  ;;  %v11024_v20 = vld [vmem:[%s14044_s20 + $0x24] ss:$16 sps:$4 sm:$0xff]   ;;  %v11022_v21 = vld [vmem:[%s14044_s20 + $0x20] ss:$16 sps:$4 sm:$0xff]  }
 0xaa0   : > { %11613 = vpow2.f32 %v3044_v41  ;;  %v11027_v41 = vld [vmem:[%s14044_s20 + $0x44] ss:$16 sps:$4 sm:$0xff]  }
 0xaa8   : > { %v11612_v22 = vpop.eup %11611 }
 0xaa9   : > { %v3046_v48 = vsel %vm2886_vm5, %v11612_v22, 0.0 }
 0xaaa   : > { %v11614_v23 = vpop.eup %11613  ;;  %3047 = vadd.xlane.f32.xlu0 %v3046_v48  ;;  %v11030_v48 = vld [vmem:[%s14044_s20 + $0x64] ss:$16 sps:$4 sm:$0xff]  }
 0xaab   : > { %v3049_v26 = vsel %vm2886_vm5, %v11614_v23, 0.0 }
 0xaae   : > { %3050 = vadd.xlane.f32.xlu0 %v3049_v26  ;;  %v3351_v26 = vrot.slane %v3342_v16, %v14184_v11  ;;  %v11084_v16 = vld [vmem:[%s14028_s4 + $0x50] ss:$8 sps:$4 sm:$0xff]  }
 0xb37   : > { %v3048_v25 = vpop.xlane.xlu0 %3047 }
 0xb38   : > { %11615 = vrcp.f32 %v3048_v25 }
 0xb3b   : > { %v3051_v28 = vpop.xlane.xlu0 %3050 }
 0xb3c   : > { %11617 = vrcp.f32 %v3051_v28 }
 0xb42   : > { %v11616_v29 = vpop.eup %11615 }
 0xb43   : > { %v3054_v32 = vmul.f32 %v11616_v29, %v11612_v22  ;;  %v11025_v22 = vld [vmem:[%s14044_s20 + $0x40] ss:$16 sps:$4 sm:$0xff]   ;;  %v11652_v29 = vld [vmem:[#allocation2 + $0x8] sm:$0xff] }
 0xb46   : > { %v11618_v24 = vpop.eup %11617 }
 0xb47   : > { %v3055_v33 = vmul.f32 %v11618_v24, %v11614_v23  ;;  %v11028_v23 = vld [vmem:[%s14044_s20 + $0x60] ss:$16 sps:$4 sm:$0xff]  }
 0xb49   : > { %v3056_v35 = vpack.c.bf16 %v3055_v33, %v3054_v32 }
 0xb4b   : > { %10483 = vmatmul.mubr.msk.bf16.vlgmr.msra.gmra.mrb[24].mxu1 %vm2886_vm5, %v3056_v35 }
 0xb4c   : > { %3296 = vmatpush1.bf16.msra.mxu1 %v10971_v34  ;;  %v11653_v34 = vld [vmem:[#allocation2 + $0x10] sm:$0xff] }
 0xb4d   : > { %3297 = vmatprep.subr.bf16.mxu1 %v10976_v36 }
 0xb50   : > { %3298 = vmatpush1.bf16.msra.mxu1 %v10974_v31 }
 0xb51   : > { %3299 = vmatprep.subr.bf16.mxu1 %v10979_v30  ;;  %v11654_v30 = vld [vmem:[#allocation2 + $0x18] sm:$0xff] }
 0xb54   : > { %3300 = vmatpush1.bf16.msra.mxu1 %v10977_v38 }
 0xb55   : > { %3301 = vmatprep.subr.bf16.mxu1 %v10982_v40 }
 0xb58   : > { %3302 = vmatpush1.bf16.msra.mxu1 %v10980_v44 }
 0xb59   : > { %3303 = vmatprep.subr.bf16.mxu1 %v10985_v45 }
 0xb5c   : > { %3304 = vmatpush1.bf16.msra.mxu1 %v10983_v46 }
 0xb5d   : > { %3305 = vmatprep.subr.bf16.mxu1 %v10988_v47  ;;  %v11033_v47 = vld [vmem:[%s14044_s20 + $0x84] ss:$16 sps:$4 sm:$0xff]  }
 0xb60   : > { %3306 = vmatpush1.bf16.msra.mxu1 %v10986_v51  ;;  %v11031_v51 = vld [vmem:[%s14044_s20 + $0x80] ss:$16 sps:$4 sm:$0xff]  }
 0xb61   : > { %3307 = vmatprep.subr.bf16.mxu1 %v10991_v52  ;;  %v11034_v52 = vld [vmem:[%s14044_s20 + $0xa0] ss:$16 sps:$4 sm:$0xff]  }
 0xb64   : > { %3308 = vmatpush1.bf16.msra.mxu1 %v10989_v53  ;;  %v11036_v53 = vld [vmem:[%s14044_s20 + $0xa4] ss:$16 sps:$4 sm:$0xff]  }
 0xb65   : > { %3309 = vmatprep.subr.bf16.mxu1 %v10994_v56  ;;  %v11039_v56 = vld [vmem:[%s14044_s20 + $0xc4] ss:$16 sps:$4 sm:$0xff]  }
 0xb68   : > { %3310 = vmatpush1.bf16.msra.mxu1 %v10992_v57  ;;  %v11037_v57 = vld [vmem:[%s14044_s20 + $0xc0] ss:$16 sps:$4 sm:$0xff]  }
 0xb69   : > { %3311 = vmatprep.subr.bf16.mxu1 %v10997_v58  ;;  %v11042_v58 = vld [vmem:[%s14044_s20 + $0xe4] ss:$16 sps:$4 sm:$0xff]  }
 0xb6c   : > { %3312 = vmatpush1.bf16.msra.mxu1 %v10995_v59  ;;  %v11040_v59 = vld [vmem:[%s14044_s20 + $0xe0] ss:$16 sps:$4 sm:$0xff]  }
 0xb6d   : > { %3313 = vmatprep.subr.bf16.mxu1 %v11000_v60  ;;  %v11045_v60 = vld [vmem:[%s14044_s20 + $0x104] ss:$16 sps:$4 sm:$0xff]  }
 0xb70   : > { %3314 = vmatpush1.bf16.msra.mxu1 %v10998_v62  ;;  %v11043_v62 = vld [vmem:[%s14044_s20 + $0x100] ss:$16 sps:$4 sm:$0xff]  }
 0xb71   : > { %3315 = vmatprep.subr.bf16.mxu1 %v11003_v63  ;;  %v11048_v63 = vld [vmem:[%s14044_s20 + $0x124] ss:$16 sps:$4 sm:$0xff]  }
 0xb74   : > { %3316 = vmatpush1.bf16.msra.mxu1 %v11001_v2  ;;  %v3686_v2 = vld [vmem:[%s13922_s0 + $0x8] sm:$0xff] }
 0xb75   : > { %3317 = vmatprep.subr.bf16.mxu1 %v11006_v5  ;;  %v3688_v5 = vld [vmem:[%s13922_s0 + $0x18] sm:$0xff] }
 0xb78   : > { %3318 = vmatpush1.bf16.msra.mxu1 %v11004_v4  ;;  %v14482_v4 = vpack.c.bf16 %v3688_v5, %v3686_v2  ;;  %v11090_v2 = vld [vmem:[%s14028_s4 + $0x70] ss:$8 sps:$4 sm:$0xff]   ;;  %v11091_v5 = vld [vmem:[%s14028_s4 + $0x84] ss:$8 sps:$4 sm:$0xff]  }
 0xb79   : > { %3319 = vmatprep.subr.bf16.mxu1 %v11009_v7  ;;  %v11067_v7 = vld [vmem:[%s14028_s4 + $0x4] ss:$8 sps:$4 sm:$0xff]  }
 0xb7a   : > { %3642 = vmatprep.subr.bf16.mxu0 %v11067_v7  ;;  %v11094_v7 = vld [vmem:[%s14028_s4 + $0x94] ss:$8 sps:$4 sm:$0xff]  }
 0xb7c   : > { %3320 = vmatpush1.bf16.msra.mxu1 %v11007_v9  ;;  %v11069_v9 = vld [vmem:[%s14028_s4] ss:$8 sps:$4 sm:$0xff]  }
 0xb7d   : > { %3321 = vmatprep.subr.bf16.mxu1 %v11012_v17  ;;  %v11070_v17 = vld [vmem:[%s14028_s4 + $0x14] ss:$8 sps:$4 sm:$0xff]   ;;  %3643 = vmatpush1.bf16.msra.mxu0 %v11069_v9  ;;  %v11096_v9 = vld [vmem:[%s14028_s4 + $0x90] ss:$8 sps:$4 sm:$0xff]  }
 0xb7e   : > { %3644 = vmatprep.subr.bf16.mxu0 %v11070_v17  ;;  %v11097_v17 = vld [vmem:[%s14028_s4 + $0xa4] ss:$8 sps:$4 sm:$0xff]  }
 0xb80   : > { %3322 = vmatpush1.bf16.msra.mxu1 %v11010_v8  ;;  %v11046_v8 = vld [vmem:[%s14044_s20 + $0x120] ss:$16 sps:$4 sm:$0xff]  }
 0xb81   : > { %3323 = vmatprep.subr.bf16.mxu1 %v11015_v49  ;;  %v11051_v49 = vld [vmem:[%s14044_s20 + $0x144] ss:$16 sps:$4 sm:$0xff]  }
 0xb84   : > { %3324 = vmatpush1.bf16.msra.mxu1 %v11013_v43  ;;  %v11072_v43 = vld [vmem:[%s14028_s4 + $0x10] ss:$8 sps:$4 sm:$0xff]  }
 0xb85   : > { %3325 = vmatprep.subr.bf16.mxu1 %v11018_v13  ;;  %v11073_v13 = vld [vmem:[%s14028_s4 + $0x24] ss:$8 sps:$4 sm:$0xff]   ;;  %3645 = vmatpush1.bf16.msra.mxu0 %v11072_v43  ;;  %v11102_v43 = vld [vmem:[%s14028_s4 + $0xb0] ss:$8 sps:$4 sm:$0xff]  }
 0xb86   : > { %3646 = vmatprep.subr.bf16.mxu0 %v11073_v13  ;;  %v11103_v13 = vld [vmem:[%s14028_s4 + $0xc4] ss:$8 sps:$4 sm:$0xff]  }
 0xb88   : > { %3326 = vmatpush1.bf16.msra.mxu1 %v11016_v37  ;;  %v11049_v37 = vld [vmem:[%s14044_s20 + $0x140] ss:$16 sps:$4 sm:$0xff]  }
 0xb89   : > { %4101 = vmatprep.subr.bf16.mxu1 %v11021_v39  ;;  %v11079_v39 = vld [vmem:[%s14028_s4 + $0x44] ss:$8 sps:$4 sm:$0xff]  }
 0xc1e   : > { %v3094_v0 = vpop.f32.mrb[24].mxu1 }
 0xc1f   : > { %v10484_v1 = vpop.f32.mrb[25].mxu1 }
 0xc20   : > { %v3097_v3 = vpop.f32.mrb[26].mxu1  ;;  %v11075_v1 = vld [vmem:[%s14028_s4 + $0x20] ss:$8 sps:$4 sm:$0xff]  }
 0xc21   : > { %v3102_v14 = vpack.c.bf16 %v3097_v3, %v3094_v0  ;;  %v10485_v15 = vpop.f32.mrb[27].mxu1  ;;  %v11054_v0 = vld [vmem:[%s14044_s20 + $0x164] ss:$16 sps:$4 sm:$0xff]   ;;  %v11076_v3 = vld [vmem:[%s14028_s4 + $0x34] ss:$8 sps:$4 sm:$0xff]   ;;  %3647 = vmatpush1.bf16.msra.mxu0 %v11075_v1 }
 0xc22   : > { %v11057_v15 = vld [vmem:[%s14044_s20 + $0x184] ss:$16 sps:$4 sm:$0xff]   ;;  %3648 = vmatprep.subr.bf16.mxu0 %v11076_v3  ;;  %v11109_v3 = vld [vmem:[%s14028_s4 + $0xe4] ss:$8 sps:$4 sm:$0xff]  }
 0xc23   : > { %3327 = vmatprep.mubr.bf16.mxu1 %v3102_v14  ;;  %v11052_v14 = vld [vmem:[%s14044_s20 + $0x160] ss:$16 sps:$4 sm:$0xff]   ;;  %v11108_v1 = vld [vmem:[%s14028_s4 + $0xd0] ss:$8 sps:$4 sm:$0xff]  }
 0xc24   : > { %3328 = vmatmul.mubr.bf16.vlgmr.msra.gmra.mrb[28].mxu1 %v3101_v6 }
 0xc25   : > { %4102 = vmatpush1.bf16.msra.mxu1 %v11019_v18  ;;  %4133 = vmatprep.mubr.bf16.mxu1 %v14482_v4  ;;  %v11078_v18 = vld [vmem:[%s14028_s4 + $0x30] ss:$8 sps:$4 sm:$0xff]  }
 0xc26   : > { %4103 = vmatprep.subr.bf16.mxu1 %v11024_v20  ;;  %v11055_v20 = vld [vmem:[%s14044_s20 + $0x180] ss:$16 sps:$4 sm:$0xff]   ;;  %3649 = vmatpush1.bf16.msra.mxu0 %v11078_v18  ;;  %v11114_v18 = vld [vmem:[%s14028_s4 + $0xf0] ss:$8 sps:$4 sm:$0xff]  }
 0xc27   : > { %3650 = vmatprep.subr.bf16.mxu0 %v11079_v39  ;;  %v11115_v39 = vld [vmem:[%s14044_s20 + $0x8] ss:$16 sps:$4 sm:$0xff]  }
 0xc29   : > { %4104 = vmatpush1.bf16.msra.mxu1 %v11022_v21  ;;  %v11060_v21 = vld [vmem:[%s14044_s20 + $0x1a4] ss:$16 sps:$4 sm:$0xff]  }
 0xc2a   : > { %4105 = vmatprep.subr.bf16.mxu1 %v11027_v41  ;;  %v11081_v41 = vld [vmem:[%s14028_s4 + $0x40] ss:$8 sps:$4 sm:$0xff]  }
 0xc2b   : > { %3651 = vmatpush1.bf16.msra.mxu0 %v11081_v41  ;;  %v11118_v41 = vld [vmem:[%s14044_s20 + $0x28] ss:$16 sps:$4 sm:$0xff]  }
 0xc2d   : > { %4106 = vmatpush1.bf16.msra.mxu1 %v11025_v22  ;;  %v11082_v22 = vld [vmem:[%s14028_s4 + $0x54] ss:$8 sps:$4 sm:$0xff]  }
 0xc2e   : > { %4107 = vmatprep.subr.bf16.mxu1 %v11030_v48  ;;  %v11058_v48 = vld [vmem:[%s14044_s20 + $0x1a0] ss:$16 sps:$4 sm:$0xff]   ;;  %3652 = vmatprep.subr.bf16.mxu0 %v11082_v22  ;;  %v11123_v22 = vld [vmem:[%s14044_s20 + $0x4c] ss:$16 sps:$4 sm:$0xff]  }
 0xc2f   : > { %3653 = vmatpush1.bf16.msra.mxu0 %v11084_v16  ;;  %v11124_v16 = vld [vmem:[%s14044_s20 + $0x68] ss:$16 sps:$4 sm:$0xff]  }
 0xc31   : > { %4108 = vmatpush1.bf16.msra.mxu1 %v11028_v23  ;;  %v11063_v23 = vld [vmem:[%s14044_s20 + $0x1c4] ss:$16 sps:$4 sm:$0xff]  }
 0xc32   : > { %4109 = vmatprep.subr.bf16.mxu1 %v11033_v47 }
 0xc35   : > { %4110 = vmatpush1.bf16.msra.mxu1 %v11031_v51 }
 0xc36   : > { %4111 = vmatprep.subr.bf16.mxu1 %v11036_v53 }
 0xc39   : > { %4112 = vmatpush1.bf16.msra.mxu1 %v11034_v52 }
 0xc3a   : > { %4113 = vmatprep.subr.bf16.mxu1 %v11039_v56 }
 0xc3d   : > { %4114 = vmatpush1.bf16.msra.mxu1 %v11037_v57 }
 0xc3e   : > { %4115 = vmatprep.subr.bf16.mxu1 %v11042_v58 }
 0xc41   : > { %4116 = vmatpush1.bf16.msra.mxu1 %v11040_v59 }
 0xc42   : > { %4117 = vmatprep.subr.bf16.mxu1 %v11045_v60  ;;  %v11085_v60 = vld [vmem:[%s14028_s4 + $0x64] ss:$8 sps:$4 sm:$0xff]  }
 0xc43   : > { %3654 = vmatprep.subr.bf16.mxu0 %v11085_v60  ;;  %v11151_v60 = vld [vmem:[%s14044_s20 + $0x188] ss:$16 sps:$4 sm:$0xff]  }
 0xc45   : > { %4118 = vmatpush1.bf16.msra.mxu1 %v11043_v62  ;;  %v11087_v62 = vld [vmem:[%s14028_s4 + $0x60] ss:$8 sps:$4 sm:$0xff]  }
 0xc46   : > { %4119 = vmatprep.subr.bf16.mxu1 %v11048_v63  ;;  %3655 = vmatpush1.bf16.msra.mxu0 %v11087_v62  ;;  %v11088_v63 = vld [vmem:[%s14028_s4 + $0x74] ss:$8 sps:$4 sm:$0xff]   ;;  %v11156_v62 = vld [vmem:[%s14044_s20 + $0x1ac] ss:$16 sps:$4 sm:$0xff]  }
 0xc47   : > { %3656 = vmatprep.subr.bf16.mxu0 %v11088_v63  ;;  %v11154_v63 = vld [vmem:[%s14044_s20 + $0x1a8] ss:$16 sps:$4 sm:$0xff]  }
 0xc49   : > { %4120 = vmatpush1.bf16.msra.mxu1 %v11046_v8  ;;  %v11099_v8 = vld [vmem:[%s14028_s4 + $0xa0] ss:$8 sps:$4 sm:$0xff]  }
 0xc4a   : > { %4121 = vmatprep.subr.bf16.mxu1 %v11051_v49  ;;  %3657 = vmatpush1.bf16.msra.mxu0 %v11090_v2  ;;  %v11100_v49 = vld [vmem:[%s14028_s4 + $0xb4] ss:$8 sps:$4 sm:$0xff]  }
 0xc4b   : > { %3658 = vmatprep.subr.bf16.mxu0 %v11091_v5  ;;  %v11157_v2 = vld [vmem:[%s14044_s20 + $0x1c8] ss:$16 sps:$4 sm:$0xff]   ;;  %v11159_v5 = vld [vmem:[%s14044_s20 + $0x1cc] ss:$16 sps:$4 sm:$0xff]  }
 0xc4d   : > { %4122 = vmatpush1.bf16.msra.mxu1 %v11049_v37  ;;  %v11105_v37 = vld [vmem:[%s14028_s4 + $0xc0] ss:$8 sps:$4 sm:$0xff]  }
 0xc4e   : > { %4123 = vmatprep.subr.bf16.mxu1 %v11054_v0  ;;  %v11106_v0 = vld [vmem:[%s14028_s4 + $0xd4] ss:$8 sps:$4 sm:$0xff]  }
 0xc51   : > { %4124 = vmatpush1.bf16.msra.mxu1 %v11052_v14  ;;  %v11111_v14 = vld [vmem:[%s14028_s4 + $0xe0] ss:$8 sps:$4 sm:$0xff]  }
 0xc52   : > { %4125 = vmatprep.subr.bf16.mxu1 %v11057_v15  ;;  %v11112_v15 = vld [vmem:[%s14028_s4 + $0xf4] ss:$8 sps:$4 sm:$0xff]  }
 0xc55   : > { %4126 = vmatpush1.bf16.msra.mxu1 %v11055_v20  ;;  %v11117_v20 = vld [vmem:[%s14044_s20 + $0xc] ss:$16 sps:$4 sm:$0xff]  }
 0xc56   : > { %4127 = vmatprep.subr.bf16.mxu1 %v11060_v21  ;;  %v11120_v21 = vld [vmem:[%s14044_s20 + $0x2c] ss:$16 sps:$4 sm:$0xff]  }
 0xc59   : > { %4128 = vmatpush1.bf16.msra.mxu1 %v11058_v48  ;;  %v11121_v48 = vld [vmem:[%s14044_s20 + $0x48] ss:$16 sps:$4 sm:$0xff]  }
 0xc5a   : > { %4129 = vmatprep.subr.bf16.mxu1 %v11063_v23  ;;  %v11126_v23 = vld [vmem:[%s14044_s20 + $0x6c] ss:$16 sps:$4 sm:$0xff]  }
 0xcf7   : > { %v3329_v6 = vpop.f32.mrb[28].mxu1 }
 0xcf8   : > { %v3338_v25 = vadd.f32 %v11651_v27, %v3329_v6  ;;  %v3331_v28 = vpop.f32.mrb[29].mxu1  ;;  %v11066_v6 = vld [vmem:[%s14044_s20 + $0x1e4] ss:$16 sps:$4 sm:$0xff]   ;;  %v3685_v27 = vld [vmem:[%s13922_s0] sm:$0xff] }
 0xcf9   : > { %v3339_v24 = vadd.f32 %v11652_v29, %v3331_v28  ;;  %v3333_v32 = vpop.f32.mrb[30].mxu1  ;;  %v3690_v28 = vld [vmem:[%s13922_s0 + $0x28] sm:$0xff] }
 0xcfa   : > { %v14457_v33 = vadd.f32 %v3347_v19, %v3338_v25  ;;  %v3340_v35 = vadd.f32 %v11653_v34, %v3333_v32  ;;  %v3335_v36 = vpop.f32.mrb[31].mxu1  ;;  %v3687_v25 = vld [vmem:[%s13922_s0 + $0x10] sm:$0xff]  ;;  %v3689_v32 = vld [vmem:[%s13922_s0 + $0x20] sm:$0xff]  ;;  %s15809_s0 = scalar_lea.vmem [#allocation30], %s13964_s15 }
 0xcfb   : > { %v14459_v31 = vadd.f32 %v3351_v26, %v3339_v24  ;;  %v3341_v38 = vadd.f32 %v11654_v30, %v3335_v36  ;;  %v14513_v29 = vpack.c.bf16 %v3687_v25, %v3685_v27  ;;  %v14515_v24 = vpack.c.bf16 %v3690_v28, %v3690_v28  ;;  %v11130_v27 = vld [vmem:[%s14044_s20 + $0xa8] ss:$16 sps:$4 sm:$0xff]   ;;  %v11135_v25 = vld [vmem:[%s14044_s20 + $0xcc] ss:$16 sps:$4 sm:$0xff]  }
 0xcfc   : > { %v14461_v40 = vadd.f32 %v3347_v19, %v3340_v35  ;;  %v11061_v19 = vld [vmem:[%s14044_s20 + $0x1c0] ss:$16 sps:$4 sm:$0xff]   ;;  %v14520_v34 = vpack.c.bf16 %v3689_v32, %v3689_v32  ;;  %v11133_v28 = vld [vmem:[%s14044_s20 + $0xc8] ss:$16 sps:$4 sm:$0xff]   ;;  %v11138_v32 = vld [vmem:[%s14044_s20 + $0xec] ss:$16 sps:$4 sm:$0xff]  }
 0xcfd   : > { %v14463_v44 = vadd.f32 %v3351_v26, %v3341_v38  ;;  %v3360_v45 = vadd.f32 %v14459_v31, %v14457_v33  ;;  %4130 = vmatpush1.bf16.msra.mxu1 %v11061_v19  ;;  %v11064_v26 = vld [vmem:[%s14044_s20 + $0x1e0] ss:$16 sps:$4 sm:$0xff]   ;;  %v11129_v19 = vld [vmem:[%s14044_s20 + $0x8c] ss:$16 sps:$4 sm:$0xff]  }
 0xcfe   : > { %4131 = vmatprep.subr.bf16.mxu1 %v11066_v6  ;;  %v11127_v6 = vld [vmem:[%s14044_s20 + $0x88] ss:$16 sps:$4 sm:$0xff]  }
 0xcff   : > { %3361 = vadd.xlane.f32.xlu0 %v3360_v45  ;;  %v3363_v46 = vadd.f32 %v14463_v44, %v14461_v40 }
 0xd01   : > { %3364 = vadd.xlane.f32.xlu1 %v3363_v46  ;;  %4132 = vmatpush1.bf16.msra.mxu1 %v11064_v26  ;;  %v11132_v26 = vld [vmem:[%s14044_s20 + $0xac] ss:$16 sps:$4 sm:$0xff]  }
 0xd02   : > { %4152 = vmatprep.subr.bf16.mxu1 %v11117_v20 }
 0xd04   : > { %4134 = vmatmul.mubr.bf16.vlgmr.msra.gmra.mrb[32].mxu1 %v14513_v29 }
 0xd05   : > { %4143 = vmatprep.mubr.bf16.mxu1 %v14515_v24  ;;  %4153 = vmatpush1.bf16.msra.mxu1 %v11115_v39 }
 0xd06   : > { %4154 = vmatprep.subr.bf16.mxu1 %v11120_v21 }
 0xd09   : > { %4155 = vmatpush1.bf16.msra.mxu1 %v11118_v41 }
 0xd0a   : > { %4156 = vmatprep.subr.bf16.mxu1 %v11123_v22 }
 0xd0c   : > { %4144 = vmatmul.mubr.bf16.gmra.mrb[36].mxu1 %v14520_v34 }
 0xd0d   : > { %4184 = vmatprep.mubr.bf16.mxu1 %v14482_v4  ;;  %v11093_v4 = vld [vmem:[%s14028_s4 + $0x80] ss:$8 sps:$4 sm:$0xff]   ;;  %4157 = vmatpush1.bf16.msra.mxu1 %v11121_v48 }
 0xd0e   : > { %3659 = vmatpush1.bf16.msra.mxu0 %v11093_v4  ;;  %4158 = vmatprep.subr.bf16.mxu1 %v11126_v23  ;;  %v14595_v4 = vld [vmem:[%s14053_s16] sm:$0xf] }
 0xd0f   : > { %3660 = vmatprep.subr.bf16.mxu0 %v11094_v7  ;;  %v11162_v7 = vld [vmem:[%s14044_s20 + $0x1ec] ss:$16 sps:$4 sm:$0xff]  }
 0xd11   : > { %4159 = vmatpush1.bf16.msra.mxu1 %v11124_v16 }
 0xd12   : > { %3661 = vmatpush1.bf16.msra.mxu0 %v11096_v9  ;;  %4160 = vmatprep.subr.bf16.mxu1 %v11129_v19  ;;  %v11160_v9 = vld [vmem:[%s14044_s20 + $0x1e8] ss:$16 sps:$4 sm:$0xff]  }
 0xd13   : > { %3662 = vmatprep.subr.bf16.mxu0 %v11097_v17  ;;  %v3764_v17 = vrot.slane %v14595_v4, %v14187_v12 }
 0xd15   : > { %4161 = vmatpush1.bf16.msra.mxu1 %v11127_v6 }
 0xd16   : > { %3663 = vmatpush1.bf16.msra.mxu0 %v11099_v8  ;;  %4162 = vmatprep.subr.bf16.mxu1 %v11132_v26 }
 0xd17   : > { %3664 = vmatprep.subr.bf16.mxu0 %v11100_v49 }
 0xd19   : > { %4163 = vmatpush1.bf16.msra.mxu1 %v11130_v27 }
 0xd1a   : > { %3665 = vmatpush1.bf16.msra.mxu0 %v11102_v43  ;;  %4164 = vmatprep.subr.bf16.mxu1 %v11135_v25 }
 0xd1b   : > { %3666 = vmatprep.subr.bf16.mxu0 %v11103_v13 }
 0xd1d   : > { %4165 = vmatpush1.bf16.msra.mxu1 %v11133_v28  ;;  %v3358_v28 = vld [vmem:[%s15808_s27] sm:$0x3] }
 0xd1e   : > { %3667 = vmatpush1.bf16.msra.mxu0 %v11105_v37  ;;  %4166 = vmatprep.subr.bf16.mxu1 %v11138_v32 }
 0xd1f   : > { %3668 = vmatprep.subr.bf16.mxu0 %v11106_v0 }
 0xd22   : > { %3669 = vmatpush1.bf16.msra.mxu0 %v11108_v1 }
 0xd23   : > { %3670 = vmatprep.subr.bf16.mxu0 %v11109_v3 }
 0xd26   : > { %3671 = vmatpush1.bf16.msra.mxu0 %v11111_v14 }
 0xd27   : > { %3672 = vmatprep.subr.bf16.mxu0 %v11112_v15 }
 0xd2a   : > { %3673 = vmatpush1.bf16.msra.mxu0 %v11114_v18 }
 0xd8c   : > { %v3362_v35 = vpop.xlane.xlu0 %3361 }
 0xd8d   : > { %v3366_v36 = vmul.f32 0.00390625, %v3362_v35  ;;  %v11136_v35 = vld [vmem:[%s14044_s20 + $0xe8] ss:$16 sps:$4 sm:$0xff]  }
 0xd8e   : > { %v3365_v30 = vpop.xlane.xlu1 %3364  ;;  %4167 = vmatpush1.bf16.msra.mxu1 %v11136_v35  ;;  %v3359_v35 = vld [vmem:[%s15809_s0] sm:$0x3] }
 0xd8f   : > { %v14525_v38 = vsub.f32 %v14457_v33, %v3366_v36  ;;  %v14528_v45 = vsub.f32 %v14459_v31, %v3366_v36  ;;  %v3367_v46 = vmul.f32 0.00390625, %v3365_v30  ;;  %v11141_v36 = vld [vmem:[%s14044_s20 + $0x10c] ss:$16 sps:$4 sm:$0xff]   ;;  %v11139_v30 = vld [vmem:[%s14044_s20 + $0x108] ss:$16 sps:$4 sm:$0xff]  }
 0xd90   : > { %4168 = vmatprep.subr.bf16.mxu1 %v11141_v36  ;;  %v3410_v36 = vrot.slane %v3358_v28, %v14187_v12 }
 0xd91   : > { %v14531_v47 = vsub.f32 %v14461_v40, %v3367_v46  ;;  %v14534_v51 = vsub.f32 %v14463_v44, %v3367_v46  ;;  %v3372_v52 = vmul.f32 %v14525_v38, %v14525_v38  ;;  %v3373_v53 = vmul.f32 %v14528_v45, %v14528_v45  ;;  %v11144_v46 = vld [vmem:[%s14044_s20 + $0x12c] ss:$16 sps:$4 sm:$0xff]  }
 0xd92   : > { %4169 = vmatpush1.bf16.msra.mxu1 %v11139_v30  ;;  %v3414_v30 = vrot.slane %v3358_v28, %v14184_v11 }
 0xd93   : > { %v3376_v56 = vadd.f32 %v3373_v53, %v3372_v52  ;;  %v3374_v57 = vmul.f32 %v14531_v47, %v14531_v47  ;;  %v3375_v58 = vmul.f32 %v14534_v51, %v14534_v51  ;;  %v11142_v52 = vld [vmem:[%s14044_s20 + $0x128] ss:$16 sps:$4 sm:$0xff]   ;;  %4170 = vmatprep.subr.bf16.mxu1 %v11144_v46  ;;  %v11147_v53 = vld [vmem:[%s14044_s20 + $0x14c] ss:$16 sps:$4 sm:$0xff]  }
 0xd95   : > { %3377 = vadd.xlane.f32.xlu0 %v3376_v56  ;;  %v3379_v59 = vadd.f32 %v3375_v58, %v3374_v57  ;;  %v11145_v56 = vld [vmem:[%s14044_s20 + $0x148] ss:$16 sps:$4 sm:$0xff]   ;;  %v11150_v57 = vld [vmem:[%s14044_s20 + $0x16c] ss:$16 sps:$4 sm:$0xff]  }
 0xd96   : > { %4171 = vmatpush1.bf16.msra.mxu1 %v11142_v52  ;;  %v11148_v58 = vld [vmem:[%s14044_s20 + $0x168] ss:$16 sps:$4 sm:$0xff]  }
 0xd97   : > { %3380 = vadd.xlane.f32.xlu1 %v3379_v59  ;;  %4172 = vmatprep.subr.bf16.mxu1 %v11147_v53  ;;  %v11153_v59 = vld [vmem:[%s14044_s20 + $0x18c] ss:$16 sps:$4 sm:$0xff]   ;;  %s15810_s20 = scalar_lea.vmem [#allocation32], %s13964_s15 }
 0xd9a   : > { %4173 = vmatpush1.bf16.msra.mxu1 %v11145_v56  ;;  %v3425_v56 = vrot.slane %v3359_v35, %v14187_v12 }
 0xd9b   : > { %4174 = vmatprep.subr.bf16.mxu1 %v11150_v57  ;;  %v3429_v57 = vrot.slane %v3359_v35, %v14184_v11  ;;  %v14671_v35 = vld [vmem:[#allocation18 + $0x10] sm:$0xff] }
 0xd9e   : > { %4175 = vmatpush1.bf16.msra.mxu1 %v11148_v58 }
 0xd9f   : > { %4176 = vmatprep.subr.bf16.mxu1 %v11153_v59 }
 0xda2   : > { %4177 = vmatpush1.bf16.msra.mxu1 %v11151_v60 }
 0xda3   : > { %4178 = vmatprep.subr.bf16.mxu1 %v11156_v62 }
 0xda6   : > { %4179 = vmatpush1.bf16.msra.mxu1 %v11154_v63 }
 0xda7   : > { %4180 = vmatprep.subr.bf16.mxu1 %v11159_v5 }
 0xdaa   : > { %4181 = vmatpush1.bf16.msra.mxu1 %v11157_v2 }
 0xdab   : > { %4182 = vmatprep.subr.bf16.mxu1 %v11162_v7 }
 0xdae   : > { %4183 = vmatpush1.bf16.msra.mxu1 %v11160_v9 }
 0xdaf   : > { %10486 = vmatprep.subr.bf16.mxu1 %v12873_v50 }
 0xdb1   : > { %4185 = vmatmul.mubr.bf16.vlgmr.msra.gmra.mrb[40].mxu1 %v14513_v29 }
 0xdb2   : > { %4194 = vmatprep.mubr.bf16.mxu1 %v14515_v24 }
 0xdb9   : > { %4195 = vmatmul.mubr.bf16.gmra.mrb[44].mxu1 %v14520_v34 }
 0xdba   : > { %10490 = vmatprep.mubr.msk.bf16.mxu1 %vm12874_vm4, %v12873_v50 }
 0xdd7   : > { %v4135_v8 = vpop.f32.mrb[32].mxu1 }
 0xdd8   : > { %v14601_v49 = vadd.f32 %v4135_v8, %v3764_v17  ;;  %v14603_v43 = vpop.f32.mrb[33].mxu1 }
 0xdd9   : > { %v4139_v13 = vpop.f32.mrb[34].mxu1 }
 0xdda   : > { %v14606_v37 = vadd.f32 %v4139_v13, %v3764_v17  ;;  %4221 = vrot.lane.b32.xlu0 %v14601_v49, %s12872_s29  ;;  %v14610_v0 = vpop.f32.mrb[35].mxu1  ;;  %v14645_v13 = vld [vmem:[#allocation17] sm:$0xff] }
 0xddc   : > { %4223 = vrot.lane.b32.xlu1 %v14606_v37, %s12872_s29 }
 0xddf   : > { %v4145_v1 = vpop.f32.mrb[36].mxu1 }
 0xde0   : > { %4227 = vrot.lane.b32.xlu1 %v14601_v49, %s12871_s13  ;;  %v14618_v3 = vadd.f32 %v4145_v1, %v3764_v17  ;;  %v14620_v14 = vpop.f32.mrb[37].mxu1 }
 0xde1   : > { %v4149_v15 = vpop.f32.mrb[38].mxu1 }
 0xde2   : > { %4225 = vrot.lane.b32.xlu0 %v14618_v3, %s12872_s29  ;;  %v4150_v18 = vpop.f32.mrb[39].mxu1  ;;  %v14649_v15 = vld [vmem:[#allocation17 + $0x8] sm:$0xff] }
 0xde4   : > { %4229 = vrot.lane.b32.xlu1 %v14606_v37, %s12871_s13 }
 0xde8   : > { %4231 = vrot.lane.b32.xlu1 %v14618_v3, %s12871_s13 }
 0xe22   : > { %v3378_v29 = vpop.xlane.xlu0 %3377 }
 0xe23   : > { %v3382_v24 = vmul.f32 0.003921569, %v3378_v29 }
 0xe24   : > { %v3381_v39 = vpop.xlane.xlu1 %3380 }
 0xe25   : > { %11619 = vrsqrt.f32 %v3382_v24  ;;  %v3383_v20 = vmul.f32 0.003921569, %v3381_v39  ;;  %vm3386_vm6 = vcmp.eq.f32.partialorder %v3382_v24, inf  ;;  %v3389_v34 = vand.u32 2147483648, %v3382_v24 }
 0xe26   : > { %vm3388_vm7 = vcmp.eq.f32.partialorder %v3382_v24, 0.0 }
 0xe27   : > { %11621 = vrsqrt.f32 %v3383_v20  ;;  %vm3393_vm8 = vcmp.eq.f32.partialorder %v3383_v20, inf  ;;  %v3396_v19 = vand.u32 2147483648, %v3383_v20  ;;  %vm3395_vm9 = vcmp.eq.f32.partialorder %v3383_v20, 0.0 }
 0xe2f   : > { %v11620_v21 = vpop.eup %11619 }
 0xe30   : > { %v3385_v41 = vmul.f32 %v11620_v21, %v3382_v24 }
 0xe31   : > { %v11622_v22 = vpop.eup %11621 }
 0xe32   : > { %v3387_v48 = vsel %vm3386_vm6, %v3382_v24, %v3385_v41  ;;  %v3392_v23 = vmul.f32 %v11622_v22, %v3383_v20  ;;  %v14654_v24 = vld [vmem:[#allocation18] sm:$0xff]  ;;  %v14660_v22 = vld [vmem:[#allocation18 + $0x8] sm:$0xff] }
 0xe33   : > { %v3390_v16 = vsel %vm3388_vm7, %v3389_v34, %v3387_v48 }
 0xe34   : > { %v3398_v6 = vadd.f32 1e-06, %v3390_v16  ;;  %v3394_v26 = vsel %vm3393_vm8, %v3383_v20, %v3392_v23 }
 0xe35   : > { %v3397_v27 = vsel %vm3395_vm9, %v3396_v19, %v3394_v26  ;;  %v14663_v26 = vld [vmem:[#allocation15 + $0x10] sm:$0xff] }
 0xe36   : > { %11623 = vrcp.f32 %v3398_v6  ;;  %v3399_v25 = vadd.f32 1e-06, %v3397_v27 }
 0xe38   : > { %11625 = vrcp.f32 %v3399_v25  ;;  %v4235_v25 = vmul.f32 %v14618_v3, %v14663_v26 }
 0xe40   : > { %v11624_v32 = vpop.eup %11623 }
 0xe41   : > { %v3402_v46 = vmul.f32 %v11624_v32, %v14528_v45  ;;  %v3401_v52 = vmul.f32 %v11624_v32, %v14525_v38  ;;  %v14643_v38 = vld [vmem:[#allocation15] sm:$0xff] }
 0xe42   : > { %v11626_v53 = vpop.eup %11625  ;;  %v4233_v18 = vmul.f32 %v14601_v49, %v14643_v38 }
 0xe43   : > { %v3405_v58 = vmul.f32 %v11626_v53, %v14534_v51  ;;  %v3418_v59 = vmul.f32 %v3414_v30, %v3402_v46  ;;  %v3404_v60 = vmul.f32 %v11626_v53, %v14531_v47  ;;  %v3417_v62 = vmul.f32 %v3410_v36, %v3401_v52  ;;  %v14647_v51 = vld [vmem:[#allocation15 + $0x8] sm:$0xff] }
 0xe44   : > { %v4234_v39 = vmul.f32 %v14606_v37, %v14647_v51  ;;  %v14665_v37 = vld [vmem:[#allocation17 + $0x10] sm:$0xff] }
 0xe45   : > { %v3420_v63 = vmul.f32 %v3414_v30, %v3405_v58  ;;  %v3419_v2 = vmul.f32 %v3410_v36, %v3404_v60  ;;  %v3433_v5 = vadd.f32 %v3429_v57, %v3418_v59  ;;  %v3432_v9 = vadd.f32 %v3425_v56, %v3417_v62  ;;  %v3470_v53 = vld [vmem:[%s15810_s20] sm:$0x3] }
 0xe47   : > { %v3435_v7 = vadd.f32 %v3429_v57, %v3420_v63  ;;  %v3434_v17 = vadd.f32 %v3425_v56, %v3419_v2  ;;  %v3475_v56 = vrot.slane %v3470_v53, %v14187_v12  ;;  %v14679_v57 = vrot.slane %v3470_v53, %v14184_v11 }
 0xe48   : > { %v3772_v63 = vrot.slane %v14595_v4, %v14279_v42 }
 0xe49   : > { %v3437_v45 = vpack.c.bf16 %v3435_v7, %v3433_v5  ;;  %v3436_v8 = vpack.c.bf16 %v3434_v17, %v3432_v9  ;;  %v3776_v5 = vrot.slane %v14595_v4, %v14356_v61 }
 0xe4b   : > { %3674 = vmatprep.mubr.bf16.mxu0 %v3437_v45 }
 0xe4c   : > { %3675 = vmatmul.mubr.bf16.vlgmr.msra.gmra.mrb[0].mxu0 %v3436_v8  ;;  %v4222_v1 = vpop.permute.xlu0 %4221 }
 0xe4d   : > { %v4236_v29 = vmul.f32 %v4222_v1, %v14645_v13 }
 0xe4e   : > { %v4224_v47 = vpop.permute.xlu1 %4223 }
 0xe4f   : > { %v4237_v20 = vmul.f32 %v4224_v47, %v14649_v15  ;;  %v4239_v34 = vadd.f32 %v4236_v29, %v4233_v18 }
 0xe51   : > { %v4240_v48 = vadd.f32 %v4237_v20, %v4234_v39 }
 0xe52   : > { %v4228_v21 = vpop.permute.xlu1 %4227 }
 0xe53   : > { %v4242_v41 = vmul.f32 %v4228_v21, %v14654_v24 }
 0xe54   : > { %v4226_v27 = vpop.permute.xlu0 %4225 }
 0xe55   : > { %v4245_v16 = vadd.f32 %v4242_v41, %v4239_v34  ;;  %v4238_v28 = vmul.f32 %v4226_v27, %v14665_v37  ;;  %v14703_v27 = vld [vmem:[#allocation12] sm:$0xff] }
 0xe56   : > { %v4230_v23 = vpop.permute.xlu1 %4229 }
 0xe57   : > { %v4243_v49 = vmul.f32 %v4230_v23, %v14660_v22  ;;  %v4241_v32 = vadd.f32 %v4238_v28, %v4235_v25  ;;  %v14706_v28 = vld [vmem:[#allocation12 + $0x8] sm:$0xff] }
 0xe59   : > { %v4246_v19 = vadd.f32 %v4243_v49, %v4240_v48 }
 0xe5a   : > { %v4232_v36 = vpop.permute.xlu1 %4231 }
 0xe5b   : > { %v4249_v6 = vpack.c.bf16 %v4246_v19, %v4245_v16  ;;  %v4244_v30 = vmul.f32 %v4232_v36, %v14671_v35 }
 0xe5d   : > { %10487 = vmatpush3.bf16.xpose.msra.mxu1 %v4249_v6  ;;  %v4247_v46 = vadd.f32 %v4244_v30, %v4241_v32  ;;  %v14709_v30 = vld [vmem:[#allocation11] sm:$0xff] }
 0xe5e   : > { %10488 = vmatprep.subr.bf16.mxu1 %v12873_v50 }
 0xe5f   : > { %v4250_v52 = vpack.c.bf16 %v4247_v46, %v4247_v46 }
 0xe65   : > { %10489 = vmatpush3.bf16.xpose.msra.mxu1 %v4250_v52  ;;  %v14712_v52 = vld [vmem:[#allocation11 + $0x8] sm:$0xff] }
 0xe66   : > { %10494 = vmatprep.subr.bf16.mxu1 %v12873_v50 }
 0xe84   : > { %v4186_v2 = vpop.f32.mrb[40].mxu1 }
 0xe85   : > { %v4188_v17 = vpop.f32.mrb[41].mxu1  ;;  %v4187_v45 = vadd.f32 %v4186_v2, %v3772_v63 }
 0xe86   : > { %v14691_v8 = vadd.f32 %v4188_v17, %v3776_v5  ;;  %v4190_v1 = vpop.f32.mrb[42].mxu1 }
 0xe87   : > { %v4191_v47 = vadd.f32 %v4190_v1, %v3772_v63  ;;  %v4192_v18 = vpop.f32.mrb[43].mxu1 }
 0xe88   : > { %v14694_v29 = vadd.f32 %v4192_v18, %v3776_v5 }
 0xe89   : > { %v4251_v20 = vpack.c.bf16 %v4191_v47, %v4187_v45 }
 0xe8a   : > { %v4420_v41 = vpack.c.bf16 %v14694_v29, %v14691_v8 }
 0xe8c   : > { %v4196_v39 = vpop.f32.mrb[44].mxu1 }
 0xe8d   : > { %v4198_v21 = vpop.f32.mrb[45].mxu1  ;;  %v4197_v45 = vadd.f32 %v4196_v39, %v3772_v63 }
 0xe8e   : > { %v4199_v34 = vadd.f32 %v4198_v21, %v3776_v5  ;;  %v4200_v48 = vpop.f32.mrb[46].mxu1  ;;  %v14718_v5 = vld [vmem:[#allocation14 + $0x8] sm:$0xff]  ;;  %v14728_v21 = vld [vmem:[%s15811_s8] ss:$0 sm:$0xff] }
 0xe8f   : > { %v4201_v23 = vpop.f32.mrb[47].mxu1  ;;  %v4252_v18 = vpack.c.bf16 %v4197_v45, %v4197_v45 }
 0xe90   : > { %v4421_v16 = vpack.c.bf16 %v4199_v34, %v4199_v34 }
 0xe92   : > { %v14701_v49 = vsel %vm4327_vm10, %v4421_v16, 0 }
 0xf1f   : > { %v3676_v3 = vpop.f32.mrb[0].mxu0 }
 0xf20   : > { %v3677_v58 = vadd.f32 %v3676_v3, %v3475_v56  ;;  %v3678_v59 = vpop.f32.mrb[1].mxu0 }
 0xf21   : > { %v14682_v60 = vadd.f32 %v3678_v59, %v14679_v57  ;;  %v3680_v62 = vpop.f32.mrb[2].mxu0 }
 0xf22   : > { %v3681_v7 = vadd.f32 %v3680_v62, %v3475_v56  ;;  %v14688_v9 = vpop.f32.mrb[3].mxu0  ;;  %4203 = vrot.lane.b32.xlu0 %v3677_v58, %s12872_s29  ;;  %v4211_v46 = vmul.f32 %v14709_v30, %v3677_v58  ;;  %v14715_v56 = vld [vmem:[#allocation14] sm:$0xff] }
 0xf24   : > { %4205 = vrot.lane.b32.xlu1 %v3681_v7, %s12872_s29  ;;  %v4212_v53 = vmul.f32 %v14712_v52, %v3681_v7 }
 0xf26   : > { %4207 = vrot.lane.b32.xlu0 %v3677_v58, %s12871_s13 }
 0xf28   : > { %4209 = vrot.lane.b32.xlu1 %v3681_v7, %s12871_s13  ;;  %v4329_v7 = vsel %vm4327_vm10, %v4252_v18, 0 }
 0xf94   : > { %v4204_v19 = vpop.permute.xlu0 %4203 }
 0xf95   : > { %v4213_v25 = vmul.f32 %v14703_v27, %v4204_v19 }
 0xf96   : > { %v4206_v6 = vpop.permute.xlu1 %4205 }
 0xf97   : > { %v4214_v32 = vmul.f32 %v14706_v28, %v4206_v6  ;;  %v4215_v62 = vadd.f32 %v4213_v25, %v4211_v46  ;;  %v3768_v6 = vrot.slane %v14595_v4, %v14184_v11  ;;  %v14746_v46 = vadd.f32 %v14688_v9, %v14679_v57 }
 0xf98   : > { %v4208_v36 = vpop.permute.xlu0 %4207 }
 0xf99   : > { %v4217_v3 = vmul.f32 %v14715_v56, %v4208_v36  ;;  %v4216_v2 = vadd.f32 %v4214_v32, %v4212_v53  ;;  %v4142_v25 = vadd.f32 %v14610_v0, %v3768_v6  ;;  %v4138_v32 = vadd.f32 %v14603_v43, %v3768_v6 }
 0xf9a   : > { %v4210_v59 = vpop.permute.xlu1 %4209  ;;  %v4148_v36 = vadd.f32 %v14620_v14, %v3768_v6 }
 0xf9b   : > { %v4218_v17 = vmul.f32 %v14718_v5, %v4210_v59  ;;  %v4219_v1 = vadd.f32 %v4217_v3, %v4215_v62 }
 0xf9d   : > { %v4220_v47 = vadd.f32 %v4218_v17, %v4216_v2 }
 0xf9f   : > { %v4248_v58 = vpack.c.bf16 %v4220_v47, %v4219_v1 }
 0xfa1   : > { %10491 = vmatmul.mubr.bf16.vlgmr.msra.gmra.mrb[48].mxu1 %v4248_v58 }
 0xfa2   : > { %10495 = vmatpush3.bf16.msra.mxu1 %v4251_v20  ;;  %10498 = vmatprep.mubr.msk.bf16.mxu1 %vm12874_vm4, %v12873_v50 }
 0xfa3   : > { %10496 = vmatprep.subr.bf16.mxu1 %v12873_v50 }
 0xfa6   : > { %10497 = vmatpush3.bf16.msra.mxu1 %v4329_v7 }
 0xfa7   : > { %10502 = vmatprep.subr.bf16.mxu1 %v12873_v50 }
0x1074   : > { %v4293_v63 = vpop.f32.mrb[48].mxu1 }
0x1075   : > { %v4294_v39 = vadd.f32 %v14728_v21, %v4293_v63  ;;  %v10492_v34 = vpop.f32.mrb[49].mxu1  ;;  %v4403_v63 = vmul.f32 %v4142_v25, %v14647_v51  ;;  %v4404_v51 = vmul.f32 %v4148_v36, %v14663_v26 }
0x1076   : > { %v4296_v48 = vpop.f32.mrb[50].mxu1 }
0x1077   : > { %v4297_v20 = vadd.f32 %v14728_v21, %v4296_v48  ;;  %v10493_v23 = vpop.f32.mrb[51].mxu1  ;;  %v4301_v16 = vsel %vm4300_vm11, %v4294_v39, -inf }
0x1078   : > { %4302 = vmax.xlane.f32.xlu0 %v4301_v16 }
0x1079   : > { %v4304_v19 = vsel %vm4300_vm11, %v4297_v20, -inf }
0x107a   : > { %4305 = vmax.xlane.f32.xlu1 %v4304_v19 }
0x108b   : > { %4392 = vrot.lane.b32.xlu1 %v4142_v25, %s12872_s29 }
0x108e   : > { %4390 = vrot.lane.b32.xlu0 %v4138_v32, %s12872_s29 }
0x108f   : > { %4396 = vrot.lane.b32.xlu1 %v4138_v32, %s12871_s13 }
0x1093   : > { %4398 = vrot.lane.b32.xlu1 %v4142_v25, %s12871_s13 }
0x1097   : > { %4400 = vrot.lane.b32.xlu1 %v4148_v36, %s12871_s13 }
0x109b   : > { %4374 = vrot.lane.b32.xlu1 %v14746_v46, %s12872_s29 }
0x109f   : > { %4378 = vrot.lane.b32.xlu1 %v14746_v46, %s12871_s13 }
0x1105   : > { %v4303_v4 = vpop.xlane.xlu0 %4302 }
0x1106   : > { %v4307_v43 = vsub.f32 %v4294_v39, %v4303_v4 }
0x1107   : > { %v4306_v0 = vpop.xlane.xlu1 %4305 }
0x1108   : > { %v4309_v53 = vmul.f32 1.442695, %v4307_v43  ;;  %v4308_v3 = vsub.f32 %v4297_v20, %v4306_v0  ;;  %v4402_v20 = vmul.f32 %v4138_v32, %v14643_v38 }
0x1109   : > { %v4391_v17 = vpop.permute.xlu0 %4390 }
0x110a   : > { %11627 = vpow2.f32 %v4309_v53  ;;  %v4311_v59 = vmul.f32 1.442695, %v4308_v3  ;;  %v4405_v7 = vmul.f32 %v4391_v17, %v14645_v13 }
0x110b   : > { %v4393_v9 = vpop.permute.xlu1 %4392 }
0x110c   : > { %11629 = vpow2.f32 %v4311_v59  ;;  %v4406_v18 = vmul.f32 %v4393_v9, %v14649_v15  ;;  %v4408_v4 = vadd.f32 %v4405_v7, %v4402_v20 }
0x110e   : > { %v4409_v23 = vadd.f32 %v4406_v18, %v4403_v63 }
0x110f   : > { %v4397_v1 = vpop.permute.xlu1 %4396 }
0x1110   : > { %v4411_v16 = vmul.f32 %v4397_v1, %v14654_v24 }
0x1112   : > { %v4414_v13 = vadd.f32 %v4411_v16, %v4408_v4 }
0x1113   : > { %v4399_v58 = vpop.permute.xlu1 %4398 }
0x1114   : > { %v11628_v14 = vpop.eup %11627  ;;  %v4412_v39 = vmul.f32 %v4399_v58, %v14660_v22 }
0x1115   : > { %v4313_v62 = vsel %vm4300_vm11, %v11628_v14, 0.0 }
0x1116   : > { %v11630_v2 = vpop.eup %11629  ;;  %4314 = vadd.xlane.f32.xlu0 %v4313_v62  ;;  %v4415_v43 = vadd.f32 %v4412_v39, %v4409_v23 }
0x1117   : > { %v4316_v57 = vsel %vm4300_vm11, %v11630_v2, 0.0  ;;  %v4401_v19 = vpop.permute.xlu1 %4400 }
0x1118   : > { %v4418_v3 = vpack.c.bf16 %v4415_v43, %v4414_v13  ;;  %v4413_v38 = vmul.f32 %v4401_v19, %v14671_v35  ;;  %v4381_v35 = vmul.f32 %v14712_v52, %v14746_v46  ;;  %v11165_v19 = vld [vmem:[%s14061_s10 + $0x4] ss:$8 sps:$4 sm:$0xff]   ;;  %v11163_v13 = vld [vmem:[%s14061_s10] ss:$8 sps:$4 sm:$0xff]  }
0x111a   : > { %4317 = vadd.xlane.f32.xlu0 %v4316_v57 }
0x111b   : > { %v4375_v59 = vpop.permute.xlu1 %4374 }
0x111f   : > { %v4379_v26 = vpop.permute.xlu1 %4378 }
0x1120   : > { %v4387_v9 = vmul.f32 %v14718_v5, %v4379_v26  ;;  %v11178_v26 = vld [vmem:[%s14061_s10 + $0x50] ss:$8 sps:$4 sm:$0xff]  }
0x1130   : > { %4394 = vrot.lane.b32.xlu0 %v4148_v36, %s12872_s29  ;;  %v4383_v36 = vmul.f32 %v14706_v28, %v4375_v59  ;;  %v11169_v59 = vld [vmem:[%s14061_s10 + $0x20] ss:$8 sps:$4 sm:$0xff]  }
0x1134   : > { %4372 = vrot.lane.b32.xlu0 %v14682_v60, %s12872_s29 }
0x1138   : > { %4376 = vrot.lane.b32.xlu0 %v14682_v60, %s12871_s13 }
0x11a3   : > { %v4315_v45 = vpop.xlane.xlu0 %4314 }
0x11a4   : > { %11631 = vrcp.f32 %v4315_v45  ;;  %v4385_v45 = vadd.f32 %v4383_v36, %v4381_v35  ;;  %v11183_v36 = vld [vmem:[%s14061_s10 + $0x64] ss:$8 sps:$4 sm:$0xff]  }
0x11a5   : > { %v11189_v35 = vld [vmem:[%s14061_s10 + $0x84] ss:$8 sps:$4 sm:$0xff]  }
0x11a7   : > { %v4318_v47 = vpop.xlane.xlu0 %4317 }
0x11a8   : > { %11633 = vrcp.f32 %v4318_v47 }
0x11ab   : > { %v4395_v34 = vpop.permute.xlu0 %4394 }
0x11ac   : > { %v4407_v0 = vmul.f32 %v4395_v34, %v14665_v37 }
0x11ae   : > { %v11632_v48 = vpop.eup %11631  ;;  %v4410_v62 = vadd.f32 %v4407_v0, %v4404_v51 }
0x11af   : > { %v4321_v15 = vmul.f32 %v11632_v48, %v11628_v14  ;;  %v4373_v25 = vpop.permute.xlu0 %4372  ;;  %v4380_v14 = vmul.f32 %v14709_v30, %v14682_v60 }
0x11b0   : > { %v4416_v24 = vadd.f32 %v4413_v38, %v4410_v62  ;;  %v4382_v32 = vmul.f32 %v14703_v27, %v4373_v25  ;;  %v4389_v27 = vadd.f32 %v4387_v9, %v4385_v45  ;;  %v11168_v25 = vld [vmem:[%s14061_s10 + $0x14] ss:$8 sps:$4 sm:$0xff]   ;;  %v11172_v38 = vld [vmem:[%s14061_s10 + $0x30] ss:$8 sps:$4 sm:$0xff]   ;;  %v11187_v9 = vld [vmem:[%s14061_s10 + $0x80] ss:$8 sps:$4 sm:$0xff]  }
0x11b1   : > { %v11174_v62 = vld [vmem:[%s14061_s10 + $0x34] ss:$8 sps:$4 sm:$0xff]   ;;  %v11190_v45 = vld [vmem:[%s14061_s10 + $0x90] ss:$8 sps:$4 sm:$0xff]  }
0x11b2   : > { %v11634_v6 = vpop.eup %11633  ;;  %v4419_v57 = vpack.c.bf16 %v4416_v24, %v4416_v24  ;;  %v4384_v17 = vadd.f32 %v4382_v32, %v4380_v14  ;;  %v11177_v24 = vld [vmem:[%s14061_s10 + $0x44] ss:$8 sps:$4 sm:$0xff]   ;;  %v11180_v32 = vld [vmem:[%s14061_s10 + $0x54] ss:$8 sps:$4 sm:$0xff]   ;;  %v11181_v14 = vld [vmem:[%s14061_s10 + $0x60] ss:$8 sps:$4 sm:$0xff]  }
0x11b3   : > { %v4322_v53 = vmul.f32 %v11634_v6, %v11630_v2  ;;  %v4377_v37 = vpop.permute.xlu0 %4376 }
0x11b4   : > { %v4386_v2 = vmul.f32 %v14715_v56, %v4377_v37  ;;  %v11175_v37 = vld [vmem:[%s14061_s10 + $0x40] ss:$8 sps:$4 sm:$0xff]  }
0x11b5   : > { %v4323_v22 = vpack.c.bf16 %v4322_v53, %v4321_v15 }
0x11b6   : > { %v4388_v1 = vadd.f32 %v4386_v2, %v4384_v17  ;;  %v11186_v2 = vld [vmem:[%s14061_s10 + $0x74] ss:$8 sps:$4 sm:$0xff]  }
0x11b7   : > { %10499 = vmatmul.mubr.msk.bf16.vlgmr.msra.gmra.mrb[52].mxu1 %vm4300_vm11, %v4323_v22  ;;  %v11166_v22 = vld [vmem:[%s14061_s10 + $0x10] ss:$8 sps:$4 sm:$0xff]   ;;  %v11192_v17 = vld [vmem:[%s14061_s10 + $0x94] ss:$8 sps:$4 sm:$0xff]  }
0x11b8   : > { %10503 = vmatpush3.bf16.xpose.msra.mxu1 %v4418_v3  ;;  %10506 = vmatprep.mubr.msk.bf16.mxu1 %vm12874_vm4, %v12873_v50  ;;  %v4417_v47 = vpack.c.bf16 %v4389_v27, %v4388_v1  ;;  %v11171_v3 = vld [vmem:[%s14061_s10 + $0x24] ss:$8 sps:$4 sm:$0xff]   ;;  %v11193_v27 = vld [vmem:[%s14061_s10 + $0xa0] ss:$8 sps:$4 sm:$0xff]  }
0x11b9   : > { %10504 = vmatprep.subr.bf16.mxu1 %v12873_v50  ;;  %v11195_v1 = vld [vmem:[%s14061_s10 + $0xa4] ss:$8 sps:$4 sm:$0xff]  }
0x11c0   : > { %10505 = vmatpush3.bf16.xpose.msra.mxu1 %v4419_v57  ;;  %v11184_v57 = vld [vmem:[%s14061_s10 + $0x70] ss:$8 sps:$4 sm:$0xff]  }
0x11c1   : > { %10510 = vmatprep.subr.bf16.mxu1 %v12873_v50 }
0x11c7   : > { %10507 = vmatmul.mubr.bf16.vlgmr.msra.gmra.mrb[56].mxu1 %v4417_v47  ;;  %v11198_v47 = vld [vmem:[%s14061_s10 + $0xb4] ss:$8 sps:$4 sm:$0xff]  }
0x11c8   : > { %10511 = vmatpush3.bf16.msra.mxu1 %v4420_v41  ;;  %10514 = vmatprep.mubr.msk.bf16.mxu1 %vm12874_vm4, %v12873_v50 }
0x11c9   : > { %10512 = vmatprep.subr.bf16.mxu1 %v12873_v50 }
0x11cc   : > { %10513 = vmatpush3.bf16.msra.mxu1 %v14701_v49 }
0x11cd   : > { %4727 = vmatprep.subr.bf16.mxu1 %v11165_v19 }
0x128a   : > { %v14788_v60 = vpop.f32.mrb[52].mxu1 }
0x128b   : > { %v10500_v28 = vpop.f32.mrb[53].mxu1 }
0x128c   : > { %v14790_v30 = vpop.f32.mrb[54].mxu1  ;;  %v11196_v28 = vld [vmem:[%s14061_s10 + $0xb0] ss:$8 sps:$4 sm:$0xff]  }
0x128d   : > { %v4533_v52 = vpack.c.bf16 %v14790_v30, %v14788_v60  ;;  %v10501_v56 = vpop.f32.mrb[55].mxu1 }
0x128e   : > { %v11201_v56 = vld [vmem:[%s14061_s10 + $0xc4] ss:$8 sps:$4 sm:$0xff]  }
0x129a   : > { %v4456_v5 = vpop.f32.mrb[56].mxu1 }
0x129b   : > { %v4457_v8 = vadd.f32 %v14728_v21, %v4456_v5  ;;  %v10508_v29 = vpop.f32.mrb[57].mxu1  ;;  %v11199_v5 = vld [vmem:[%s14061_s10 + $0xc0] ss:$8 sps:$4 sm:$0xff]  }
0x129c   : > { %v4459_v41 = vpop.f32.mrb[58].mxu1  ;;  %v11202_v29 = vld [vmem:[%s14061_s10 + $0xd0] ss:$8 sps:$4 sm:$0xff]  }
0x129d   : > { %v4460_v46 = vadd.f32 %v14728_v21, %v4459_v41  ;;  %v10509_v58 = vpop.f32.mrb[59].mxu1  ;;  %v4463_v50 = vsel %vm4300_vm11, %v4457_v8, -inf  ;;  %v11207_v41 = vld [vmem:[%s14061_s10 + $0xe4] ss:$8 sps:$4 sm:$0xff]  }
0x129e   : > { %4464 = vmax.xlane.f32.xlu0 %v4463_v50  ;;  %v11210_v58 = vld [vmem:[%s14061_s10 + $0xf4] ss:$8 sps:$4 sm:$0xff]   ;;  %v11208_v50 = vld [vmem:[%s14061_s10 + $0xf0] ss:$8 sps:$4 sm:$0xff]  }
0x129f   : > { %v4466_v49 = vsel %vm4300_vm11, %v4460_v46, -inf }
0x12a0   : > { %4467 = vmax.xlane.f32.xlu1 %v4466_v49 }
0x132b   : > { %v4465_v18 = vpop.xlane.xlu0 %4464 }
0x132c   : > { %v4469_v7 = vsub.f32 %v4457_v8, %v4465_v18  ;;  %v11204_v8 = vld [vmem:[%s14061_s10 + $0xd4] ss:$8 sps:$4 sm:$0xff]  }
0x132d   : > { %v4468_v63 = vpop.xlane.xlu1 %4467 }
0x132e   : > { %v4471_v39 = vmul.f32 1.442695, %v4469_v7  ;;  %v4470_v34 = vsub.f32 %v4460_v46, %v4468_v63  ;;  %v11205_v46 = vld [vmem:[%s14061_s10 + $0xe0] ss:$8 sps:$4 sm:$0xff]  }
0x1330   : > { %11635 = vpow2.f32 %v4471_v39  ;;  %v4473_v48 = vmul.f32 1.442695, %v4470_v34  ;;  %v4774_v34 = vld [vmem:[%s15812_s23] sm:$0x3] }
0x1332   : > { %11637 = vpow2.f32 %v4473_v48  ;;  %v4779_v48 = vrot.slane %v4774_v34, %v14187_v12 }
0x133a   : > { %v11636_v20 = vpop.eup %11635 }
0x133b   : > { %v4475_v21 = vsel %vm4300_vm11, %v11636_v20, 0.0 }
0x133c   : > { %v11638_v23 = vpop.eup %11637  ;;  %4476 = vadd.xlane.f32.xlu0 %v4475_v21  ;;  %v4783_v21 = vrot.slane %v4774_v34, %v14184_v11  ;;  %v4951_v34 = vld [vmem:[%s14091_s11 + $0x288] sm:$0xff] }
0x133d   : > { %v4478_v16 = vsel %vm4300_vm11, %v11638_v23, 0.0 }
0x1340   : > { %4479 = vadd.xlane.f32.xlu0 %v4478_v16 }
0x13c9   : > { %v4477_v6 = vpop.xlane.xlu0 %4476 }
0x13ca   : > { %11639 = vrcp.f32 %v4477_v6 }
0x13cd   : > { %v4480_v4 = vpop.xlane.xlu0 %4479 }
0x13ce   : > { %11641 = vrcp.f32 %v4480_v4 }
0x13d4   : > { %v11640_v43 = vpop.eup %11639 }
0x13d5   : > { %v4483_v15 = vmul.f32 %v11640_v43, %v11636_v20 }
0x13d8   : > { %v11642_v0 = vpop.eup %11641 }
0x13d9   : > { %v4484_v53 = vmul.f32 %v11642_v0, %v11638_v23 }
0x13db   : > { %v4485_v51 = vpack.c.bf16 %v4484_v53, %v4483_v15  ;;  %v4870_v15 = vld [vmem:[%s14091_s11] sm:$0xff] }
0x13dc   : > { %v4878_v53 = vld [vmem:[%s14091_s11 + $0x40] sm:$0xff] }
0x13dd   : > { %10515 = vmatmul.mubr.msk.bf16.vlgmr.msra.gmra.mrb[60].mxu1 %vm4300_vm11, %v4485_v51  ;;  %v9905_v51 = vcombine.high %v4870_v15, %v4878_v53 }
0x13de   : > { %4728 = vmatpush1.bf16.msra.mxu1 %v11163_v13  ;;  %v9904_v13 = vcombine.low %v4870_v15, %v4878_v53 }
0x13df   : > { %4729 = vmatprep.subr.bf16.mxu1 %v11168_v25  ;;  %v4879_v25 = vld [vmem:[%s14091_s11 + $0x48] sm:$0xff]  ;;  %6490 = vmatprep.subr.bf16.mxu0 %v9905_v51 }
0x13e0   : > { %6491 = vmatpush1.bf16.msra.mxu0 %v9904_v13 }
0x13e2   : > { %4730 = vmatpush1.bf16.msra.mxu1 %v11166_v22  ;;  %v4886_v22 = vld [vmem:[%s14091_s11 + $0x80] sm:$0xff] }
0x13e3   : > { %4731 = vmatprep.subr.bf16.mxu1 %v11171_v3  ;;  %v4894_v3 = vld [vmem:[%s14091_s11 + $0xc0] sm:$0xff] }
0x13e6   : > { %4732 = vmatpush1.bf16.msra.mxu1 %v11169_v59 }
0x13e7   : > { %4733 = vmatprep.subr.bf16.mxu1 %v11174_v62 }
0x13ea   : > { %4734 = vmatpush1.bf16.msra.mxu1 %v11172_v38  ;;  %v9921_v38 = vcombine.high %v4886_v22, %v4894_v3 }
0x13eb   : > { %4735 = vmatprep.subr.bf16.mxu1 %v11177_v24  ;;  %v4887_v24 = vld [vmem:[%s14091_s11 + $0x88] sm:$0xff] }
0x13ec   : > { %6492 = vmatprep.subr.bf16.mxu0 %v9921_v38  ;;  %v4974_v38 = vld [vmem:[%s14091_s11 + $0x340] sm:$0xff] }
0x13ee   : > { %4736 = vmatpush1.bf16.msra.mxu1 %v11175_v37  ;;  %v4895_v37 = vld [vmem:[%s14091_s11 + $0xc8] sm:$0xff] }
0x13ef   : > { %4737 = vmatprep.subr.bf16.mxu1 %v11180_v32  ;;  %v4902_v32 = vld [vmem:[%s14091_s11 + $0x100] sm:$0xff] }
0x13f2   : > { %4738 = vmatpush1.bf16.msra.mxu1 %v11178_v26  ;;  %v9923_v26 = vcombine.high %v4887_v24, %v4895_v37 }
0x13f3   : > { %4739 = vmatprep.subr.bf16.mxu1 %v11183_v36  ;;  %v4910_v36 = vld [vmem:[%s14091_s11 + $0x140] sm:$0xff] }
0x13f6   : > { %4740 = vmatpush1.bf16.msra.mxu1 %v11181_v14  ;;  %v4903_v14 = vld [vmem:[%s14091_s11 + $0x108] sm:$0xff] }
0x13f7   : > { %4741 = vmatprep.subr.bf16.mxu1 %v11186_v2  ;;  %v4911_v2 = vld [vmem:[%s14091_s11 + $0x148] sm:$0xff] }
0x13fa   : > { %4742 = vmatpush1.bf16.msra.mxu1 %v11184_v57  ;;  %v9920_v57 = vcombine.low %v4886_v22, %v4894_v3 }
0x13fb   : > { %4743 = vmatprep.subr.bf16.mxu1 %v11189_v35  ;;  %v9922_v35 = vcombine.low %v4887_v24, %v4895_v37  ;;  %v4967_v24 = vld [vmem:[%s14091_s11 + $0x308] sm:$0xff] }
0x13fc   : > { %6493 = vmatpush1.bf16.msra.mxu0 %v9920_v57  ;;  %v4990_v57 = vld [vmem:[%s14091_s11 + $0x3c0] sm:$0xff] }
0x13fe   : > { %4744 = vmatpush1.bf16.msra.mxu1 %v11187_v9  ;;  %v9937_v9 = vcombine.high %v4902_v32, %v4910_v36 }
0x13ff   : > { %4745 = vmatprep.subr.bf16.mxu1 %v11192_v17  ;;  %v9939_v17 = vcombine.high %v4903_v14, %v4911_v2 }
0x1400   : > { %6494 = vmatprep.subr.bf16.mxu0 %v9937_v9 }
0x1402   : > { %4746 = vmatpush1.bf16.msra.mxu1 %v11190_v45  ;;  %v4918_v45 = vld [vmem:[%s14091_s11 + $0x180] sm:$0xff] }
0x1403   : > { %4747 = vmatprep.subr.bf16.mxu1 %v11195_v1  ;;  %v4926_v1 = vld [vmem:[%s14091_s11 + $0x1c0] sm:$0xff] }
0x1406   : > { %4748 = vmatpush1.bf16.msra.mxu1 %v11193_v27  ;;  %v4919_v27 = vld [vmem:[%s14091_s11 + $0x188] sm:$0xff] }
0x1407   : > { %4749 = vmatprep.subr.bf16.mxu1 %v11198_v47  ;;  %v4927_v47 = vld [vmem:[%s14091_s11 + $0x1c8] sm:$0xff] }
0x140a   : > { %4750 = vmatpush1.bf16.msra.mxu1 %v11196_v28  ;;  %v9936_v28 = vcombine.low %v4902_v32, %v4910_v36  ;;  %v4975_v32 = vld [vmem:[%s14091_s11 + $0x348] sm:$0xff] }
0x140b   : > { %4751 = vmatprep.subr.bf16.mxu1 %v11201_v56  ;;  %v9938_v56 = vcombine.low %v4903_v14, %v4911_v2  ;;  %v10002_v36 = vcombine.low %v4967_v24, %v4975_v32  ;;  %v10003_v14 = vcombine.high %v4967_v24, %v4975_v32  ;;  %v4982_v2 = vld [vmem:[%s14091_s11 + $0x380] sm:$0xff] }
0x140c   : > { %6495 = vmatpush1.bf16.msra.mxu0 %v9936_v28  ;;  %v10017_v9 = vcombine.high %v4982_v2, %v4990_v57  ;;  %v5006_v28 = vld [vmem:[%s14091_s11 + $0x440] sm:$0xff] }
0x140e   : > { %4752 = vmatpush1.bf16.msra.mxu1 %v11199_v5  ;;  %v9953_v5 = vcombine.high %v4918_v45, %v4926_v1 }
0x140f   : > { %4753 = vmatprep.subr.bf16.mxu1 %v11204_v8  ;;  %v9955_v8 = vcombine.high %v4919_v27, %v4927_v47 }
0x1410   : > { %6496 = vmatprep.subr.bf16.mxu0 %v9953_v5 }
0x1412   : > { %4754 = vmatpush1.bf16.msra.mxu1 %v11202_v29  ;;  %v4934_v29 = vld [vmem:[%s14091_s11 + $0x200] sm:$0xff] }
0x1413   : > { %4755 = vmatprep.subr.bf16.mxu1 %v11207_v41  ;;  %v4942_v41 = vld [vmem:[%s14091_s11 + $0x240] sm:$0xff] }
0x1416   : > { %4756 = vmatpush1.bf16.msra.mxu1 %v11205_v46  ;;  %v4935_v46 = vld [vmem:[%s14091_s11 + $0x208] sm:$0xff] }
0x1417   : > { %4757 = vmatprep.subr.bf16.mxu1 %v11210_v58  ;;  %v4943_v58 = vld [vmem:[%s14091_s11 + $0x248] sm:$0xff] }
0x141a   : > { %4758 = vmatpush1.bf16.msra.mxu1 %v11208_v50  ;;  %v9952_v50 = vcombine.low %v4918_v45, %v4926_v1  ;;  %v10016_v45 = vcombine.low %v4982_v2, %v4990_v57  ;;  %v5086_v2 = vld [vmem:[%s14091_s11 + $0x6c0] sm:$0xff]  ;;  %v5079_v57 = vld [vmem:[%s14091_s11 + $0x688] sm:$0xff] }
0x141c   : > { %6497 = vmatpush1.bf16.msra.mxu0 %v9952_v50  ;;  %v5022_v50 = vld [vmem:[%s14091_s11 + $0x4c0] sm:$0xff] }
0x14b0   : > { %v4526_v49 = vpop.f32.mrb[60].mxu1 }
0x14b1   : > { %v10516_v18 = vpop.f32.mrb[61].mxu1 }
0x14b2   : > { %v4529_v7 = vpop.f32.mrb[62].mxu1  ;;  %v9969_v18 = vcombine.high %v4934_v29, %v4942_v41 }
0x14b3   : > { %v4534_v63 = vpack.c.bf16 %v4529_v7, %v4526_v49  ;;  %v10517_v39 = vpop.f32.mrb[63].mxu1  ;;  %v9954_v49 = vcombine.low %v4919_v27, %v4927_v47  ;;  %v9971_v7 = vcombine.high %v4935_v46, %v4943_v58  ;;  %v4998_v47 = vld [vmem:[%s14091_s11 + $0x400] sm:$0xff] }
0x14b4   : > { %v4958_v39 = vld [vmem:[%s14091_s11 + $0x2c0] sm:$0xff]  ;;  %6498 = vmatprep.subr.bf16.mxu0 %v9969_v18  ;;  %v10033_v5 = vcombine.high %v4998_v47, %v5006_v28 }
0x14b5   : > { %4759 = vmatprep.mubr.bf16.mxu1 %v4534_v63  ;;  %v4950_v63 = vld [vmem:[%s14091_s11 + $0x280] sm:$0xff] }
0x14b6   : > { %4760 = vmatmul.mubr.bf16.vlgmr.msra.gmra.mrb[64].mxu1 %v4533_v52 }
0x1589   : > { %v4761_v20 = vpop.f32.mrb[64].mxu1 }
0x158a   : > { %v4770_v23 = vadd.f32 %v4761_v20, %v14457_v33  ;;  %v4763_v16 = vpop.f32.mrb[65].mxu1  ;;  %v9968_v20 = vcombine.low %v4934_v29, %v4942_v41  ;;  %v10032_v29 = vcombine.low %v4998_v47, %v5006_v28  ;;  %v5102_v47 = vld [vmem:[%s14091_s11 + $0x740] sm:$0xff]  ;;  %v5095_v28 = vld [vmem:[%s14091_s11 + $0x708] sm:$0xff] }
0x158b   : > { %v4771_v19 = vadd.f32 %v4763_v16, %v14459_v31  ;;  %v4765_v6 = vpop.f32.mrb[66].mxu1 }
0x158c   : > { %v14842_v4 = vadd.f32 %v4779_v48, %v4770_v23  ;;  %v4772_v60 = vadd.f32 %v4765_v6, %v14461_v40  ;;  %v4767_v30 = vpop.f32.mrb[67].mxu1  ;;  %v9985_v23 = vcombine.high %v4950_v63, %v4958_v39  ;;  %6499 = vmatpush1.bf16.msra.mxu0 %v9968_v20  ;;  %v5038_v20 = vld [vmem:[%s14091_s11 + $0x540] sm:$0xff] }
0x158d   : > { %v14845_v52 = vadd.f32 %v4783_v21, %v4771_v19  ;;  %v4773_v43 = vadd.f32 %v4767_v30, %v14463_v44  ;;  %v4871_v44 = vld [vmem:[%s14091_s11 + $0x8] sm:$0xff]  ;;  %v9984_v19 = vcombine.low %v4950_v63, %v4958_v39 }
0x158e   : > { %v14848_v0 = vadd.f32 %v4779_v48, %v4772_v60  ;;  %v9906_v59 = vcombine.low %v4871_v44, %v4879_v25  ;;  %v9907_v62 = vcombine.high %v4871_v44, %v4879_v25  ;;  %v4959_v48 = vld [vmem:[%s14091_s11 + $0x2c8] sm:$0xff]  ;;  %6500 = vmatprep.subr.bf16.mxu0 %v9985_v23 }
0x158f   : > { %v14850_v33 = vadd.f32 %v4783_v21, %v4773_v43  ;;  %v4792_v31 = vadd.f32 %v14845_v52, %v14842_v4  ;;  %v9970_v21 = vcombine.low %v4935_v46, %v4943_v58  ;;  %v9987_v16 = vcombine.high %v4951_v34, %v4959_v48  ;;  %v5014_v58 = vld [vmem:[%s14091_s11 + $0x480] sm:$0xff] }
0x1590   : > { %6533 = vmatprep.subr.bf16.mxu1 %v9907_v62  ;;  %v9986_v6 = vcombine.low %v4951_v34, %v4959_v48  ;;  %6501 = vmatpush1.bf16.msra.mxu0 %v9984_v19  ;;  %v4966_v62 = vld [vmem:[%s14091_s11 + $0x300] sm:$0xff]  ;;  %v10049_v18 = vcombine.high %v5014_v58, %v5022_v50  ;;  %v10048_v63 = vcombine.low %v5014_v58, %v5022_v50  ;;  %v5111_v50 = vld [vmem:[%s14091_s11 + $0x788] sm:$0xff] }
0x1591   : > { %4793 = vadd.xlane.f32.xlu0 %v4792_v31  ;;  %v4795_v40 = vadd.f32 %v14850_v33, %v14848_v0  ;;  %6534 = vmatpush1.bf16.msra.mxu1 %v9906_v59  ;;  %v10001_v37 = vcombine.high %v4966_v62, %v4974_v38  ;;  %v5030_v48 = vld [vmem:[%s14091_s11 + $0x500] sm:$0xff] }
0x1592   : > { %6535 = vmatprep.subr.bf16.mxu1 %v9923_v26  ;;  %v10000_v26 = vcombine.low %v4966_v62, %v4974_v38  ;;  %v10065_v23 = vcombine.high %v5030_v48, %v5038_v20  ;;  %v10064_v19 = vcombine.low %v5030_v48, %v5038_v20  ;;  %v5070_v62 = vld [vmem:[%s14091_s11 + $0x640] sm:$0xff]  ;;  %v5063_v38 = vld [vmem:[%s14091_s11 + $0x608] sm:$0xff]  ;;  %v14944_v48 = vld [vmem:[%s14091_s11 + $0x50] sm:$0xff] }
0x1593   : > { %4796 = vadd.xlane.f32.xlu1 %v4795_v40  ;;  %6502 = vmatprep.subr.bf16.mxu0 %v10001_v37  ;;  %v5071_v37 = vld [vmem:[%s14091_s11 + $0x648] sm:$0xff]  ;;  %v5118_v58 = vld [vmem:[%s14091_s11 + $0x7c0] sm:$0xff]  ;;  %v14947_v20 = vld [vmem:[%s14091_s11 + $0x18] sm:$0xff] }
0x1594   : > { %6503 = vmatpush1.bf16.msra.mxu0 %v10000_v26  ;;  %v10098_v26 = vcombine.low %v5063_v38, %v5071_v37 }
0x1595   : > { %6536 = vmatpush1.bf16.msra.mxu1 %v9922_v35  ;;  %v4983_v35 = vld [vmem:[%s14091_s11 + $0x388] sm:$0xff]  ;;  %6504 = vmatprep.subr.bf16.mxu0 %v10017_v9 }
0x1596   : > { %6537 = vmatprep.subr.bf16.mxu1 %v9939_v17  ;;  %v4991_v17 = vld [vmem:[%s14091_s11 + $0x3c8] sm:$0xff] }
0x1597   : > { %v10018_v1 = vcombine.low %v4983_v35, %v4991_v17  ;;  %v10019_v27 = vcombine.high %v4983_v35, %v4991_v17  ;;  %v5087_v9 = vld [vmem:[%s14091_s11 + $0x6c8] sm:$0xff] }
0x1598   : > { %6505 = vmatpush1.bf16.msra.mxu0 %v10016_v45  ;;  %v10114_v45 = vcombine.low %v5079_v57, %v5087_v9 }
0x1599   : > { %6538 = vmatpush1.bf16.msra.mxu1 %v9938_v56  ;;  %v4999_v56 = vld [vmem:[%s14091_s11 + $0x408] sm:$0xff]  ;;  %6506 = vmatprep.subr.bf16.mxu0 %v10033_v5 }
0x159a   : > { %6539 = vmatprep.subr.bf16.mxu1 %v9955_v8  ;;  %v5007_v8 = vld [vmem:[%s14091_s11 + $0x448] sm:$0xff] }
0x159b   : > { %v10034_v41 = vcombine.low %v4999_v56, %v5007_v8  ;;  %v10035_v46 = vcombine.high %v4999_v56, %v5007_v8  ;;  %v5103_v5 = vld [vmem:[%s14091_s11 + $0x748] sm:$0xff] }
0x159c   : > { %6507 = vmatpush1.bf16.msra.mxu0 %v10032_v29  ;;  %v10130_v29 = vcombine.low %v5095_v28, %v5103_v5 }
0x159d   : > { %6540 = vmatpush1.bf16.msra.mxu1 %v9954_v49  ;;  %v5015_v49 = vld [vmem:[%s14091_s11 + $0x488] sm:$0xff]  ;;  %6508 = vmatprep.subr.bf16.mxu0 %v10049_v18 }
0x159e   : > { %6541 = vmatprep.subr.bf16.mxu1 %v9971_v7  ;;  %v5023_v7 = vld [vmem:[%s14091_s11 + $0x4c8] sm:$0xff] }
0x159f   : > { %v10050_v39 = vcombine.low %v5015_v49, %v5023_v7  ;;  %v10051_v34 = vcombine.high %v5015_v49, %v5023_v7  ;;  %v5119_v7 = vld [vmem:[%s14091_s11 + $0x7c8] sm:$0xff] }
0x15a0   : > { %6509 = vmatpush1.bf16.msra.mxu0 %v10048_v63  ;;  %v10146_v63 = vcombine.low %v5111_v50, %v5119_v7 }
0x15a1   : > { %6542 = vmatpush1.bf16.msra.mxu1 %v9970_v21  ;;  %v5031_v21 = vld [vmem:[%s14091_s11 + $0x508] sm:$0xff]  ;;  %6510 = vmatprep.subr.bf16.mxu0 %v10065_v23  ;;  %v14952_v23 = vld [vmem:[%s14091_s11 + $0x58] sm:$0xff] }
0x15a2   : > { %6543 = vmatprep.subr.bf16.mxu1 %v9987_v16  ;;  %v5039_v16 = vld [vmem:[%s14091_s11 + $0x548] sm:$0xff] }
0x15a4   : > { %6511 = vmatpush1.bf16.msra.mxu0 %v10064_v19  ;;  %v9910_v19 = vcombine.low %v14947_v20, %v14952_v23 }
0x15a5   : > { %6544 = vmatpush1.bf16.msra.mxu1 %v9986_v6  ;;  %v10066_v6 = vcombine.low %v5031_v21, %v5039_v16 }
0x15a6   : > { %6545 = vmatprep.subr.bf16.mxu1 %v10003_v14  ;;  %v5078_v14 = vld [vmem:[%s14091_s11 + $0x680] sm:$0xff] }
0x15a7   : > { %v10113_v35 = vcombine.high %v5078_v14, %v5086_v2  ;;  %v10112_v17 = vcombine.low %v5078_v14, %v5086_v2 }
0x15a9   : > { %6546 = vmatpush1.bf16.msra.mxu1 %v10002_v36  ;;  %v10099_v36 = vcombine.high %v5063_v38, %v5071_v37 }
0x15aa   : > { %6547 = vmatprep.subr.bf16.mxu1 %v10019_v27  ;;  %v5094_v27 = vld [vmem:[%s14091_s11 + $0x700] sm:$0xff] }
0x15ab   : > { %v10129_v56 = vcombine.high %v5094_v27, %v5102_v47  ;;  %v10128_v8 = vcombine.low %v5094_v27, %v5102_v47 }
0x15ad   : > { %6548 = vmatpush1.bf16.msra.mxu1 %v10018_v1  ;;  %v10115_v1 = vcombine.high %v5079_v57, %v5087_v9 }
0x15ae   : > { %6549 = vmatprep.subr.bf16.mxu1 %v10035_v46  ;;  %v5110_v46 = vld [vmem:[%s14091_s11 + $0x780] sm:$0xff] }
0x15af   : > { %v10144_v49 = vcombine.low %v5110_v46, %v5118_v58  ;;  %v10145_v18 = vcombine.high %v5110_v46, %v5118_v58  ;;  %v4888_v58 = vld [vmem:[%s14091_s11 + $0x90] sm:$0xff] }
0x15b1   : > { %6550 = vmatpush1.bf16.msra.mxu1 %v10034_v41  ;;  %v10131_v41 = vcombine.high %v5095_v28, %v5103_v5 }
0x15b2   : > { %6551 = vmatprep.subr.bf16.mxu1 %v10051_v34  ;;  %v14941_v34 = vld [vmem:[%s14091_s11 + $0x10] sm:$0xff] }
0x15b5   : > { %6552 = vmatpush1.bf16.msra.mxu1 %v10050_v39  ;;  %v10147_v39 = vcombine.high %v5111_v50, %v5119_v7  ;;  %v4896_v50 = vld [vmem:[%s14091_s11 + $0xd0] sm:$0xff] }
0x161e   : > { %v4794_v60 = vpop.xlane.xlu0 %4793 }
0x161f   : > { %v4798_v30 = vmul.f32 0.00390625, %v4794_v60  ;;  %v10067_v60 = vcombine.high %v5031_v21, %v5039_v16  ;;  %v9909_v21 = vcombine.high %v14941_v34, %v14944_v48  ;;  %v9908_v16 = vcombine.low %v14941_v34, %v14944_v48  ;;  %v4928_v34 = vld [vmem:[%s14091_s11 + $0x1d0] sm:$0xff]  ;;  %v4921_v48 = vld [vmem:[%s14091_s11 + $0x198] sm:$0xff] }
0x1620   : > { %v4797_v43 = vpop.xlane.xlu1 %4796 }
0x1621   : > { %v14881_v31 = vsub.f32 %v14842_v4, %v4798_v30  ;;  %v14884_v40 = vsub.f32 %v14845_v52, %v4798_v30  ;;  %v4799_v15 = vmul.f32 0.00390625, %v4797_v43  ;;  %6553 = vmatprep.subr.bf16.mxu1 %v10067_v60  ;;  %v5046_v30 = vld [vmem:[%s14091_s11 + $0x580] sm:$0xff] }
0x1622   : > { %v5054_v43 = vld [vmem:[%s14091_s11 + $0x5c0] sm:$0xff]  ;;  %6554 = vmatpush1.bf16.msra.mxu1 %v10066_v6  ;;  %v9911_v6 = vcombine.high %v14947_v20, %v14952_v23 }
0x1623   : > { %v14887_v53 = vsub.f32 %v14848_v0, %v4799_v15  ;;  %v14890_v44 = vsub.f32 %v14850_v33, %v4799_v15  ;;  %v4804_v13 = vmul.f32 %v14881_v31, %v14881_v31  ;;  %v4805_v51 = vmul.f32 %v14884_v40, %v14884_v40  ;;  %v5047_v15 = vld [vmem:[%s14091_s11 + $0x588] sm:$0xff] }
0x1625   : > { %v4808_v25 = vadd.f32 %v4805_v51, %v4804_v13  ;;  %v4806_v22 = vmul.f32 %v14887_v53, %v14887_v53  ;;  %v4807_v3 = vmul.f32 %v14890_v44, %v14890_v44  ;;  %v10081_v13 = vcombine.high %v5046_v30, %v5054_v43  ;;  %v5055_v51 = vld [vmem:[%s14091_s11 + $0x5c8] sm:$0xff] }
0x1627   : > { %4809 = vadd.xlane.f32.xlu0 %v4808_v25  ;;  %v4811_v59 = vadd.f32 %v4807_v3, %v4806_v22  ;;  %v10080_v25 = vcombine.low %v5046_v30, %v5054_v43  ;;  %v10082_v22 = vcombine.low %v5047_v15, %v5055_v51  ;;  %v10083_v3 = vcombine.high %v5047_v15, %v5055_v51 }
0x1628   : > { %6512 = vmatprep.subr.bf16.mxu0 %v10081_v13 }
0x1629   : > { %4812 = vadd.xlane.f32.xlu1 %v4811_v59  ;;  %6555 = vmatprep.subr.bf16.mxu1 %v10083_v3  ;;  %v5062_v59 = vld [vmem:[%s14091_s11 + $0x600] sm:$0xff] }
0x162a   : > { %6513 = vmatpush1.bf16.msra.mxu0 %v10080_v25  ;;  %6556 = vmatpush1.bf16.msra.mxu1 %v10082_v22  ;;  %v10097_v24 = vcombine.high %v5062_v59, %v5070_v62  ;;  %v10096_v32 = vcombine.low %v5062_v59, %v5070_v62 }
0x162b   : > { %6557 = vmatprep.subr.bf16.mxu1 %v10099_v36  ;;  %v4790_v36 = vld [vmem:[%s15813_s28] sm:$0x3] }
0x162c   : > { %6514 = vmatprep.subr.bf16.mxu0 %v10097_v24  ;;  %v4842_v2 = vrot.slane %v4790_v36, %v14187_v12  ;;  %v4846_v57 = vrot.slane %v4790_v36, %v14184_v11  ;;  %v4960_v36 = vld [vmem:[%s14091_s11 + $0x2d0] sm:$0xff] }
0x162e   : > { %6515 = vmatpush1.bf16.msra.mxu0 %v10096_v32  ;;  %6558 = vmatpush1.bf16.msra.mxu1 %v10098_v26 }
0x162f   : > { %6516 = vmatprep.subr.bf16.mxu0 %v10113_v35  ;;  %6559 = vmatprep.subr.bf16.mxu1 %v10115_v1  ;;  %v4791_v35 = vld [vmem:[%s15814_s5] sm:$0x3] }
0x1630   : > { %v4861_v1 = vrot.slane %v4791_v35, %v14184_v11  ;;  %v4857_v27 = vrot.slane %v4791_v35, %v14187_v12 }
0x1632   : > { %6517 = vmatpush1.bf16.msra.mxu0 %v10112_v17  ;;  %6560 = vmatpush1.bf16.msra.mxu1 %v10114_v45 }
0x1633   : > { %6518 = vmatprep.subr.bf16.mxu0 %v10129_v56  ;;  %6561 = vmatprep.subr.bf16.mxu1 %v10131_v41 }
0x1636   : > { %6519 = vmatpush1.bf16.msra.mxu0 %v10128_v8  ;;  %6562 = vmatpush1.bf16.msra.mxu1 %v10130_v29 }
0x1637   : > { %6520 = vmatprep.subr.bf16.mxu0 %v10145_v18  ;;  %6563 = vmatprep.subr.bf16.mxu1 %v10147_v39  ;;  %v4897_v18 = vld [vmem:[%s14091_s11 + $0xd8] sm:$0xff] }
0x163a   : > { %6521 = vmatpush1.bf16.msra.mxu0 %v10144_v49  ;;  %6564 = vmatpush1.bf16.msra.mxu1 %v10146_v63  ;;  %v4889_v49 = vld [vmem:[%s14091_s11 + $0x98] sm:$0xff] }
0x163b   : > { %6576 = vmatprep.subr.bf16.mxu0 %v9909_v21  ;;  %6619 = vmatprep.subr.bf16.mxu1 %v9911_v6  ;;  %v9927_v39 = vcombine.high %v4889_v49, %v4897_v18  ;;  %v4912_v21 = vld [vmem:[%s14091_s11 + $0x150] sm:$0xff]  ;;  %v4905_v6 = vld [vmem:[%s14091_s11 + $0x118] sm:$0xff] }
0x16b4   : > { %v4810_v60 = vpop.xlane.xlu0 %4809 }
0x16b5   : > { %v4814_v30 = vmul.f32 0.003921569, %v4810_v60  ;;  %v4913_v60 = vld [vmem:[%s14091_s11 + $0x158] sm:$0xff] }
0x16b6   : > { %v4813_v43 = vpop.xlane.xlu1 %4812  ;;  %v9942_v23 = vcombine.low %v4905_v6, %v4913_v60 }
0x16b7   : > { %11643 = vrsqrt.f32 %v4814_v30  ;;  %v4815_v15 = vmul.f32 0.003921569, %v4813_v43  ;;  %vm4818_vm12 = vcmp.eq.f32.partialorder %v4814_v30, inf  ;;  %v4821_v25 = vand.u32 2147483648, %v4814_v30 }
0x16b8   : > { %vm4820_vm13 = vcmp.eq.f32.partialorder %v4814_v30, 0.0  ;;  %v9926_v43 = vcombine.low %v4889_v49, %v4897_v18  ;;  %v5000_v18 = vld [vmem:[%s14091_s11 + $0x410] sm:$0xff] }
0x16b9   : > { %11645 = vrsqrt.f32 %v4815_v15  ;;  %vm4825_vm14 = vcmp.eq.f32.partialorder %v4815_v15, inf  ;;  %v4828_v24 = vand.u32 2147483648, %v4815_v15  ;;  %vm4827_vm15 = vcmp.eq.f32.partialorder %v4815_v15, 0.0 }
0x16c1   : > { %v11644_v13 = vpop.eup %11643 }
0x16c2   : > { %v4817_v51 = vmul.f32 %v11644_v13, %v4814_v30  ;;  %v9943_v13 = vcombine.high %v4905_v6, %v4913_v60 }
0x16c3   : > { %v11646_v22 = vpop.eup %11645 }
0x16c4   : > { %v4819_v3 = vsel %vm4818_vm12, %v4814_v30, %v4817_v51  ;;  %v4824_v62 = vmul.f32 %v11646_v22, %v4815_v15  ;;  %v9924_v30 = vcombine.low %v4888_v58, %v4896_v50  ;;  %v4920_v51 = vld [vmem:[%s14091_s11 + $0x190] sm:$0xff] }
0x16c5   : > { %v4822_v59 = vsel %vm4820_vm13, %v4821_v25, %v4819_v3  ;;  %v4936_v22 = vld [vmem:[%s14091_s11 + $0x210] sm:$0xff] }
0x16c6   : > { %v4830_v38 = vadd.f32 1e-06, %v4822_v59  ;;  %v4826_v37 = vsel %vm4825_vm14, %v4815_v15, %v4824_v62  ;;  %v4944_v3 = vld [vmem:[%s14091_s11 + $0x250] sm:$0xff]  ;;  %v4937_v59 = vld [vmem:[%s14091_s11 + $0x218] sm:$0xff] }
0x16c7   : > { %v4829_v32 = vsel %vm4827_vm15, %v4828_v24, %v4826_v37  ;;  %v4945_v62 = vld [vmem:[%s14091_s11 + $0x258] sm:$0xff]  ;;  %v9973_v37 = vcombine.high %v4936_v22, %v4944_v3 }
0x16c8   : > { %11647 = vrcp.f32 %v4830_v38  ;;  %v4831_v26 = vadd.f32 1e-06, %v4829_v32  ;;  %v9956_v38 = vcombine.low %v4920_v51, %v4928_v34  ;;  %v9975_v32 = vcombine.high %v4937_v59, %v4945_v62 }
0x16c9   : > { %v9974_v35 = vcombine.low %v4937_v59, %v4945_v62 }
0x16ca   : > { %11649 = vrcp.f32 %v4831_v26  ;;  %v4952_v26 = vld [vmem:[%s14091_s11 + $0x290] sm:$0xff] }
0x16d2   : > { %v11648_v14 = vpop.eup %11647 }
0x16d3   : > { %v4833_v9 = vmul.f32 %v11648_v14, %v14881_v31  ;;  %v4834_v17 = vmul.f32 %v11648_v14, %v14884_v40  ;;  %v4953_v14 = vld [vmem:[%s14091_s11 + $0x298] sm:$0xff] }
0x16d4   : > { %v11650_v45 = vpop.eup %11649 }
0x16d5   : > { %v4849_v47 = vmul.f32 %v4842_v2, %v4833_v9  ;;  %v4850_v28 = vmul.f32 %v4846_v57, %v4834_v17  ;;  %v4836_v56 = vmul.f32 %v11650_v45, %v14887_v53  ;;  %v4837_v5 = vmul.f32 %v11650_v45, %v14890_v44  ;;  %v4904_v53 = vld [vmem:[%s14091_s11 + $0x110] sm:$0xff] }
0x16d6   : > { %v9925_v44 = vcombine.high %v4888_v58, %v4896_v50  ;;  %v9941_v15 = vcombine.high %v4904_v53, %v4912_v21  ;;  %v9940_v20 = vcombine.low %v4904_v53, %v4912_v21  ;;  %v9989_v9 = vcombine.high %v4952_v26, %v4960_v36  ;;  %v4968_v45 = vld [vmem:[%s14091_s11 + $0x310] sm:$0xff] }
0x16d7   : > { %v4851_v8 = vmul.f32 %v4842_v2, %v4836_v56  ;;  %v4852_v29 = vmul.f32 %v4846_v57, %v4837_v5  ;;  %v4865_v31 = vadd.f32 %v4861_v1, %v4850_v28  ;;  %v4864_v41 = vadd.f32 %v4857_v27, %v4849_v47  ;;  %v4961_v2 = vld [vmem:[%s14091_s11 + $0x2d8] sm:$0xff]  ;;  %v5008_v53 = vld [vmem:[%s14091_s11 + $0x450] sm:$0xff] }
0x16d8   : > { %v9972_v57 = vcombine.low %v4936_v22, %v4944_v3  ;;  %v9991_v17 = vcombine.high %v4953_v14, %v4961_v2  ;;  %v4977_v47 = vld [vmem:[%s14091_s11 + $0x358] sm:$0xff]  ;;  %v9988_v28 = vcombine.low %v4952_v26, %v4960_v36  ;;  %v9990_v56 = vcombine.low %v4953_v14, %v4961_v2 }
0x16d9   : > { %v4867_v40 = vadd.f32 %v4861_v1, %v4852_v29  ;;  %v4866_v46 = vadd.f32 %v4857_v27, %v4851_v8  ;;  %v4976_v1 = vld [vmem:[%s14091_s11 + $0x350] sm:$0xff]  ;;  %v4969_v27 = vld [vmem:[%s14091_s11 + $0x318] sm:$0xff]  ;;  %v10037_v60 = vcombine.high %v5000_v18, %v5008_v53 }
0x16da   : > { %v10005_v5 = vcombine.high %v4968_v45, %v4976_v1  ;;  %v10007_v8 = vcombine.high %v4969_v27, %v4977_v47  ;;  %v4984_v29 = vld [vmem:[%s14091_s11 + $0x390] sm:$0xff]  ;;  %v10006_v58 = vcombine.low %v4969_v27, %v4977_v47  ;;  %v5041_v22 = vld [vmem:[%s14091_s11 + $0x558] sm:$0xff] }
0x16db   : > { %v14976_v7 = vpack.c.bf16 %v4867_v40, %v4865_v31  ;;  %v14978_v63 = vpack.c.bf16 %v4866_v46, %v4864_v41  ;;  %v4992_v31 = vld [vmem:[%s14091_s11 + $0x3d0] sm:$0xff]  ;;  %v4985_v40 = vld [vmem:[%s14091_s11 + $0x398] sm:$0xff]  ;;  %v10004_v46 = vcombine.low %v4968_v45, %v4976_v1 }
0x16dc   : > { %v4993_v41 = vld [vmem:[%s14091_s11 + $0x3d8] sm:$0xff]  ;;  %v10021_v50 = vcombine.high %v4984_v29, %v4992_v31  ;;  %v10020_v21 = vcombine.low %v4984_v29, %v4992_v31 }
0x16dd   : > { %6522 = vmatprep.mubr.bf16.mxu0 %v14976_v7  ;;  %6565 = vmatprep.mubr.bf16.mxu1 %v14976_v7  ;;  %v10023_v49 = vcombine.high %v4985_v40, %v4993_v41  ;;  %v10022_v6 = vcombine.low %v4985_v40, %v4993_v41  ;;  %v5057_v26 = vld [vmem:[%s14091_s11 + $0x5d8] sm:$0xff] }
0x16de   : > { %6523 = vmatmul.mubr.bf16.vlgmr.msra.gmra.mrb[4].mxu0 %v14978_v63  ;;  %6566 = vmatmul.mubr.bf16.vlgmr.msra.gmra.mrb[68].mxu1 %v14978_v63  ;;  %v5073_v45 = vld [vmem:[%s14091_s11 + $0x658] sm:$0xff] }
0x16df   : > { %6577 = vmatpush1.bf16.msra.mxu0 %v9908_v16  ;;  %6620 = vmatpush1.bf16.msra.mxu1 %v9910_v19  ;;  %v4929_v16 = vld [vmem:[%s14091_s11 + $0x1d8] sm:$0xff]  ;;  %v9957_v19 = vcombine.high %v4920_v51, %v4928_v34  ;;  %v10036_v34 = vcombine.low %v5000_v18, %v5008_v53 }
0x16e0   : > { %6608 = vmatprep.mubr.bf16.mxu0 %v14976_v7  ;;  %6651 = vmatprep.mubr.bf16.mxu1 %v14976_v7  ;;  %v9959_v25 = vcombine.high %v4921_v48, %v4929_v16  ;;  %v9958_v24 = vcombine.low %v4921_v48, %v4929_v16  ;;  %v5025_v51 = vld [vmem:[%s14091_s11 + $0x4d8] sm:$0xff] }
0x16e1   : > { %6578 = vmatprep.subr.bf16.mxu0 %v9925_v44  ;;  %6621 = vmatprep.subr.bf16.mxu1 %v9927_v39  ;;  %v5001_v44 = vld [vmem:[%s14091_s11 + $0x418] sm:$0xff] }
0x16e2   : > { %v5009_v39 = vld [vmem:[%s14091_s11 + $0x458] sm:$0xff] }
0x16e3   : > { %6579 = vmatpush1.bf16.msra.mxu0 %v9924_v30  ;;  %6622 = vmatpush1.bf16.msra.mxu1 %v9926_v43  ;;  %v10039_v30 = vcombine.high %v5001_v44, %v5009_v39  ;;  %v5016_v43 = vld [vmem:[%s14091_s11 + $0x490] sm:$0xff]  ;;  %v10038_v48 = vcombine.low %v5001_v44, %v5009_v39  ;;  %v5089_v29 = vld [vmem:[%s14091_s11 + $0x6d8] sm:$0xff] }
0x16e4   : > { %6580 = vmatprep.subr.bf16.mxu0 %v9941_v15  ;;  %6623 = vmatprep.subr.bf16.mxu1 %v9943_v13  ;;  %v5024_v15 = vld [vmem:[%s14091_s11 + $0x4d0] sm:$0xff]  ;;  %v5017_v13 = vld [vmem:[%s14091_s11 + $0x498] sm:$0xff] }
0x16e5   : > { %v10053_v16 = vcombine.high %v5016_v43, %v5024_v15  ;;  %v10052_v3 = vcombine.low %v5016_v43, %v5024_v15  ;;  %v10054_v59 = vcombine.low %v5017_v13, %v5025_v51  ;;  %v5105_v18 = vld [vmem:[%s14091_s11 + $0x758] sm:$0xff] }
0x16e6   : > { %v5121_v43 = vld [vmem:[%s14091_s11 + $0x7d8] sm:$0xff] }
0x16e7   : > { %6581 = vmatpush1.bf16.msra.mxu0 %v9940_v20  ;;  %6624 = vmatpush1.bf16.msra.mxu1 %v9942_v23  ;;  %v10055_v20 = vcombine.high %v5017_v13, %v5025_v51  ;;  %v5032_v23 = vld [vmem:[%s14091_s11 + $0x510] sm:$0xff] }
0x16e8   : > { %6582 = vmatprep.subr.bf16.mxu0 %v9957_v19  ;;  %6625 = vmatprep.subr.bf16.mxu1 %v9959_v25  ;;  %v5040_v19 = vld [vmem:[%s14091_s11 + $0x550] sm:$0xff]  ;;  %v5033_v25 = vld [vmem:[%s14091_s11 + $0x518] sm:$0xff] }
0x16e9   : > { %v10069_v62 = vcombine.high %v5032_v23, %v5040_v19  ;;  %v10068_v36 = vcombine.low %v5032_v23, %v5040_v19  ;;  %v10070_v14 = vcombine.low %v5033_v25, %v5041_v22  ;;  %v4883_v23 = vld [vmem:[%s14091_s11 + $0x68] sm:$0xff] }
0x16eb   : > { %6583 = vmatpush1.bf16.msra.mxu0 %v9956_v38  ;;  %6626 = vmatpush1.bf16.msra.mxu1 %v9958_v24  ;;  %v10071_v38 = vcombine.high %v5033_v25, %v5041_v22  ;;  %v5048_v24 = vld [vmem:[%s14091_s11 + $0x590] sm:$0xff] }
0x16ec   : > { %6584 = vmatprep.subr.bf16.mxu0 %v9973_v37  ;;  %6627 = vmatprep.subr.bf16.mxu1 %v9975_v32  ;;  %v5056_v37 = vld [vmem:[%s14091_s11 + $0x5d0] sm:$0xff]  ;;  %v5049_v32 = vld [vmem:[%s14091_s11 + $0x598] sm:$0xff] }
0x16ed   : > { %v10085_v2 = vcombine.high %v5048_v24, %v5056_v37  ;;  %v10084_v1 = vcombine.low %v5048_v24, %v5056_v37  ;;  %v10086_v27 = vcombine.low %v5049_v32, %v5057_v26  ;;  %v4899_v24 = vld [vmem:[%s14091_s11 + $0xe8] sm:$0xff] }
0x16ef   : > { %6585 = vmatpush1.bf16.msra.mxu0 %v9972_v57  ;;  %6628 = vmatpush1.bf16.msra.mxu1 %v9974_v35  ;;  %v10087_v57 = vcombine.high %v5049_v32, %v5057_v26  ;;  %v5064_v35 = vld [vmem:[%s14091_s11 + $0x610] sm:$0xff] }
0x16f0   : > { %6586 = vmatprep.subr.bf16.mxu0 %v9989_v9  ;;  %6629 = vmatprep.subr.bf16.mxu1 %v9991_v17  ;;  %v5072_v9 = vld [vmem:[%s14091_s11 + $0x650] sm:$0xff]  ;;  %v5065_v17 = vld [vmem:[%s14091_s11 + $0x618] sm:$0xff] }
0x16f1   : > { %v10101_v47 = vcombine.high %v5064_v35, %v5072_v9  ;;  %v10100_v31 = vcombine.low %v5064_v35, %v5072_v9  ;;  %v10102_v40 = vcombine.low %v5065_v17, %v5073_v45  ;;  %v4915_v35 = vld [vmem:[%s14091_s11 + $0x168] sm:$0xff] }
0x16f3   : > { %6587 = vmatpush1.bf16.msra.mxu0 %v9988_v28  ;;  %6630 = vmatpush1.bf16.msra.mxu1 %v9990_v56  ;;  %v10103_v28 = vcombine.high %v5065_v17, %v5073_v45  ;;  %v5080_v56 = vld [vmem:[%s14091_s11 + $0x690] sm:$0xff] }
0x16f4   : > { %6588 = vmatprep.subr.bf16.mxu0 %v10005_v5  ;;  %6631 = vmatprep.subr.bf16.mxu1 %v10007_v8  ;;  %v5088_v5 = vld [vmem:[%s14091_s11 + $0x6d0] sm:$0xff]  ;;  %v5081_v8 = vld [vmem:[%s14091_s11 + $0x698] sm:$0xff] }
0x16f5   : > { %v10117_v41 = vcombine.high %v5080_v56, %v5088_v5  ;;  %v10116_v53 = vcombine.low %v5080_v56, %v5088_v5  ;;  %v10118_v44 = vcombine.low %v5081_v8, %v5089_v29  ;;  %v4931_v56 = vld [vmem:[%s14091_s11 + $0x1e8] sm:$0xff] }
0x16f7   : > { %6589 = vmatpush1.bf16.msra.mxu0 %v10004_v46  ;;  %6632 = vmatpush1.bf16.msra.mxu1 %v10006_v58  ;;  %v10119_v46 = vcombine.high %v5081_v8, %v5089_v29  ;;  %v5096_v58 = vld [vmem:[%s14091_s11 + $0x710] sm:$0xff] }
0x16f8   : > { %6590 = vmatprep.subr.bf16.mxu0 %v10021_v50  ;;  %6633 = vmatprep.subr.bf16.mxu1 %v10023_v49  ;;  %v5104_v50 = vld [vmem:[%s14091_s11 + $0x750] sm:$0xff]  ;;  %v5097_v49 = vld [vmem:[%s14091_s11 + $0x718] sm:$0xff] }
0x16f9   : > { %v10133_v39 = vcombine.high %v5096_v58, %v5104_v50  ;;  %v10132_v15 = vcombine.low %v5096_v58, %v5104_v50  ;;  %v10134_v13 = vcombine.low %v5097_v49, %v5105_v18  ;;  %v4947_v58 = vld [vmem:[%s14091_s11 + $0x268] sm:$0xff] }
0x16fb   : > { %6591 = vmatpush1.bf16.msra.mxu0 %v10020_v21  ;;  %6634 = vmatpush1.bf16.msra.mxu1 %v10022_v6  ;;  %v10135_v21 = vcombine.high %v5097_v49, %v5105_v18  ;;  %v5112_v6 = vld [vmem:[%s14091_s11 + $0x790] sm:$0xff] }
0x16fc   : > { %6592 = vmatprep.subr.bf16.mxu0 %v10037_v60  ;;  %6635 = vmatprep.subr.bf16.mxu1 %v10039_v30  ;;  %v5120_v60 = vld [vmem:[%s14091_s11 + $0x7d0] sm:$0xff]  ;;  %v5113_v30 = vld [vmem:[%s14091_s11 + $0x798] sm:$0xff] }
0x16fd   : > { %v10149_v51 = vcombine.high %v5112_v6, %v5120_v60  ;;  %v10148_v19 = vcombine.low %v5112_v6, %v5120_v60  ;;  %v10150_v25 = vcombine.low %v5113_v30, %v5121_v43  ;;  %v4963_v6 = vld [vmem:[%s14091_s11 + $0x2e8] sm:$0xff] }
0x16ff   : > { %6593 = vmatpush1.bf16.msra.mxu0 %v10036_v34  ;;  %6636 = vmatpush1.bf16.msra.mxu1 %v10038_v48  ;;  %v10151_v34 = vcombine.high %v5113_v30, %v5121_v43  ;;  %v4874_v48 = vld [vmem:[%s14091_s11 + $0x20] sm:$0xff] }
0x1700   : > { %6594 = vmatprep.subr.bf16.mxu0 %v10053_v16  ;;  %6637 = vmatprep.subr.bf16.mxu1 %v10055_v20  ;;  %v4882_v16 = vld [vmem:[%s14091_s11 + $0x60] sm:$0xff]  ;;  %v4875_v20 = vld [vmem:[%s14091_s11 + $0x28] sm:$0xff] }
0x1701   : > { %v9913_v22 = vcombine.high %v4874_v48, %v4882_v16  ;;  %v9912_v37 = vcombine.low %v4874_v48, %v4882_v16  ;;  %v9914_v32 = vcombine.low %v4875_v20, %v4883_v23  ;;  %v4979_v48 = vld [vmem:[%s14091_s11 + $0x368] sm:$0xff] }
0x1703   : > { %6595 = vmatpush1.bf16.msra.mxu0 %v10052_v3  ;;  %6638 = vmatpush1.bf16.msra.mxu1 %v10054_v59  ;;  %v9915_v3 = vcombine.high %v4875_v20, %v4883_v23  ;;  %v4890_v59 = vld [vmem:[%s14091_s11 + $0xa0] sm:$0xff] }
0x1704   : > { %6596 = vmatprep.subr.bf16.mxu0 %v10069_v62  ;;  %6639 = vmatprep.subr.bf16.mxu1 %v10071_v38  ;;  %v4898_v62 = vld [vmem:[%s14091_s11 + $0xe0] sm:$0xff]  ;;  %v4891_v38 = vld [vmem:[%s14091_s11 + $0xa8] sm:$0xff] }
0x1705   : > { %v9929_v26 = vcombine.high %v4890_v59, %v4898_v62  ;;  %v9928_v9 = vcombine.low %v4890_v59, %v4898_v62  ;;  %v9930_v17 = vcombine.low %v4891_v38, %v4899_v24  ;;  %v4995_v59 = vld [vmem:[%s14091_s11 + $0x3e8] sm:$0xff] }
0x1707   : > { %6597 = vmatpush1.bf16.msra.mxu0 %v10068_v36  ;;  %6640 = vmatpush1.bf16.msra.mxu1 %v10070_v14  ;;  %v9931_v36 = vcombine.high %v4891_v38, %v4899_v24  ;;  %v4906_v14 = vld [vmem:[%s14091_s11 + $0x120] sm:$0xff] }
0x1708   : > { %6598 = vmatprep.subr.bf16.mxu0 %v10085_v2  ;;  %6641 = vmatprep.subr.bf16.mxu1 %v10087_v57  ;;  %v4914_v2 = vld [vmem:[%s14091_s11 + $0x160] sm:$0xff]  ;;  %v4907_v57 = vld [vmem:[%s14091_s11 + $0x128] sm:$0xff] }
0x1709   : > { %v9945_v45 = vcombine.high %v4906_v14, %v4914_v2  ;;  %v9944_v5 = vcombine.low %v4906_v14, %v4914_v2  ;;  %v9946_v8 = vcombine.low %v4907_v57, %v4915_v35  ;;  %v5011_v14 = vld [vmem:[%s14091_s11 + $0x468] sm:$0xff] }
0x170b   : > { %6599 = vmatpush1.bf16.msra.mxu0 %v10084_v1  ;;  %6642 = vmatpush1.bf16.msra.mxu1 %v10086_v27  ;;  %v9947_v1 = vcombine.high %v4907_v57, %v4915_v35  ;;  %v4922_v27 = vld [vmem:[%s14091_s11 + $0x1a0] sm:$0xff] }
0x170c   : > { %6600 = vmatprep.subr.bf16.mxu0 %v10101_v47  ;;  %6643 = vmatprep.subr.bf16.mxu1 %v10103_v28  ;;  %v4930_v47 = vld [vmem:[%s14091_s11 + $0x1e0] sm:$0xff]  ;;  %v4923_v28 = vld [vmem:[%s14091_s11 + $0x1a8] sm:$0xff] }
0x170d   : > { %v9961_v29 = vcombine.high %v4922_v27, %v4930_v47  ;;  %v9960_v50 = vcombine.low %v4922_v27, %v4930_v47  ;;  %v9962_v49 = vcombine.low %v4923_v28, %v4931_v56  ;;  %v5027_v27 = vld [vmem:[%s14091_s11 + $0x4e8] sm:$0xff] }
0x170f   : > { %6601 = vmatpush1.bf16.msra.mxu0 %v10100_v31  ;;  %6644 = vmatpush1.bf16.msra.mxu1 %v10102_v40  ;;  %v9963_v31 = vcombine.high %v4923_v28, %v4931_v56  ;;  %v4938_v40 = vld [vmem:[%s14091_s11 + $0x220] sm:$0xff] }
0x1710   : > { %6602 = vmatprep.subr.bf16.mxu0 %v10117_v41  ;;  %6645 = vmatprep.subr.bf16.mxu1 %v10119_v46  ;;  %v4946_v41 = vld [vmem:[%s14091_s11 + $0x260] sm:$0xff]  ;;  %v4939_v46 = vld [vmem:[%s14091_s11 + $0x228] sm:$0xff] }
0x1711   : > { %v9977_v18 = vcombine.high %v4938_v40, %v4946_v41  ;;  %v9976_v60 = vcombine.low %v4938_v40, %v4946_v41  ;;  %v9978_v30 = vcombine.low %v4939_v46, %v4947_v58  ;;  %v5043_v40 = vld [vmem:[%s14091_s11 + $0x568] sm:$0xff] }
0x1713   : > { %6603 = vmatpush1.bf16.msra.mxu0 %v10116_v53  ;;  %6646 = vmatpush1.bf16.msra.mxu1 %v10118_v44  ;;  %v9979_v53 = vcombine.high %v4939_v46, %v4947_v58  ;;  %v4954_v44 = vld [vmem:[%s14091_s11 + $0x2a0] sm:$0xff] }
0x1714   : > { %6604 = vmatprep.subr.bf16.mxu0 %v10133_v39  ;;  %6647 = vmatprep.subr.bf16.mxu1 %v10135_v21  ;;  %v4962_v39 = vld [vmem:[%s14091_s11 + $0x2e0] sm:$0xff]  ;;  %v4955_v21 = vld [vmem:[%s14091_s11 + $0x2a8] sm:$0xff] }
0x1715   : > { %v9993_v43 = vcombine.high %v4954_v44, %v4962_v39  ;;  %v9992_v16 = vcombine.low %v4954_v44, %v4962_v39  ;;  %v9994_v20 = vcombine.low %v4955_v21, %v4963_v6  ;;  %v5059_v44 = vld [vmem:[%s14091_s11 + $0x5e8] sm:$0xff] }
0x1717   : > { %6605 = vmatpush1.bf16.msra.mxu0 %v10132_v15  ;;  %6648 = vmatpush1.bf16.msra.mxu1 %v10134_v13  ;;  %v9995_v15 = vcombine.high %v4955_v21, %v4963_v6  ;;  %v4970_v13 = vld [vmem:[%s14091_s11 + $0x320] sm:$0xff] }
0x1718   : > { %6606 = vmatprep.subr.bf16.mxu0 %v10149_v51  ;;  %6649 = vmatprep.subr.bf16.mxu1 %v10151_v34  ;;  %v4978_v51 = vld [vmem:[%s14091_s11 + $0x360] sm:$0xff]  ;;  %v4971_v34 = vld [vmem:[%s14091_s11 + $0x328] sm:$0xff] }
0x1719   : > { %v10009_v23 = vcombine.high %v4970_v13, %v4978_v51  ;;  %v10008_v62 = vcombine.low %v4970_v13, %v4978_v51  ;;  %v10010_v38 = vcombine.low %v4971_v34, %v4979_v48  ;;  %v5075_v13 = vld [vmem:[%s14091_s11 + $0x668] sm:$0xff] }
0x171b   : > { %6607 = vmatpush1.bf16.msra.mxu0 %v10148_v19  ;;  %6650 = vmatpush1.bf16.msra.mxu1 %v10150_v25  ;;  %v10011_v19 = vcombine.high %v4971_v34, %v4979_v48  ;;  %v4986_v25 = vld [vmem:[%s14091_s11 + $0x3a0] sm:$0xff] }
0x171c   : > { %6662 = vmatprep.subr.bf16.mxu0 %v9913_v22  ;;  %6705 = vmatprep.subr.bf16.mxu1 %v9915_v3  ;;  %v4994_v22 = vld [vmem:[%s14091_s11 + $0x3e0] sm:$0xff]  ;;  %v4987_v3 = vld [vmem:[%s14091_s11 + $0x3a8] sm:$0xff] }
0x171d   : > { %v10025_v24 = vcombine.high %v4986_v25, %v4994_v22  ;;  %v10024_v2 = vcombine.low %v4986_v25, %v4994_v22  ;;  %v10026_v57 = vcombine.low %v4987_v3, %v4995_v59  ;;  %v5091_v25 = vld [vmem:[%s14091_s11 + $0x6e8] sm:$0xff] }
0x171e   : > { %6609 = vmatmul.mubr.bf16.vlgmr.msra.gmra.mrb[8].mxu0 %v14978_v63  ;;  %6652 = vmatmul.mubr.bf16.vlgmr.msra.gmra.mrb[72].mxu1 %v14978_v63 }
0x171f   : > { %6663 = vmatpush1.bf16.msra.mxu0 %v9912_v37  ;;  %6694 = vmatprep.mubr.bf16.mxu0 %v14976_v7  ;;  %v10027_v37 = vcombine.high %v4987_v3, %v4995_v59 }
0x1720   : > { %6706 = vmatpush1.bf16.msra.mxu1 %v9914_v32  ;;  %6737 = vmatprep.mubr.bf16.mxu1 %v14976_v7  ;;  %v5002_v32 = vld [vmem:[%s14091_s11 + $0x420] sm:$0xff] }
0x1721   : > { %6664 = vmatprep.subr.bf16.mxu0 %v9929_v26  ;;  %6707 = vmatprep.subr.bf16.mxu1 %v9931_v36  ;;  %v5010_v26 = vld [vmem:[%s14091_s11 + $0x460] sm:$0xff]  ;;  %v5003_v36 = vld [vmem:[%s14091_s11 + $0x428] sm:$0xff] }
0x1722   : > { %v10041_v35 = vcombine.high %v5002_v32, %v5010_v26  ;;  %v10040_v47 = vcombine.low %v5002_v32, %v5010_v26  ;;  %v10042_v28 = vcombine.low %v5003_v36, %v5011_v14  ;;  %v5107_v32 = vld [vmem:[%s14091_s11 + $0x768] sm:$0xff] }
0x1723   : > { %6665 = vmatpush1.bf16.msra.mxu0 %v9928_v9  ;;  %v10043_v9 = vcombine.high %v5003_v36, %v5011_v14 }
0x1724   : > { %6708 = vmatpush1.bf16.msra.mxu1 %v9930_v17  ;;  %6666 = vmatprep.subr.bf16.mxu0 %v9945_v45  ;;  %v5018_v17 = vld [vmem:[%s14091_s11 + $0x4a0] sm:$0xff] }
0x1725   : > { %6709 = vmatprep.subr.bf16.mxu1 %v9947_v1  ;;  %v5026_v45 = vld [vmem:[%s14091_s11 + $0x4e0] sm:$0xff]  ;;  %v5019_v1 = vld [vmem:[%s14091_s11 + $0x4a8] sm:$0xff] }
0x1726   : > { %v10057_v56 = vcombine.high %v5018_v17, %v5026_v45  ;;  %v10056_v41 = vcombine.low %v5018_v17, %v5026_v45  ;;  %v10058_v46 = vcombine.low %v5019_v1, %v5027_v27  ;;  %v5123_v17 = vld [vmem:[%s14091_s11 + $0x7e8] sm:$0xff] }
0x1727   : > { %6667 = vmatpush1.bf16.msra.mxu0 %v9944_v5  ;;  %v10059_v5 = vcombine.high %v5019_v1, %v5027_v27 }
0x1728   : > { %6710 = vmatpush1.bf16.msra.mxu1 %v9946_v8  ;;  %6668 = vmatprep.subr.bf16.mxu0 %v9961_v29  ;;  %v5034_v8 = vld [vmem:[%s14091_s11 + $0x520] sm:$0xff] }
0x1729   : > { %6711 = vmatprep.subr.bf16.mxu1 %v9963_v31  ;;  %v5042_v29 = vld [vmem:[%s14091_s11 + $0x560] sm:$0xff]  ;;  %v5035_v31 = vld [vmem:[%s14091_s11 + $0x528] sm:$0xff] }
0x172a   : > { %v10073_v58 = vcombine.high %v5034_v8, %v5042_v29  ;;  %v10072_v39 = vcombine.low %v5034_v8, %v5042_v29  ;;  %v10074_v21 = vcombine.low %v5035_v31, %v5043_v40  ;;  %v4885_v8 = vld [vmem:[%s14091_s11 + $0x78] sm:$0xff] }
0x172b   : > { %6669 = vmatpush1.bf16.msra.mxu0 %v9960_v50  ;;  %v10075_v50 = vcombine.high %v5035_v31, %v5043_v40 }
0x172c   : > { %6712 = vmatpush1.bf16.msra.mxu1 %v9962_v49  ;;  %6670 = vmatprep.subr.bf16.mxu0 %v9977_v18  ;;  %v5050_v49 = vld [vmem:[%s14091_s11 + $0x5a0] sm:$0xff] }
0x172d   : > { %6713 = vmatprep.subr.bf16.mxu1 %v9979_v53  ;;  %v5058_v18 = vld [vmem:[%s14091_s11 + $0x5e0] sm:$0xff]  ;;  %v5051_v53 = vld [vmem:[%s14091_s11 + $0x5a8] sm:$0xff] }
0x172e   : > { %v10089_v6 = vcombine.high %v5050_v49, %v5058_v18  ;;  %v10088_v51 = vcombine.low %v5050_v49, %v5058_v18  ;;  %v10090_v34 = vcombine.low %v5051_v53, %v5059_v44  ;;  %v4893_v49 = vld [vmem:[%s14091_s11 + $0xb8] sm:$0xff] }
0x172f   : > { %6671 = vmatpush1.bf16.msra.mxu0 %v9976_v60  ;;  %v10091_v60 = vcombine.high %v5051_v53, %v5059_v44  ;;  %v4901_v18 = vld [vmem:[%s14091_s11 + $0xf8] sm:$0xff] }
0x1730   : > { %6714 = vmatpush1.bf16.msra.mxu1 %v9978_v30  ;;  %6672 = vmatprep.subr.bf16.mxu0 %v9993_v43  ;;  %v5066_v30 = vld [vmem:[%s14091_s11 + $0x620] sm:$0xff] }
0x1731   : > { %6715 = vmatprep.subr.bf16.mxu1 %v9995_v15  ;;  %v5074_v43 = vld [vmem:[%s14091_s11 + $0x660] sm:$0xff]  ;;  %v5067_v15 = vld [vmem:[%s14091_s11 + $0x628] sm:$0xff] }
0x1732   : > { %v10105_v48 = vcombine.high %v5066_v30, %v5074_v43  ;;  %v10104_v22 = vcombine.low %v5066_v30, %v5074_v43  ;;  %v10106_v3 = vcombine.low %v5067_v15, %v5075_v13  ;;  %v4917_v30 = vld [vmem:[%s14091_s11 + $0x178] sm:$0xff] }
0x1733   : > { %6673 = vmatpush1.bf16.msra.mxu0 %v9992_v16  ;;  %v10107_v16 = vcombine.high %v5067_v15, %v5075_v13  ;;  %v9934_v15 = vcombine.low %v4893_v49, %v4901_v18 }
0x1734   : > { %6716 = vmatpush1.bf16.msra.mxu1 %v9994_v20  ;;  %6674 = vmatprep.subr.bf16.mxu0 %v10009_v23  ;;  %v5082_v20 = vld [vmem:[%s14091_s11 + $0x6a0] sm:$0xff] }
0x1735   : > { %6717 = vmatprep.subr.bf16.mxu1 %v10011_v19  ;;  %v5090_v23 = vld [vmem:[%s14091_s11 + $0x6e0] sm:$0xff]  ;;  %v5083_v19 = vld [vmem:[%s14091_s11 + $0x6a8] sm:$0xff] }
0x1736   : > { %v10121_v59 = vcombine.high %v5082_v20, %v5090_v23  ;;  %v10120_v26 = vcombine.low %v5082_v20, %v5090_v23  ;;  %v10122_v36 = vcombine.low %v5083_v19, %v5091_v25  ;;  %v4933_v20 = vld [vmem:[%s14091_s11 + $0x1f8] sm:$0xff] }
0x1737   : > { %6675 = vmatpush1.bf16.msra.mxu0 %v10008_v62  ;;  %v10123_v62 = vcombine.high %v5083_v19, %v5091_v25 }
0x1738   : > { %6718 = vmatpush1.bf16.msra.mxu1 %v10010_v38  ;;  %6676 = vmatprep.subr.bf16.mxu0 %v10025_v24  ;;  %v5098_v38 = vld [vmem:[%s14091_s11 + $0x720] sm:$0xff] }
0x1739   : > { %6719 = vmatprep.subr.bf16.mxu1 %v10027_v37  ;;  %v5106_v24 = vld [vmem:[%s14091_s11 + $0x760] sm:$0xff]  ;;  %v5099_v37 = vld [vmem:[%s14091_s11 + $0x728] sm:$0xff] }
0x173a   : > { %v10137_v14 = vcombine.high %v5098_v38, %v5106_v24  ;;  %v10136_v45 = vcombine.low %v5098_v38, %v5106_v24  ;;  %v10138_v1 = vcombine.low %v5099_v37, %v5107_v32 }
0x173b   : > { %6677 = vmatpush1.bf16.msra.mxu0 %v10024_v2  ;;  %v10139_v2 = vcombine.high %v5099_v37, %v5107_v32 }
0x173c   : > { %6720 = vmatpush1.bf16.msra.mxu1 %v10026_v57  ;;  %6678 = vmatprep.subr.bf16.mxu0 %v10041_v35  ;;  %v5114_v57 = vld [vmem:[%s14091_s11 + $0x7a0] sm:$0xff] }
0x173d   : > { %6721 = vmatprep.subr.bf16.mxu1 %v10043_v9  ;;  %v5122_v35 = vld [vmem:[%s14091_s11 + $0x7e0] sm:$0xff]  ;;  %v5115_v9 = vld [vmem:[%s14091_s11 + $0x7a8] sm:$0xff] }
0x173e   : > { %v10153_v27 = vcombine.high %v5114_v57, %v5122_v35  ;;  %v10152_v29 = vcombine.low %v5114_v57, %v5122_v35  ;;  %v10154_v31 = vcombine.low %v5115_v9, %v5123_v17 }
0x173f   : > { %6679 = vmatpush1.bf16.msra.mxu0 %v10040_v47  ;;  %v10155_v47 = vcombine.high %v5115_v9, %v5123_v17 }
0x1740   : > { %6722 = vmatpush1.bf16.msra.mxu1 %v10042_v28  ;;  %6680 = vmatprep.subr.bf16.mxu0 %v10057_v56  ;;  %v4876_v28 = vld [vmem:[%s14091_s11 + $0x30] sm:$0xff] }
0x1741   : > { %6723 = vmatprep.subr.bf16.mxu1 %v10059_v5  ;;  %v4884_v56 = vld [vmem:[%s14091_s11 + $0x70] sm:$0xff]  ;;  %v4877_v5 = vld [vmem:[%s14091_s11 + $0x38] sm:$0xff] }
0x1742   : > { %v9917_v40 = vcombine.high %v4876_v28, %v4884_v56  ;;  %v9918_v53 = vcombine.low %v4877_v5, %v4885_v8 }
0x1743   : > { %6681 = vmatpush1.bf16.msra.mxu0 %v10056_v41  ;;  %v9919_v41 = vcombine.high %v4877_v5, %v4885_v8 }
0x1744   : > { %6724 = vmatpush1.bf16.msra.mxu1 %v10058_v46  ;;  %6682 = vmatprep.subr.bf16.mxu0 %v10073_v58  ;;  %v4892_v46 = vld [vmem:[%s14091_s11 + $0xb0] sm:$0xff] }
0x1745   : > { %6725 = vmatprep.subr.bf16.mxu1 %v10075_v50  ;;  %v4900_v58 = vld [vmem:[%s14091_s11 + $0xf0] sm:$0xff]  ;;  %v9916_v50 = vcombine.low %v4876_v28, %v4884_v56 }
0x1746   : > { %v9933_v44 = vcombine.high %v4892_v46, %v4900_v58  ;;  %v9932_v43 = vcombine.low %v4892_v46, %v4900_v58 }
0x1747   : > { %6683 = vmatpush1.bf16.msra.mxu0 %v10072_v39  ;;  %v4908_v39 = vld [vmem:[%s14091_s11 + $0x130] sm:$0xff] }
0x1748   : > { %6726 = vmatpush1.bf16.msra.mxu1 %v10074_v21  ;;  %6684 = vmatprep.subr.bf16.mxu0 %v10089_v6  ;;  %v4916_v21 = vld [vmem:[%s14091_s11 + $0x170] sm:$0xff]  ;;  %v9935_v6 = vcombine.high %v4893_v49, %v4901_v18 }
0x1749   : > { %6727 = vmatprep.subr.bf16.mxu1 %v10091_v60  ;;  %v4909_v60 = vld [vmem:[%s14091_s11 + $0x138] sm:$0xff]  ;;  %v9949_v13 = vcombine.high %v4908_v39, %v4916_v21  ;;  %v9948_v23 = vcombine.low %v4908_v39, %v4916_v21  ;;  %v5004_v18 = vld [vmem:[%s14091_s11 + $0x430] sm:$0xff] }
0x174a   : > { %v9950_v19 = vcombine.low %v4909_v60, %v4917_v30  ;;  %v5013_v39 = vld [vmem:[%s14091_s11 + $0x478] sm:$0xff] }
0x174b   : > { %6685 = vmatpush1.bf16.msra.mxu0 %v10088_v51  ;;  %v9951_v51 = vcombine.high %v4909_v60, %v4917_v30 }
0x174c   : > { %6728 = vmatpush1.bf16.msra.mxu1 %v10090_v34  ;;  %6686 = vmatprep.subr.bf16.mxu0 %v10105_v48  ;;  %v4924_v34 = vld [vmem:[%s14091_s11 + $0x1b0] sm:$0xff] }
0x174d   : > { %6729 = vmatprep.subr.bf16.mxu1 %v10107_v16  ;;  %v4932_v48 = vld [vmem:[%s14091_s11 + $0x1f0] sm:$0xff]  ;;  %v4925_v16 = vld [vmem:[%s14091_s11 + $0x1b8] sm:$0xff] }
0x174e   : > { %v9965_v25 = vcombine.high %v4924_v34, %v4932_v48  ;;  %v9964_v38 = vcombine.low %v4924_v34, %v4932_v48  ;;  %v9966_v24 = vcombine.low %v4925_v16, %v4933_v20 }
0x174f   : > { %6687 = vmatpush1.bf16.msra.mxu0 %v10104_v22  ;;  %v4940_v22 = vld [vmem:[%s14091_s11 + $0x230] sm:$0xff] }
0x1750   : > { %6730 = vmatpush1.bf16.msra.mxu1 %v10106_v3  ;;  %6688 = vmatprep.subr.bf16.mxu0 %v10121_v59  ;;  %v4948_v3 = vld [vmem:[%s14091_s11 + $0x270] sm:$0xff]  ;;  %v4941_v59 = vld [vmem:[%s14091_s11 + $0x238] sm:$0xff] }
0x1751   : > { %6731 = vmatprep.subr.bf16.mxu1 %v10123_v62  ;;  %v4949_v62 = vld [vmem:[%s14091_s11 + $0x278] sm:$0xff]  ;;  %v9981_v37 = vcombine.high %v4940_v22, %v4948_v3  ;;  %v9980_v57 = vcombine.low %v4940_v22, %v4948_v3 }
0x1752   : > { %v9983_v32 = vcombine.high %v4941_v59, %v4949_v62  ;;  %v9982_v35 = vcombine.low %v4941_v59, %v4949_v62 }
0x1753   : > { %6689 = vmatpush1.bf16.msra.mxu0 %v10120_v26  ;;  %v4956_v26 = vld [vmem:[%s14091_s11 + $0x2b0] sm:$0xff] }
0x1754   : > { %6732 = vmatpush1.bf16.msra.mxu1 %v10122_v36  ;;  %6690 = vmatprep.subr.bf16.mxu0 %v10137_v14  ;;  %v4964_v36 = vld [vmem:[%s14091_s11 + $0x2f0] sm:$0xff]  ;;  %v4957_v14 = vld [vmem:[%s14091_s11 + $0x2b8] sm:$0xff] }
0x1755   : > { %6733 = vmatprep.subr.bf16.mxu1 %v10139_v2  ;;  %v4965_v2 = vld [vmem:[%s14091_s11 + $0x2f8] sm:$0xff]  ;;  %v9997_v9 = vcombine.high %v4956_v26, %v4964_v36  ;;  %v9996_v28 = vcombine.low %v4956_v26, %v4964_v36 }
0x1756   : > { %v9999_v17 = vcombine.high %v4957_v14, %v4965_v2  ;;  %v9998_v56 = vcombine.low %v4957_v14, %v4965_v2 }
0x1757   : > { %6691 = vmatpush1.bf16.msra.mxu0 %v10136_v45  ;;  %v4972_v45 = vld [vmem:[%s14091_s11 + $0x330] sm:$0xff] }
0x1758   : > { %6734 = vmatpush1.bf16.msra.mxu1 %v10138_v1  ;;  %6692 = vmatprep.subr.bf16.mxu0 %v10153_v27  ;;  %v4980_v1 = vld [vmem:[%s14091_s11 + $0x370] sm:$0xff]  ;;  %v4973_v27 = vld [vmem:[%s14091_s11 + $0x338] sm:$0xff] }
0x1759   : > { %6735 = vmatprep.subr.bf16.mxu1 %v10155_v47  ;;  %v4981_v47 = vld [vmem:[%s14091_s11 + $0x378] sm:$0xff]  ;;  %v10013_v5 = vcombine.high %v4972_v45, %v4980_v1  ;;  %v10012_v46 = vcombine.low %v4972_v45, %v4980_v1 }
0x175a   : > { %v10015_v8 = vcombine.high %v4973_v27, %v4981_v47  ;;  %v10014_v58 = vcombine.low %v4973_v27, %v4981_v47 }
0x175b   : > { %6693 = vmatpush1.bf16.msra.mxu0 %v10152_v29  ;;  %v4988_v29 = vld [vmem:[%s14091_s11 + $0x3b0] sm:$0xff] }
0x175c   : > { %6736 = vmatpush1.bf16.msra.mxu1 %v10154_v31  ;;  %6748 = vmatprep.subr.bf16.mxu0 %v9917_v40  ;;  %v4996_v31 = vld [vmem:[%s14091_s11 + $0x3f0] sm:$0xff]  ;;  %v4989_v40 = vld [vmem:[%s14091_s11 + $0x3b8] sm:$0xff] }
0x175d   : > { %6791 = vmatprep.subr.bf16.mxu1 %v9919_v41  ;;  %v4997_v41 = vld [vmem:[%s14091_s11 + $0x3f8] sm:$0xff]  ;;  %v10028_v21 = vcombine.low %v4988_v29, %v4996_v31 }
0x175e   : > { %6695 = vmatmul.mubr.bf16.vlgmr.msra.gmra.mrb[12].mxu0 %v14978_v63  ;;  %v10031_v49 = vcombine.high %v4989_v40, %v4997_v41 }
0x175f   : > { %6738 = vmatmul.mubr.bf16.vlgmr.msra.gmra.mrb[76].mxu1 %v14978_v63  ;;  %6749 = vmatpush1.bf16.msra.mxu0 %v9916_v50  ;;  %v10029_v50 = vcombine.high %v4988_v29, %v4996_v31 }
0x1760   : > { %6780 = vmatprep.mubr.bf16.mxu0 %v14976_v7  ;;  %6792 = vmatpush1.bf16.msra.mxu1 %v9918_v53  ;;  %v5012_v53 = vld [vmem:[%s14091_s11 + $0x470] sm:$0xff] }
0x1761   : > { %6823 = vmatprep.mubr.bf16.mxu1 %v14976_v7  ;;  %6750 = vmatprep.subr.bf16.mxu0 %v9933_v44  ;;  %v9967_v7 = vcombine.high %v4925_v16, %v4933_v20  ;;  %v5005_v44 = vld [vmem:[%s14091_s11 + $0x438] sm:$0xff]  ;;  %v10045_v60 = vcombine.high %v5004_v18, %v5012_v53  ;;  %v10044_v34 = vcombine.low %v5004_v18, %v5012_v53 }
0x1762   : > { %6793 = vmatprep.subr.bf16.mxu1 %v9935_v6  ;;  %v10030_v6 = vcombine.low %v4989_v40, %v4997_v41  ;;  %v10047_v30 = vcombine.high %v5005_v44, %v5013_v39  ;;  %v10046_v48 = vcombine.low %v5005_v44, %v5013_v39 }
0x1763   : > { %6751 = vmatpush1.bf16.msra.mxu0 %v9932_v43  ;;  %v5020_v43 = vld [vmem:[%s14091_s11 + $0x4b0] sm:$0xff] }
0x1764   : > { %6794 = vmatpush1.bf16.msra.mxu1 %v9934_v15  ;;  %6752 = vmatprep.subr.bf16.mxu0 %v9949_v13  ;;  %v5028_v15 = vld [vmem:[%s14091_s11 + $0x4f0] sm:$0xff]  ;;  %v5021_v13 = vld [vmem:[%s14091_s11 + $0x4b8] sm:$0xff] }
0x1765   : > { %6795 = vmatprep.subr.bf16.mxu1 %v9951_v51  ;;  %v5029_v51 = vld [vmem:[%s14091_s11 + $0x4f8] sm:$0xff]  ;;  %v10061_v16 = vcombine.high %v5020_v43, %v5028_v15  ;;  %v10060_v22 = vcombine.low %v5020_v43, %v5028_v15 }
0x1766   : > { %v10063_v20 = vcombine.high %v5021_v13, %v5029_v51  ;;  %v10062_v3 = vcombine.low %v5021_v13, %v5029_v51 }
0x1767   : > { %6753 = vmatpush1.bf16.msra.mxu0 %v9948_v23  ;;  %v5036_v23 = vld [vmem:[%s14091_s11 + $0x530] sm:$0xff] }
0x1768   : > { %6796 = vmatpush1.bf16.msra.mxu1 %v9950_v19  ;;  %6754 = vmatprep.subr.bf16.mxu0 %v9965_v25  ;;  %v5044_v19 = vld [vmem:[%s14091_s11 + $0x570] sm:$0xff]  ;;  %v5037_v25 = vld [vmem:[%s14091_s11 + $0x538] sm:$0xff] }
0x1769   : > { %6797 = vmatprep.subr.bf16.mxu1 %v9967_v7  ;;  %v5045_v7 = vld [vmem:[%s14091_s11 + $0x578] sm:$0xff]  ;;  %v10077_v59 = vcombine.high %v5036_v23, %v5044_v19  ;;  %v10076_v26 = vcombine.low %v5036_v23, %v5044_v19 }
0x176a   : > { %v10079_v62 = vcombine.high %v5037_v25, %v5045_v7  ;;  %v10078_v36 = vcombine.low %v5037_v25, %v5045_v7  ;;  %v11216_v23 = vld [vmem:[%s14108_s25 + $0x14] ss:$8 sps:$4 sm:$0xff]   ;;  %v11214_v19 = vld [vmem:[%s14108_s25 + $0x10] ss:$8 sps:$4 sm:$0xff]   ;;  %v11219_v25 = vld [vmem:[%s14108_s25 + $0x24] ss:$8 sps:$4 sm:$0xff]  }
0x176b   : > { %6755 = vmatpush1.bf16.msra.mxu0 %v9964_v38  ;;  %v5052_v38 = vld [vmem:[%s14091_s11 + $0x5b0] sm:$0xff]  ;;  %v11217_v7 = vld [vmem:[%s14108_s25 + $0x20] ss:$8 sps:$4 sm:$0xff]  }
0x176c   : > { %6798 = vmatpush1.bf16.msra.mxu1 %v9966_v24  ;;  %6756 = vmatprep.subr.bf16.mxu0 %v9981_v37  ;;  %v5060_v24 = vld [vmem:[%s14091_s11 + $0x5f0] sm:$0xff]  ;;  %v5053_v37 = vld [vmem:[%s14091_s11 + $0x5b8] sm:$0xff] }
0x176d   : > { %6799 = vmatprep.subr.bf16.mxu1 %v9983_v32  ;;  %v5061_v32 = vld [vmem:[%s14091_s11 + $0x5f8] sm:$0xff]  ;;  %v10093_v14 = vcombine.high %v5052_v38, %v5060_v24  ;;  %v10092_v45 = vcombine.low %v5052_v38, %v5060_v24  ;;  %v15197_v38 = vld [vmem:[%s14100_s12] sm:$0xff] }
0x176e   : > { %v10095_v2 = vcombine.high %v5053_v37, %v5061_v32  ;;  %v10094_v1 = vcombine.low %v5053_v37, %v5061_v32  ;;  %v5133_v24 = vrot.slane %v15197_v38, %v14187_v12  ;;  %v5141_v37 = vrot.slane %v15197_v38, %v14279_v42  ;;  %v11226_v32 = vld [vmem:[%s14108_s25 + $0x50] ss:$8 sps:$4 sm:$0xff]  }
0x176f   : > { %6757 = vmatpush1.bf16.msra.mxu0 %v9980_v57  ;;  %v5068_v57 = vld [vmem:[%s14091_s11 + $0x630] sm:$0xff] }
0x1770   : > { %6800 = vmatpush1.bf16.msra.mxu1 %v9982_v35  ;;  %6758 = vmatprep.subr.bf16.mxu0 %v9997_v9  ;;  %v5076_v35 = vld [vmem:[%s14091_s11 + $0x670] sm:$0xff]  ;;  %v5069_v9 = vld [vmem:[%s14091_s11 + $0x638] sm:$0xff] }
0x1771   : > { %6801 = vmatprep.subr.bf16.mxu1 %v9999_v17  ;;  %v5077_v17 = vld [vmem:[%s14091_s11 + $0x678] sm:$0xff]  ;;  %v10109_v27 = vcombine.high %v5068_v57, %v5076_v35  ;;  %v10108_v29 = vcombine.low %v5068_v57, %v5076_v35 }
0x1772   : > { %v10111_v47 = vcombine.high %v5069_v9, %v5077_v17  ;;  %v10110_v31 = vcombine.low %v5069_v9, %v5077_v17 }
0x1773   : > { %6759 = vmatpush1.bf16.msra.mxu0 %v9996_v28  ;;  %v5084_v28 = vld [vmem:[%s14091_s11 + $0x6b0] sm:$0xff] }
0x1774   : > { %6802 = vmatpush1.bf16.msra.mxu1 %v9998_v56  ;;  %6760 = vmatprep.subr.bf16.mxu0 %v10013_v5  ;;  %v5092_v56 = vld [vmem:[%s14091_s11 + $0x6f0] sm:$0xff]  ;;  %v5085_v5 = vld [vmem:[%s14091_s11 + $0x6b8] sm:$0xff] }
0x1775   : > { %6803 = vmatprep.subr.bf16.mxu1 %v10015_v8  ;;  %v5093_v8 = vld [vmem:[%s14091_s11 + $0x6f8] sm:$0xff]  ;;  %v10125_v40 = vcombine.high %v5084_v28, %v5092_v56  ;;  %v10124_v18 = vcombine.low %v5084_v28, %v5092_v56  ;;  %v11229_v56 = vld [vmem:[%s14108_s25 + $0x60] ss:$8 sps:$4 sm:$0xff]  }
0x1776   : > { %v10127_v41 = vcombine.high %v5085_v5, %v5093_v8  ;;  %v10126_v53 = vcombine.low %v5085_v5, %v5093_v8 }
0x1777   : > { %6761 = vmatpush1.bf16.msra.mxu0 %v10012_v46  ;;  %v5100_v46 = vld [vmem:[%s14091_s11 + $0x730] sm:$0xff] }
0x1778   : > { %6804 = vmatpush1.bf16.msra.mxu1 %v10014_v58  ;;  %6762 = vmatprep.subr.bf16.mxu0 %v10029_v50  ;;  %v5108_v58 = vld [vmem:[%s14091_s11 + $0x770] sm:$0xff]  ;;  %v5101_v50 = vld [vmem:[%s14091_s11 + $0x738] sm:$0xff] }
0x1779   : > { %6805 = vmatprep.subr.bf16.mxu1 %v10031_v49  ;;  %v5109_v49 = vld [vmem:[%s14091_s11 + $0x778] sm:$0xff]  ;;  %v10141_v44 = vcombine.high %v5100_v46, %v5108_v58  ;;  %v10140_v43 = vcombine.low %v5100_v46, %v5108_v58 }
0x177a   : > { %v10143_v39 = vcombine.high %v5101_v50, %v5109_v49  ;;  %v10142_v15 = vcombine.low %v5101_v50, %v5109_v49 }
0x177b   : > { %6763 = vmatpush1.bf16.msra.mxu0 %v10028_v21  ;;  %v5116_v21 = vld [vmem:[%s14091_s11 + $0x7b0] sm:$0xff] }
0x177c   : > { %6806 = vmatpush1.bf16.msra.mxu1 %v10030_v6  ;;  %6764 = vmatprep.subr.bf16.mxu0 %v10045_v60  ;;  %v5124_v6 = vld [vmem:[%s14091_s11 + $0x7f0] sm:$0xff]  ;;  %v5117_v60 = vld [vmem:[%s14091_s11 + $0x7b8] sm:$0xff] }
0x177d   : > { %6807 = vmatprep.subr.bf16.mxu1 %v10047_v30  ;;  %v5125_v30 = vld [vmem:[%s14091_s11 + $0x7f8] sm:$0xff]  ;;  %v10157_v13 = vcombine.high %v5116_v21, %v5124_v6 }
0x177e   : > { %v10159_v51 = vcombine.high %v5117_v60, %v5125_v30 }
0x177f   : > { %6765 = vmatpush1.bf16.msra.mxu0 %v10044_v34  ;;  %v10156_v34 = vcombine.low %v5116_v21, %v5124_v6  ;;  %v11232_v6 = vld [vmem:[%s14108_s25 + $0x70] ss:$8 sps:$4 sm:$0xff]  }
0x1780   : > { %6808 = vmatpush1.bf16.msra.mxu1 %v10046_v48  ;;  %6766 = vmatprep.subr.bf16.mxu0 %v10061_v16  ;;  %v10158_v48 = vcombine.low %v5117_v60, %v5125_v30  ;;  %v11213_v16 = vld [vmem:[%s14108_s25 + $0x4] ss:$8 sps:$4 sm:$0xff]  }
0x1781   : > { %6809 = vmatprep.subr.bf16.mxu1 %v10063_v20  ;;  %v11211_v20 = vld [vmem:[%s14108_s25] ss:$8 sps:$4 sm:$0xff]  }
0x1783   : > { %6767 = vmatpush1.bf16.msra.mxu0 %v10060_v22  ;;  %v11222_v22 = vld [vmem:[%s14108_s25 + $0x34] ss:$8 sps:$4 sm:$0xff]  }
0x1784   : > { %6810 = vmatpush1.bf16.msra.mxu1 %v10062_v3  ;;  %6768 = vmatprep.subr.bf16.mxu0 %v10077_v59  ;;  %v11220_v3 = vld [vmem:[%s14108_s25 + $0x30] ss:$8 sps:$4 sm:$0xff]   ;;  %v11225_v59 = vld [vmem:[%s14108_s25 + $0x44] ss:$8 sps:$4 sm:$0xff]  }
0x1785   : > { %6811 = vmatprep.subr.bf16.mxu1 %v10079_v62  ;;  %v11223_v62 = vld [vmem:[%s14108_s25 + $0x40] ss:$8 sps:$4 sm:$0xff]  }
0x1787   : > { %6769 = vmatpush1.bf16.msra.mxu0 %v10076_v26  ;;  %v5137_v26 = vrot.slane %v15197_v38, %v14184_v11 }
0x1788   : > { %6812 = vmatpush1.bf16.msra.mxu1 %v10078_v36  ;;  %6770 = vmatprep.subr.bf16.mxu0 %v10093_v14  ;;  %v5145_v36 = vrot.slane %v15197_v38, %v14356_v61  ;;  %v11231_v14 = vld [vmem:[%s14108_s25 + $0x64] ss:$8 sps:$4 sm:$0xff]  }
0x1789   : > { %6813 = vmatprep.subr.bf16.mxu1 %v10095_v2 }
0x178b   : > { %6771 = vmatpush1.bf16.msra.mxu0 %v10092_v45 }
0x178c   : > { %6814 = vmatpush1.bf16.msra.mxu1 %v10094_v1  ;;  %6772 = vmatprep.subr.bf16.mxu0 %v10109_v27 }
0x178d   : > { %6815 = vmatprep.subr.bf16.mxu1 %v10111_v47 }
0x178f   : > { %6773 = vmatpush1.bf16.msra.mxu0 %v10108_v29 }
0x1790   : > { %6816 = vmatpush1.bf16.msra.mxu1 %v10110_v31  ;;  %6774 = vmatprep.subr.bf16.mxu0 %v10125_v40  ;;  %v11234_v40 = vld [vmem:[%s14108_s25 + $0x74] ss:$8 sps:$4 sm:$0xff]  }
0x1791   : > { %6817 = vmatprep.subr.bf16.mxu1 %v10127_v41 }
0x1793   : > { %6775 = vmatpush1.bf16.msra.mxu0 %v10124_v18 }
0x1794   : > { %6818 = vmatpush1.bf16.msra.mxu1 %v10126_v53  ;;  %6776 = vmatprep.subr.bf16.mxu0 %v10141_v44 }
0x1795   : > { %6819 = vmatprep.subr.bf16.mxu1 %v10143_v39 }
0x1797   : > { %6777 = vmatpush1.bf16.msra.mxu0 %v10140_v43  ;;  %v11237_v43 = vld [vmem:[%s14108_s25 + $0x84] ss:$8 sps:$4 sm:$0xff]  }
0x1798   : > { %6820 = vmatpush1.bf16.msra.mxu1 %v10142_v15  ;;  %6778 = vmatprep.subr.bf16.mxu0 %v10157_v13 }
0x1799   : > { %6821 = vmatprep.subr.bf16.mxu1 %v10159_v51  ;;  %v11235_v51 = vld [vmem:[%s14108_s25 + $0x80] ss:$8 sps:$4 sm:$0xff]  }
0x179b   : > { %6779 = vmatpush1.bf16.msra.mxu0 %v10156_v34  ;;  %v11240_v34 = vld [vmem:[%s14108_s25 + $0x94] ss:$8 sps:$4 sm:$0xff]  }
0x179c   : > { %6822 = vmatpush1.bf16.msra.mxu1 %v10158_v48  ;;  %8418 = vmatprep.subr.bf16.mxu0 %v11213_v16  ;;  %v11238_v48 = vld [vmem:[%s14108_s25 + $0x90] ss:$8 sps:$4 sm:$0xff]   ;;  %v11243_v16 = vld [vmem:[%s14108_s25 + $0xa4] ss:$8 sps:$4 sm:$0xff]  }
0x179e   : > { %6781 = vmatmul.mubr.bf16.vlgmr.msra.gmra.mrb[16].mxu0 %v14978_v63 }
0x179f   : > { %6824 = vmatmul.mubr.bf16.vlgmr.msra.gmra.mrb[80].mxu1 %v14978_v63  ;;  %8419 = vmatpush1.bf16.msra.mxu0 %v11211_v20  ;;  %v11228_v63 = vld [vmem:[%s14108_s25 + $0x54] ss:$8 sps:$4 sm:$0xff]   ;;  %v11241_v20 = vld [vmem:[%s14108_s25 + $0xa0] ss:$8 sps:$4 sm:$0xff]  }
0x17a0   : > { %8420 = vmatprep.subr.bf16.mxu0 %v11216_v23  ;;  %v11246_v23 = vld [vmem:[%s14108_s25 + $0xb4] ss:$8 sps:$4 sm:$0xff]  }
0x17a3   : > { %8421 = vmatpush1.bf16.msra.mxu0 %v11214_v19  ;;  %v11244_v19 = vld [vmem:[%s14108_s25 + $0xb0] ss:$8 sps:$4 sm:$0xff]  }
0x17a4   : > { %8422 = vmatprep.subr.bf16.mxu0 %v11219_v25  ;;  %v11249_v25 = vld [vmem:[%s14108_s25 + $0xc4] ss:$8 sps:$4 sm:$0xff]  }
0x17a7   : > { %8423 = vmatpush1.bf16.msra.mxu0 %v11217_v7  ;;  %v11247_v7 = vld [vmem:[%s14108_s25 + $0xc0] ss:$8 sps:$4 sm:$0xff]  }
0x17a8   : > { %8424 = vmatprep.subr.bf16.mxu0 %v11222_v22  ;;  %v11252_v22 = vld [vmem:[%s14108_s25 + $0xd4] ss:$8 sps:$4 sm:$0xff]  }
0x17ab   : > { %8425 = vmatpush1.bf16.msra.mxu0 %v11220_v3  ;;  %v11250_v3 = vld [vmem:[%s14108_s25 + $0xd0] ss:$8 sps:$4 sm:$0xff]  }
0x17ac   : > { %8426 = vmatprep.subr.bf16.mxu0 %v11225_v59  ;;  %v11255_v59 = vld [vmem:[%s14108_s25 + $0xe4] ss:$8 sps:$4 sm:$0xff]  }
0x17af   : > { %8427 = vmatpush1.bf16.msra.mxu0 %v11223_v62  ;;  %v11253_v62 = vld [vmem:[%s14108_s25 + $0xe0] ss:$8 sps:$4 sm:$0xff]  }
0x17b0   : > { %8428 = vmatprep.subr.bf16.mxu0 %v11228_v63  ;;  %v11258_v63 = vld [vmem:[%s14108_s25 + $0xf4] ss:$8 sps:$4 sm:$0xff]  }
0x17b1   : > { %v6524_v2 = vpop.f32.mrb[4].mxu0  ;;  %v6567_v57 = vpop.f32.mrb[68].mxu1 }
0x17b2   : > { %v6525_v35 = vadd.f32 %v6524_v2, %v5133_v24  ;;  %v6568_v9 = vadd.f32 %v6567_v57, %v5141_v37  ;;  %v6526_v17 = vpop.f32.mrb[5].mxu0  ;;  %v6569_v45 = vpop.f32.mrb[69].mxu1  ;;  %v11265_v2 = vld [vmem:[%s14108_s25 + $0x120] ss:$8 sps:$4 sm:$0xff]   ;;  %v11270_v57 = vld [vmem:[%s14108_s25 + $0x134] ss:$8 sps:$4 sm:$0xff]  }
0x17b3   : > { %v6527_v1 = vadd.f32 %v6526_v17, %v5137_v26  ;;  %v6570_v27 = vadd.f32 %v6569_v45, %v5145_v36  ;;  %8429 = vmatpush1.bf16.msra.mxu0 %v11226_v32  ;;  %v6528_v47 = vpop.f32.mrb[6].mxu0  ;;  %v6571_v28 = vpop.f32.mrb[70].mxu1  ;;  %v11259_v32 = vld [vmem:[%s14108_s25 + $0x100] ss:$8 sps:$4 sm:$0xff]   ;;  %v5156_v17 = vsub.s32 6, %v14181_v10 }
0x17b4   : > { %v6529_v5 = vadd.f32 %v6528_v47, %v5133_v24  ;;  %v6572_v8 = vadd.f32 %v6571_v28, %v5141_v37  ;;  %v6530_v29 = vpop.f32.mrb[7].mxu0  ;;  %v6573_v31 = vpop.f32.mrb[71].mxu1  ;;  %8430 = vmatprep.subr.bf16.mxu0 %v11231_v14  ;;  %v6834_v58 = vmax.f32 %v6525_v35, 0.0  ;;  %v6836_v50 = vmax.f32 %v6568_v9, 0.0  ;;  %v11256_v24 = vld [vmem:[%s14108_s25 + $0xf0] ss:$8 sps:$4 sm:$0xff]  }
0x17b5   : > { %v6531_v41 = vadd.f32 %v6530_v29, %v5137_v26  ;;  %v6574_v46 = vadd.f32 %v6573_v31, %v5145_v36  ;;  %v6835_v53 = vmax.f32 %v6527_v1, 0.0  ;;  %v6837_v44 = vmax.f32 %v6570_v27, 0.0  ;;  %v11261_v37 = vld [vmem:[%s14108_s25 + $0x104] ss:$8 sps:$4 sm:$0xff]   ;;  %v11264_v26 = vld [vmem:[%s14108_s25 + $0x114] ss:$8 sps:$4 sm:$0xff]  }
0x17b6   : > { %v6850_v49 = vmax.f32 %v6529_v5, 0.0  ;;  %v6852_v18 = vmax.f32 %v6572_v8, 0.0  ;;  %v11262_v36 = vld [vmem:[%s14108_s25 + $0x110] ss:$8 sps:$4 sm:$0xff]   ;;  %v11267_v14 = vld [vmem:[%s14108_s25 + $0x124] ss:$8 sps:$4 sm:$0xff]   ;;  %v5149_v47 = vrot.slane %v15197_v38, %v14304_v54  ;;  %v5157_v28 = vrot.slane %v15197_v38, %v5156_v17 }
0x17b7   : > { %v6851_v39 = vmax.f32 %v6531_v41, 0.0  ;;  %v6853_v21 = vmax.f32 %v6574_v46, 0.0  ;;  %8431 = vmatpush1.bf16.msra.mxu0 %v11229_v56  ;;  %v11268_v35 = vld [vmem:[%s14108_s25 + $0x130] ss:$8 sps:$4 sm:$0xff]   ;;  %v11273_v9 = vld [vmem:[%s14108_s25 + $0x144] ss:$8 sps:$4 sm:$0xff]   ;;  %v5153_v56 = vrot.slane %v15197_v38, %v14307_v55 }
0x17b8   : > { %v6866_v60 = vpack.c.bf16 %v6850_v49, %v6834_v58  ;;  %v15213_v30 = vpack.c.bf16 %v6852_v18, %v6836_v50  ;;  %8432 = vmatprep.subr.bf16.mxu0 %v11234_v40  ;;  %v11271_v45 = vld [vmem:[%s14108_s25 + $0x140] ss:$8 sps:$4 sm:$0xff]   ;;  %v5160_v1 = vsub.s32 7, %v14181_v10  ;;  %v11276_v27 = vld [vmem:[%s14108_s25 + $0x154] ss:$8 sps:$4 sm:$0xff]  }
0x17b9   : > { %v6867_v15 = vpack.c.bf16 %v6851_v39, %v6835_v53  ;;  %v6869_v13 = vpack.c.bf16 %v6853_v21, %v6837_v44  ;;  %v11274_v8 = vld [vmem:[%s14108_s25 + $0x150] ss:$8 sps:$4 sm:$0xff]   ;;  %v11279_v29 = vld [vmem:[%s14108_s25 + $0x164] ss:$8 sps:$4 sm:$0xff]   ;;  %v11277_v39 = vld [vmem:[%s14108_s25 + $0x160] ss:$8 sps:$4 sm:$0xff]  }
0x17ba   : > { %v5161_v5 = vrot.slane %v15197_v38, %v5160_v1 }
0x17bb   : > { %8433 = vmatpush1.bf16.msra.mxu0 %v11232_v6  ;;  %8450 = vmatprep.mubr.bf16.mxu0 %v6867_v15 }
0x17bc   : > { %8434 = vmatprep.subr.bf16.mxu0 %v11237_v43  ;;  %v11282_v43 = vld [vmem:[%s14108_s25 + $0x174] ss:$8 sps:$4 sm:$0xff]  }
0x17bf   : > { %8435 = vmatpush1.bf16.msra.mxu0 %v11235_v51 }
0x17c0   : > { %8436 = vmatprep.subr.bf16.mxu0 %v11240_v34 }
0x17c3   : > { %8437 = vmatpush1.bf16.msra.mxu0 %v11238_v48 }
0x17c4   : > { %8438 = vmatprep.subr.bf16.mxu0 %v11243_v16 }
0x17c7   : > { %8439 = vmatpush1.bf16.msra.mxu0 %v11241_v20 }
0x17c8   : > { %8440 = vmatprep.subr.bf16.mxu0 %v11246_v23 }
0x17cb   : > { %8441 = vmatpush1.bf16.msra.mxu0 %v11244_v19 }
0x17cc   : > { %8442 = vmatprep.subr.bf16.mxu0 %v11249_v25 }
0x17cf   : > { %8443 = vmatpush1.bf16.msra.mxu0 %v11247_v7  ;;  %v11280_v7 = vld [vmem:[%s14108_s25 + $0x170] ss:$8 sps:$4 sm:$0xff]  }
0x17d0   : > { %8444 = vmatprep.subr.bf16.mxu0 %v11252_v22 }
0x17d3   : > { %8445 = vmatpush1.bf16.msra.mxu0 %v11250_v3 }
0x17d4   : > { %8446 = vmatprep.subr.bf16.mxu0 %v11255_v59  ;;  %v11285_v59 = vld [vmem:[%s14108_s25 + $0x184] ss:$8 sps:$4 sm:$0xff]  }
0x17d7   : > { %8447 = vmatpush1.bf16.msra.mxu0 %v11253_v62 }
0x17d8   : > { %8448 = vmatprep.subr.bf16.mxu0 %v11258_v63 }
0x17db   : > { %8449 = vmatpush1.bf16.msra.mxu0 %v11256_v24  ;;  %v11283_v24 = vld [vmem:[%s14108_s25 + $0x180] ss:$8 sps:$4 sm:$0xff]  }
0x17dc   : > { %8461 = vmatprep.subr.bf16.mxu0 %v11261_v37  ;;  %v11288_v37 = vld [vmem:[%s14108_s25 + $0x194] ss:$8 sps:$4 sm:$0xff]  }
0x17de   : > { %8451 = vmatmul.mubr.bf16.vlgmr.msra.gmra.mrb[20].mxu0 %v6866_v60 }
0x17df   : > { %8462 = vmatpush1.bf16.msra.mxu0 %v11259_v32  ;;  %8493 = vmatprep.mubr.bf16.mxu0 %v6869_v13  ;;  %v11286_v32 = vld [vmem:[%s14108_s25 + $0x190] ss:$8 sps:$4 sm:$0xff]  }
0x17e0   : > { %8463 = vmatprep.subr.bf16.mxu0 %v11264_v26  ;;  %v11291_v26 = vld [vmem:[%s14108_s25 + $0x1a4] ss:$8 sps:$4 sm:$0xff]  }
0x17e3   : > { %8464 = vmatpush1.bf16.msra.mxu0 %v11262_v36  ;;  %v11289_v36 = vld [vmem:[%s14108_s25 + $0x1a0] ss:$8 sps:$4 sm:$0xff]  }
0x17e4   : > { %8465 = vmatprep.subr.bf16.mxu0 %v11267_v14  ;;  %v11294_v14 = vld [vmem:[%s14108_s25 + $0x1b4] ss:$8 sps:$4 sm:$0xff]  }
0x17e7   : > { %8466 = vmatpush1.bf16.msra.mxu0 %v11265_v2  ;;  %v11292_v2 = vld [vmem:[%s14108_s25 + $0x1b0] ss:$8 sps:$4 sm:$0xff]  }
0x17e8   : > { %8467 = vmatprep.subr.bf16.mxu0 %v11270_v57  ;;  %v11297_v57 = vld [vmem:[%s14108_s25 + $0x1c4] ss:$8 sps:$4 sm:$0xff]  }
0x17eb   : > { %8468 = vmatpush1.bf16.msra.mxu0 %v11268_v35  ;;  %v11295_v35 = vld [vmem:[%s14108_s25 + $0x1c0] ss:$8 sps:$4 sm:$0xff]  }
0x17ec   : > { %8469 = vmatprep.subr.bf16.mxu0 %v11273_v9  ;;  %v11300_v9 = vld [vmem:[%s14108_s25 + $0x1d4] ss:$8 sps:$4 sm:$0xff]  }
0x17ef   : > { %8470 = vmatpush1.bf16.msra.mxu0 %v11271_v45  ;;  %v11298_v45 = vld [vmem:[%s14108_s25 + $0x1d0] ss:$8 sps:$4 sm:$0xff]  }
0x17f0   : > { %8471 = vmatprep.subr.bf16.mxu0 %v11276_v27  ;;  %v11303_v27 = vld [vmem:[%s14108_s25 + $0x1e4] ss:$8 sps:$4 sm:$0xff]  }
0x17f1   : > { %v6610_v31 = vpop.f32.mrb[8].mxu0  ;;  %v6653_v40 = vpop.f32.mrb[72].mxu1 }
0x17f2   : > { %v6611_v41 = vadd.f32 %v6610_v31, %v5149_v47  ;;  %v6654_v46 = vadd.f32 %v6653_v40, %v5157_v28  ;;  %v6612_v58 = vpop.f32.mrb[9].mxu0  ;;  %v6655_v50 = vpop.f32.mrb[73].mxu1  ;;  %v11310_v31 = vld [vmem:[%s14108_s25 + $0x210] ss:$8 sps:$4 sm:$0xff]   ;;  %v11315_v40 = vld [vmem:[%s14108_s25 + $0x224] ss:$8 sps:$4 sm:$0xff]  }
0x17f3   : > { %v6613_v49 = vadd.f32 %v6612_v58, %v5153_v56  ;;  %v6656_v18 = vadd.f32 %v6655_v50, %v5161_v5  ;;  %v6614_v53 = vpop.f32.mrb[10].mxu0  ;;  %v6657_v44 = vpop.f32.mrb[74].mxu1  ;;  %8472 = vmatpush1.bf16.msra.mxu0 %v11274_v8  ;;  %v11307_v8 = vld [vmem:[%s14108_s25 + $0x200] ss:$8 sps:$4 sm:$0xff]   ;;  %v11316_v58 = vld [vmem:[%s14108_s25 + $0x230] ss:$8 sps:$4 sm:$0xff]  }
0x17f4   : > { %v6615_v21 = vadd.f32 %v6614_v53, %v5149_v47  ;;  %v6658_v6 = vadd.f32 %v6657_v44, %v5157_v28  ;;  %v6616_v38 = vpop.f32.mrb[11].mxu0  ;;  %v6659_v60 = vpop.f32.mrb[75].mxu1  ;;  %8473 = vmatprep.subr.bf16.mxu0 %v11279_v29  ;;  %v6838_v51 = vmax.f32 %v6611_v41, 0.0  ;;  %v6840_v34 = vmax.f32 %v6654_v46, 0.0  ;;  %v11301_v47 = vld [vmem:[%s14108_s25 + $0x1e0] ss:$8 sps:$4 sm:$0xff]  }
0x17f5   : > { %v6617_v15 = vadd.f32 %v6616_v38, %v5153_v56  ;;  %v6660_v13 = vadd.f32 %v6659_v60, %v5161_v5  ;;  %v6839_v20 = vmax.f32 %v6613_v49, 0.0  ;;  %v6841_v23 = vmax.f32 %v6656_v18, 0.0  ;;  %v11306_v28 = vld [vmem:[%s14108_s25 + $0x1f4] ss:$8 sps:$4 sm:$0xff]   ;;  %v11304_v56 = vld [vmem:[%s14108_s25 + $0x1f0] ss:$8 sps:$4 sm:$0xff]  }
0x17f6   : > { %v6854_v48 = vmax.f32 %v6615_v21, 0.0  ;;  %v6856_v16 = vmax.f32 %v6658_v6, 0.0  ;;  %v11309_v5 = vld [vmem:[%s14108_s25 + $0x204] ss:$8 sps:$4 sm:$0xff]   ;;  %v11312_v29 = vld [vmem:[%s14108_s25 + $0x214] ss:$8 sps:$4 sm:$0xff]  }
0x17f7   : > { %v6855_v19 = vmax.f32 %v6617_v15, 0.0  ;;  %v6857_v25 = vmax.f32 %v6660_v13, 0.0  ;;  %8474 = vmatpush1.bf16.msra.mxu0 %v11277_v39  ;;  %v11313_v41 = vld [vmem:[%s14108_s25 + $0x220] ss:$8 sps:$4 sm:$0xff]   ;;  %v11318_v46 = vld [vmem:[%s14108_s25 + $0x234] ss:$8 sps:$4 sm:$0xff]  }
0x17f8   : > { %v15259_v22 = vpack.c.bf16 %v6854_v48, %v6838_v51  ;;  %v15261_v3 = vpack.c.bf16 %v6856_v16, %v6840_v34  ;;  %8475 = vmatprep.subr.bf16.mxu0 %v11282_v43  ;;  %v11321_v50 = vld [vmem:[%s14108_s25 + $0x244] ss:$8 sps:$4 sm:$0xff]   ;;  %v11319_v49 = vld [vmem:[%s14108_s25 + $0x240] ss:$8 sps:$4 sm:$0xff]   ;;  %v11324_v18 = vld [vmem:[%s14108_s25 + $0x254] ss:$8 sps:$4 sm:$0xff]  }
0x17f9   : > { %v6871_v62 = vpack.c.bf16 %v6855_v19, %v6839_v20  ;;  %v15264_v63 = vpack.c.bf16 %v6857_v25, %v6841_v23  ;;  %v11322_v21 = vld [vmem:[%s14108_s25 + $0x250] ss:$8 sps:$4 sm:$0xff]   ;;  %v11327_v38 = vld [vmem:[%s14108_s25 + $0x264] ss:$8 sps:$4 sm:$0xff]  }
0x17fb   : > { %8476 = vmatpush1.bf16.msra.mxu0 %v11280_v7 }
0x17fc   : > { %8477 = vmatprep.subr.bf16.mxu0 %v11285_v59 }
0x17ff   : > { %8478 = vmatpush1.bf16.msra.mxu0 %v11283_v24 }
0x1800   : > { %8479 = vmatprep.subr.bf16.mxu0 %v11288_v37 }
0x1803   : > { %8480 = vmatpush1.bf16.msra.mxu0 %v11286_v32 }
0x1804   : > { %8481 = vmatprep.subr.bf16.mxu0 %v11291_v26 }
0x1807   : > { %8482 = vmatpush1.bf16.msra.mxu0 %v11289_v36 }
0x1808   : > { %8483 = vmatprep.subr.bf16.mxu0 %v11294_v14 }
0x180b   : > { %8484 = vmatpush1.bf16.msra.mxu0 %v11292_v2 }
0x180c   : > { %8485 = vmatprep.subr.bf16.mxu0 %v11297_v57  ;;  %v11328_v57 = vld [vmem:[%s14108_s25 + $0x270] ss:$8 sps:$4 sm:$0xff]  }
0x180f   : > { %8486 = vmatpush1.bf16.msra.mxu0 %v11295_v35 }
0x1810   : > { %8487 = vmatprep.subr.bf16.mxu0 %v11300_v9 }
0x1813   : > { %8488 = vmatpush1.bf16.msra.mxu0 %v11298_v45 }
0x1814   : > { %8489 = vmatprep.subr.bf16.mxu0 %v11303_v27  ;;  %v11333_v27 = vld [vmem:[%s14108_s25 + $0x284] ss:$8 sps:$4 sm:$0xff]  }
0x1817   : > { %8490 = vmatpush1.bf16.msra.mxu0 %v11301_v47 }
0x1818   : > { %8491 = vmatprep.subr.bf16.mxu0 %v11306_v28 }
0x181b   : > { %8492 = vmatpush1.bf16.msra.mxu0 %v11304_v56 }
0x181c   : > { %8504 = vmatprep.subr.bf16.mxu0 %v11309_v5  ;;  %v11331_v5 = vld [vmem:[%s14108_s25 + $0x280] ss:$8 sps:$4 sm:$0xff]  }
0x181e   : > { %8494 = vmatmul.mubr.bf16.vlgmr.msra.gmra.mrb[20].mxu0 %v15213_v30  ;;  %v15293_v30 = vld [vmem:[%s14100_s12 + $0x8] sm:$0xff] }
0x181f   : > { %8505 = vmatpush1.bf16.msra.mxu0 %v11307_v8  ;;  %8536 = vmatprep.mubr.bf16.mxu0 %v6871_v62  ;;  %v5165_v53 = vrot.slane %v15293_v30, %v14187_v12  ;;  %v5173_v44 = vrot.slane %v15293_v30, %v14279_v42  ;;  %v5169_v39 = vrot.slane %v15293_v30, %v14184_v11  ;;  %v11325_v42 = vld [vmem:[%s14108_s25 + $0x260] ss:$8 sps:$4 sm:$0xff]   ;;  %v11336_v8 = vld [vmem:[%s14108_s25 + $0x294] ss:$8 sps:$4 sm:$0xff]  }
0x1820   : > { %8506 = vmatprep.subr.bf16.mxu0 %v11312_v29  ;;  %v5177_v6 = vrot.slane %v15293_v30, %v14356_v61  ;;  %v11330_v61 = vld [vmem:[%s14108_s25 + $0x274] ss:$8 sps:$4 sm:$0xff]   ;;  %v11334_v29 = vld [vmem:[%s14108_s25 + $0x290] ss:$8 sps:$4 sm:$0xff]  }
0x1823   : > { %8507 = vmatpush1.bf16.msra.mxu0 %v11310_v31  ;;  %v11339_v31 = vld [vmem:[%s14108_s25 + $0x2a4] ss:$8 sps:$4 sm:$0xff]  }
0x1824   : > { %8508 = vmatprep.subr.bf16.mxu0 %v11315_v40  ;;  %v11337_v40 = vld [vmem:[%s14108_s25 + $0x2a0] ss:$8 sps:$4 sm:$0xff]  }
0x1827   : > { %8509 = vmatpush1.bf16.msra.mxu0 %v11313_v41  ;;  %v11342_v41 = vld [vmem:[%s14108_s25 + $0x2b4] ss:$8 sps:$4 sm:$0xff]  }
0x1828   : > { %8510 = vmatprep.subr.bf16.mxu0 %v11318_v46  ;;  %v11340_v46 = vld [vmem:[%s14108_s25 + $0x2b0] ss:$8 sps:$4 sm:$0xff]  }
0x182b   : > { %8511 = vmatpush1.bf16.msra.mxu0 %v11316_v58  ;;  %v11345_v58 = vld [vmem:[%s14108_s25 + $0x2c4] ss:$8 sps:$4 sm:$0xff]  }
0x182c   : > { %8512 = vmatprep.subr.bf16.mxu0 %v11321_v50  ;;  %v11343_v50 = vld [vmem:[%s14108_s25 + $0x2c0] ss:$8 sps:$4 sm:$0xff]  }
0x182f   : > { %8513 = vmatpush1.bf16.msra.mxu0 %v11319_v49  ;;  %v11348_v49 = vld [vmem:[%s14108_s25 + $0x2d4] ss:$8 sps:$4 sm:$0xff]  }
0x1830   : > { %8514 = vmatprep.subr.bf16.mxu0 %v11324_v18  ;;  %v11346_v18 = vld [vmem:[%s14108_s25 + $0x2d0] ss:$8 sps:$4 sm:$0xff]  }
0x1831   : > { %v6696_v60 = vpop.f32.mrb[12].mxu0 }
0x1832   : > { %v6697_v43 = vadd.f32 %v6696_v60, %v5165_v53  ;;  %v6739_v15 = vpop.f32.mrb[76].mxu1  ;;  %v6698_v13 = vpop.f32.mrb[13].mxu0  ;;  %v11360_v60 = vld [vmem:[%s14108_s25 + $0x314] ss:$8 sps:$4 sm:$0xff]  }
0x1833   : > { %v6740_v51 = vadd.f32 %v6739_v15, %v5173_v44  ;;  %v6699_v34 = vadd.f32 %v6698_v13, %v5169_v39  ;;  %v6741_v48 = vpop.f32.mrb[77].mxu1  ;;  %v6700_v16 = vpop.f32.mrb[14].mxu0  ;;  %8515 = vmatpush1.bf16.msra.mxu0 %v11322_v21  ;;  %v11352_v21 = vld [vmem:[%s14108_s25 + $0x2f0] ss:$8 sps:$4 sm:$0xff]   ;;  %v11363_v15 = vld [vmem:[%s14108_s25 + $0x324] ss:$8 sps:$4 sm:$0xff]  }
0x1834   : > { %v6742_v20 = vadd.f32 %v6741_v48, %v5177_v6  ;;  %v6701_v23 = vadd.f32 %v6700_v16, %v5165_v53  ;;  %v6743_v19 = vpop.f32.mrb[78].mxu1  ;;  %v6702_v25 = vpop.f32.mrb[15].mxu0  ;;  %8516 = vmatprep.subr.bf16.mxu0 %v11327_v38  ;;  %v6842_v24 = vmax.f32 %v6697_v43, 0.0  ;;  %v11351_v53 = vld [vmem:[%s14108_s25 + $0x2e4] ss:$8 sps:$4 sm:$0xff]  }
0x1835   : > { %v6744_v7 = vadd.f32 %v6743_v19, %v5173_v44  ;;  %v6703_v59 = vadd.f32 %v6702_v25, %v5169_v39  ;;  %v6745_v62 = vpop.f32.mrb[79].mxu1  ;;  %v6844_v26 = vmax.f32 %v6740_v51, 0.0  ;;  %v6843_v36 = vmax.f32 %v6699_v34, 0.0  ;;  %v11349_v44 = vld [vmem:[%s14108_s25 + $0x2e0] ss:$8 sps:$4 sm:$0xff]  }
0x1836   : > { %v6858_v37 = vmax.f32 %v6701_v23, 0.0  ;;  %v6746_v32 = vadd.f32 %v6745_v62, %v5177_v6  ;;  %v6845_v35 = vmax.f32 %v6742_v20, 0.0  ;;  %v11354_v39 = vld [vmem:[%s14108_s25 + $0x2f4] ss:$8 sps:$4 sm:$0xff]   ;;  %v11357_v6 = vld [vmem:[%s14108_s25 + $0x304] ss:$8 sps:$4 sm:$0xff]   ;;  %v5185_v20 = vrot.slane %v15293_v30, %v14307_v55 }
0x1837   : > { %v6860_v14 = vmax.f32 %v6744_v7, 0.0  ;;  %v6859_v2 = vmax.f32 %v6703_v59, 0.0  ;;  %8517 = vmatpush1.bf16.msra.mxu0 %v11325_v42  ;;  %v11355_v38 = vld [vmem:[%s14108_s25 + $0x300] ss:$8 sps:$4 sm:$0xff]   ;;  %v11358_v43 = vld [vmem:[%s14108_s25 + $0x310] ss:$8 sps:$4 sm:$0xff]   ;;  %v5189_v42 = vrot.slane %v15293_v30, %v5156_v17  ;;  %v5193_v19 = vrot.slane %v15293_v30, %v5160_v1 }
0x1838   : > { %v15309_v9 = vpack.c.bf16 %v6858_v37, %v6842_v24  ;;  %v6861_v45 = vmax.f32 %v6746_v32, 0.0  ;;  %8518 = vmatprep.subr.bf16.mxu0 %v11330_v61  ;;  %v11361_v13 = vld [vmem:[%s14108_s25 + $0x320] ss:$8 sps:$4 sm:$0xff]   ;;  %v11366_v51 = vld [vmem:[%s14108_s25 + $0x334] ss:$8 sps:$4 sm:$0xff]  }
0x1839   : > { %v15312_v47 = vpack.c.bf16 %v6860_v14, %v6844_v26  ;;  %v15314_v28 = vpack.c.bf16 %v6859_v2, %v6843_v36  ;;  %v11364_v34 = vld [vmem:[%s14108_s25 + $0x330] ss:$8 sps:$4 sm:$0xff]   ;;  %v11369_v48 = vld [vmem:[%s14108_s25 + $0x344] ss:$8 sps:$4 sm:$0xff]   ;;  %v11367_v16 = vld [vmem:[%s14108_s25 + $0x340] ss:$8 sps:$4 sm:$0xff]  }
0x183a   : > { %v15316_v56 = vpack.c.bf16 %v6861_v45, %v6845_v35  ;;  %v11370_v23 = vld [vmem:[%s14108_s25 + $0x350] ss:$8 sps:$4 sm:$0xff]   ;;  %v11375_v25 = vld [vmem:[%s14108_s25 + $0x364] ss:$8 sps:$4 sm:$0xff]   ;;  %v11373_v17 = vld [vmem:[%s14108_s25 + $0x360] ss:$8 sps:$4 sm:$0xff]  }
0x183b   : > { %8519 = vmatpush1.bf16.msra.mxu0 %v11328_v57  ;;  %v11378_v1 = vld [vmem:[%s14108_s25 + $0x374] ss:$8 sps:$4 sm:$0xff]  }
0x183c   : > { %8520 = vmatprep.subr.bf16.mxu0 %v11333_v27 }
0x183f   : > { %8521 = vmatpush1.bf16.msra.mxu0 %v11331_v5 }
0x1840   : > { %8522 = vmatprep.subr.bf16.mxu0 %v11336_v8 }
0x1843   : > { %8523 = vmatpush1.bf16.msra.mxu0 %v11334_v29 }
0x1844   : > { %8524 = vmatprep.subr.bf16.mxu0 %v11339_v31  ;;  %v11376_v31 = vld [vmem:[%s14108_s25 + $0x370] ss:$8 sps:$4 sm:$0xff]  }
0x1847   : > { %8525 = vmatpush1.bf16.msra.mxu0 %v11337_v40 }
0x1848   : > { %8526 = vmatprep.subr.bf16.mxu0 %v11342_v41 }
0x184b   : > { %8527 = vmatpush1.bf16.msra.mxu0 %v11340_v46 }
0x184c   : > { %8528 = vmatprep.subr.bf16.mxu0 %v11345_v58  ;;  %v11381_v58 = vld [vmem:[%s14108_s25 + $0x384] ss:$8 sps:$4 sm:$0xff]  }
0x184f   : > { %8529 = vmatpush1.bf16.msra.mxu0 %v11343_v50 }
0x1850   : > { %8530 = vmatprep.subr.bf16.mxu0 %v11348_v49 }
0x1853   : > { %8531 = vmatpush1.bf16.msra.mxu0 %v11346_v18 }
0x1854   : > { %8532 = vmatprep.subr.bf16.mxu0 %v11351_v53  ;;  %v11379_v53 = vld [vmem:[%s14108_s25 + $0x380] ss:$8 sps:$4 sm:$0xff]  }
0x1857   : > { %8533 = vmatpush1.bf16.msra.mxu0 %v11349_v44  ;;  %v11384_v44 = vld [vmem:[%s14108_s25 + $0x394] ss:$8 sps:$4 sm:$0xff]  }
0x1858   : > { %8534 = vmatprep.subr.bf16.mxu0 %v11354_v39  ;;  %v11382_v39 = vld [vmem:[%s14108_s25 + $0x390] ss:$8 sps:$4 sm:$0xff]  }
0x185b   : > { %8535 = vmatpush1.bf16.msra.mxu0 %v11352_v21  ;;  %v11387_v21 = vld [vmem:[%s14108_s25 + $0x3a4] ss:$8 sps:$4 sm:$0xff]  }
0x185c   : > { %8547 = vmatprep.subr.bf16.mxu0 %v11357_v6  ;;  %v11385_v6 = vld [vmem:[%s14108_s25 + $0x3a0] ss:$8 sps:$4 sm:$0xff]  }
0x185e   : > { %8537 = vmatmul.mubr.bf16.vlgmr.msra.gmra.mrb[20].mxu0 %v15259_v22  ;;  %v11372_v22 = vld [vmem:[%s14108_s25 + $0x354] ss:$8 sps:$4 sm:$0xff]  }
0x185f   : > { %8548 = vmatpush1.bf16.msra.mxu0 %v11355_v38  ;;  %8579 = vmatprep.mubr.bf16.mxu0 %v15264_v63  ;;  %v5181_v63 = vrot.slane %v15293_v30, %v14304_v54  ;;  %v11390_v38 = vld [vmem:[%s14108_s25 + $0x3b4] ss:$8 sps:$4 sm:$0xff]  }
0x1860   : > { %8549 = vmatprep.subr.bf16.mxu0 %v11360_v60  ;;  %v11388_v60 = vld [vmem:[%s14108_s25 + $0x3b0] ss:$8 sps:$4 sm:$0xff]  }
0x1863   : > { %8550 = vmatpush1.bf16.msra.mxu0 %v11358_v43  ;;  %v11393_v43 = vld [vmem:[%s14108_s25 + $0x3c4] ss:$8 sps:$4 sm:$0xff]  }
0x1864   : > { %8551 = vmatprep.subr.bf16.mxu0 %v11363_v15  ;;  %v11391_v15 = vld [vmem:[%s14108_s25 + $0x3c0] ss:$8 sps:$4 sm:$0xff]  }
0x1867   : > { %8552 = vmatpush1.bf16.msra.mxu0 %v11361_v13  ;;  %v11396_v13 = vld [vmem:[%s14108_s25 + $0x3d4] ss:$8 sps:$4 sm:$0xff]  }
0x1868   : > { %8553 = vmatprep.subr.bf16.mxu0 %v11366_v51  ;;  %v11394_v51 = vld [vmem:[%s14108_s25 + $0x3d0] ss:$8 sps:$4 sm:$0xff]  }
0x186b   : > { %8554 = vmatpush1.bf16.msra.mxu0 %v11364_v34  ;;  %v11399_v34 = vld [vmem:[%s14108_s25 + $0x3e4] ss:$8 sps:$4 sm:$0xff]  }
0x186c   : > { %8555 = vmatprep.subr.bf16.mxu0 %v11369_v48  ;;  %v11397_v48 = vld [vmem:[%s14108_s25 + $0x3e0] ss:$8 sps:$4 sm:$0xff]  }
0x186f   : > { %8556 = vmatpush1.bf16.msra.mxu0 %v11367_v16  ;;  %v11402_v16 = vld [vmem:[%s14108_s25 + $0x3f4] ss:$8 sps:$4 sm:$0xff]  }
0x1870   : > { %8557 = vmatprep.subr.bf16.mxu0 %v11372_v22  ;;  %v11400_v22 = vld [vmem:[%s14108_s25 + $0x3f0] ss:$8 sps:$4 sm:$0xff]  }
0x1871   : > { %v6782_v61 = vpop.f32.mrb[16].mxu0 }
0x1872   : > { %v6783_v7 = vadd.f32 %v6782_v61, %v5181_v63  ;;  %v6825_v54 = vpop.f32.mrb[80].mxu1  ;;  %v6784_v59 = vpop.f32.mrb[17].mxu0  ;;  %v11414_v61 = vld [vmem:[%s14108_s25 + $0x434] ss:$8 sps:$4 sm:$0xff]  }
0x1873   : > { %v6826_v62 = vadd.f32 %v6825_v54, %v5189_v42  ;;  %v6785_v24 = vadd.f32 %v6784_v59, %v5185_v20  ;;  %v6827_v37 = vpop.f32.mrb[81].mxu1  ;;  %v6786_v32 = vpop.f32.mrb[18].mxu0  ;;  %8558 = vmatpush1.bf16.msra.mxu0 %v11370_v23  ;;  %v11406_v23 = vld [vmem:[%s14108_s25 + $0x410] ss:$8 sps:$4 sm:$0xff]   ;;  %v11415_v54 = vld [vmem:[%s14108_s25 + $0x440] ss:$8 sps:$4 sm:$0xff]  }
0x1874   : > { %v6828_v26 = vadd.f32 %v6827_v37, %v5193_v19  ;;  %v6787_v55 = vadd.f32 %v6786_v32, %v5181_v63  ;;  %v6829_v36 = vpop.f32.mrb[82].mxu1  ;;  %v6788_v10 = vpop.f32.mrb[19].mxu0  ;;  %8559 = vmatprep.subr.bf16.mxu0 %v11375_v25  ;;  %v6846_v57 = vmax.f32 %v6783_v7, 0.0  ;;  %v11405_v63 = vld [vmem:[%s14108_s25 + $0x404] ss:$8 sps:$4 sm:$0xff]  }
0x1875   : > { %v6830_v30 = vadd.f32 %v6829_v36, %v5189_v42  ;;  %v6789_v14 = vadd.f32 %v6788_v10, %v5185_v20  ;;  %v6831_v2 = vpop.f32.mrb[83].mxu1  ;;  %v6848_v27 = vmax.f32 %v6826_v62, 0.0  ;;  %v6847_v5 = vmax.f32 %v6785_v24, 0.0  ;;  %v11403_v42 = vld [vmem:[%s14108_s25 + $0x400] ss:$8 sps:$4 sm:$0xff]  }
0x1876   : > { %v6862_v35 = vmax.f32 %v6787_v55, 0.0  ;;  %v6832_v45 = vadd.f32 %v6831_v2, %v5193_v19  ;;  %v6849_v40 = vmax.f32 %v6828_v26, 0.0  ;;  %v11408_v20 = vld [vmem:[%s14108_s25 + $0x414] ss:$8 sps:$4 sm:$0xff]   ;;  %v11411_v19 = vld [vmem:[%s14108_s25 + $0x424] ss:$8 sps:$4 sm:$0xff]  }
0x1877   : > { %v6864_v8 = vmax.f32 %v6830_v30, 0.0  ;;  %v6863_v29 = vmax.f32 %v6789_v14, 0.0  ;;  %8560 = vmatpush1.bf16.msra.mxu0 %v11373_v17  ;;  %v11409_v25 = vld [vmem:[%s14108_s25 + $0x420] ss:$8 sps:$4 sm:$0xff]   ;;  %v11412_v7 = vld [vmem:[%s14108_s25 + $0x430] ss:$8 sps:$4 sm:$0xff]  }
0x1878   : > { %v15361_v41 = vpack.c.bf16 %v6862_v35, %v6846_v57  ;;  %v6865_v46 = vmax.f32 %v6832_v45, 0.0  ;;  %8561 = vmatprep.subr.bf16.mxu0 %v11378_v1  ;;  %v11418_v59 = vld [vmem:[%s14108_s25 + $0x450] ss:$8 sps:$4 sm:$0xff]   ;;  %v11423_v62 = vld [vmem:[%s14108_s25 + $0x464] ss:$8 sps:$4 sm:$0xff]  }
0x1879   : > { %v15364_v50 = vpack.c.bf16 %v6864_v8, %v6848_v27  ;;  %v15366_v49 = vpack.c.bf16 %v6863_v29, %v6847_v5  ;;  %v11421_v24 = vld [vmem:[%s14108_s25 + $0x460] ss:$8 sps:$4 sm:$0xff]   ;;  %v11426_v37 = vld [vmem:[%s14108_s25 + $0x474] ss:$8 sps:$4 sm:$0xff]   ;;  %v11424_v32 = vld [vmem:[%s14108_s25 + $0x470] ss:$8 sps:$4 sm:$0xff]  }
0x187a   : > { %v15368_v18 = vpack.c.bf16 %v6865_v46, %v6849_v40  ;;  %v11429_v17 = vld [vmem:[%s14108_s25 + $0x484] ss:$8 sps:$4 sm:$0xff]   ;;  %v11427_v26 = vld [vmem:[%s14108_s25 + $0x480] ss:$8 sps:$4 sm:$0xff]   ;;  %v11432_v55 = vld [vmem:[%s14108_s25 + $0x494] ss:$8 sps:$4 sm:$0xff]  }
0x187b   : > { %8562 = vmatpush1.bf16.msra.mxu0 %v11376_v31  ;;  %v11430_v36 = vld [vmem:[%s14108_s25 + $0x490] ss:$8 sps:$4 sm:$0xff]   ;;  %v11435_v10 = vld [vmem:[%s14108_s25 + $0x4a4] ss:$8 sps:$4 sm:$0xff]   ;;  %v11433_v1 = vld [vmem:[%s14108_s25 + $0x4a0] ss:$8 sps:$4 sm:$0xff]  }
0x187c   : > { %8563 = vmatprep.subr.bf16.mxu0 %v11381_v58  ;;  %v11438_v30 = vld [vmem:[%s14108_s25 + $0x4b4] ss:$8 sps:$4 sm:$0xff]   ;;  %v11436_v14 = vld [vmem:[%s14108_s25 + $0x4b0] ss:$8 sps:$4 sm:$0xff]   ;;  %v11441_v2 = vld [vmem:[%s14108_s25 + $0x4c4] ss:$8 sps:$4 sm:$0xff]  }
0x187d   : > { %v11439_v57 = vld [vmem:[%s14108_s25 + $0x4c0] ss:$8 sps:$4 sm:$0xff]   ;;  %v11444_v35 = vld [vmem:[%s14108_s25 + $0x4d4] ss:$8 sps:$4 sm:$0xff]   ;;  %v11442_v45 = vld [vmem:[%s14108_s25 + $0x4d0] ss:$8 sps:$4 sm:$0xff]  }
0x187e   : > { %v11447_v27 = vld [vmem:[%s14108_s25 + $0x4e4] ss:$8 sps:$4 sm:$0xff]   ;;  %v11445_v5 = vld [vmem:[%s14108_s25 + $0x4e0] ss:$8 sps:$4 sm:$0xff]   ;;  %v11450_v8 = vld [vmem:[%s14108_s25 + $0x4f4] ss:$8 sps:$4 sm:$0xff]  }
0x187f   : > { %8564 = vmatpush1.bf16.msra.mxu0 %v11379_v53  ;;  %v11448_v29 = vld [vmem:[%s14108_s25 + $0x4f0] ss:$8 sps:$4 sm:$0xff]   ;;  %v11453_v31 = vld [vmem:[%s14108_s25 + $0x504] ss:$8 sps:$4 sm:$0xff]   ;;  %v11451_v40 = vld [vmem:[%s14108_s25 + $0x500] ss:$8 sps:$4 sm:$0xff]  }
0x1880   : > { %8565 = vmatprep.subr.bf16.mxu0 %v11384_v44  ;;  %v11456_v46 = vld [vmem:[%s14108_s25 + $0x514] ss:$8 sps:$4 sm:$0xff]   ;;  %v11454_v58 = vld [vmem:[%s14108_s25 + $0x510] ss:$8 sps:$4 sm:$0xff]   ;;  %v11459_v53 = vld [vmem:[%s14108_s25 + $0x524] ss:$8 sps:$4 sm:$0xff]  }
0x1881   : > { %v11457_v44 = vld [vmem:[%s14108_s25 + $0x520] ss:$8 sps:$4 sm:$0xff]  }
0x1883   : > { %8566 = vmatpush1.bf16.msra.mxu0 %v11382_v39  ;;  %v11462_v39 = vld [vmem:[%s14108_s25 + $0x534] ss:$8 sps:$4 sm:$0xff]  }
0x1884   : > { %8567 = vmatprep.subr.bf16.mxu0 %v11387_v21  ;;  %v11460_v21 = vld [vmem:[%s14108_s25 + $0x530] ss:$8 sps:$4 sm:$0xff]  }
0x1887   : > { %8568 = vmatpush1.bf16.msra.mxu0 %v11385_v6  ;;  %v11463_v6 = vld [vmem:[%s14108_s25 + $0x540] ss:$8 sps:$4 sm:$0xff]  }
0x1888   : > { %8569 = vmatprep.subr.bf16.mxu0 %v11390_v38  ;;  %v11466_v38 = vld [vmem:[%s14108_s25 + $0x550] ss:$8 sps:$4 sm:$0xff]  }
0x188b   : > { %8570 = vmatpush1.bf16.msra.mxu0 %v11388_v60  ;;  %v11471_v60 = vld [vmem:[%s14108_s25 + $0x564] ss:$8 sps:$4 sm:$0xff]  }
0x188c   : > { %8571 = vmatprep.subr.bf16.mxu0 %v11393_v43  ;;  %v11469_v43 = vld [vmem:[%s14108_s25 + $0x560] ss:$8 sps:$4 sm:$0xff]  }
0x188f   : > { %8572 = vmatpush1.bf16.msra.mxu0 %v11391_v15  ;;  %v11474_v15 = vld [vmem:[%s14108_s25 + $0x574] ss:$8 sps:$4 sm:$0xff]  }
0x1890   : > { %8573 = vmatprep.subr.bf16.mxu0 %v11396_v13  ;;  %v11472_v13 = vld [vmem:[%s14108_s25 + $0x570] ss:$8 sps:$4 sm:$0xff]  }
0x1893   : > { %8574 = vmatpush1.bf16.msra.mxu0 %v11394_v51  ;;  %v11477_v51 = vld [vmem:[%s14108_s25 + $0x584] ss:$8 sps:$4 sm:$0xff]  }
0x1894   : > { %8575 = vmatprep.subr.bf16.mxu0 %v11399_v34  ;;  %v11475_v34 = vld [vmem:[%s14108_s25 + $0x580] ss:$8 sps:$4 sm:$0xff]  }
0x1897   : > { %8576 = vmatpush1.bf16.msra.mxu0 %v11397_v48  ;;  %v11480_v48 = vld [vmem:[%s14108_s25 + $0x594] ss:$8 sps:$4 sm:$0xff]  }
0x1898   : > { %8577 = vmatprep.subr.bf16.mxu0 %v11402_v16  ;;  %v11478_v16 = vld [vmem:[%s14108_s25 + $0x590] ss:$8 sps:$4 sm:$0xff]  }
0x189b   : > { %8578 = vmatpush1.bf16.msra.mxu0 %v11400_v22  ;;  %v11483_v22 = vld [vmem:[%s14108_s25 + $0x5a4] ss:$8 sps:$4 sm:$0xff]  }
0x189c   : > { %8590 = vmatprep.subr.bf16.mxu0 %v11405_v63  ;;  %v11481_v63 = vld [vmem:[%s14108_s25 + $0x5a0] ss:$8 sps:$4 sm:$0xff]  }
0x189e   : > { %8580 = vmatmul.mubr.bf16.vlgmr.msra.gmra.mrb[20].mxu0 %v15261_v3  ;;  %v11417_v3 = vld [vmem:[%s14108_s25 + $0x444] ss:$8 sps:$4 sm:$0xff]  }
0x189f   : > { %8591 = vmatpush1.bf16.msra.mxu0 %v11403_v42  ;;  %8622 = vmatprep.mubr.bf16.mxu0 %v15314_v28  ;;  %v11420_v28 = vld [vmem:[%s14108_s25 + $0x454] ss:$8 sps:$4 sm:$0xff]  }
0x18a0   : > { %8592 = vmatprep.subr.bf16.mxu0 %v11408_v20  ;;  %v11486_v42 = vld [vmem:[%s14108_s25 + $0x5b4] ss:$8 sps:$4 sm:$0xff]   ;;  %v11484_v20 = vld [vmem:[%s14108_s25 + $0x5b0] ss:$8 sps:$4 sm:$0xff]  }
0x18a3   : > { %8593 = vmatpush1.bf16.msra.mxu0 %v11406_v23  ;;  %v11489_v23 = vld [vmem:[%s14108_s25 + $0x5c4] ss:$8 sps:$4 sm:$0xff]  }
0x18a4   : > { %8594 = vmatprep.subr.bf16.mxu0 %v11411_v19  ;;  %v11487_v19 = vld [vmem:[%s14108_s25 + $0x5c0] ss:$8 sps:$4 sm:$0xff]  }
0x18a7   : > { %8595 = vmatpush1.bf16.msra.mxu0 %v11409_v25  ;;  %v11492_v25 = vld [vmem:[%s14108_s25 + $0x5d4] ss:$8 sps:$4 sm:$0xff]  }
0x18a8   : > { %8596 = vmatprep.subr.bf16.mxu0 %v11414_v61  ;;  %v11490_v61 = vld [vmem:[%s14108_s25 + $0x5d0] ss:$8 sps:$4 sm:$0xff]  }
0x18ab   : > { %8597 = vmatpush1.bf16.msra.mxu0 %v11412_v7  ;;  %v11495_v7 = vld [vmem:[%s14108_s25 + $0x5e4] ss:$8 sps:$4 sm:$0xff]  }
0x18ac   : > { %8598 = vmatprep.subr.bf16.mxu0 %v11417_v3  ;;  %v11493_v3 = vld [vmem:[%s14108_s25 + $0x5e0] ss:$8 sps:$4 sm:$0xff]  }
0x18af   : > { %8599 = vmatpush1.bf16.msra.mxu0 %v11415_v54  ;;  %v11498_v54 = vld [vmem:[%s14108_s25 + $0x5f4] ss:$8 sps:$4 sm:$0xff]  }
0x18b0   : > { %8600 = vmatprep.subr.bf16.mxu0 %v11420_v28  ;;  %v11496_v28 = vld [vmem:[%s14108_s25 + $0x5f0] ss:$8 sps:$4 sm:$0xff]  }
0x18b3   : > { %8601 = vmatpush1.bf16.msra.mxu0 %v11418_v59  ;;  %v11501_v59 = vld [vmem:[%s14108_s25 + $0x604] ss:$8 sps:$4 sm:$0xff]  }
0x18b4   : > { %8602 = vmatprep.subr.bf16.mxu0 %v11423_v62  ;;  %v11499_v62 = vld [vmem:[%s14108_s25 + $0x600] ss:$8 sps:$4 sm:$0xff]  }
0x18b7   : > { %8603 = vmatpush1.bf16.msra.mxu0 %v11421_v24  ;;  %v11504_v24 = vld [vmem:[%s14108_s25 + $0x614] ss:$8 sps:$4 sm:$0xff]  }
0x18b8   : > { %8604 = vmatprep.subr.bf16.mxu0 %v11426_v37  ;;  %v11502_v37 = vld [vmem:[%s14108_s25 + $0x610] ss:$8 sps:$4 sm:$0xff]  }
0x18bb   : > { %8605 = vmatpush1.bf16.msra.mxu0 %v11424_v32  ;;  %v11507_v32 = vld [vmem:[%s14108_s25 + $0x624] ss:$8 sps:$4 sm:$0xff]  }
0x18bc   : > { %8606 = vmatprep.subr.bf16.mxu0 %v11429_v17  ;;  %v11505_v17 = vld [vmem:[%s14108_s25 + $0x620] ss:$8 sps:$4 sm:$0xff]  }
0x18bf   : > { %8607 = vmatpush1.bf16.msra.mxu0 %v11427_v26  ;;  %v11510_v26 = vld [vmem:[%s14108_s25 + $0x634] ss:$8 sps:$4 sm:$0xff]  }
0x18c0   : > { %8608 = vmatprep.subr.bf16.mxu0 %v11432_v55  ;;  %v11508_v55 = vld [vmem:[%s14108_s25 + $0x630] ss:$8 sps:$4 sm:$0xff]  }
0x18c3   : > { %8609 = vmatpush1.bf16.msra.mxu0 %v11430_v36  ;;  %v11511_v36 = vld [vmem:[%s14108_s25 + $0x640] ss:$8 sps:$4 sm:$0xff]  }
0x18c4   : > { %8610 = vmatprep.subr.bf16.mxu0 %v11435_v10  ;;  %v11514_v10 = vld [vmem:[%s14108_s25 + $0x650] ss:$8 sps:$4 sm:$0xff]  }
0x18c7   : > { %8611 = vmatpush1.bf16.msra.mxu0 %v11433_v1  ;;  %v11519_v1 = vld [vmem:[%s14108_s25 + $0x664] ss:$8 sps:$4 sm:$0xff]  }
0x18c8   : > { %8612 = vmatprep.subr.bf16.mxu0 %v11438_v30  ;;  %v11517_v30 = vld [vmem:[%s14108_s25 + $0x660] ss:$8 sps:$4 sm:$0xff]  }
0x18cb   : > { %8613 = vmatpush1.bf16.msra.mxu0 %v11436_v14  ;;  %v11522_v14 = vld [vmem:[%s14108_s25 + $0x674] ss:$8 sps:$4 sm:$0xff]  }
0x18cc   : > { %8614 = vmatprep.subr.bf16.mxu0 %v11441_v2  ;;  %v11520_v2 = vld [vmem:[%s14108_s25 + $0x670] ss:$8 sps:$4 sm:$0xff]  }
0x18cf   : > { %8615 = vmatpush1.bf16.msra.mxu0 %v11439_v57  ;;  %v11525_v57 = vld [vmem:[%s14108_s25 + $0x684] ss:$8 sps:$4 sm:$0xff]  }
0x18d0   : > { %8616 = vmatprep.subr.bf16.mxu0 %v11444_v35  ;;  %v11523_v35 = vld [vmem:[%s14108_s25 + $0x680] ss:$8 sps:$4 sm:$0xff]  }
0x18d3   : > { %8617 = vmatpush1.bf16.msra.mxu0 %v11442_v45  ;;  %v11528_v45 = vld [vmem:[%s14108_s25 + $0x694] ss:$8 sps:$4 sm:$0xff]  }
0x18d4   : > { %8618 = vmatprep.subr.bf16.mxu0 %v11447_v27  ;;  %v11526_v27 = vld [vmem:[%s14108_s25 + $0x690] ss:$8 sps:$4 sm:$0xff]  }
0x18d7   : > { %8619 = vmatpush1.bf16.msra.mxu0 %v11445_v5  ;;  %v11531_v5 = vld [vmem:[%s14108_s25 + $0x6a4] ss:$8 sps:$4 sm:$0xff]  }
0x18d8   : > { %8620 = vmatprep.subr.bf16.mxu0 %v11450_v8  ;;  %v11529_v8 = vld [vmem:[%s14108_s25 + $0x6a0] ss:$8 sps:$4 sm:$0xff]  }
0x18db   : > { %8621 = vmatpush1.bf16.msra.mxu0 %v11448_v29  ;;  %v11534_v29 = vld [vmem:[%s14108_s25 + $0x6b4] ss:$8 sps:$4 sm:$0xff]  }
0x18dc   : > { %8633 = vmatprep.subr.bf16.mxu0 %v11453_v31  ;;  %v11532_v31 = vld [vmem:[%s14108_s25 + $0x6b0] ss:$8 sps:$4 sm:$0xff]  }
0x18de   : > { %8623 = vmatmul.mubr.bf16.vlgmr.msra.gmra.mrb[20].mxu0 %v15309_v9  ;;  %v11465_v9 = vld [vmem:[%s14108_s25 + $0x544] ss:$8 sps:$4 sm:$0xff]  }
0x18df   : > { %8634 = vmatpush1.bf16.msra.mxu0 %v11451_v40  ;;  %8665 = vmatprep.mubr.bf16.mxu0 %v15316_v56  ;;  %v11468_v56 = vld [vmem:[%s14108_s25 + $0x554] ss:$8 sps:$4 sm:$0xff]   ;;  %v11537_v40 = vld [vmem:[%s14108_s25 + $0x6c4] ss:$8 sps:$4 sm:$0xff]  }
0x18e0   : > { %8635 = vmatprep.subr.bf16.mxu0 %v11456_v46  ;;  %v11535_v46 = vld [vmem:[%s14108_s25 + $0x6c0] ss:$8 sps:$4 sm:$0xff]  }
0x18e3   : > { %8636 = vmatpush1.bf16.msra.mxu0 %v11454_v58  ;;  %v11540_v58 = vld [vmem:[%s14108_s25 + $0x6d4] ss:$8 sps:$4 sm:$0xff]  }
0x18e4   : > { %8637 = vmatprep.subr.bf16.mxu0 %v11459_v53  ;;  %v11538_v53 = vld [vmem:[%s14108_s25 + $0x6d0] ss:$8 sps:$4 sm:$0xff]  }
0x18e7   : > { %8638 = vmatpush1.bf16.msra.mxu0 %v11457_v44  ;;  %v11543_v44 = vld [vmem:[%s14108_s25 + $0x6e4] ss:$8 sps:$4 sm:$0xff]  }
0x18e8   : > { %8639 = vmatprep.subr.bf16.mxu0 %v11462_v39  ;;  %v11541_v39 = vld [vmem:[%s14108_s25 + $0x6e0] ss:$8 sps:$4 sm:$0xff]  }
0x18eb   : > { %8640 = vmatpush1.bf16.msra.mxu0 %v11460_v21  ;;  %v11546_v21 = vld [vmem:[%s14108_s25 + $0x6f4] ss:$8 sps:$4 sm:$0xff]  }
0x18ec   : > { %8641 = vmatprep.subr.bf16.mxu0 %v11465_v9  ;;  %v11544_v9 = vld [vmem:[%s14108_s25 + $0x6f0] ss:$8 sps:$4 sm:$0xff]  }
0x18ef   : > { %8642 = vmatpush1.bf16.msra.mxu0 %v11463_v6  ;;  %v11549_v6 = vld [vmem:[%s14108_s25 + $0x704] ss:$8 sps:$4 sm:$0xff]  }
0x18f0   : > { %8643 = vmatprep.subr.bf16.mxu0 %v11468_v56  ;;  %v11547_v56 = vld [vmem:[%s14108_s25 + $0x700] ss:$8 sps:$4 sm:$0xff]  }
0x18f3   : > { %8644 = vmatpush1.bf16.msra.mxu0 %v11466_v38  ;;  %v11552_v38 = vld [vmem:[%s14108_s25 + $0x714] ss:$8 sps:$4 sm:$0xff]  }
0x18f4   : > { %8645 = vmatprep.subr.bf16.mxu0 %v11471_v60  ;;  %v11550_v60 = vld [vmem:[%s14108_s25 + $0x710] ss:$8 sps:$4 sm:$0xff]  }
0x18f7   : > { %8646 = vmatpush1.bf16.msra.mxu0 %v11469_v43  ;;  %v11555_v43 = vld [vmem:[%s14108_s25 + $0x724] ss:$8 sps:$4 sm:$0xff]  }
0x18f8   : > { %8647 = vmatprep.subr.bf16.mxu0 %v11474_v15  ;;  %v11553_v15 = vld [vmem:[%s14108_s25 + $0x720] ss:$8 sps:$4 sm:$0xff]  }
0x18fb   : > { %8648 = vmatpush1.bf16.msra.mxu0 %v11472_v13  ;;  %v11558_v13 = vld [vmem:[%s14108_s25 + $0x734] ss:$8 sps:$4 sm:$0xff]  }
0x18fc   : > { %8649 = vmatprep.subr.bf16.mxu0 %v11477_v51  ;;  %v11556_v51 = vld [vmem:[%s14108_s25 + $0x730] ss:$8 sps:$4 sm:$0xff]  }
0x18ff   : > { %8650 = vmatpush1.bf16.msra.mxu0 %v11475_v34  ;;  %v11559_v34 = vld [vmem:[%s14108_s25 + $0x740] ss:$8 sps:$4 sm:$0xff]  }
0x1900   : > { %8651 = vmatprep.subr.bf16.mxu0 %v11480_v48  ;;  %v11562_v48 = vld [vmem:[%s14108_s25 + $0x750] ss:$8 sps:$4 sm:$0xff]  }
0x1903   : > { %8652 = vmatpush1.bf16.msra.mxu0 %v11478_v16  ;;  %v11567_v16 = vld [vmem:[%s14108_s25 + $0x764] ss:$8 sps:$4 sm:$0xff]  }
0x1904   : > { %8653 = vmatprep.subr.bf16.mxu0 %v11483_v22  ;;  %v11565_v22 = vld [vmem:[%s14108_s25 + $0x760] ss:$8 sps:$4 sm:$0xff]  }
0x1907   : > { %8654 = vmatpush1.bf16.msra.mxu0 %v11481_v63  ;;  %v11570_v63 = vld [vmem:[%s14108_s25 + $0x774] ss:$8 sps:$4 sm:$0xff]  }
0x1908   : > { %8655 = vmatprep.subr.bf16.mxu0 %v11486_v42  ;;  %v11568_v42 = vld [vmem:[%s14108_s25 + $0x770] ss:$8 sps:$4 sm:$0xff]  }
0x190b   : > { %8656 = vmatpush1.bf16.msra.mxu0 %v11484_v20  ;;  %v11573_v20 = vld [vmem:[%s14108_s25 + $0x784] ss:$8 sps:$4 sm:$0xff]  }
0x190c   : > { %8657 = vmatprep.subr.bf16.mxu0 %v11489_v23  ;;  %v11571_v23 = vld [vmem:[%s14108_s25 + $0x780] ss:$8 sps:$4 sm:$0xff]  }
0x190f   : > { %8658 = vmatpush1.bf16.msra.mxu0 %v11487_v19  ;;  %v11576_v19 = vld [vmem:[%s14108_s25 + $0x794] ss:$8 sps:$4 sm:$0xff]  }
0x1910   : > { %8659 = vmatprep.subr.bf16.mxu0 %v11492_v25  ;;  %v11574_v25 = vld [vmem:[%s14108_s25 + $0x790] ss:$8 sps:$4 sm:$0xff]  }
0x1913   : > { %8660 = vmatpush1.bf16.msra.mxu0 %v11490_v61  ;;  %v11579_v61 = vld [vmem:[%s14108_s25 + $0x7a4] ss:$8 sps:$4 sm:$0xff]  }
0x1914   : > { %8661 = vmatprep.subr.bf16.mxu0 %v11495_v7  ;;  %v11577_v7 = vld [vmem:[%s14108_s25 + $0x7a0] ss:$8 sps:$4 sm:$0xff]  }
0x1917   : > { %8662 = vmatpush1.bf16.msra.mxu0 %v11493_v3  ;;  %v11582_v3 = vld [vmem:[%s14108_s25 + $0x7b4] ss:$8 sps:$4 sm:$0xff]  }
0x1918   : > { %8663 = vmatprep.subr.bf16.mxu0 %v11498_v54  ;;  %v11580_v54 = vld [vmem:[%s14108_s25 + $0x7b0] ss:$8 sps:$4 sm:$0xff]  }
0x191b   : > { %8664 = vmatpush1.bf16.msra.mxu0 %v11496_v28  ;;  %v11585_v28 = vld [vmem:[%s14108_s25 + $0x7c4] ss:$8 sps:$4 sm:$0xff]  }
0x191c   : > { %8676 = vmatprep.subr.bf16.mxu0 %v11501_v59  ;;  %v11583_v59 = vld [vmem:[%s14108_s25 + $0x7c0] ss:$8 sps:$4 sm:$0xff]  }
0x191e   : > { %8666 = vmatmul.mubr.bf16.vlgmr.msra.gmra.mrb[20].mxu0 %v15312_v47  ;;  %v11513_v47 = vld [vmem:[%s14108_s25 + $0x644] ss:$8 sps:$4 sm:$0xff]  }
0x191f   : > { %8677 = vmatpush1.bf16.msra.mxu0 %v11499_v62  ;;  %8708 = vmatprep.mubr.bf16.mxu0 %v15366_v49  ;;  %v11516_v49 = vld [vmem:[%s14108_s25 + $0x654] ss:$8 sps:$4 sm:$0xff]  }
0x1920   : > { %8678 = vmatprep.subr.bf16.mxu0 %v11504_v24  ;;  %v11588_v62 = vld [vmem:[%s14108_s25 + $0x7d4] ss:$8 sps:$4 sm:$0xff]   ;;  %v11586_v24 = vld [vmem:[%s14108_s25 + $0x7d0] ss:$8 sps:$4 sm:$0xff]  }
0x1923   : > { %8679 = vmatpush1.bf16.msra.mxu0 %v11502_v37  ;;  %v11591_v37 = vld [vmem:[%s14108_s25 + $0x7e4] ss:$8 sps:$4 sm:$0xff]  }
0x1924   : > { %8680 = vmatprep.subr.bf16.mxu0 %v11507_v32  ;;  %v11589_v32 = vld [vmem:[%s14108_s25 + $0x7e0] ss:$8 sps:$4 sm:$0xff]  }
0x1927   : > { %8681 = vmatpush1.bf16.msra.mxu0 %v11505_v17  ;;  %v11594_v17 = vld [vmem:[%s14108_s25 + $0x7f4] ss:$8 sps:$4 sm:$0xff]  }
0x1928   : > { %8682 = vmatprep.subr.bf16.mxu0 %v11510_v26  ;;  %v11592_v26 = vld [vmem:[%s14108_s25 + $0x7f0] ss:$8 sps:$4 sm:$0xff]  }
0x192b   : > { %8683 = vmatpush1.bf16.msra.mxu0 %v11508_v55  ;;  %v8766_v55 = vld [vmem:[%s1754_s6] sm:$0x3] }
0x192c   : > { %8684 = vmatprep.subr.bf16.mxu0 %v11513_v47  ;;  %v8771_v47 = vrot.slane %v8766_v55, %v14187_v12 }
0x192f   : > { %8685 = vmatpush1.bf16.msra.mxu0 %v11511_v36 }
0x1930   : > { %8686 = vmatprep.subr.bf16.mxu0 %v11516_v49  ;;  %v8775_v49 = vrot.slane %v8766_v55, %v14184_v11 }
0x1933   : > { %8687 = vmatpush1.bf16.msra.mxu0 %v11514_v10 }
0x1934   : > { %8688 = vmatprep.subr.bf16.mxu0 %v11519_v1 }
0x1937   : > { %8689 = vmatpush1.bf16.msra.mxu0 %v11517_v30 }
0x1938   : > { %8690 = vmatprep.subr.bf16.mxu0 %v11522_v14 }
0x193b   : > { %8691 = vmatpush1.bf16.msra.mxu0 %v11520_v2 }
0x193c   : > { %8692 = vmatprep.subr.bf16.mxu0 %v11525_v57 }
0x193f   : > { %8693 = vmatpush1.bf16.msra.mxu0 %v11523_v35 }
0x1940   : > { %8694 = vmatprep.subr.bf16.mxu0 %v11528_v45 }
0x1943   : > { %8695 = vmatpush1.bf16.msra.mxu0 %v11526_v27 }
0x1944   : > { %8696 = vmatprep.subr.bf16.mxu0 %v11531_v5 }
0x1947   : > { %8697 = vmatpush1.bf16.msra.mxu0 %v11529_v8 }
0x1948   : > { %8698 = vmatprep.subr.bf16.mxu0 %v11534_v29 }
0x194b   : > { %8699 = vmatpush1.bf16.msra.mxu0 %v11532_v31 }
0x194c   : > { %8700 = vmatprep.subr.bf16.mxu0 %v11537_v40 }
0x194f   : > { %8701 = vmatpush1.bf16.msra.mxu0 %v11535_v46 }
0x1950   : > { %8702 = vmatprep.subr.bf16.mxu0 %v11540_v58 }
0x1953   : > { %8703 = vmatpush1.bf16.msra.mxu0 %v11538_v53 }
0x1954   : > { %8704 = vmatprep.subr.bf16.mxu0 %v11543_v44 }
0x1957   : > { %8705 = vmatpush1.bf16.msra.mxu0 %v11541_v39 }
0x1958   : > { %8706 = vmatprep.subr.bf16.mxu0 %v11546_v21 }
0x195b   : > { %8707 = vmatpush1.bf16.msra.mxu0 %v11544_v9 }
0x195c   : > { %8719 = vmatprep.subr.bf16.mxu0 %v11549_v6 }
0x195e   : > { %8709 = vmatmul.mubr.bf16.vlgmr.msra.gmra.mrb[20].mxu0 %v15361_v41  ;;  %v11561_v41 = vld [vmem:[%s14108_s25 + $0x744] ss:$8 sps:$4 sm:$0xff]  }
0x195f   : > { %8720 = vmatpush1.bf16.msra.mxu0 %v11547_v56  ;;  %8751 = vmatprep.mubr.bf16.mxu0 %v15368_v18  ;;  %v11564_v18 = vld [vmem:[%s14108_s25 + $0x754] ss:$8 sps:$4 sm:$0xff]   ;;  %s15815_s25 = sld [smem:[#allocation109_spill]] }
0x1960   : > { %8721 = vmatprep.subr.bf16.mxu0 %v11552_v38 }
0x1963   : > { %8722 = vmatpush1.bf16.msra.mxu0 %v11550_v60 }
0x1964   : > { %8723 = vmatprep.subr.bf16.mxu0 %v11555_v43 }
0x1965   : > { %p10416_p10 = scmp.ne.s32.totalorder %s15815_s25, 1 }
0x1967   : > { %8724 = vmatpush1.bf16.msra.mxu0 %v11553_v15 }
0x1968   : > { %8725 = vmatprep.subr.bf16.mxu0 %v11558_v13 }
0x196b   : > { %8726 = vmatpush1.bf16.msra.mxu0 %v11556_v51 }
0x196c   : > { %8727 = vmatprep.subr.bf16.mxu0 %v11561_v41 }
0x196f   : > { %8728 = vmatpush1.bf16.msra.mxu0 %v11559_v34 }
0x1970   : > { %8729 = vmatprep.subr.bf16.mxu0 %v11564_v18 }
0x1973   : > { %8730 = vmatpush1.bf16.msra.mxu0 %v11562_v48 }
0x1974   : > { %8731 = vmatprep.subr.bf16.mxu0 %v11567_v16 }
0x1977   : > { %8732 = vmatpush1.bf16.msra.mxu0 %v11565_v22 }
0x1978   : > { %8733 = vmatprep.subr.bf16.mxu0 %v11570_v63 }
0x197b   : > { %8734 = vmatpush1.bf16.msra.mxu0 %v11568_v42 }
0x197c   : > { %8735 = vmatprep.subr.bf16.mxu0 %v11573_v20 }
0x197f   : > { %8736 = vmatpush1.bf16.msra.mxu0 %v11571_v23  ;;  %v8790_v23 = vld [vmem:[#allocation20] sm:$0x3] (!%p10416_p10) }
0x1980   : > { %8737 = vmatprep.subr.bf16.mxu0 %v11576_v19  ;;  %v8791_v19 = vld [vmem:[#allocation21] sm:$0x3] (!%p10416_p10) }
0x1983   : > { %8738 = vmatpush1.bf16.msra.mxu0 %v11574_v25  ;;  %v8842_v25 = vrot.slane (!%p10416_p10), %v8790_v23, %v14187_v12 }
0x1984   : > { %8739 = vmatprep.subr.bf16.mxu0 %v11579_v61  ;;  %v8846_v61 = vrot.slane (!%p10416_p10), %v8790_v23, %v14184_v11 }
0x1987   : > { %8740 = vmatpush1.bf16.msra.mxu0 %v11577_v7 }
0x1988   : > { %8741 = vmatprep.subr.bf16.mxu0 %v11582_v3 }
0x198b   : > { %8742 = vmatpush1.bf16.msra.mxu0 %v11580_v54 }
0x198c   : > { %8743 = vmatprep.subr.bf16.mxu0 %v11585_v28  ;;  %v8857_v28 = vrot.slane (!%p10416_p10), %v8791_v19, %v14187_v12 }
0x198f   : > { %8744 = vmatpush1.bf16.msra.mxu0 %v11583_v59  ;;  %v8861_v59 = vrot.slane (!%p10416_p10), %v8791_v19, %v14184_v11 }
0x1990   : > { %8745 = vmatprep.subr.bf16.mxu0 %v11588_v62 }
0x1993   : > { %8746 = vmatpush1.bf16.msra.mxu0 %v11586_v24 }
0x1994   : > { %8747 = vmatprep.subr.bf16.mxu0 %v11591_v37 }
0x1997   : > { %8748 = vmatpush1.bf16.msra.mxu0 %v11589_v32 }
0x1998   : > { %8749 = vmatprep.subr.bf16.mxu0 %v11594_v17 }
0x199b   : > { %8750 = vmatpush1.bf16.msra.mxu0 %v11592_v26 }
0x199e   : > { %8752 = vmatmul.mubr.bf16.vlgmr.msra.gmra.mrb[20].mxu0 %v15364_v50 }
0x1a71   : > { %v8753_v36 = vpop.f32.mrb[20].mxu0 }
0x1a72   : > { %v8762_v10 = vadd.f32 %v8753_v36, %v14842_v4  ;;  %v8755_v1 = vpop.f32.mrb[21].mxu0 }
0x1a73   : > { %v8763_v30 = vadd.f32 %v8755_v1, %v14845_v52  ;;  %v8757_v14 = vpop.f32.mrb[22].mxu0  ;;  %8789 = sbr.rel (%p10416_p10) target bundleno = 7110 (0x1bc6), region = 284 }
0x1a74   : > { %v8778_v2 = vadd.f32 %v8771_v47, %v8762_v10  ;;  %v8764_v57 = vadd.f32 %v8757_v14, %v14848_v0  ;;  %v8759_v35 = vpop.f32.mrb[23].mxu0 }
0x1a75   : > { %v8779_v45 = vadd.f32 %v8775_v49, %v8763_v30  ;;  %v8765_v50 = vadd.f32 %v8759_v35, %v14850_v33 }
0x1a76   : > { %8782 = vst [vmem:[#allocation2] sm:$0xff] %v8778_v2  ;;  %v8780_v27 = vadd.f32 %v8771_v47, %v8764_v57 }
0x1a77   : > { %8783 = vst [vmem:[#allocation2 + $0x8] sm:$0xff] %v8779_v45  ;;  %v8781_v5 = vadd.f32 %v8775_v49, %v8765_v50  ;;  %v8792_v4 = vadd.f32 (!%p10416_p10), %v8779_v45, %v8778_v2 }
0x1a78   : > { %8784 = vst [vmem:[#allocation2 + $0x10] sm:$0xff] %v8780_v27 }
0x1a79   : > { %8785 = vst [vmem:[#allocation2 + $0x18] sm:$0xff] %v8781_v5  ;;  %8793 = vadd.xlane.f32.xlu0 (!%p10416_p10), %v8792_v4  ;;  %v8795_v52 = vadd.f32 (!%p10416_p10), %v8781_v5, %v8780_v27 }
0x1a7d   : > { %8796 = vadd.xlane.f32.xlu0 %v8795_v52 }
0x1b06   : > { %v8794_v8 = vpop.xlane.xlu0 %8793 }
0x1b07   : > { %v8798_v29 = vmul.f32 0.00390625, %v8794_v8 }
0x1b09   : > { %v8800_v0 = vsub.f32 %v8778_v2, %v8798_v29  ;;  %v8801_v31 = vsub.f32 %v8779_v45, %v8798_v29 }
0x1b0a   : > { %v8797_v40 = vpop.xlane.xlu0 %8796 }
0x1b0b   : > { %v8799_v46 = vmul.f32 0.00390625, %v8797_v40  ;;  %v8804_v33 = vmul.f32 %v8800_v0, %v8800_v0  ;;  %v8805_v58 = vmul.f32 %v8801_v31, %v8801_v31 }
0x1b0d   : > { %v8802_v53 = vsub.f32 %v8780_v27, %v8799_v46  ;;  %v8803_v44 = vsub.f32 %v8781_v5, %v8799_v46  ;;  %v8808_v39 = vadd.f32 %v8805_v58, %v8804_v33 }
0x1b0f   : > { %8809 = vadd.xlane.f32.xlu1 %v8808_v39  ;;  %v8806_v21 = vmul.f32 %v8802_v53, %v8802_v53  ;;  %v8807_v9 = vmul.f32 %v8803_v44, %v8803_v44 }
0x1b11   : > { %v8811_v6 = vadd.f32 %v8807_v9, %v8806_v21 }
0x1b13   : > { %8812 = vadd.xlane.f32.xlu1 %v8811_v6 }
0x1b9c   : > { %v8810_v56 = vpop.xlane.xlu1 %8809 }
0x1b9d   : > { %v8814_v38 = vmul.f32 0.003921569, %v8810_v56 }
0x1b9f   : > { %11661 = vrsqrt.f32 %v8814_v38  ;;  %vm8818_vm0 = vcmp.eq.f32.partialorder %v8814_v38, inf  ;;  %v8821_v51 = vand.u32 2147483648, %v8814_v38  ;;  %vm8820_vm1 = vcmp.eq.f32.partialorder %v8814_v38, 0.0 }
0x1ba0   : > { %v8813_v60 = vpop.xlane.xlu1 %8812 }
0x1ba1   : > { %v8815_v43 = vmul.f32 0.003921569, %v8813_v60 }
0x1ba3   : > { %11663 = vrsqrt.f32 %v8815_v43  ;;  %vm8825_vm2 = vcmp.eq.f32.partialorder %v8815_v43, inf  ;;  %v8828_v22 = vand.u32 2147483648, %v8815_v43  ;;  %vm8827_vm3 = vcmp.eq.f32.partialorder %v8815_v43, 0.0 }
0x1ba9   : > { %v11662_v15 = vpop.eup %11661 }
0x1baa   : > { %v8817_v13 = vmul.f32 %v11662_v15, %v8814_v38 }
0x1bac   : > { %v8819_v41 = vsel %vm8818_vm0, %v8814_v38, %v8817_v13 }
0x1bad   : > { %v11664_v34 = vpop.eup %11663  ;;  %v8822_v18 = vsel %vm8820_vm1, %v8821_v51, %v8819_v41 }
0x1bae   : > { %v8830_v48 = vadd.f32 1e-06, %v8822_v18  ;;  %v8824_v16 = vmul.f32 %v11664_v34, %v8815_v43 }
0x1bb0   : > { %11665 = vrcp.f32 %v8830_v48  ;;  %v8826_v63 = vsel %vm8825_vm2, %v8815_v43, %v8824_v16 }
0x1bb1   : > { %v8829_v42 = vsel %vm8827_vm3, %v8828_v22, %v8826_v63 }
0x1bb2   : > { %v8831_v20 = vadd.f32 1e-06, %v8829_v42 }
0x1bb4   : > { %11667 = vrcp.f32 %v8831_v20 }
0x1bba   : > { %v11666_v7 = vpop.eup %11665 }
0x1bbb   : > { %v8833_v3 = vmul.f32 %v11666_v7, %v8800_v0  ;;  %v8834_v54 = vmul.f32 %v11666_v7, %v8801_v31 }
0x1bbd   : > { %v8849_v62 = vmul.f32 %v8842_v25, %v8833_v3  ;;  %v8850_v24 = vmul.f32 %v8846_v61, %v8834_v54 }
0x1bbe   : > { %v11668_v37 = vpop.eup %11667 }
0x1bbf   : > { %v8864_v32 = vadd.f32 %v8857_v28, %v8849_v62  ;;  %v8865_v17 = vadd.f32 %v8861_v59, %v8850_v24  ;;  %v8836_v26 = vmul.f32 %v11668_v37, %v8802_v53  ;;  %v8837_v55 = vmul.f32 %v11668_v37, %v8803_v44 }
0x1bc1   : > { %8868 = vst [vmem:[%s14125_s14] sm:$0xff] %v8864_v32  ;;  %8869 = vst [vmem:[%s14125_s14 + $0x8] sm:$0xff] %v8865_v17  ;;  %v8851_v47 = vmul.f32 %v8842_v25, %v8836_v26  ;;  %v8852_v36 = vmul.f32 %v8846_v61, %v8837_v55 }
0x1bc3   : > { %v8866_v49 = vadd.f32 %v8857_v28, %v8851_v47  ;;  %v8867_v10 = vadd.f32 %v8861_v59, %v8852_v36 }
0x1bc5   : > { %8870 = vst [vmem:[%s14125_s14 + $0x10] sm:$0xff] %v8866_v49  ;;  %8871 = vst [vmem:[%s14125_s14 + $0x18] sm:$0xff] %v8867_v10 }
0x1bc6 PF: > { %s15816_s15 = sld [smem:[#allocation110_spill]]  ;;  %s15817_s30 = sld [smem:[#allocation105_spill]] }
0x1bc7   : > { %s15818_s12 = sld [smem:[#allocation117_spill]]  ;;  %s8886_s4 = sshll.u32 %s14125_s14, 4  ;;  %s15544_s4 = int_to_ptr.vmem [resolvable:$true] %s8886_s4 }
0x1bc8   : > { %s8873_s10 = scalar_lea.sflag [#allocation5], %s13904_s2  ;;  %s12565_s9 = scalar_lea.vmem %s15544_s4, 512 }
0x1bc9   : > { %p12566_p0 = scmp.ne.s32.totalorder %s15544_s4, %s12565_s9  ;;  %s12875_s6 = smov [#allocation43]  }
0x1bca   : > { %s12569_s24 = sshll.u32 %s12875_s6, 4  ;;  %s12570_s24 = int_to_ptr.vmem [resolvable:$false] %s12569_s24 }
0x1bcb   : > { %s12571_s13 = scalar_lea.vmem %s12570_s24, 1024  ;;  %p12572_p6 = scmp.lt.s32.totalorder %s15544_s4, %s12570_s24 }
0x1bcc   : > { %s10441_s11 = sshll.u32 %s15816_s15, 9  ;;  %p12573_p8 = scmp.lt.s32.totalorder %s12571_s13, %s12565_s9 }
0x1bcd   : > { %s15541_s16 = scalar_lea.hbm %s15817_s30, %s10441_s11  ;;  %p15819_p12 = scmp.ne.s32.totalorder %s15818_s12, 0 }
0x1bce   : > { %p12574_p3 = por %p12573_p8, %p12572_p6 }
0x1bcf   : > { %p12567_p5 = pnand %p12566_p0, %p15819_p12 }
0x1bd1   : > { %p12568_p4 = pneg %p12567_p5 }
0x1bd3   : > { %p12575_p11 = pnand %p12574_p3, %p12568_p4 }
0x1bd5   : > { %12578 = shalt.err (!%p12575_p11)
}
0x1bd6   : > { %s12579_s14 = scalar_lea.hbm %s15541_s16, 512  ;;  %s12583_s29 = scalar_lea.hbm %s15817_s30, 1024 }
0x1bd7   : > { %p12580_p9 = scmp.ne.s32.totalorder %s15541_s16, %s12579_s14  ;;  %p12584_p13 = scmp.lt.u32.totalorder %s15541_s16, %s15817_s30 }
0x1bd8   : > { %p12585_p2 = scmp.lt.u32.totalorder %s12583_s29, %s12579_s14  ;;  %p12587_p0 = scmp.lt.u32.totalorder %s12579_s14, %s15541_s16 }
0x1bd9   : > { %p12581_p1 = pnand %p12580_p9, %p15819_p12 }
0x1bda   : > { %p12586_p10 = por %p12585_p2, %p12584_p13 }
0x1bdb   : > { %p12582_p7 = pneg %p12581_p1 }
0x1bdc   : > { %p12588_p5 = por %p12587_p0, %p12586_p10 }
0x1bde   : > { %p12589_p4 = pnand %p12588_p5, %p12582_p7 }
0x1be0   : > { %12592 = shalt.err (!%p12589_p4)
}
0x1be1   : > { %s12876_s18 = smov 256   ;;  %s12877_s17 = smov 16  }
0x1be2   : > { %10635 = dma.vmem_to_hbm [thread:$0]  (%p15819_p12), %s15544_s4, 512, %s15541_s16, %s8873_s10, %s12876_s18, %s12876_s18, %s12877_s17  }
0x1be3 PF: > { %s15820_s27 = sld [smem:[#allocation107_spill]]  ;;  %s15821_s0 = sld [smem:[#allocation118_spill]] }
0x1be4   : > { %p10682_p6 = scmp.ge.s32.totalorder %s12795_s22, 2 }
0x1be9   : > { %s8901_s20 = sand.u32 1, %s15820_s27   ;;  %p15822_p8 = scmp.ne.s32.totalorder %s15821_s0, 0 }
0x1bea   : > { %s8902_s8 = scalar_lea.sflag [#allocation5], %s8901_s20 }
0x1beb   : > { %p10663_p3 = pnand %p10682_p6, %p15822_p8 }
0x1bed   : > { %12750 = dma.done.wait (!%p10663_p3), %s8902_s8, 512  }
0x1bee   : > { %12752 = vsyncadd (!%p10663_p3), %s8902_s8, 4294966784  ;;  %s91_s22 = sadd.s32 1, %s12795_s22   ;;  %s15823_s23 = sld [smem:[#allocation106_spill]] }
0x1bef   : > { %p88_p11 = scmp.ge.s32.totalorder %s91_s22, 6   ;;  %s15824_s2 = sld [smem:[#allocation115_spill]] }
0x1bf0   : > { %s15825_s5 = sld [smem:[#allocation108_spill]]  ;;  %s15826_s10 = sld [smem:[#allocation116_spill]] }
0x1bf1   : > { %s15827_s11 = sld [smem:[#allocation111_spill]]  ;;  %s15828_s15 = sld [smem:[#allocation112_spill]] }
0x1bf2   : > { %s15829_s16 = sld [smem:[#allocation113_spill]]  ;;  %s15830_s18 = sld [smem:[#allocation114_spill]] }
0x1bf3   : > { %s15831_s28 = smov %s12759_s1  ;;  %s15833_s0 = smov %s12771_s7 }
0x1bf4   : > { %s15832_s1 = smov %s15823_s23  ;;  %90 = sbr.rel (!%p88_p11) target bundleno = 93 (0x5d), region = 522 }
0x1bf6   : > { %s15834_s7 = smov %s15825_s5 }
0x1bfb   :  { %8907 = vsyncpa [#allocation4], 1 }
0x1bfc   :  { %8909 = vsyncpa [#allocation4 + $0x1], 1 }
0x1bfd   :  { %8910 = vsyncpa [#allocation7], 1 }
0x1bfe   :  { %8912 = vsyncpa [#allocation7 + $0x1], 1 }
0x1bff   :  { %8913 = vsyncpa [#allocation10], 1 }
0x1c00   :  { %8915 = vsyncpa [#allocation10 + $0x1], 1 }
0x1c01   :  { %8916 = vsyncpa [#allocation13], 1 }
0x1c02   :  { %8917 = vsyncpa [#allocation16], 1 }
0x1c03   :  { %8918 = vsyncpa [#allocation19], 1 }
0x1c04   :  { %8919 = vsyncpa [#allocation22], 1 }
0x1c05   :  { %8920 = vsyncpa [#allocation5], 1 }
0x1c06   :  { %8922 = vsyncpa [#allocation5 + $0x1], 1 }

</bundles_post_ra>
